<compile_context>
chip_gen: v5e
topology: v5e:2x2
jax: 0.10.0
libtpu: 0.0.40
codegen_flags: <defaults>
</compile_context>

<pallas_src>
import math
import functools

import jax
import jax.numpy as jnp
from jax.experimental import pallas as pl
from jax.experimental.pallas import tpu as pltpu

# fp32-accurate matmuls everywhere (kernel and pure-JAX reference) so the
# correctness check below is meaningful.
jax.config.update("jax_default_matmul_precision", "highest")


# ----------------------------------------------------------------------------
# Single fused kernel: embedding + all encoder layers
# ----------------------------------------------------------------------------
def _encoder_kernel(src_ref, pos_ref, embw_ref, embb_ref,
                    wqkv_ref, bqkv_ref, wo_ref, bo_ref,
                    ln1g_ref, ln1b_ref, w1_ref, b1_ref,
                    w2_ref, b2_ref, ln2g_ref, ln2b_ref,
                    o_ref,
                    *, n_layers, n_heads, head_dim, B, T, emb_scale, eps):
    H = n_heads * head_dim
    inv_attn_scale = 1.0 / math.sqrt(head_dim)

    # ---- input embedding: (src @ W_emb + b) * sqrt(hid) + pos  (dropout = id)
    x = jnp.dot(src_ref[...], embw_ref[...], preferred_element_type=jnp.float32)
    x = (x + embb_ref[...]) * emb_scale + pos_ref[...]            # [B*T, H]

    def layer_norm(v, g, b):
        mu = jnp.mean(v, axis=-1, keepdims=True)
        var = jnp.mean(jnp.square(v - mu), axis=-1, keepdims=True)
        return (v - mu) * jax.lax.rsqrt(var + eps) * g + b

    for l in range(n_layers):                                     # static unroll
        wqkv = wqkv_ref[l]; bqkv = bqkv_ref[l]
        wo = wo_ref[l];     bo = bo_ref[l]
        w1 = w1_ref[l];     b1 = b1_ref[l]
        w2 = w2_ref[l];     b2 = b2_ref[l]
        g1 = ln1g_ref[l];   be1 = ln1b_ref[l]
        g2 = ln2g_ref[l];   be2 = ln2b_ref[l]

        # ---- fused QKV projection: one [B*T, H] @ [H, 3H] matmul ----
        qkv = jnp.dot(x, wqkv, preferred_element_type=jnp.float32) + bqkv
        q = qkv[:, 0:H]
        k = qkv[:, H:2 * H]
        v = qkv[:, 2 * H:3 * H]

        # ---- per-head attention, batched over B via 3-D dot_general ----
        # (mask=None in the PyTorch EncoderLayer)
        ctx_heads = []
        for h in range(n_heads):                                  # static unroll
            lo = h * head_dim
            hi = lo + head_dim
            qh = q[:, lo:hi].reshape(B, T, head_dim)
            kh = k[:, lo:hi].reshape(B, T, head_dim)
            vh = v[:, lo:hi].reshape(B, T, head_dim)
            e = jax.lax.dot_general(
                qh, kh, (((2,), (2,)), ((0,), (0,))),
                preferred_element_type=jnp.float32) * inv_attn_scale   # [B,T,T]
            e = e - jnp.max(e, axis=-1, keepdims=True)
            p = jnp.exp(e)
            inv_den = pl.reciprocal(jnp.sum(p, axis=-1, keepdims=True),
                                    approx=True)
            attn = p * inv_den
            ch = jax.lax.dot_general(
                attn, vh, (((2,), (1,)), ((0,), (0,))),
                preferred_element_type=jnp.float32)                    # [B,T,hd]
            ctx_heads.append(ch.reshape(B * T, head_dim))
        ctx = jnp.concatenate(ctx_heads, axis=-1)                      # [B*T, H]

        # ---- output projection + residual + LayerNorm 1 ----
        x1 = jnp.dot(ctx, wo, preferred_element_type=jnp.float32) + bo
        h1 = layer_norm(x + x1, g1, be1)

        # ---- position-wise FFN (matmul + relu + matmul) ----
        f = jnp.dot(h1, w1, preferred_element_type=jnp.float32) + b1
        f = jnp.maximum(f, 0.0)
        x2 = jnp.dot(f, w2, preferred_element_type=jnp.float32) + b2

        # ---- residual + LayerNorm 2 ----
        x = layer_norm(h1 + x2, g2, be2)

    o_ref[...] = x


# ----------------------------------------------------------------------------
# Wrapper: a single pallas_call for the whole Encoder forward
# ----------------------------------------------------------------------------
def encoder_forward(params, src, src_mask, *, hid_dim, n_heads, n_layers):
    # src_mask is unused: PyTorch EncoderLayer calls self_attention(..., mask=None).
    del src_mask
    B, T, IN = src.shape
    head_dim = hid_dim // n_heads

    src_flat = src.reshape(B * T, IN)                      # fold batch into M
    pos_tiled = jnp.tile(params["pos_emb"][:T], (B, 1))    # [B*T, H]

    inputs = (src_flat, pos_tiled, params["emb_w"], params["emb_b"],
              params["wqkv"], params["bqkv"], params["wo"], params["bo"],
              params["ln1_g"], params["ln1_b"], params["w1"], params["b1"],
              params["w2"], params["b2"], params["ln2_g"], params["ln2_b"])

    def full_spec(a):
        nd = a.ndim
        return pl.BlockSpec(a.shape, lambda i, nd=nd: (0,) * nd)

    kernel = functools.partial(
        _encoder_kernel,
        n_layers=n_layers, n_heads=n_heads, head_dim=head_dim,
        B=B, T=T, emb_scale=math.sqrt(hid_dim), eps=1e-5)

    out_flat = pl.pallas_call(
        kernel,
        grid=(1,),
        in_specs=[full_spec(a) for a in inputs],
        out_specs=pl.BlockSpec((B * T, hid_dim), lambda i: (0, 0)),
        out_shape=jax.ShapeDtypeStruct((B * T, hid_dim), jnp.float32),
        compiler_params=pltpu.CompilerParams(
            dimension_semantics=("arbitrary",)),
    )(*inputs)
    return out_flat.reshape(B, T, hid_dim)


# ----------------------------------------------------------------------------
# Pure-JAX reference (same math, for correctness check)
# ----------------------------------------------------------------------------
def _ln_ref(x, g, b, eps=1e-5):
    mu = jnp.mean(x, axis=-1, keepdims=True)
    var = jnp.mean(jnp.square(x - mu), axis=-1, keepdims=True)
    return (x - mu) * jax.lax.rsqrt(var + eps) * g + b


def encoder_ref(params, src, *, hid_dim, n_heads, n_layers):
    B, T, _ = src.shape
    hd = hid_dim // n_heads
    x = jnp.dot(src, params["emb_w"]) + params["emb_b"]
    x = x * math.sqrt(hid_dim) + params["pos_emb"][:T][None]
    for l in range(n_layers):
        qkv = jnp.dot(x, params["wqkv"][l]) + params["bqkv"][l]
        q, k, v = jnp.split(qkv, 3, axis=-1)
        sh = lambda t: t.reshape(B, T, n_heads, hd).transpose(0, 2, 1, 3)
        qh, kh, vh = sh(q), sh(k), sh(v)
        e = jnp.einsum("bhqd,bhkd->bhqk", qh, kh) / math.sqrt(hd)
        a = jax.nn.softmax(e, axis=-1)
        ctx = jnp.einsum("bhqk,bhkd->bhqd", a, vh)
        ctx = ctx.transpose(0, 2, 1, 3).reshape(B, T, hid_dim)
        x1 = jnp.dot(ctx, params["wo"][l]) + params["bo"][l]
        h1 = _ln_ref(x + x1, params["ln1_g"][l], params["ln1_b"][l])
        f = jnp.maximum(jnp.dot(h1, params["w1"][l]) + params["b1"][l], 0.0)
        x2 = jnp.dot(f, params["w2"][l]) + params["b2"][l]
        x = _ln_ref(h1 + x2, params["ln2_g"][l], params["ln2_b"][l])
    return x


# ----------------------------------------------------------------------------
# Deterministic parameter init (mirrors nn.Linear / nn.Embedding / nn.LayerNorm)
# Per-layer params are stacked along a leading layer axis.
# ----------------------------------------------------------------------------
def init_params(key, *, in_dim, hid_dim, n_layers, n_heads, pf_dim, max_length):
    keys = iter(jax.random.split(key, 512))

    def lin(fan_in, fan_out):
        bound = 1.0 / math.sqrt(fan_in)
        w = jax.random.uniform(next(keys), (fan_in, fan_out), jnp.float32, -bound, bound)
        b = jax.random.uniform(next(keys), (1, fan_out), jnp.float32, -bound, bound)
        return w, b

    params = {"pos_emb": jax.random.normal(next(keys), (max_length, hid_dim), jnp.float32)}
    params["emb_w"], params["emb_b"] = lin(in_dim, hid_dim)

    wqkv_l, bqkv_l, wo_l, bo_l = [], [], [], []
    w1_l, b1_l, w2_l, b2_l = [], [], [], []
    for _ in range(n_layers):
        wq, bq = lin(hid_dim, hid_dim)
        wk, bk = lin(hid_dim, hid_dim)
        wv, bv = lin(hid_dim, hid_dim)
        wqkv_l.append(jnp.concatenate([wq, wk, wv], axis=1))      # [H, 3H]
        bqkv_l.append(jnp.concatenate([bq, bk, bv], axis=1))      # [1, 3H]
        wo, bo = lin(hid_dim, hid_dim); wo_l.append(wo); bo_l.append(bo)
        w1, b1 = lin(hid_dim, pf_dim);  w1_l.append(w1); b1_l.append(b1)
        w2, b2 = lin(pf_dim, hid_dim);  w2_l.append(w2); b2_l.append(b2)

    params["wqkv"] = jnp.stack(wqkv_l); params["bqkv"] = jnp.stack(bqkv_l)
    params["wo"] = jnp.stack(wo_l);     params["bo"] = jnp.stack(bo_l)
    params["w1"] = jnp.stack(w1_l);     params["b1"] = jnp.stack(b1_l)
    params["w2"] = jnp.stack(w2_l);     params["b2"] = jnp.stack(b2_l)
    params["ln1_g"] = jnp.ones((n_layers, 1, hid_dim), jnp.float32)
    params["ln1_b"] = jnp.zeros((n_layers, 1, hid_dim), jnp.float32)
    params["ln2_g"] = jnp.ones((n_layers, 1, hid_dim), jnp.float32)
    params["ln2_b"] = jnp.zeros((n_layers, 1, hid_dim), jnp.float32)
    return params


# ----------------------------------------------------------------------------
if __name__ == "__main__":
    in_dim, hid_dim, n_layers, n_heads, pf_dim = 2048, 32, 2, 4, 64
    B, T, max_length = 2, 8, 64

    key = jax.random.PRNGKey(0)
    kp, kx = jax.random.split(key)
    params = init_params(kp, in_dim=in_dim, hid_dim=hid_dim, n_layers=n_layers,
                         n_heads=n_heads, pf_dim=pf_dim, max_length=max_length)

    src = jax.random.normal(kx, (B, T, in_dim), jnp.float32)
    # TODO(synk): src_mask is unused because EncoderLayer passes mask=None to
    # self-attention in the PyTorch reference; kept only for API parity.
    src_mask = jnp.ones((B, 1, 1, T), jnp.int32)

    fwd = jax.jit(functools.partial(encoder_forward, hid_dim=hid_dim,
                                    n_heads=n_heads, n_layers=n_layers))
    out = fwd(params, src, src_mask)
    jax.block_until_ready(out)

    ref = encoder_ref(params, src, hid_dim=hid_dim, n_heads=n_heads,
                      n_layers=n_layers)

    assert out.shape == (B, T, hid_dim)
    assert bool(jnp.all(jnp.isfinite(out)))
    max_err = float(jnp.max(jnp.abs(out - ref)))
    # Tolerance accounts for pl.reciprocal(approx=True) in the softmax
    # normalization (~1e-3-level relative error, per review note).
    assert bool(jnp.allclose(out, ref, atol=5e-3, rtol=5e-3)), f"max abs err {max_err}"

    print("KERNEL_OK")
</pallas_src>

<mosaic_0001>
module attributes {stable_mosaic.version = 11 : i64} {
  func.func @_encoder_kernel(%arg0: i32, %arg1: memref<16x2048xf32, #tpu.memory_space<vmem>>, %arg2: memref<16x32xf32, #tpu.memory_space<vmem>>, %arg3: memref<2048x32xf32, #tpu.memory_space<vmem>>, %arg4: memref<1x32xf32, #tpu.memory_space<vmem>>, %arg5: memref<2x32x96xf32, #tpu.memory_space<vmem>>, %arg6: memref<2x1x96xf32, #tpu.memory_space<vmem>>, %arg7: memref<2x32x32xf32, #tpu.memory_space<vmem>>, %arg8: memref<2x1x32xf32, #tpu.memory_space<vmem>>, %arg9: memref<2x1x32xf32, #tpu.memory_space<vmem>>, %arg10: memref<2x1x32xf32, #tpu.memory_space<vmem>>, %arg11: memref<2x32x64xf32, #tpu.memory_space<vmem>>, %arg12: memref<2x1x64xf32, #tpu.memory_space<vmem>>, %arg13: memref<2x64x32xf32, #tpu.memory_space<vmem>>, %arg14: memref<2x1x32xf32, #tpu.memory_space<vmem>>, %arg15: memref<2x1x32xf32, #tpu.memory_space<vmem>>, %arg16: memref<2x1x32xf32, #tpu.memory_space<vmem>>, %arg17: memref<16x32xf32, #tpu.memory_space<vmem>>) attributes {dimension_semantics = [#tpu.dimension_semantics<arbitrary>], iteration_bounds = array<i64: 1>, scalar_prefetch = 0 : i64, scratch_operands = 0 : i64, tpu.core_type = #tpu.core_type<tc>, window_params = [{pipeline_mode = #tpu.pipeline_mode<synchronous>, transform_indices = @transform_0, window_bounds = array<i64: 16, 2048>}, {pipeline_mode = #tpu.pipeline_mode<synchronous>, transform_indices = @transform_1, window_bounds = array<i64: 16, 32>}, {pipeline_mode = #tpu.pipeline_mode<synchronous>, transform_indices = @transform_2, window_bounds = array<i64: 2048, 32>}, {pipeline_mode = #tpu.pipeline_mode<synchronous>, transform_indices = @transform_3, window_bounds = array<i64: 1, 32>}, {pipeline_mode = #tpu.pipeline_mode<synchronous>, transform_indices = @transform_4, window_bounds = array<i64: 2, 32, 96>}, {pipeline_mode = #tpu.pipeline_mode<synchronous>, transform_indices = @transform_5, window_bounds = array<i64: 2, 1, 96>}, {pipeline_mode = #tpu.pipeline_mode<synchronous>, transform_indices = @transform_6, window_bounds = array<i64: 2, 32, 32>}, {pipeline_mode = #tpu.pipeline_mode<synchronous>, transform_indices = @transform_7, window_bounds = array<i64: 2, 1, 32>}, {pipeline_mode = #tpu.pipeline_mode<synchronous>, transform_indices = @transform_8, window_bounds = array<i64: 2, 1, 32>}, {pipeline_mode = #tpu.pipeline_mode<synchronous>, transform_indices = @transform_9, window_bounds = array<i64: 2, 1, 32>}, {pipeline_mode = #tpu.pipeline_mode<synchronous>, transform_indices = @transform_10, window_bounds = array<i64: 2, 32, 64>}, {pipeline_mode = #tpu.pipeline_mode<synchronous>, transform_indices = @transform_11, window_bounds = array<i64: 2, 1, 64>}, {pipeline_mode = #tpu.pipeline_mode<synchronous>, transform_indices = @transform_12, window_bounds = array<i64: 2, 64, 32>}, {pipeline_mode = #tpu.pipeline_mode<synchronous>, transform_indices = @transform_13, window_bounds = array<i64: 2, 1, 32>}, {pipeline_mode = #tpu.pipeline_mode<synchronous>, transform_indices = @transform_14, window_bounds = array<i64: 2, 1, 32>}, {pipeline_mode = #tpu.pipeline_mode<synchronous>, transform_indices = @transform_15, window_bounds = array<i64: 2, 1, 32>}, {pipeline_mode = #tpu.pipeline_mode<synchronous>, transform_indices = @transform_16, window_bounds = array<i64: 16, 32>}]} {
    %c0 = arith.constant 0 : index
    %c0_0 = arith.constant 0 : index
    %0 = vector.load %arg1[%c0, %c0_0] : memref<16x2048xf32, #tpu.memory_space<vmem>>, vector<16x2048xf32>
    %c0_1 = arith.constant 0 : index
    %c0_2 = arith.constant 0 : index
    %1 = vector.load %arg3[%c0_1, %c0_2] : memref<2048x32xf32, #tpu.memory_space<vmem>>, vector<2048x32xf32>
    %cst = arith.constant dense<0.000000e+00> : vector<16x32xf32>
    %2 = tpu.matmul %0, %1, %cst {dimension_numbers = #tpu.dot_dimension_numbers<[1], [0], [0], [1], [0, 0, 1, 1], [], []>, precision = #tpu.contract_precision<fp32>} : vector<16x2048xf32>, vector<2048x32xf32>, vector<16x32xf32> -> vector<16x32xf32>
    %c0_3 = arith.constant 0 : index
    %c0_4 = arith.constant 0 : index
    %3 = vector.load %arg4[%c0_3, %c0_4] : memref<1x32xf32, #tpu.memory_space<vmem>>, vector<1x32xf32>
    %4 = vector.broadcast %3 : vector<1x32xf32> to vector<16x32xf32>
    %5 = arith.addf %2, %4 : vector<16x32xf32>
    %cst_5 = arith.constant 5.65685415 : f32
    %6 = vector.broadcast %cst_5 : f32 to vector<16x32xf32>
    %7 = arith.mulf %5, %6 : vector<16x32xf32>
    %c0_6 = arith.constant 0 : index
    %c0_7 = arith.constant 0 : index
    %8 = vector.load %arg2[%c0_6, %c0_7] : memref<16x32xf32, #tpu.memory_space<vmem>>, vector<16x32xf32>
    %9 = arith.addf %7, %8 : vector<16x32xf32>
    %c0_8 = arith.constant 0 : index
    %c0_9 = arith.constant 0 : index
    %c0_10 = arith.constant 0 : index
    %10 = vector.load %arg5[%c0_8, %c0_9, %c0_10] : memref<2x32x96xf32, #tpu.memory_space<vmem>>, vector<1x32x96xf32>
    %11 = vector.shape_cast %10 : vector<1x32x96xf32> to vector<32x96xf32>
    %c0_11 = arith.constant 0 : index
    %c0_12 = arith.constant 0 : index
    %c0_13 = arith.constant 0 : index
    %12 = vector.load %arg6[%c0_11, %c0_12, %c0_13] : memref<2x1x96xf32, #tpu.memory_space<vmem>>, vector<1x1x96xf32>
    %13 = vector.shape_cast %12 : vector<1x1x96xf32> to vector<1x96xf32>
    %c0_14 = arith.constant 0 : index
    %c0_15 = arith.constant 0 : index
    %c0_16 = arith.constant 0 : index
    %14 = vector.load %arg7[%c0_14, %c0_15, %c0_16] : memref<2x32x32xf32, #tpu.memory_space<vmem>>, vector<1x32x32xf32>
    %15 = vector.shape_cast %14 : vector<1x32x32xf32> to vector<32x32xf32>
    %c0_17 = arith.constant 0 : index
    %c0_18 = arith.constant 0 : index
    %c0_19 = arith.constant 0 : index
    %16 = vector.load %arg8[%c0_17, %c0_18, %c0_19] : memref<2x1x32xf32, #tpu.memory_space<vmem>>, vector<1x1x32xf32>
    %17 = vector.shape_cast %16 : vector<1x1x32xf32> to vector<1x32xf32>
    %c0_20 = arith.constant 0 : index
    %c0_21 = arith.constant 0 : index
    %c0_22 = arith.constant 0 : index
    %18 = vector.load %arg11[%c0_20, %c0_21, %c0_22] : memref<2x32x64xf32, #tpu.memory_space<vmem>>, vector<1x32x64xf32>
    %19 = vector.shape_cast %18 : vector<1x32x64xf32> to vector<32x64xf32>
    %c0_23 = arith.constant 0 : index
    %c0_24 = arith.constant 0 : index
    %c0_25 = arith.constant 0 : index
    %20 = vector.load %arg12[%c0_23, %c0_24, %c0_25] : memref<2x1x64xf32, #tpu.memory_space<vmem>>, vector<1x1x64xf32>
    %21 = vector.shape_cast %20 : vector<1x1x64xf32> to vector<1x64xf32>
    %c0_26 = arith.constant 0 : index
    %c0_27 = arith.constant 0 : index
    %c0_28 = arith.constant 0 : index
    %22 = vector.load %arg13[%c0_26, %c0_27, %c0_28] : memref<2x64x32xf32, #tpu.memory_space<vmem>>, vector<1x64x32xf32>
    %23 = vector.shape_cast %22 : vector<1x64x32xf32> to vector<64x32xf32>
    %c0_29 = arith.constant 0 : index
    %c0_30 = arith.constant 0 : index
    %c0_31 = arith.constant 0 : index
    %24 = vector.load %arg14[%c0_29, %c0_30, %c0_31] : memref<2x1x32xf32, #tpu.memory_space<vmem>>, vector<1x1x32xf32>
    %25 = vector.shape_cast %24 : vector<1x1x32xf32> to vector<1x32xf32>
    %c0_32 = arith.constant 0 : index
    %c0_33 = arith.constant 0 : index
    %c0_34 = arith.constant 0 : index
    %26 = vector.load %arg9[%c0_32, %c0_33, %c0_34] : memref<2x1x32xf32, #tpu.memory_space<vmem>>, vector<1x1x32xf32>
    %27 = vector.shape_cast %26 : vector<1x1x32xf32> to vector<1x32xf32>
    %c0_35 = arith.constant 0 : index
    %c0_36 = arith.constant 0 : index
    %c0_37 = arith.constant 0 : index
    %28 = vector.load %arg10[%c0_35, %c0_36, %c0_37] : memref<2x1x32xf32, #tpu.memory_space<vmem>>, vector<1x1x32xf32>
    %29 = vector.shape_cast %28 : vector<1x1x32xf32> to vector<1x32xf32>
    %c0_38 = arith.constant 0 : index
    %c0_39 = arith.constant 0 : index
    %c0_40 = arith.constant 0 : index
    %30 = vector.load %arg15[%c0_38, %c0_39, %c0_40] : memref<2x1x32xf32, #tpu.memory_space<vmem>>, vector<1x1x32xf32>
    %31 = vector.shape_cast %30 : vector<1x1x32xf32> to vector<1x32xf32>
    %c0_41 = arith.constant 0 : index
    %c0_42 = arith.constant 0 : index
    %c0_43 = arith.constant 0 : index
    %32 = vector.load %arg16[%c0_41, %c0_42, %c0_43] : memref<2x1x32xf32, #tpu.memory_space<vmem>>, vector<1x1x32xf32>
    %33 = vector.shape_cast %32 : vector<1x1x32xf32> to vector<1x32xf32>
    %cst_44 = arith.constant dense<0.000000e+00> : vector<16x96xf32>
    %34 = tpu.matmul %9, %11, %cst_44 {dimension_numbers = #tpu.dot_dimension_numbers<[1], [0], [0], [1], [0, 0, 1, 1], [], []>, precision = #tpu.contract_precision<fp32>} : vector<16x32xf32>, vector<32x96xf32>, vector<16x96xf32> -> vector<16x96xf32>
    %35 = vector.broadcast %13 : vector<1x96xf32> to vector<16x96xf32>
    %36 = arith.addf %34, %35 : vector<16x96xf32>
    %37 = vector.extract_strided_slice %36 {offsets = [0, 0], sizes = [16, 32], strides = [1, 1]} : vector<16x96xf32> to vector<16x32xf32>
    %38 = vector.extract_strided_slice %36 {offsets = [0, 32], sizes = [16, 32], strides = [1, 1]} : vector<16x96xf32> to vector<16x32xf32>
    %39 = vector.extract_strided_slice %36 {offsets = [0, 64], sizes = [16, 32], strides = [1, 1]} : vector<16x96xf32> to vector<16x32xf32>
    %40 = vector.extract_strided_slice %37 {offsets = [0, 0], sizes = [16, 8], strides = [1, 1]} : vector<16x32xf32> to vector<16x8xf32>
    %41 = vector.shape_cast %40 : vector<16x8xf32> to vector<2x8x8xf32>
    %42 = vector.extract_strided_slice %38 {offsets = [0, 0], sizes = [16, 8], strides = [1, 1]} : vector<16x32xf32> to vector<16x8xf32>
    %43 = vector.shape_cast %42 : vector<16x8xf32> to vector<2x8x8xf32>
    %44 = vector.extract_strided_slice %39 {offsets = [0, 0], sizes = [16, 8], strides = [1, 1]} : vector<16x32xf32> to vector<16x8xf32>
    %45 = vector.shape_cast %44 : vector<16x8xf32> to vector<2x8x8xf32>
    %cst_45 = arith.constant dense<0.000000e+00> : vector<2x8x8xf32>
    %46 = tpu.matmul %41, %43, %cst_45 {dimension_numbers = #tpu.dot_dimension_numbers<[2], [2], [1], [1], [0, 0, 0, 1, 1, 1], [0], [0]>, precision = #tpu.contract_precision<fp32>} : vector<2x8x8xf32>, vector<2x8x8xf32>, vector<2x8x8xf32> -> vector<2x8x8xf32>
    %cst_46 = arith.constant 0.353553385 : f32
    %47 = vector.broadcast %cst_46 : f32 to vector<2x8x8xf32>
    %48 = arith.mulf %46, %47 : vector<2x8x8xf32>
    %cst_47 = arith.constant dense<0xFF800000> : vector<2x8xf32>
    %49 = vector.multi_reduction <maximumf>, %48, %cst_47 [2] : vector<2x8x8xf32> to vector<2x8xf32>
    %50 = vector.shape_cast %49 : vector<2x8xf32> to vector<2x8x1xf32>
    %51 = vector.broadcast %50 : vector<2x8x1xf32> to vector<2x8x8xf32>
    %52 = arith.subf %48, %51 : vector<2x8x8xf32>
    %53 = math.exp %52 : vector<2x8x8xf32>
    %cst_48 = arith.constant dense<0.000000e+00> : vector<2x8xf32>
    %54 = vector.multi_reduction <add>, %53, %cst_48 [2] : vector<2x8x8xf32> to vector<2x8xf32>
    %55 = vector.shape_cast %54 : vector<2x8xf32> to vector<2x8x1xf32>
    %56 = tpu.reciprocal %55 {approx = true} : vector<2x8x1xf32> -> vector<2x8x1xf32>
    %57 = vector.broadcast %56 : vector<2x8x1xf32> to vector<2x8x8xf32>
    %58 = arith.mulf %53, %57 : vector<2x8x8xf32>
    %cst_49 = arith.constant dense<0.000000e+00> : vector<2x8x8xf32>
    %59 = tpu.matmul %58, %45, %cst_49 {dimension_numbers = #tpu.dot_dimension_numbers<[2], [1], [1], [2], [0, 0, 0, 1, 1, 2], [0], [0]>, precision = #tpu.contract_precision<fp32>} : vector<2x8x8xf32>, vector<2x8x8xf32>, vector<2x8x8xf32> -> vector<2x8x8xf32>
    %60 = vector.shape_cast %59 : vector<2x8x8xf32> to vector<16x8xf32>
    %61 = vector.extract_strided_slice %37 {offsets = [0, 8], sizes = [16, 8], strides = [1, 1]} : vector<16x32xf32> to vector<16x8xf32>
    %62 = vector.shape_cast %61 : vector<16x8xf32> to vector<2x8x8xf32>
    %63 = vector.extract_strided_slice %38 {offsets = [0, 8], sizes = [16, 8], strides = [1, 1]} : vector<16x32xf32> to vector<16x8xf32>
    %64 = vector.shape_cast %63 : vector<16x8xf32> to vector<2x8x8xf32>
    %65 = vector.extract_strided_slice %39 {offsets = [0, 8], sizes = [16, 8], strides = [1, 1]} : vector<16x32xf32> to vector<16x8xf32>
    %66 = vector.shape_cast %65 : vector<16x8xf32> to vector<2x8x8xf32>
    %cst_50 = arith.constant dense<0.000000e+00> : vector<2x8x8xf32>
    %67 = tpu.matmul %62, %64, %cst_50 {dimension_numbers = #tpu.dot_dimension_numbers<[2], [2], [1], [1], [0, 0, 0, 1, 1, 1], [0], [0]>, precision = #tpu.contract_precision<fp32>} : vector<2x8x8xf32>, vector<2x8x8xf32>, vector<2x8x8xf32> -> vector<2x8x8xf32>
    %cst_51 = arith.constant 0.353553385 : f32
    %68 = vector.broadcast %cst_51 : f32 to vector<2x8x8xf32>
    %69 = arith.mulf %67, %68 : vector<2x8x8xf32>
    %cst_52 = arith.constant dense<0xFF800000> : vector<2x8xf32>
    %70 = vector.multi_reduction <maximumf>, %69, %cst_52 [2] : vector<2x8x8xf32> to vector<2x8xf32>
    %71 = vector.shape_cast %70 : vector<2x8xf32> to vector<2x8x1xf32>
    %72 = vector.broadcast %71 : vector<2x8x1xf32> to vector<2x8x8xf32>
    %73 = arith.subf %69, %72 : vector<2x8x8xf32>
    %74 = math.exp %73 : vector<2x8x8xf32>
    %cst_53 = arith.constant dense<0.000000e+00> : vector<2x8xf32>
    %75 = vector.multi_reduction <add>, %74, %cst_53 [2] : vector<2x8x8xf32> to vector<2x8xf32>
    %76 = vector.shape_cast %75 : vector<2x8xf32> to vector<2x8x1xf32>
    %77 = tpu.reciprocal %76 {approx = true} : vector<2x8x1xf32> -> vector<2x8x1xf32>
    %78 = vector.broadcast %77 : vector<2x8x1xf32> to vector<2x8x8xf32>
    %79 = arith.mulf %74, %78 : vector<2x8x8xf32>
    %cst_54 = arith.constant dense<0.000000e+00> : vector<2x8x8xf32>
    %80 = tpu.matmul %79, %66, %cst_54 {dimension_numbers = #tpu.dot_dimension_numbers<[2], [1], [1], [2], [0, 0, 0, 1, 1, 2], [0], [0]>, precision = #tpu.contract_precision<fp32>} : vector<2x8x8xf32>, vector<2x8x8xf32>, vector<2x8x8xf32> -> vector<2x8x8xf32>
    %81 = vector.shape_cast %80 : vector<2x8x8xf32> to vector<16x8xf32>
    %82 = vector.extract_strided_slice %37 {offsets = [0, 16], sizes = [16, 8], strides = [1, 1]} : vector<16x32xf32> to vector<16x8xf32>
    %83 = vector.shape_cast %82 : vector<16x8xf32> to vector<2x8x8xf32>
    %84 = vector.extract_strided_slice %38 {offsets = [0, 16], sizes = [16, 8], strides = [1, 1]} : vector<16x32xf32> to vector<16x8xf32>
    %85 = vector.shape_cast %84 : vector<16x8xf32> to vector<2x8x8xf32>
    %86 = vector.extract_strided_slice %39 {offsets = [0, 16], sizes = [16, 8], strides = [1, 1]} : vector<16x32xf32> to vector<16x8xf32>
    %87 = vector.shape_cast %86 : vector<16x8xf32> to vector<2x8x8xf32>
    %cst_55 = arith.constant dense<0.000000e+00> : vector<2x8x8xf32>
    %88 = tpu.matmul %83, %85, %cst_55 {dimension_numbers = #tpu.dot_dimension_numbers<[2], [2], [1], [1], [0, 0, 0, 1, 1, 1], [0], [0]>, precision = #tpu.contract_precision<fp32>} : vector<2x8x8xf32>, vector<2x8x8xf32>, vector<2x8x8xf32> -> vector<2x8x8xf32>
    %cst_56 = arith.constant 0.353553385 : f32
    %89 = vector.broadcast %cst_56 : f32 to vector<2x8x8xf32>
    %90 = arith.mulf %88, %89 : vector<2x8x8xf32>
    %cst_57 = arith.constant dense<0xFF800000> : vector<2x8xf32>
    %91 = vector.multi_reduction <maximumf>, %90, %cst_57 [2] : vector<2x8x8xf32> to vector<2x8xf32>
    %92 = vector.shape_cast %91 : vector<2x8xf32> to vector<2x8x1xf32>
    %93 = vector.broadcast %92 : vector<2x8x1xf32> to vector<2x8x8xf32>
    %94 = arith.subf %90, %93 : vector<2x8x8xf32>
    %95 = math.exp %94 : vector<2x8x8xf32>
    %cst_58 = arith.constant dense<0.000000e+00> : vector<2x8xf32>
    %96 = vector.multi_reduction <add>, %95, %cst_58 [2] : vector<2x8x8xf32> to vector<2x8xf32>
    %97 = vector.shape_cast %96 : vector<2x8xf32> to vector<2x8x1xf32>
    %98 = tpu.reciprocal %97 {approx = true} : vector<2x8x1xf32> -> vector<2x8x1xf32>
    %99 = vector.broadcast %98 : vector<2x8x1xf32> to vector<2x8x8xf32>
    %100 = arith.mulf %95, %99 : vector<2x8x8xf32>
    %cst_59 = arith.constant dense<0.000000e+00> : vector<2x8x8xf32>
    %101 = tpu.matmul %100, %87, %cst_59 {dimension_numbers = #tpu.dot_dimension_numbers<[2], [1], [1], [2], [0, 0, 0, 1, 1, 2], [0], [0]>, precision = #tpu.contract_precision<fp32>} : vector<2x8x8xf32>, vector<2x8x8xf32>, vector<2x8x8xf32> -> vector<2x8x8xf32>
    %102 = vector.shape_cast %101 : vector<2x8x8xf32> to vector<16x8xf32>
    %103 = vector.extract_strided_slice %37 {offsets = [0, 24], sizes = [16, 8], strides = [1, 1]} : vector<16x32xf32> to vector<16x8xf32>
    %104 = vector.shape_cast %103 : vector<16x8xf32> to vector<2x8x8xf32>
    %105 = vector.extract_strided_slice %38 {offsets = [0, 24], sizes = [16, 8], strides = [1, 1]} : vector<16x32xf32> to vector<16x8xf32>
    %106 = vector.shape_cast %105 : vector<16x8xf32> to vector<2x8x8xf32>
    %107 = vector.extract_strided_slice %39 {offsets = [0, 24], sizes = [16, 8], strides = [1, 1]} : vector<16x32xf32> to vector<16x8xf32>
    %108 = vector.shape_cast %107 : vector<16x8xf32> to vector<2x8x8xf32>
    %cst_60 = arith.constant dense<0.000000e+00> : vector<2x8x8xf32>
    %109 = tpu.matmul %104, %106, %cst_60 {dimension_numbers = #tpu.dot_dimension_numbers<[2], [2], [1], [1], [0, 0, 0, 1, 1, 1], [0], [0]>, precision = #tpu.contract_precision<fp32>} : vector<2x8x8xf32>, vector<2x8x8xf32>, vector<2x8x8xf32> -> vector<2x8x8xf32>
    %cst_61 = arith.constant 0.353553385 : f32
    %110 = vector.broadcast %cst_61 : f32 to vector<2x8x8xf32>
    %111 = arith.mulf %109, %110 : vector<2x8x8xf32>
    %cst_62 = arith.constant dense<0xFF800000> : vector<2x8xf32>
    %112 = vector.multi_reduction <maximumf>, %111, %cst_62 [2] : vector<2x8x8xf32> to vector<2x8xf32>
    %113 = vector.shape_cast %112 : vector<2x8xf32> to vector<2x8x1xf32>
    %114 = vector.broadcast %113 : vector<2x8x1xf32> to vector<2x8x8xf32>
    %115 = arith.subf %111, %114 : vector<2x8x8xf32>
    %116 = math.exp %115 : vector<2x8x8xf32>
    %cst_63 = arith.constant dense<0.000000e+00> : vector<2x8xf32>
    %117 = vector.multi_reduction <add>, %116, %cst_63 [2] : vector<2x8x8xf32> to vector<2x8xf32>
    %118 = vector.shape_cast %117 : vector<2x8xf32> to vector<2x8x1xf32>
    %119 = tpu.reciprocal %118 {approx = true} : vector<2x8x1xf32> -> vector<2x8x1xf32>
    %120 = vector.broadcast %119 : vector<2x8x1xf32> to vector<2x8x8xf32>
    %121 = arith.mulf %116, %120 : vector<2x8x8xf32>
    %cst_64 = arith.constant dense<0.000000e+00> : vector<2x8x8xf32>
    %122 = tpu.matmul %121, %108, %cst_64 {dimension_numbers = #tpu.dot_dimension_numbers<[2], [1], [1], [2], [0, 0, 0, 1, 1, 2], [0], [0]>, precision = #tpu.contract_precision<fp32>} : vector<2x8x8xf32>, vector<2x8x8xf32>, vector<2x8x8xf32> -> vector<2x8x8xf32>
    %123 = vector.shape_cast %122 : vector<2x8x8xf32> to vector<16x8xf32>
    %124 = tpu.concatenate %60, %81, %102, %123 in 1 : vector<16x8xf32>, vector<16x8xf32>, vector<16x8xf32>, vector<16x8xf32> -> vector<16x32xf32>
    %cst_65 = arith.constant dense<0.000000e+00> : vector<16x32xf32>
    %125 = tpu.matmul %124, %15, %cst_65 {dimension_numbers = #tpu.dot_dimension_numbers<[1], [0], [0], [1], [0, 0, 1, 1], [], []>, precision = #tpu.contract_precision<fp32>} : vector<16x32xf32>, vector<32x32xf32>, vector<16x32xf32> -> vector<16x32xf32>
    %126 = vector.broadcast %17 : vector<1x32xf32> to vector<16x32xf32>
    %127 = arith.addf %125, %126 : vector<16x32xf32>
    %128 = arith.addf %9, %127 : vector<16x32xf32>
    %cst_66 = arith.constant dense<0.000000e+00> : vector<16xf32>
    %129 = vector.multi_reduction <add>, %128, %cst_66 [1] : vector<16x32xf32> to vector<16xf32>
    %130 = vector.shape_cast %129 : vector<16xf32> to vector<16x1xf32>
    %cst_67 = arith.constant 3.200000e+01 : f32
    %131 = vector.broadcast %cst_67 : f32 to vector<16x1xf32>
    %132 = arith.divf %130, %131 : vector<16x1xf32>
    %133 = vector.broadcast %132 : vector<16x1xf32> to vector<16x32xf32>
    %134 = arith.subf %128, %133 : vector<16x32xf32>
    %135 = arith.mulf %134, %134 : vector<16x32xf32>
    %cst_68 = arith.constant dense<0.000000e+00> : vector<16xf32>
    %136 = vector.multi_reduction <add>, %135, %cst_68 [1] : vector<16x32xf32> to vector<16xf32>
    %137 = vector.shape_cast %136 : vector<16xf32> to vector<16x1xf32>
    %cst_69 = arith.constant 3.200000e+01 : f32
    %138 = vector.broadcast %cst_69 : f32 to vector<16x1xf32>
    %139 = arith.divf %137, %138 : vector<16x1xf32>
    %140 = vector.broadcast %132 : vector<16x1xf32> to vector<16x32xf32>
    %141 = arith.subf %128, %140 : vector<16x32xf32>
    %cst_70 = arith.constant 9.99999974E-6 : f32
    %142 = vector.broadcast %cst_70 : f32 to vector<16x1xf32>
    %143 = arith.addf %139, %142 : vector<16x1xf32>
    %144 = math.rsqrt %143 : vector<16x1xf32>
    %145 = vector.broadcast %144 : vector<16x1xf32> to vector<16x32xf32>
    %146 = arith.mulf %141, %145 : vector<16x32xf32>
    %147 = vector.broadcast %27 : vector<1x32xf32> to vector<16x32xf32>
    %148 = arith.mulf %146, %147 : vector<16x32xf32>
    %149 = vector.broadcast %29 : vector<1x32xf32> to vector<16x32xf32>
    %150 = arith.addf %148, %149 : vector<16x32xf32>
    %cst_71 = arith.constant dense<0.000000e+00> : vector<16x64xf32>
    %151 = tpu.matmul %150, %19, %cst_71 {dimension_numbers = #tpu.dot_dimension_numbers<[1], [0], [0], [1], [0, 0, 1, 1], [], []>, precision = #tpu.contract_precision<fp32>} : vector<16x32xf32>, vector<32x64xf32>, vector<16x64xf32> -> vector<16x64xf32>
    %152 = vector.broadcast %21 : vector<1x64xf32> to vector<16x64xf32>
    %153 = arith.addf %151, %152 : vector<16x64xf32>
    %cst_72 = arith.constant 0.000000e+00 : f32
    %154 = vector.broadcast %cst_72 : f32 to vector<16x64xf32>
    %155 = arith.maximumf %153, %154 : vector<16x64xf32>
    %cst_73 = arith.constant dense<0.000000e+00> : vector<16x32xf32>
    %156 = tpu.matmul %155, %23, %cst_73 {dimension_numbers = #tpu.dot_dimension_numbers<[1], [0], [0], [1], [0, 0, 1, 1], [], []>, precision = #tpu.contract_precision<fp32>} : vector<16x64xf32>, vector<64x32xf32>, vector<16x32xf32> -> vector<16x32xf32>
    %157 = vector.broadcast %25 : vector<1x32xf32> to vector<16x32xf32>
    %158 = arith.addf %156, %157 : vector<16x32xf32>
    %159 = arith.addf %150, %158 : vector<16x32xf32>
    %cst_74 = arith.constant dense<0.000000e+00> : vector<16xf32>
    %160 = vector.multi_reduction <add>, %159, %cst_74 [1] : vector<16x32xf32> to vector<16xf32>
    %161 = vector.shape_cast %160 : vector<16xf32> to vector<16x1xf32>
    %cst_75 = arith.constant 3.200000e+01 : f32
    %162 = vector.broadcast %cst_75 : f32 to vector<16x1xf32>
    %163 = arith.divf %161, %162 : vector<16x1xf32>
    %164 = vector.broadcast %163 : vector<16x1xf32> to vector<16x32xf32>
    %165 = arith.subf %159, %164 : vector<16x32xf32>
    %166 = arith.mulf %165, %165 : vector<16x32xf32>
    %cst_76 = arith.constant dense<0.000000e+00> : vector<16xf32>
    %167 = vector.multi_reduction <add>, %166, %cst_76 [1] : vector<16x32xf32> to vector<16xf32>
    %168 = vector.shape_cast %167 : vector<16xf32> to vector<16x1xf32>
    %cst_77 = arith.constant 3.200000e+01 : f32
    %169 = vector.broadcast %cst_77 : f32 to vector<16x1xf32>
    %170 = arith.divf %168, %169 : vector<16x1xf32>
    %171 = vector.broadcast %163 : vector<16x1xf32> to vector<16x32xf32>
    %172 = arith.subf %159, %171 : vector<16x32xf32>
    %cst_78 = arith.constant 9.99999974E-6 : f32
    %173 = vector.broadcast %cst_78 : f32 to vector<16x1xf32>
    %174 = arith.addf %170, %173 : vector<16x1xf32>
    %175 = math.rsqrt %174 : vector<16x1xf32>
    %176 = vector.broadcast %175 : vector<16x1xf32> to vector<16x32xf32>
    %177 = arith.mulf %172, %176 : vector<16x32xf32>
    %178 = vector.broadcast %31 : vector<1x32xf32> to vector<16x32xf32>
    %179 = arith.mulf %177, %178 : vector<16x32xf32>
    %180 = vector.broadcast %33 : vector<1x32xf32> to vector<16x32xf32>
    %181 = arith.addf %179, %180 : vector<16x32xf32>
    %c1 = arith.constant 1 : index
    %c0_79 = arith.constant 0 : index
    %c0_80 = arith.constant 0 : index
    %182 = vector.load %arg5[%c1, %c0_79, %c0_80] : memref<2x32x96xf32, #tpu.memory_space<vmem>>, vector<1x32x96xf32>
    %183 = vector.shape_cast %182 : vector<1x32x96xf32> to vector<32x96xf32>
    %c1_81 = arith.constant 1 : index
    %c0_82 = arith.constant 0 : index
    %c0_83 = arith.constant 0 : index
    %184 = vector.load %arg6[%c1_81, %c0_82, %c0_83] : memref<2x1x96xf32, #tpu.memory_space<vmem>>, vector<1x1x96xf32>
    %185 = vector.shape_cast %184 : vector<1x1x96xf32> to vector<1x96xf32>
    %c1_84 = arith.constant 1 : index
    %c0_85 = arith.constant 0 : index
    %c0_86 = arith.constant 0 : index
    %186 = vector.load %arg7[%c1_84, %c0_85, %c0_86] : memref<2x32x32xf32, #tpu.memory_space<vmem>>, vector<1x32x32xf32>
    %187 = vector.shape_cast %186 : vector<1x32x32xf32> to vector<32x32xf32>
    %c1_87 = arith.constant 1 : index
    %c0_88 = arith.constant 0 : index
    %c0_89 = arith.constant 0 : index
    %188 = vector.load %arg8[%c1_87, %c0_88, %c0_89] : memref<2x1x32xf32, #tpu.memory_space<vmem>>, vector<1x1x32xf32>
    %189 = vector.shape_cast %188 : vector<1x1x32xf32> to vector<1x32xf32>
    %c1_90 = arith.constant 1 : index
    %c0_91 = arith.constant 0 : index
    %c0_92 = arith.constant 0 : index
    %190 = vector.load %arg11[%c1_90, %c0_91, %c0_92] : memref<2x32x64xf32, #tpu.memory_space<vmem>>, vector<1x32x64xf32>
    %191 = vector.shape_cast %190 : vector<1x32x64xf32> to vector<32x64xf32>
    %c1_93 = arith.constant 1 : index
    %c0_94 = arith.constant 0 : index
    %c0_95 = arith.constant 0 : index
    %192 = vector.load %arg12[%c1_93, %c0_94, %c0_95] : memref<2x1x64xf32, #tpu.memory_space<vmem>>, vector<1x1x64xf32>
    %193 = vector.shape_cast %192 : vector<1x1x64xf32> to vector<1x64xf32>
    %c1_96 = arith.constant 1 : index
    %c0_97 = arith.constant 0 : index
    %c0_98 = arith.constant 0 : index
    %194 = vector.load %arg13[%c1_96, %c0_97, %c0_98] : memref<2x64x32xf32, #tpu.memory_space<vmem>>, vector<1x64x32xf32>
    %195 = vector.shape_cast %194 : vector<1x64x32xf32> to vector<64x32xf32>
    %c1_99 = arith.constant 1 : index
    %c0_100 = arith.constant 0 : index
    %c0_101 = arith.constant 0 : index
    %196 = vector.load %arg14[%c1_99, %c0_100, %c0_101] : memref<2x1x32xf32, #tpu.memory_space<vmem>>, vector<1x1x32xf32>
    %197 = vector.shape_cast %196 : vector<1x1x32xf32> to vector<1x32xf32>
    %c1_102 = arith.constant 1 : index
    %c0_103 = arith.constant 0 : index
    %c0_104 = arith.constant 0 : index
    %198 = vector.load %arg9[%c1_102, %c0_103, %c0_104] : memref<2x1x32xf32, #tpu.memory_space<vmem>>, vector<1x1x32xf32>
    %199 = vector.shape_cast %198 : vector<1x1x32xf32> to vector<1x32xf32>
    %c1_105 = arith.constant 1 : index
    %c0_106 = arith.constant 0 : index
    %c0_107 = arith.constant 0 : index
    %200 = vector.load %arg10[%c1_105, %c0_106, %c0_107] : memref<2x1x32xf32, #tpu.memory_space<vmem>>, vector<1x1x32xf32>
    %201 = vector.shape_cast %200 : vector<1x1x32xf32> to vector<1x32xf32>
    %c1_108 = arith.constant 1 : index
    %c0_109 = arith.constant 0 : index
    %c0_110 = arith.constant 0 : index
    %202 = vector.load %arg15[%c1_108, %c0_109, %c0_110] : memref<2x1x32xf32, #tpu.memory_space<vmem>>, vector<1x1x32xf32>
    %203 = vector.shape_cast %202 : vector<1x1x32xf32> to vector<1x32xf32>
    %c1_111 = arith.constant 1 : index
    %c0_112 = arith.constant 0 : index
    %c0_113 = arith.constant 0 : index
    %204 = vector.load %arg16[%c1_111, %c0_112, %c0_113] : memref<2x1x32xf32, #tpu.memory_space<vmem>>, vector<1x1x32xf32>
    %205 = vector.shape_cast %204 : vector<1x1x32xf32> to vector<1x32xf32>
    %cst_114 = arith.constant dense<0.000000e+00> : vector<16x96xf32>
    %206 = tpu.matmul %181, %183, %cst_114 {dimension_numbers = #tpu.dot_dimension_numbers<[1], [0], [0], [1], [0, 0, 1, 1], [], []>, precision = #tpu.contract_precision<fp32>} : vector<16x32xf32>, vector<32x96xf32>, vector<16x96xf32> -> vector<16x96xf32>
    %207 = vector.broadcast %185 : vector<1x96xf32> to vector<16x96xf32>
    %208 = arith.addf %206, %207 : vector<16x96xf32>
    %209 = vector.extract_strided_slice %208 {offsets = [0, 0], sizes = [16, 32], strides = [1, 1]} : vector<16x96xf32> to vector<16x32xf32>
    %210 = vector.extract_strided_slice %208 {offsets = [0, 32], sizes = [16, 32], strides = [1, 1]} : vector<16x96xf32> to vector<16x32xf32>
    %211 = vector.extract_strided_slice %208 {offsets = [0, 64], sizes = [16, 32], strides = [1, 1]} : vector<16x96xf32> to vector<16x32xf32>
    %212 = vector.extract_strided_slice %209 {offsets = [0, 0], sizes = [16, 8], strides = [1, 1]} : vector<16x32xf32> to vector<16x8xf32>
    %213 = vector.shape_cast %212 : vector<16x8xf32> to vector<2x8x8xf32>
    %214 = vector.extract_strided_slice %210 {offsets = [0, 0], sizes = [16, 8], strides = [1, 1]} : vector<16x32xf32> to vector<16x8xf32>
    %215 = vector.shape_cast %214 : vector<16x8xf32> to vector<2x8x8xf32>
    %216 = vector.extract_strided_slice %211 {offsets = [0, 0], sizes = [16, 8], strides = [1, 1]} : vector<16x32xf32> to vector<16x8xf32>
    %217 = vector.shape_cast %216 : vector<16x8xf32> to vector<2x8x8xf32>
    %cst_115 = arith.constant dense<0.000000e+00> : vector<2x8x8xf32>
    %218 = tpu.matmul %213, %215, %cst_115 {dimension_numbers = #tpu.dot_dimension_numbers<[2], [2], [1], [1], [0, 0, 0, 1, 1, 1], [0], [0]>, precision = #tpu.contract_precision<fp32>} : vector<2x8x8xf32>, vector<2x8x8xf32>, vector<2x8x8xf32> -> vector<2x8x8xf32>
    %cst_116 = arith.constant 0.353553385 : f32
    %219 = vector.broadcast %cst_116 : f32 to vector<2x8x8xf32>
    %220 = arith.mulf %218, %219 : vector<2x8x8xf32>
    %cst_117 = arith.constant dense<0xFF800000> : vector<2x8xf32>
    %221 = vector.multi_reduction <maximumf>, %220, %cst_117 [2] : vector<2x8x8xf32> to vector<2x8xf32>
    %222 = vector.shape_cast %221 : vector<2x8xf32> to vector<2x8x1xf32>
    %223 = vector.broadcast %222 : vector<2x8x1xf32> to vector<2x8x8xf32>
    %224 = arith.subf %220, %223 : vector<2x8x8xf32>
    %225 = math.exp %224 : vector<2x8x8xf32>
    %cst_118 = arith.constant dense<0.000000e+00> : vector<2x8xf32>
    %226 = vector.multi_reduction <add>, %225, %cst_118 [2] : vector<2x8x8xf32> to vector<2x8xf32>
    %227 = vector.shape_cast %226 : vector<2x8xf32> to vector<2x8x1xf32>
    %228 = tpu.reciprocal %227 {approx = true} : vector<2x8x1xf32> -> vector<2x8x1xf32>
    %229 = vector.broadcast %228 : vector<2x8x1xf32> to vector<2x8x8xf32>
    %230 = arith.mulf %225, %229 : vector<2x8x8xf32>
    %cst_119 = arith.constant dense<0.000000e+00> : vector<2x8x8xf32>
    %231 = tpu.matmul %230, %217, %cst_119 {dimension_numbers = #tpu.dot_dimension_numbers<[2], [1], [1], [2], [0, 0, 0, 1, 1, 2], [0], [0]>, precision = #tpu.contract_precision<fp32>} : vector<2x8x8xf32>, vector<2x8x8xf32>, vector<2x8x8xf32> -> vector<2x8x8xf32>
    %232 = vector.shape_cast %231 : vector<2x8x8xf32> to vector<16x8xf32>
    %233 = vector.extract_strided_slice %209 {offsets = [0, 8], sizes = [16, 8], strides = [1, 1]} : vector<16x32xf32> to vector<16x8xf32>
    %234 = vector.shape_cast %233 : vector<16x8xf32> to vector<2x8x8xf32>
    %235 = vector.extract_strided_slice %210 {offsets = [0, 8], sizes = [16, 8], strides = [1, 1]} : vector<16x32xf32> to vector<16x8xf32>
    %236 = vector.shape_cast %235 : vector<16x8xf32> to vector<2x8x8xf32>
    %237 = vector.extract_strided_slice %211 {offsets = [0, 8], sizes = [16, 8], strides = [1, 1]} : vector<16x32xf32> to vector<16x8xf32>
    %238 = vector.shape_cast %237 : vector<16x8xf32> to vector<2x8x8xf32>
    %cst_120 = arith.constant dense<0.000000e+00> : vector<2x8x8xf32>
    %239 = tpu.matmul %234, %236, %cst_120 {dimension_numbers = #tpu.dot_dimension_numbers<[2], [2], [1], [1], [0, 0, 0, 1, 1, 1], [0], [0]>, precision = #tpu.contract_precision<fp32>} : vector<2x8x8xf32>, vector<2x8x8xf32>, vector<2x8x8xf32> -> vector<2x8x8xf32>
    %cst_121 = arith.constant 0.353553385 : f32
    %240 = vector.broadcast %cst_121 : f32 to vector<2x8x8xf32>
    %241 = arith.mulf %239, %240 : vector<2x8x8xf32>
    %cst_122 = arith.constant dense<0xFF800000> : vector<2x8xf32>
    %242 = vector.multi_reduction <maximumf>, %241, %cst_122 [2] : vector<2x8x8xf32> to vector<2x8xf32>
    %243 = vector.shape_cast %242 : vector<2x8xf32> to vector<2x8x1xf32>
    %244 = vector.broadcast %243 : vector<2x8x1xf32> to vector<2x8x8xf32>
    %245 = arith.subf %241, %244 : vector<2x8x8xf32>
    %246 = math.exp %245 : vector<2x8x8xf32>
    %cst_123 = arith.constant dense<0.000000e+00> : vector<2x8xf32>
    %247 = vector.multi_reduction <add>, %246, %cst_123 [2] : vector<2x8x8xf32> to vector<2x8xf32>
    %248 = vector.shape_cast %247 : vector<2x8xf32> to vector<2x8x1xf32>
    %249 = tpu.reciprocal %248 {approx = true} : vector<2x8x1xf32> -> vector<2x8x1xf32>
    %250 = vector.broadcast %249 : vector<2x8x1xf32> to vector<2x8x8xf32>
    %251 = arith.mulf %246, %250 : vector<2x8x8xf32>
    %cst_124 = arith.constant dense<0.000000e+00> : vector<2x8x8xf32>
    %252 = tpu.matmul %251, %238, %cst_124 {dimension_numbers = #tpu.dot_dimension_numbers<[2], [1], [1], [2], [0, 0, 0, 1, 1, 2], [0], [0]>, precision = #tpu.contract_precision<fp32>} : vector<2x8x8xf32>, vector<2x8x8xf32>, vector<2x8x8xf32> -> vector<2x8x8xf32>
    %253 = vector.shape_cast %252 : vector<2x8x8xf32> to vector<16x8xf32>
    %254 = vector.extract_strided_slice %209 {offsets = [0, 16], sizes = [16, 8], strides = [1, 1]} : vector<16x32xf32> to vector<16x8xf32>
    %255 = vector.shape_cast %254 : vector<16x8xf32> to vector<2x8x8xf32>
    %256 = vector.extract_strided_slice %210 {offsets = [0, 16], sizes = [16, 8], strides = [1, 1]} : vector<16x32xf32> to vector<16x8xf32>
    %257 = vector.shape_cast %256 : vector<16x8xf32> to vector<2x8x8xf32>
    %258 = vector.extract_strided_slice %211 {offsets = [0, 16], sizes = [16, 8], strides = [1, 1]} : vector<16x32xf32> to vector<16x8xf32>
    %259 = vector.shape_cast %258 : vector<16x8xf32> to vector<2x8x8xf32>
    %cst_125 = arith.constant dense<0.000000e+00> : vector<2x8x8xf32>
    %260 = tpu.matmul %255, %257, %cst_125 {dimension_numbers = #tpu.dot_dimension_numbers<[2], [2], [1], [1], [0, 0, 0, 1, 1, 1], [0], [0]>, precision = #tpu.contract_precision<fp32>} : vector<2x8x8xf32>, vector<2x8x8xf32>, vector<2x8x8xf32> -> vector<2x8x8xf32>
    %cst_126 = arith.constant 0.353553385 : f32
    %261 = vector.broadcast %cst_126 : f32 to vector<2x8x8xf32>
    %262 = arith.mulf %260, %261 : vector<2x8x8xf32>
    %cst_127 = arith.constant dense<0xFF800000> : vector<2x8xf32>
    %263 = vector.multi_reduction <maximumf>, %262, %cst_127 [2] : vector<2x8x8xf32> to vector<2x8xf32>
    %264 = vector.shape_cast %263 : vector<2x8xf32> to vector<2x8x1xf32>
    %265 = vector.broadcast %264 : vector<2x8x1xf32> to vector<2x8x8xf32>
    %266 = arith.subf %262, %265 : vector<2x8x8xf32>
    %267 = math.exp %266 : vector<2x8x8xf32>
    %cst_128 = arith.constant dense<0.000000e+00> : vector<2x8xf32>
    %268 = vector.multi_reduction <add>, %267, %cst_128 [2] : vector<2x8x8xf32> to vector<2x8xf32>
    %269 = vector.shape_cast %268 : vector<2x8xf32> to vector<2x8x1xf32>
    %270 = tpu.reciprocal %269 {approx = true} : vector<2x8x1xf32> -> vector<2x8x1xf32>
    %271 = vector.broadcast %270 : vector<2x8x1xf32> to vector<2x8x8xf32>
    %272 = arith.mulf %267, %271 : vector<2x8x8xf32>
    %cst_129 = arith.constant dense<0.000000e+00> : vector<2x8x8xf32>
    %273 = tpu.matmul %272, %259, %cst_129 {dimension_numbers = #tpu.dot_dimension_numbers<[2], [1], [1], [2], [0, 0, 0, 1, 1, 2], [0], [0]>, precision = #tpu.contract_precision<fp32>} : vector<2x8x8xf32>, vector<2x8x8xf32>, vector<2x8x8xf32> -> vector<2x8x8xf32>
    %274 = vector.shape_cast %273 : vector<2x8x8xf32> to vector<16x8xf32>
    %275 = vector.extract_strided_slice %209 {offsets = [0, 24], sizes = [16, 8], strides = [1, 1]} : vector<16x32xf32> to vector<16x8xf32>
    %276 = vector.shape_cast %275 : vector<16x8xf32> to vector<2x8x8xf32>
    %277 = vector.extract_strided_slice %210 {offsets = [0, 24], sizes = [16, 8], strides = [1, 1]} : vector<16x32xf32> to vector<16x8xf32>
    %278 = vector.shape_cast %277 : vector<16x8xf32> to vector<2x8x8xf32>
    %279 = vector.extract_strided_slice %211 {offsets = [0, 24], sizes = [16, 8], strides = [1, 1]} : vector<16x32xf32> to vector<16x8xf32>
    %280 = vector.shape_cast %279 : vector<16x8xf32> to vector<2x8x8xf32>
    %cst_130 = arith.constant dense<0.000000e+00> : vector<2x8x8xf32>
    %281 = tpu.matmul %276, %278, %cst_130 {dimension_numbers = #tpu.dot_dimension_numbers<[2], [2], [1], [1], [0, 0, 0, 1, 1, 1], [0], [0]>, precision = #tpu.contract_precision<fp32>} : vector<2x8x8xf32>, vector<2x8x8xf32>, vector<2x8x8xf32> -> vector<2x8x8xf32>
    %cst_131 = arith.constant 0.353553385 : f32
    %282 = vector.broadcast %cst_131 : f32 to vector<2x8x8xf32>
    %283 = arith.mulf %281, %282 : vector<2x8x8xf32>
    %cst_132 = arith.constant dense<0xFF800000> : vector<2x8xf32>
    %284 = vector.multi_reduction <maximumf>, %283, %cst_132 [2] : vector<2x8x8xf32> to vector<2x8xf32>
    %285 = vector.shape_cast %284 : vector<2x8xf32> to vector<2x8x1xf32>
    %286 = vector.broadcast %285 : vector<2x8x1xf32> to vector<2x8x8xf32>
    %287 = arith.subf %283, %286 : vector<2x8x8xf32>
    %288 = math.exp %287 : vector<2x8x8xf32>
    %cst_133 = arith.constant dense<0.000000e+00> : vector<2x8xf32>
    %289 = vector.multi_reduction <add>, %288, %cst_133 [2] : vector<2x8x8xf32> to vector<2x8xf32>
    %290 = vector.shape_cast %289 : vector<2x8xf32> to vector<2x8x1xf32>
    %291 = tpu.reciprocal %290 {approx = true} : vector<2x8x1xf32> -> vector<2x8x1xf32>
    %292 = vector.broadcast %291 : vector<2x8x1xf32> to vector<2x8x8xf32>
    %293 = arith.mulf %288, %292 : vector<2x8x8xf32>
    %cst_134 = arith.constant dense<0.000000e+00> : vector<2x8x8xf32>
    %294 = tpu.matmul %293, %280, %cst_134 {dimension_numbers = #tpu.dot_dimension_numbers<[2], [1], [1], [2], [0, 0, 0, 1, 1, 2], [0], [0]>, precision = #tpu.contract_precision<fp32>} : vector<2x8x8xf32>, vector<2x8x8xf32>, vector<2x8x8xf32> -> vector<2x8x8xf32>
    %295 = vector.shape_cast %294 : vector<2x8x8xf32> to vector<16x8xf32>
    %296 = tpu.concatenate %232, %253, %274, %295 in 1 : vector<16x8xf32>, vector<16x8xf32>, vector<16x8xf32>, vector<16x8xf32> -> vector<16x32xf32>
    %cst_135 = arith.constant dense<0.000000e+00> : vector<16x32xf32>
    %297 = tpu.matmul %296, %187, %cst_135 {dimension_numbers = #tpu.dot_dimension_numbers<[1], [0], [0], [1], [0, 0, 1, 1], [], []>, precision = #tpu.contract_precision<fp32>} : vector<16x32xf32>, vector<32x32xf32>, vector<16x32xf32> -> vector<16x32xf32>
    %298 = vector.broadcast %189 : vector<1x32xf32> to vector<16x32xf32>
    %299 = arith.addf %297, %298 : vector<16x32xf32>
    %300 = arith.addf %181, %299 : vector<16x32xf32>
    %cst_136 = arith.constant dense<0.000000e+00> : vector<16xf32>
    %301 = vector.multi_reduction <add>, %300, %cst_136 [1] : vector<16x32xf32> to vector<16xf32>
    %302 = vector.shape_cast %301 : vector<16xf32> to vector<16x1xf32>
    %cst_137 = arith.constant 3.200000e+01 : f32
    %303 = vector.broadcast %cst_137 : f32 to vector<16x1xf32>
    %304 = arith.divf %302, %303 : vector<16x1xf32>
    %305 = vector.broadcast %304 : vector<16x1xf32> to vector<16x32xf32>
    %306 = arith.subf %300, %305 : vector<16x32xf32>
    %307 = arith.mulf %306, %306 : vector<16x32xf32>
    %cst_138 = arith.constant dense<0.000000e+00> : vector<16xf32>
    %308 = vector.multi_reduction <add>, %307, %cst_138 [1] : vector<16x32xf32> to vector<16xf32>
    %309 = vector.shape_cast %308 : vector<16xf32> to vector<16x1xf32>
    %cst_139 = arith.constant 3.200000e+01 : f32
    %310 = vector.broadcast %cst_139 : f32 to vector<16x1xf32>
    %311 = arith.divf %309, %310 : vector<16x1xf32>
    %312 = vector.broadcast %304 : vector<16x1xf32> to vector<16x32xf32>
    %313 = arith.subf %300, %312 : vector<16x32xf32>
    %cst_140 = arith.constant 9.99999974E-6 : f32
    %314 = vector.broadcast %cst_140 : f32 to vector<16x1xf32>
    %315 = arith.addf %311, %314 : vector<16x1xf32>
    %316 = math.rsqrt %315 : vector<16x1xf32>
    %317 = vector.broadcast %316 : vector<16x1xf32> to vector<16x32xf32>
    %318 = arith.mulf %313, %317 : vector<16x32xf32>
    %319 = vector.broadcast %199 : vector<1x32xf32> to vector<16x32xf32>
    %320 = arith.mulf %318, %319 : vector<16x32xf32>
    %321 = vector.broadcast %201 : vector<1x32xf32> to vector<16x32xf32>
    %322 = arith.addf %320, %321 : vector<16x32xf32>
    %cst_141 = arith.constant dense<0.000000e+00> : vector<16x64xf32>
    %323 = tpu.matmul %322, %191, %cst_141 {dimension_numbers = #tpu.dot_dimension_numbers<[1], [0], [0], [1], [0, 0, 1, 1], [], []>, precision = #tpu.contract_precision<fp32>} : vector<16x32xf32>, vector<32x64xf32>, vector<16x64xf32> -> vector<16x64xf32>
    %324 = vector.broadcast %193 : vector<1x64xf32> to vector<16x64xf32>
    %325 = arith.addf %323, %324 : vector<16x64xf32>
    %cst_142 = arith.constant 0.000000e+00 : f32
    %326 = vector.broadcast %cst_142 : f32 to vector<16x64xf32>
    %327 = arith.maximumf %325, %326 : vector<16x64xf32>
    %cst_143 = arith.constant dense<0.000000e+00> : vector<16x32xf32>
    %328 = tpu.matmul %327, %195, %cst_143 {dimension_numbers = #tpu.dot_dimension_numbers<[1], [0], [0], [1], [0, 0, 1, 1], [], []>, precision = #tpu.contract_precision<fp32>} : vector<16x64xf32>, vector<64x32xf32>, vector<16x32xf32> -> vector<16x32xf32>
    %329 = vector.broadcast %197 : vector<1x32xf32> to vector<16x32xf32>
    %330 = arith.addf %328, %329 : vector<16x32xf32>
    %331 = arith.addf %322, %330 : vector<16x32xf32>
    %cst_144 = arith.constant dense<0.000000e+00> : vector<16xf32>
    %332 = vector.multi_reduction <add>, %331, %cst_144 [1] : vector<16x32xf32> to vector<16xf32>
    %333 = vector.shape_cast %332 : vector<16xf32> to vector<16x1xf32>
    %cst_145 = arith.constant 3.200000e+01 : f32
    %334 = vector.broadcast %cst_145 : f32 to vector<16x1xf32>
    %335 = arith.divf %333, %334 : vector<16x1xf32>
    %336 = vector.broadcast %335 : vector<16x1xf32> to vector<16x32xf32>
    %337 = arith.subf %331, %336 : vector<16x32xf32>
    %338 = arith.mulf %337, %337 : vector<16x32xf32>
    %cst_146 = arith.constant dense<0.000000e+00> : vector<16xf32>
    %339 = vector.multi_reduction <add>, %338, %cst_146 [1] : vector<16x32xf32> to vector<16xf32>
    %340 = vector.shape_cast %339 : vector<16xf32> to vector<16x1xf32>
    %cst_147 = arith.constant 3.200000e+01 : f32
    %341 = vector.broadcast %cst_147 : f32 to vector<16x1xf32>
    %342 = arith.divf %340, %341 : vector<16x1xf32>
    %343 = vector.broadcast %335 : vector<16x1xf32> to vector<16x32xf32>
    %344 = arith.subf %331, %343 : vector<16x32xf32>
    %cst_148 = arith.constant 9.99999974E-6 : f32
    %345 = vector.broadcast %cst_148 : f32 to vector<16x1xf32>
    %346 = arith.addf %342, %345 : vector<16x1xf32>
    %347 = math.rsqrt %346 : vector<16x1xf32>
    %348 = vector.broadcast %347 : vector<16x1xf32> to vector<16x32xf32>
    %349 = arith.mulf %344, %348 : vector<16x32xf32>
    %350 = vector.broadcast %203 : vector<1x32xf32> to vector<16x32xf32>
    %351 = arith.mulf %349, %350 : vector<16x32xf32>
    %352 = vector.broadcast %205 : vector<1x32xf32> to vector<16x32xf32>
    %353 = arith.addf %351, %352 : vector<16x32xf32>
    %c0_149 = arith.constant 0 : index
    %c0_150 = arith.constant 0 : index
    %354 = vector.load %arg17[%c0_149, %c0_150] : memref<16x32xf32, #tpu.memory_space<vmem>>, vector<16x32xf32>
    tpu.vector_store %arg17[%c0_149, %c0_150], %353 {strides = array<i32>} : memref<16x32xf32, #tpu.memory_space<vmem>>, vector<16x32xf32>,
    return
  }
  func.func @transform_0(%arg0: i32) -> (i32, i32) {
    %c0_i32 = arith.constant 0 : i32
    %c0_i32_0 = arith.constant 0 : i32
    %c0_i32_1 = arith.constant 0 : i32
    return %c0_i32, %c0_i32_0 : i32, i32
  }
  func.func @transform_1(%arg0: i32) -> (i32, i32) {
    %c0_i32 = arith.constant 0 : i32
    %c0_i32_0 = arith.constant 0 : i32
    %c0_i32_1 = arith.constant 0 : i32
    return %c0_i32, %c0_i32_0 : i32, i32
  }
  func.func @transform_2(%arg0: i32) -> (i32, i32) {
    %c0_i32 = arith.constant 0 : i32
    %c0_i32_0 = arith.constant 0 : i32
    %c0_i32_1 = arith.constant 0 : i32
    return %c0_i32, %c0_i32_0 : i32, i32
  }
  func.func @transform_3(%arg0: i32) -> (i32, i32) {
    %c0_i32 = arith.constant 0 : i32
    %c0_i32_0 = arith.constant 0 : i32
    %c0_i32_1 = arith.constant 0 : i32
    return %c0_i32, %c0_i32_0 : i32, i32
  }
  func.func @transform_4(%arg0: i32) -> (i32, i32, i32) {
    %c0_i32 = arith.constant 0 : i32
    %c0_i32_0 = arith.constant 0 : i32
    %c0_i32_1 = arith.constant 0 : i32
    %c0_i32_2 = arith.constant 0 : i32
    return %c0_i32, %c0_i32_0, %c0_i32_1 : i32, i32, i32
  }
  func.func @transform_5(%arg0: i32) -> (i32, i32, i32) {
    %c0_i32 = arith.constant 0 : i32
    %c0_i32_0 = arith.constant 0 : i32
    %c0_i32_1 = arith.constant 0 : i32
    %c0_i32_2 = arith.constant 0 : i32
    return %c0_i32, %c0_i32_0, %c0_i32_1 : i32, i32, i32
  }
  func.func @transform_6(%arg0: i32) -> (i32, i32, i32) {
    %c0_i32 = arith.constant 0 : i32
    %c0_i32_0 = arith.constant 0 : i32
    %c0_i32_1 = arith.constant 0 : i32
    %c0_i32_2 = arith.constant 0 : i32
    return %c0_i32, %c0_i32_0, %c0_i32_1 : i32, i32, i32
  }
  func.func @transform_7(%arg0: i32) -> (i32, i32, i32) {
    %c0_i32 = arith.constant 0 : i32
    %c0_i32_0 = arith.constant 0 : i32
    %c0_i32_1 = arith.constant 0 : i32
    %c0_i32_2 = arith.constant 0 : i32
    return %c0_i32, %c0_i32_0, %c0_i32_1 : i32, i32, i32
  }
  func.func @transform_8(%arg0: i32) -> (i32, i32, i32) {
    %c0_i32 = arith.constant 0 : i32
    %c0_i32_0 = arith.constant 0 : i32
    %c0_i32_1 = arith.constant 0 : i32
    %c0_i32_2 = arith.constant 0 : i32
    return %c0_i32, %c0_i32_0, %c0_i32_1 : i32, i32, i32
  }
  func.func @transform_9(%arg0: i32) -> (i32, i32, i32) {
    %c0_i32 = arith.constant 0 : i32
    %c0_i32_0 = arith.constant 0 : i32
    %c0_i32_1 = arith.constant 0 : i32
    %c0_i32_2 = arith.constant 0 : i32
    return %c0_i32, %c0_i32_0, %c0_i32_1 : i32, i32, i32
  }
  func.func @transform_10(%arg0: i32) -> (i32, i32, i32) {
    %c0_i32 = arith.constant 0 : i32
    %c0_i32_0 = arith.constant 0 : i32
    %c0_i32_1 = arith.constant 0 : i32
    %c0_i32_2 = arith.constant 0 : i32
    return %c0_i32, %c0_i32_0, %c0_i32_1 : i32, i32, i32
  }
  func.func @transform_11(%arg0: i32) -> (i32, i32, i32) {
    %c0_i32 = arith.constant 0 : i32
    %c0_i32_0 = arith.constant 0 : i32
    %c0_i32_1 = arith.constant 0 : i32
    %c0_i32_2 = arith.constant 0 : i32
    return %c0_i32, %c0_i32_0, %c0_i32_1 : i32, i32, i32
  }
  func.func @transform_12(%arg0: i32) -> (i32, i32, i32) {
    %c0_i32 = arith.constant 0 : i32
    %c0_i32_0 = arith.constant 0 : i32
    %c0_i32_1 = arith.constant 0 : i32
    %c0_i32_2 = arith.constant 0 : i32
    return %c0_i32, %c0_i32_0, %c0_i32_1 : i32, i32, i32
  }
  func.func @transform_13(%arg0: i32) -> (i32, i32, i32) {
    %c0_i32 = arith.constant 0 : i32
    %c0_i32_0 = arith.constant 0 : i32
    %c0_i32_1 = arith.constant 0 : i32
    %c0_i32_2 = arith.constant 0 : i32
    return %c0_i32, %c0_i32_0, %c0_i32_1 : i32, i32, i32
  }
  func.func @transform_14(%arg0: i32) -> (i32, i32, i32) {
    %c0_i32 = arith.constant 0 : i32
    %c0_i32_0 = arith.constant 0 : i32
    %c0_i32_1 = arith.constant 0 : i32
    %c0_i32_2 = arith.constant 0 : i32
    return %c0_i32, %c0_i32_0, %c0_i32_1 : i32, i32, i32
  }
  func.func @transform_15(%arg0: i32) -> (i32, i32, i32) {
    %c0_i32 = arith.constant 0 : i32
    %c0_i32_0 = arith.constant 0 : i32
    %c0_i32_1 = arith.constant 0 : i32
    %c0_i32_2 = arith.constant 0 : i32
    return %c0_i32, %c0_i32_0, %c0_i32_1 : i32, i32, i32
  }
  func.func @transform_16(%arg0: i32) -> (i32, i32) {
    %c0_i32 = arith.constant 0 : i32
    %c0_i32_0 = arith.constant 0 : i32
    %c0_i32_1 = arith.constant 0 : i32
    return %c0_i32, %c0_i32_0 : i32, i32
  }
}

</mosaic_0001>

<bundles_post_ra>
// kernel: encoder_forward.1
= control target key start
LH: loop header
LB: loop body
LE: loop exit
PB: predicated region body
PF: predicated region fallthrough
CT: control target
= control target key end

     0   :  { %s20288_s0 = inlined_call_operand.vmem [shape: f32[16,2048], index: 0, kind: input, shape index: {}]   ;;  %s20289_s1 = inlined_call_operand.vmem [shape: f32[16,32], index: 1, kind: input, shape index: {}]   ;;  %s20290_s2 = inlined_call_operand.vmem [shape: f32[2048,32], index: 2, kind: input, shape index: {}]   ;;  %s20291_s3 = inlined_call_operand.vmem [shape: f32[1,32], index: 3, kind: input, shape index: {}]   ;;  %s20292_s4 = inlined_call_operand.vmem [shape: f32[2,32,96], index: 4, kind: input, shape index: {}]   ;;  %s20293_s5 = inlined_call_operand.vmem [shape: f32[2,1,96], index: 5, kind: input, shape index: {}]   ;;  %s20294_s6 = inlined_call_operand.vmem [shape: f32[2,32,32], index: 6, kind: input, shape index: {}]   ;;  %s20295_s7 = inlined_call_operand.vmem [shape: f32[2,1,32], index: 7, kind: input, shape index: {}]   ;;  %s20296_s8 = inlined_call_operand.vmem [shape: f32[2,1,32], index: 8, kind: input, shape index: {}]   ;;  %s20297_s9 = inlined_call_operand.vmem [shape: f32[2,1,32], index: 9, kind: input, shape index: {}]   ;;  %s20298_s10 = inlined_call_operand.vmem [shape: f32[2,32,64], index: 10, kind: input, shape index: {}]   ;;  %s20299_s11 = inlined_call_operand.vmem [shape: f32[2,1,64], index: 11, kind: input, shape index: {}]   ;;  %s20300_s12 = inlined_call_operand.vmem [shape: f32[2,64,32], index: 12, kind: input, shape index: {}]   ;;  %s20301_s13 = inlined_call_operand.vmem [shape: f32[2,1,32], index: 13, kind: input, shape index: {}]   ;;  %s20302_s14 = inlined_call_operand.vmem [shape: f32[2,1,32], index: 14, kind: input, shape index: {}]   ;;  %s20303_s15 = inlined_call_operand.vmem [shape: f32[2,1,32], index: 15, kind: input, shape index: {}]   ;;  %s20304_s16 = inlined_call_operand.hbm [shape: f32[16,32], index: 16, kind: output, shape index: {}]  }
   0x1   :  { %20488 = sst [smem:[#allocation64_spill]] %s20288_s0 }
   0x2   :  { %v101_v0 = vld [vmem:[%s20290_s2 + $0x78] sm:$0xff]  ;;  %v100_v1 = vld [vmem:[%s20290_s2 + $0x70] sm:$0xff]  ;;  %v99_v2 = vld [vmem:[%s20290_s2 + $0x68] sm:$0xff] }
   0x3   :  { %v13969_v3 = vand.u32 4294901760, %v101_v0  ;;  %v13971_v4 = vand.u32 4294901760, %v100_v1  ;;  %v13973_v5 = vand.u32 4294901760, %v99_v2  ;;  %v98_v6 = vld [vmem:[%s20290_s2 + $0x60] sm:$0xff]  ;;  %v97_v7 = vld [vmem:[%s20290_s2 + $0x58] sm:$0xff]  ;;  %v96_v8 = vld [vmem:[%s20290_s2 + $0x50] sm:$0xff] }
   0x4   :  { %v13984_v9 = vand.u32 4294901760, %v98_v6  ;;  %v13986_v10 = vand.u32 4294901760, %v97_v7  ;;  %v13988_v11 = vand.u32 4294901760, %v96_v8  ;;  %v95_v12 = vld [vmem:[%s20290_s2 + $0x48] sm:$0xff]  ;;  %v94_v13 = vld [vmem:[%s20290_s2 + $0x40] sm:$0xff]  ;;  %v93_v18 = vld [vmem:[%s20290_s2 + $0x38] sm:$0xff] }
   0x5   :  { %347 = vmatpush.msra.mxu0 %v13969_v3  ;;  %v13998_v14 = vsub.f32 %v101_v0, %v13969_v3  ;;  %v14001_v15 = vsub.f32 %v100_v1, %v13971_v4  ;;  %560 = vmatpush.msra.mxu3 %v13969_v3  ;;  %v14005_v16 = vsub.f32 %v99_v2, %v13973_v5  ;;  %v14007_v17 = vand.u32 4294901760, %v95_v12  ;;  %v92_v26 = vld [vmem:[%s20290_s2 + $0x30] sm:$0xff]  ;;  %v91_v36 = vld [vmem:[%s20290_s2 + $0x28] sm:$0xff]  ;;  %v90_v42 = vld [vmem:[%s20290_s2 + $0x20] sm:$0xff] }
   0x6   :  { %v14013_v19 = vsub.f32 %v98_v6, %v13984_v9  ;;  %v14016_v20 = vsub.f32 %v97_v7, %v13986_v10  ;;  %v14018_v21 = vand.u32 4294901760, %v94_v13  ;;  %v14026_v25 = vsub.f32 %v96_v8, %v13988_v11  ;;  %v89_v48 = vld [vmem:[%s20290_s2 + $0x18] sm:$0xff]  ;;  %v88_v54 = vld [vmem:[%s20290_s2 + $0x10] sm:$0xff]  ;;  %v87_v61 = vld [vmem:[%s20290_s2 + $0x8] sm:$0xff] }
   0x7   :  { %349 = vmatpush.msra.mxu0 %v13971_v4  ;;  %502 = vmatpush.msra.mxu2 %v13998_v14  ;;  %v397_v22 = vand.u32 4294901760, %v13998_v14  ;;  %v403_v23 = vand.u32 4294901760, %v14001_v15  ;;  %v20319_v24 = vand.u32 4294901760, %v14005_v16  ;;  %v14033_v28 = vand.u32 4294901760, %v93_v18  ;;  %v117_v59 = vld [vmem:[%s20290_s2 + $0xf8] sm:$0xff]  ;;  %v116_v2 = vld [vmem:[%s20290_s2 + $0xf0] sm:$0xff] }
   0x8   :  { %562 = vmatpush.msra.mxu3 %v13971_v4  ;;  %v20318_v27 = vand.u32 4294901760, %v14013_v19  ;;  %v14036_v29 = vsub.f32 %v95_v12, %v14007_v17  ;;  %v20315_v33 = vand.u32 4294901760, %v14016_v20  ;;  %v14051_v34 = vand.u32 4294901760, %v92_v26  ;;  %v86_v7 = vld [vmem:[%s20290_s2] sm:$0xff] }
   0x9   :  { %351 = vmatpush.msra.mxu0 %v13973_v5  ;;  %505 = vmatpush.msra.mxu2 %v14001_v15  ;;  %v398_v30 = vsub.f32 %v13998_v14, %v397_v22  ;;  %v404_v31 = vsub.f32 %v14001_v15, %v403_v23  ;;  %v410_v32 = vsub.f32 %v14005_v16, %v20319_v24  ;;  %v20314_v40 = vand.u32 4294901760, %v14026_v25 }
   0xa   :  { %564 = vmatpush.msra.mxu3 %v13973_v5  ;;  %v14054_v35 = vsub.f32 %v94_v13, %v14018_v21  ;;  %v416_v39 = vsub.f32 %v14013_v19, %v20318_v27  ;;  %v14067_v41 = vsub.f32 %v93_v18, %v14033_v28  ;;  %v422_v44 = vsub.f32 %v14016_v20, %v20315_v33 }
   0xb   :  { %353 = vmatpush.msra.mxu0 %v13984_v9  ;;  %v399_v37 = vand.u32 4294901760, %v398_v30  ;;  %508 = vmatpush.msra.mxu2 %v14005_v16  ;;  %v405_v38 = vand.u32 4294901760, %v404_v31  ;;  %v411_v43 = vand.u32 4294901760, %v410_v32  ;;  %v14076_v45 = vand.u32 4294901760, %v91_v36  ;;  %v115_v32 = vld [vmem:[%s20290_s2 + $0xe8] sm:$0xff] }
   0xc   :  { %566 = vmatpush.msra.mxu3 %v13984_v9  ;;  %v20312_v46 = vand.u32 4294901760, %v14036_v29  ;;  %v20311_v47 = vand.u32 4294901760, %v14054_v35  ;;  %v417_v49 = vand.u32 4294901760, %v416_v39  ;;  %v428_v50 = vsub.f32 %v14026_v25, %v20314_v40 }
   0xd   :  { %355 = vmatpush.msra.mxu0 %v13986_v10  ;;  %400 = vmatpush.msra.mxu1 %v399_v37  ;;  %v14089_v51 = vand.u32 4294901760, %v90_v42  ;;  %v14092_v52 = vsub.f32 %v92_v26, %v14051_v34  ;;  %v20309_v53 = vand.u32 4294901760, %v14067_v41  ;;  %v423_v55 = vand.u32 4294901760, %v422_v44 }
   0xe   :  { %511 = vmatpush.msra.mxu2 %v14013_v19  ;;  %568 = vmatpush.msra.mxu3 %v13986_v10  ;;  %v434_v56 = vsub.f32 %v14036_v29, %v20312_v46  ;;  %v14104_v57 = vand.u32 4294901760, %v89_v48  ;;  %v14107_v58 = vsub.f32 %v91_v36, %v14076_v45  ;;  %v440_v60 = vsub.f32 %v14054_v35, %v20311_v47 }
   0xf   :  { %357 = vmatpush.msra.mxu0 %v13988_v11  ;;  %406 = vmatpush.msra.mxu1 %v405_v38  ;;  %v429_v62 = vand.u32 4294901760, %v428_v50  ;;  %v14121_v63 = vand.u32 4294901760, %v88_v54  ;;  %v20308_v0 = vand.u32 4294901760, %v14092_v52  ;;  %v14125_v1 = vsub.f32 %v90_v42, %v14089_v51 }
  0x10   :  { %514 = vmatpush.msra.mxu2 %v14016_v20  ;;  %570 = vmatpush.msra.mxu3 %v13988_v11  ;;  %v446_v6 = vsub.f32 %v14067_v41, %v20309_v53  ;;  %v14138_v8 = vand.u32 4294901760, %v117_v59  ;;  %v435_v12 = vand.u32 4294901760, %v434_v56  ;;  %v14141_v13 = vand.u32 4294901760, %v87_v61 }
  0x11   :  { %359 = vmatpush.msra.mxu0 %v14007_v17  ;;  %412 = vmatpush.msra.mxu1 %v411_v43  ;;  %v20307_v18 = vand.u32 4294901760, %v14107_v58  ;;  %v14145_v26 = vsub.f32 %v89_v48, %v14104_v57  ;;  %v441_v30 = vand.u32 4294901760, %v440_v60  ;;  %v14149_v31 = vand.u32 4294901760, %v116_v2 }
  0x12   :  { %517 = vmatpush.msra.mxu2 %v14026_v25  ;;  %572 = vmatpush.msra.mxu3 %v14007_v17 }
  0x13   :  { %361 = vmatpush.msra.mxu0 %v14018_v21  ;;  %418 = vmatpush.msra.mxu1 %v417_v49 }
  0x14   :  { %520 = vmatpush.msra.mxu2 %v14036_v29  ;;  %574 = vmatpush.msra.mxu3 %v14018_v21 }
  0x15   :  { %363 = vmatpush.msra.mxu0 %v14033_v28  ;;  %424 = vmatpush.msra.mxu1 %v423_v55 }
  0x16   :  { %523 = vmatpush.msra.mxu2 %v14054_v35  ;;  %576 = vmatpush.msra.mxu3 %v14033_v28 }
  0x17   :  { %21 = vsyncpa [#allocation3], 0  ;;  %365 = vmatpush.msra.mxu0 %v14051_v34  ;;  %430 = vmatpush.msra.mxu1 %v429_v62  ;;  %v452_v36 = vsub.f32 %v14092_v52, %v20308_v0  ;;  %v14158_v37 = vand.u32 4294901760, %v86_v7  ;;  %v20306_v38 = vand.u32 4294901760, %v14125_v1  ;;  %v14162_v39 = vsub.f32 %v88_v54, %v14121_v63  ;;  %v114_v42 = vld [vmem:[%s20290_s2 + $0xe0] sm:$0xff]  ;;  %v113_v55 = vld [vmem:[%s20290_s2 + $0xd8] sm:$0xff] }
  0x18   :  { %526 = vmatpush.msra.mxu2 %v14067_v41  ;;  %v447_v43 = vand.u32 4294901760, %v446_v6  ;;  %578 = vmatpush.msra.mxu3 %v14051_v34  ;;  %v14170_v44 = vsub.f32 %v117_v59, %v14138_v8  ;;  %v458_v48 = vsub.f32 %v14107_v58, %v20307_v18  ;;  %v20310_v49 = vand.u32 4294901760, %v14145_v26  ;;  %s20492_s19 = sld [smem:[#allocation64_spill]]  ;;  %s13858_s27 = smov 96  }
  0x19   :  { %367 = vmatpush.msra.mxu0 %v14076_v45  ;;  %436 = vmatpush.msra.mxu1 %v435_v12  ;;  %v14178_v50 = vsub.f32 %v87_v61, %v14141_v13  ;;  %v14180_v54 = vand.u32 4294901760, %v115_v32  ;;  %v14188_v56 = vsub.f32 %v116_v2, %v14149_v31  ;;  %v14190_v59 = vand.u32 4294901760, %v114_v42  ;;  %s13859_s28 = smov 64   ;;  %s13861_s29 = smov 88  }
  0x1a   :  { %529 = vmatpush.msra.mxu2 %v14092_v52  ;;  %580 = vmatpush.msra.mxu3 %v14076_v45  ;;  %v453_v60 = vand.u32 4294901760, %v452_v36  ;;  %v464_v61 = vsub.f32 %v14125_v1, %v20306_v38  ;;  %v20313_v62 = vand.u32 4294901760, %v14162_v39  ;;  %v14198_v6 = vsub.f32 %v86_v7, %v14158_v37  ;;  %s13863_s30 = smov 56   ;;  %s13864_s0 = smov 112  }
  0x1b   :  { %369 = vmatpush.msra.mxu0 %v14089_v51  ;;  %442 = vmatpush.msra.mxu1 %v441_v30  ;;  %v20316_v2 = vand.u32 4294901760, %v14170_v44  ;;  %v14203_v12 = vand.u32 4294901760, %v113_v55  ;;  %v112_v30 = vld [vmem:[%s20290_s2 + $0xd0] sm:$0xff]  ;;  %v459_v36 = vand.u32 4294901760, %v458_v48  ;;  %v470_v7 = vsub.f32 %v14145_v26, %v20310_v49  ;;  %s13866_s17 = smov 104   ;;  %s13867_s18 = smov 72  }
  0x1c   :  { %532 = vmatpush.msra.mxu2 %v14107_v58  ;;  %582 = vmatpush.msra.mxu3 %v14089_v51  ;;  %v20317_v38 = vand.u32 4294901760, %v14178_v50  ;;  %v14214_v18 = vsub.f32 %v115_v32, %v14180_v54  ;;  %v20320_v0 = vand.u32 4294901760, %v14188_v56  ;;  %v14220_v53 = vsub.f32 %v114_v42, %v14190_v59  ;;  %s13868_s20 = smov 40   ;;  %s13869_s21 = smov 16  }
  0x1d   :  { %371 = vmatpush.msra.mxu0 %v14104_v57  ;;  %448 = vmatpush.msra.mxu1 %v447_v43  ;;  %v111_v43 = vld [vmem:[%s20290_s2 + $0xc8] sm:$0xff]  ;;  %v465_v48 = vand.u32 4294901760, %v464_v61  ;;  %v476_v32 = vsub.f32 %v14162_v39, %v20313_v62  ;;  %v20321_v49 = vand.u32 4294901760, %v14198_v6  ;;  %v14230_v47 = vand.u32 4294901760, %v112_v30  ;;  %s20486_s22 = smov 8   ;;  %s20484_s26 = smov 24  }
  0x1e   :  { %535 = vmatpush.msra.mxu2 %v14125_v1  ;;  %584 = vmatpush.msra.mxu3 %v14104_v57  ;;  %v770_v42 = vsub.f32 %v14170_v44, %v20316_v2  ;;  %v14238_v46 = vsub.f32 %v113_v55, %v14203_v12  ;;  %v471_v61 = vand.u32 4294901760, %v470_v7  ;;  %v482_v62 = vsub.f32 %v14178_v50, %v20317_v38 }
  0x1f   :  { %373 = vmatpush.msra.mxu0 %v14121_v63  ;;  %454 = vmatpush.msra.mxu1 %v453_v60  ;;  %v110_v60 = vld [vmem:[%s20290_s2 + $0xc0] sm:$0xff]  ;;  %v20322_v40 = vand.u32 4294901760, %v14214_v18  ;;  %v14248_v33 = vand.u32 4294901760, %v111_v43  ;;  %v776_v55 = vsub.f32 %v14188_v56, %v20320_v0  ;;  %v477_v7 = vand.u32 4294901760, %v476_v32 }
  0x20   :  { %538 = vmatpush.msra.mxu2 %v14145_v26  ;;  %586 = vmatpush.msra.mxu3 %v14121_v63  ;;  %v488_v38 = vsub.f32 %v14198_v6, %v20321_v49  ;;  %v14264_v27 = vsub.f32 %v112_v30, %v14230_v47  ;;  %v14266_v24 = vand.u32 4294901760, %v110_v60  ;;  %v771_v0 = vand.u32 4294901760, %v770_v42  ;;  %v107_v49 = vld [vmem:[%s20290_s2 + $0xa8] sm:$0xff] }
  0x21   :  { %375 = vmatpush.msra.mxu0 %v14141_v13  ;;  %460 = vmatpush.msra.mxu1 %v459_v36  ;;  %v109_v36 = vld [vmem:[%s20290_s2 + $0xb8] sm:$0xff]  ;;  %v20323_v2 = vand.u32 4294901760, %v14238_v46  ;;  %v483_v32 = vand.u32 4294901760, %v482_v62  ;;  %v782_v30 = vsub.f32 %v14214_v18, %v20322_v40  ;;  %v14280_v14 = vsub.f32 %v111_v43, %v14248_v33 }
  0x22   :  { %541 = vmatpush.msra.mxu2 %v14162_v39  ;;  %588 = vmatpush.msra.mxu3 %v14141_v13  ;;  %v777_v42 = vand.u32 4294901760, %v776_v55  ;;  %v489_v43 = vand.u32 4294901760, %v488_v38  ;;  %v14296_v15 = vsub.f32 %v110_v60, %v14266_v24  ;;  %v20490_v55 = vand.u32 4294901760, %v14005_v16 }
  0x23   :  { %377 = vmatpush.msra.mxu0 %v14158_v37  ;;  %466 = vmatpush.msra.mxu1 %v465_v48  ;;  %v108_v48 = vld [vmem:[%s20290_s2 + $0xb0] sm:$0xff]  ;;  %v783_v38 = vand.u32 4294901760, %v782_v30  ;;  %v14313_v16 = vand.u32 4294901760, %v107_v49  ;;  %vm6335_vm0 = vcmask 261120   ;;  %vm6561_vm1 = vcmask 64512  }
  0x24   :  { %544 = vmatpush.msra.mxu2 %v14178_v50  ;;  %590 = vmatpush.msra.mxu3 %v14158_v37  ;;  %vm9127_vm2 = vcmask 130048   ;;  %vm9130_vm3 = vcmask 195584   ;;  %vm9651_vm11 = vcmask 523264  }
  0x25   :  { %607 = vmatpush.msrb.mxu0 %v397_v22  ;;  %472 = vmatpush.msra.mxu1 %v471_v61  ;;  %v14282_v22 = vand.u32 4294901760, %v109_v36  ;;  %v20489_v61 = vand.u32 4294901760, %v14220_v53 }
  0x26   :  { %547 = vmatpush.msra.mxu2 %v14198_v6  ;;  %772 = vmatpush.msrb.mxu3 %v771_v0  ;;  %v20491_v0 = vand.u32 4294901760, %v14013_v19 }
  0x27   :  { %611 = vmatpush.msrb.mxu0 %v403_v23  ;;  %v788_v62 = vsub.f32 %v14220_v53, %v20489_v61  ;;  %478 = vmatpush.msra.mxu1 %v477_v7  ;;  %v14298_v23 = vand.u32 4294901760, %v108_v48  ;;  %v794_v61 = vsub.f32 %v14238_v46, %v20323_v2  ;;  %v106_v7 = vld [vmem:[%s20290_s2 + $0xa0] sm:$0xff]  ;;  %v14311_v40 = vsub.f32 %v109_v36, %v14282_v22 }
  0x28   :  { %719 = vmatpush.msrb.mxu2 %v14138_v8  ;;  %778 = vmatpush.msrb.mxu3 %v777_v42  ;;  %v54_v2 = vld [vmem:[%s20492_s19] sm:$0xff]  ;;  %v14328_v19 = vand.u32 4294901760, %v106_v7  ;;  %v20494_v42 = vand.u32 4294901760, %v14016_v20  ;;  %v105_v20 = vld [vmem:[%s20290_s2 + $0x98] sm:$0xff] }
  0x29   :  { %615 = vmatpush.msrb.mxu0 %v20490_v55  ;;  %484 = vmatpush.msra.mxu1 %v483_v32  ;;  %v789_v55 = vand.u32 4294901760, %v788_v62  ;;  %v20493_v32 = vand.u32 4294901760, %v14264_v27  ;;  %v14326_v60 = vsub.f32 %v108_v48, %v14298_v23  ;;  %v795_v62 = vand.u32 4294901760, %v794_v61 }
  0x2a   :  { %721 = vmatpush.msrb.mxu2 %v14149_v31  ;;  %784 = vmatpush.msrb.mxu3 %v783_v38  ;;  %v14339_v48 = vsub.f32 %v107_v49, %v14313_v16  ;;  %v14341_v36 = vand.u32 4294901760, %v54_v2  ;;  %v20497_v38 = vand.u32 4294901760, %v14296_v15 }
  0x2b   :  { %619 = vmatpush.msrb.mxu0 %v20491_v0  ;;  %490 = vmatpush.msra.mxu1 %v489_v43  ;;  %v800_v30 = vsub.f32 %v14264_v27, %v20493_v32  ;;  %v20495_v43 = vand.u32 4294901760, %v14280_v14  ;;  %v20324_v32 = vand.u32 4294901760, %v14311_v40 }
  0x2c   :  { %723 = vmatpush.msrb.mxu2 %v14180_v54  ;;  %790 = vmatpush.msrb.mxu3 %v789_v55  ;;  %v812_v49 = vsub.f32 %v14296_v15, %v20497_v38  ;;  %v14371_v38 = vsub.f32 %v54_v2, %v14341_v36 }
  0x2d   :  { %623 = vmatpush.msrb.mxu0 %v20494_v42  ;;  %678 = vmatpush.msrb.mxu1 %v13969_v3  ;;  %v806_v0 = vsub.f32 %v14280_v14, %v20495_v43  ;;  %v20496_v3 = vand.u32 4294901760, %v14026_v25  ;;  %v801_v61 = vand.u32 4294901760, %v800_v30  ;;  %v20325_v42 = vand.u32 4294901760, %v14326_v60  ;;  %v104_v25 = vld [vmem:[%s20290_s2 + $0x90] sm:$0xff] }
  0x2e   :  { %725 = vmatpush.msrb.mxu2 %v14190_v59  ;;  %v14355_v43 = vsub.f32 %v106_v7, %v14328_v19  ;;  %796 = vmatpush.msrb.mxu3 %v795_v62  ;;  %v818_v7 = vsub.f32 %v14311_v40, %v20324_v32  ;;  %v20326_v30 = vand.u32 4294901760, %v14339_v48  ;;  %v14379_v62 = vand.u32 4294901760, %v104_v25 }
  0x2f   :  { %627 = vmatpush.msrb.mxu0 %v20496_v3  ;;  %680 = vmatpush.msrb.mxu1 %v13971_v4  ;;  %v20498_v3 = vand.u32 4294901760, %v14036_v29  ;;  %v14363_v4 = vand.u32 4294901760, %v105_v20  ;;  %v807_v55 = vand.u32 4294901760, %v806_v0  ;;  %v103_v29 = vld [vmem:[%s20290_s2 + $0x88] sm:$0xff]  ;;  %v813_v0 = vand.u32 4294901760, %v812_v49  ;;  %v70_v49 = vld [vmem:[%s20492_s19 + $0x80] sm:$0xff] }
  0x30   :  { %727 = vmatpush.msrb.mxu2 %v14203_v12  ;;  %802 = vmatpush.msrb.mxu3 %v801_v61  ;;  %v824_v2 = vsub.f32 %v14326_v60, %v20325_v42  ;;  %v20500_v32 = vand.u32 4294901760, %v14067_v41  ;;  %v102_v61 = vld [vmem:[%s20290_s2 + $0x80] sm:$0xff]  ;;  %v819_v41 = vand.u32 4294901760, %v818_v7 }
  0x31   :  { %631 = vmatpush.msrb.mxu0 %v20498_v3  ;;  %682 = vmatpush.msrb.mxu1 %v13973_v5  ;;  %v20499_v5 = vand.u32 4294901760, %v14054_v35  ;;  %v835_v3 = vand.u32 4294901760, %v14355_v43  ;;  %v14390_v35 = vsub.f32 %v105_v20, %v14363_v4  ;;  %v20501_v20 = vand.u32 4294901760, %v14092_v52 }
  0x32   :  { %729 = vmatpush.msrb.mxu2 %v14230_v47  ;;  %808 = vmatpush.msrb.mxu3 %v807_v55  ;;  %v825_v42 = vand.u32 4294901760, %v824_v2  ;;  %v14415_v7 = vand.u32 4294901760, %v102_v61  ;;  %v20502_v52 = vand.u32 4294901760, %v14107_v58 }
  0x33   :  { %635 = vmatpush.msrb.mxu0 %v20499_v5  ;;  %684 = vmatpush.msrb.mxu1 %v13984_v9  ;;  %v14392_v9 = vand.u32 4294901760, %v103_v29  ;;  %v14409_v5 = vsub.f32 %v104_v25, %v14379_v62  ;;  %v836_v55 = vsub.f32 %v14355_v43, %v835_v3 }
  0x34   :  { %731 = vmatpush.msrb.mxu2 %v14248_v33  ;;  %814 = vmatpush.msrb.mxu3 %v813_v0 }
  0x35   :  { %639 = vmatpush.msrb.mxu0 %v20500_v32  ;;  %686 = vmatpush.msrb.mxu1 %v13986_v10  ;;  %v830_v10 = vsub.f32 %v14339_v48, %v20326_v30  ;;  %v380_v32 = vand.u32 4294901760, %v14371_v38  ;;  %v14417_v30 = vand.u32 4294901760, %v70_v49  ;;  %v14424_v25 = vsub.f32 %v103_v29, %v14392_v9 }
  0x36   :  { %733 = vmatpush.msrb.mxu2 %v14266_v24  ;;  %820 = vmatpush.msrb.mxu3 %v819_v41  ;;  %v847_v58 = vand.u32 4294901760, %v14409_v5  ;;  %v20504_v41 = vand.u32 4294901760, %v14145_v26 }
  0x37   :  { %643 = vmatpush.msrb.mxu0 %v20501_v20  ;;  %688 = vmatpush.msrb.mxu1 %v13988_v11  ;;  %v841_v11 = vand.u32 4294901760, %v14390_v35  ;;  %v831_v0 = vand.u32 4294901760, %v830_v10  ;;  %v381_v2 = vsub.f32 %v14371_v38, %v380_v32  ;;  %v20503_v20 = vand.u32 4294901760, %v14125_v1 }
  0x38   :  { %735 = vmatpush.msrb.mxu2 %v14282_v22  ;;  %826 = vmatpush.msrb.mxu3 %v825_v42  ;;  %v387_v29 = vsub.f32 %v70_v49, %v14417_v30  ;;  %v853_v1 = vand.u32 4294901760, %v14424_v25  ;;  %v55_v42 = vld [vmem:[%s20492_s19 + $0x8] sm:$0xff]  ;;  %v20505_v49 = vand.u32 4294901760, %v14162_v39 }
  0x39   :  { %647 = vmatpush.msrb.mxu0 %v20502_v52  ;;  %690 = vmatpush.msrb.mxu1 %v14007_v17  ;;  %v837_v17 = vand.u32 4294901760, %v836_v55  ;;  %v14435_v52 = vsub.f32 %v102_v61, %v14415_v7  ;;  %v382_v61 = vand.u32 4294901760, %v381_v2  ;;  %v14456_v55 = vand.u32 4294901760, %v55_v42 }
  0x3a   :  { %737 = vmatpush.msrb.mxu2 %v14298_v23  ;;  %832 = vmatpush.msrb.mxu3 %v831_v0  ;;  %v388_v10 = vand.u32 4294901760, %v387_v29  ;;  %v20506_v0 = vand.u32 4294901760, %v14178_v50 }
  0x3b   :  { %651 = vmatpush.msrb.mxu0 %v20503_v20  ;;  %692 = vmatpush.msrb.mxu1 %v14018_v21  ;;  %v842_v21 = vsub.f32 %v14390_v35, %v841_v11  ;;  %v859_v26 = vand.u32 4294901760, %v14435_v52  ;;  %v14473_v20 = vsub.f32 %v55_v42, %v14456_v55 }
  0x3c   :  { %739 = vmatpush.msrb.mxu2 %v14313_v16  ;;  %838 = vmatpush.msrb.mxu3 %v837_v17  ;;  %v389_v50 = vsub.f32 %v387_v29, %v388_v10 }
  0x3d   :  { %655 = vmatpush.msrb.mxu0 %v20504_v41  ;;  %694 = vmatpush.msrb.mxu1 %v14033_v28  ;;  %v848_v28 = vsub.f32 %v14409_v5, %v847_v58  ;;  %v843_v39 = vand.u32 4294901760, %v842_v21  ;;  %v752_v17 = vand.u32 4294901760, %v14473_v20  ;;  %v20508_v41 = vand.u32 4294901760, %v14170_v44 }
  0x3e   :  { %741 = vmatpush.msrb.mxu2 %v14328_v19  ;;  %383 = vmatmul.f32.vlgmr.msra.gmra.mxu0 %v382_v61 }
  0x3f   :  { %659 = vmatpush.msrb.mxu0 %v20505_v49  ;;  %696 = vmatpush.msrb.mxu1 %v14051_v34  ;;  %v854_v34 = vsub.f32 %v14424_v25, %v853_v1  ;;  %v849_v2 = vand.u32 4294901760, %v848_v28  ;;  %v125_v49 = vld [vmem:[%s20290_s2 + $0x138] sm:$0xff] }
  0x40   :  { %550 = vmatmul.f32.vlgmr.msra.gmra.mxu2 %v14371_v38  ;;  %594 = vmatmul.f32.vlgmr.msra.gmra.mxu3 %v380_v32  ;;  %v20507_v38 = vand.u32 4294901760, %v14198_v6  ;;  %v390_v6 = vand.u32 4294901760, %v389_v50 }
  0x41   :  { %663 = vmatpush.msrb.mxu0 %v20506_v0  ;;  %698 = vmatpush.msrb.mxu1 %v14076_v45  ;;  %v860_v45 = vsub.f32 %v14435_v52, %v859_v26  ;;  %v855_v32 = vand.u32 4294901760, %v854_v34  ;;  %v14672_v34 = vand.u32 4294901760, %v125_v49 }
  0x42   :  { %743 = vmatpush.msrb.mxu2 %v14363_v4  ;;  %844 = vmatpush.msrb.mxu3 %v843_v39 }
  0x43   :  { %667 = vmatpush.msrb.mxu0 %v20507_v38  ;;  %700 = vmatpush.msrb.mxu1 %v14089_v51  ;;  %v861_v51 = vand.u32 4294901760, %v860_v45  ;;  %v123_v45 = vld [vmem:[%s20290_s2 + $0x128] sm:$0xff] }
  0x44   :  { %745 = vmatpush.msrb.mxu2 %v14379_v62  ;;  %492 = vmatmul.f32.vlgmr.msra.gmra.mxu1 %v14341_v36 }
  0x45   :  { %874 = vmatpush.msra.mxu0 %v14170_v44  ;;  %702 = vmatpush.msrb.mxu1 %v14104_v57  ;;  %v753_v57 = vsub.f32 %v14473_v20, %v752_v17  ;;  %v20510_v44 = vand.u32 4294901760, %v14214_v18 }
  0x46   :  { %747 = vmatpush.msrb.mxu2 %v14392_v9  ;;  %850 = vmatpush.msrb.mxu3 %v849_v2 }
  0x47   :  { %877 = vmatpush.msra.mxu0 %v14188_v56  ;;  %704 = vmatpush.msrb.mxu1 %v14121_v63  ;;  %v20509_v63 = vand.u32 4294901760, %v14188_v56 }
  0x48   :  { %749 = vmatpush.msrb.mxu2 %v14415_v7  ;;  %856 = vmatpush.msrb.mxu3 %v855_v32 }
  0x49   :  { %555 = vmatmul.f32.gmra.mxu2 %v387_v29  ;;  %880 = vmatpush.msra.mxu0 %v14214_v18  ;;  %v754_v29 = vand.u32 4294901760, %v753_v57  ;;  %v20513_v18 = vand.u32 4294901760, %v14264_v27  ;;  %v14707_v57 = vsub.f32 %v125_v49, %v14672_v34 }
  0x4a   :  { %979 = vmatpush.msra.mxu2 %v20508_v41  ;;  %706 = vmatpush.msrb.mxu1 %v14141_v13  ;;  %v71_v13 = vld [vmem:[%s20492_s19 + $0x88] sm:$0xff] }
  0x4b   :  { %862 = vmatpush.msrb.mxu3 %v861_v51  ;;  %391 = vmatmul.f32.gmra.mxu0 %v390_v6  ;;  %v14507_v56 = vand.u32 4294901760, %v71_v13 }
  0x4c   :  { %600 = vmatmul.f32.gmra.mxu3 %v388_v10  ;;  %883 = vmatpush.msra.mxu0 %v14220_v53 }
  0x4d   :  { %983 = vmatpush.msra.mxu2 %v20509_v63  ;;  %1050 = vmatpush.msra.mxu3 %v14138_v8  ;;  %v56_v63 = vld [vmem:[%s20492_s19 + $0x10] sm:$0xff] }
  0x4e   :  { %708 = vmatpush.msrb.mxu1 %v14158_v37  ;;  %886 = vmatpush.msra.mxu0 %v14238_v46  ;;  %v20511_v37 = vand.u32 4294901760, %v14220_v53  ;;  %v14518_v53 = vsub.f32 %v71_v13, %v14507_v56 }
  0x4f   :  { %496 = vmatmul.f32.gmra.mxu1 %v14417_v30  ;;  %987 = vmatpush.msra.mxu2 %v20510_v44  ;;  %v121_v44 = vld [vmem:[%s20290_s2 + $0x118] sm:$0xff] }
  0x50   :  { %932 = vmatpush.msra.mxu1 %v14138_v8  ;;  %1052 = vmatpush.msra.mxu3 %v14149_v31  ;;  %v20512_v8 = vand.u32 4294901760, %v14238_v46  ;;  %v760_v46 = vand.u32 4294901760, %v14518_v53 }
  0x51   :  { %889 = vmatpush.msra.mxu0 %v14264_v27  ;;  %991 = vmatpush.msra.mxu2 %v20511_v37  ;;  %v20515_v27 = vand.u32 4294901760, %v14296_v15 }
  0x52   :  { %934 = vmatpush.msra.mxu1 %v14149_v31  ;;  %1054 = vmatpush.msra.mxu3 %v14180_v54  ;;  %v20514_v31 = vand.u32 4294901760, %v14280_v14 }
  0x53   :  { %755 = vmatmul.f32.vlgmr.msrb.gmra.mxu2 %v754_v29  ;;  %892 = vmatpush.msra.mxu0 %v14280_v14 }
  0x54   :  { %936 = vmatpush.msra.mxu1 %v14180_v54  ;;  %995 = vmatpush.msra.mxu2 %v20512_v8  ;;  %v761_v54 = vsub.f32 %v14518_v53, %v760_v46 }
  0x55   :  { %1056 = vmatpush.msra.mxu3 %v14190_v59  ;;  %669 = vmatmul.f32.vlgmr.msrb.gmra.mxu0 %v14341_v36 }
  0x56   :  { %864 = vmatmul.f32.vlgmr.msrb.gmra.mxu3 %v14456_v55  ;;  %895 = vmatpush.msra.mxu0 %v14296_v15 }
  0x57   :  { %938 = vmatpush.msra.mxu1 %v14190_v59  ;;  %999 = vmatpush.msra.mxu2 %v20513_v18  ;;  %v20516_v59 = vand.u32 4294901760, %v14311_v40 }
  0x58   :  { %1058 = vmatpush.msra.mxu3 %v14203_v12  ;;  %710 = vmatmul.f32.vlgmr.msrb.gmra.mxu1 %v14341_v36  ;;  %v130_v36 = vld [vmem:[%s20290_s2 + $0x160] sm:$0xff] }
  0x59   :  { %898 = vmatpush.msra.mxu0 %v14311_v40  ;;  %940 = vmatpush.msra.mxu1 %v14203_v12  ;;  %v20517_v12 = vand.u32 4294901760, %v14326_v60  ;;  %v132_v40 = vld [vmem:[%s20290_s2 + $0x170] sm:$0xff] }
  0x5a   :  { %1003 = vmatpush.msra.mxu2 %v20514_v31  ;;  %1060 = vmatpush.msra.mxu3 %v14230_v47  ;;  %v14572_v15 = vand.u32 4294901760, %v132_v40 }
  0x5b   :  { %901 = vmatpush.msra.mxu0 %v14326_v60  ;;  %942 = vmatpush.msra.mxu1 %v14230_v47  ;;  %v133_v47 = vld [vmem:[%s20290_s2 + $0x178] sm:$0xff] }
  0x5c   :  { %1007 = vmatpush.msra.mxu2 %v20515_v27  ;;  %1062 = vmatpush.msra.mxu3 %v14248_v33  ;;  %v14562_v14 = vand.u32 4294901760, %v133_v47  ;;  %v120_v27 = vld [vmem:[%s20290_s2 + $0x110] sm:$0xff] }
  0x5d   :  { %904 = vmatpush.msra.mxu0 %v14339_v48  ;;  %944 = vmatpush.msra.mxu1 %v14248_v33  ;;  %v762_v33 = vand.u32 4294901760, %v761_v54  ;;  %v14731_v54 = vand.u32 4294901760, %v56_v63 }
  0x5e   :  { %1011 = vmatpush.msra.mxu2 %v20516_v59  ;;  %1064 = vmatpush.msra.mxu3 %v14266_v24 }
  0x5f   :  { %907 = vmatpush.msra.mxu0 %v14355_v43  ;;  %946 = vmatpush.msra.mxu1 %v14266_v24  ;;  %v20518_v24 = vand.u32 4294901760, %v14339_v48  ;;  %v129_v48 = vld [vmem:[%s20290_s2 + $0x158] sm:$0xff]  ;;  %v14599_v43 = vand.u32 4294901760, %v130_v36 }
  0x60   :  { %1015 = vmatpush.msra.mxu2 %v20517_v12  ;;  %1066 = vmatpush.msra.mxu3 %v14282_v22  ;;  %v20332_v12 = vand.u32 4294901760, %v14707_v57 }
  0x61   :  { %673 = vmatmul.f32.gmra.mxu0 %v14417_v30  ;;  %948 = vmatpush.msra.mxu1 %v14282_v22  ;;  %v131_v22 = vld [vmem:[%s20290_s2 + $0x168] sm:$0xff]  ;;  %v14626_v21 = vsub.f32 %v130_v36, %v14599_v43 }
  0x62   :  { %910 = vmatpush.msra.mxu0 %v14390_v35  ;;  %1019 = vmatpush.msra.mxu2 %v20518_v24  ;;  %v14577_v60 = vand.u32 4294901760, %v131_v22 }
  0x63   :  { %1068 = vmatpush.msra.mxu3 %v14298_v23  ;;  %950 = vmatpush.msra.mxu1 %v14298_v23  ;;  %v14580_v23 = vsub.f32 %v133_v47, %v14562_v14  ;;  %v20341_v28 = vand.u32 4294901760, %v14626_v21  ;;  %v14738_v47 = vand.u32 4294901760, %v121_v44 }
  0x64   :  { %913 = vmatpush.msra.mxu0 %v14409_v5  ;;  %1023 = vmatpush.msra.mxu2 %v835_v3  ;;  %v14603_v3 = vand.u32 4294901760, %v129_v48  ;;  %v127_v5 = vld [vmem:[%s20290_s2 + $0x148] sm:$0xff] }
  0x65   :  { %1070 = vmatpush.msra.mxu3 %v14313_v16  ;;  %763 = vmatmul.f32.gmra.mxu2 %v762_v33  ;;  %v1141_v35 = vand.u32 4294901760, %v14580_v23  ;;  %v14643_v42 = vand.u32 4294901760, %v127_v5  ;;  %v1160_v50 = vsub.f32 %v14626_v21, %v20341_v28 }
  0x66   :  { %916 = vmatpush.msra.mxu0 %v14424_v25  ;;  %952 = vmatpush.msra.mxu1 %v14313_v16  ;;  %v14594_v16 = vsub.f32 %v132_v40, %v14572_v15 }
  0x67   :  { %1027 = vmatpush.msra.mxu2 %v841_v11  ;;  %1072 = vmatpush.msra.mxu3 %v14328_v19  ;;  %v14607_v11 = vsub.f32 %v131_v22, %v14577_v60  ;;  %v1142_v25 = vsub.f32 %v14580_v23, %v1141_v35  ;;  %v1161_v29 = vand.u32 4294901760, %v1160_v50  ;;  %v14750_v22 = vand.u32 4294901760, %v120_v27 }
  0x68   :  { %868 = vmatmul.f32.gmra.mxu3 %v14507_v56  ;;  %919 = vmatpush.msra.mxu0 %v14435_v52 }
  0x69   :  { %954 = vmatpush.msra.mxu1 %v14328_v19  ;;  %1031 = vmatpush.msra.mxu2 %v847_v58  ;;  %v128_v19 = vld [vmem:[%s20290_s2 + $0x150] sm:$0xff]  ;;  %v1143_v10 = vand.u32 4294901760, %v1142_v25 }
  0x6a   :  { %1074 = vmatpush.msra.mxu3 %v14363_v4  ;;  %714 = vmatmul.f32.gmra.mxu1 %v14417_v30  ;;  %v1147_v30 = vand.u32 4294901760, %v14594_v16  ;;  %v14623_v58 = vand.u32 4294901760, %v128_v19 }
  0x6b   :  { %922 = vmatmul.f32.vlgmr.msra.gmra.mxu0 %v14473_v20  ;;  %956 = vmatpush.msra.mxu1 %v14363_v4  ;;  %v126_v4 = vld [vmem:[%s20290_s2 + $0x140] sm:$0xff] }
  0x6c   :  { %1091 = vmatpush.msrb.mxu0 %v14562_v14  ;;  %1035 = vmatpush.msra.mxu2 %v853_v1  ;;  %v14639_v1 = vsub.f32 %v129_v48, %v14603_v3  ;;  %v1148_v52 = vsub.f32 %v14594_v16, %v1147_v30  ;;  %v14650_v61 = vand.u32 4294901760, %v126_v4  ;;  %v122_v20 = vld [vmem:[%s20290_s2 + $0x120] sm:$0xff] }
  0x6d   :  { %1076 = vmatpush.msra.mxu3 %v14379_v62  ;;  %958 = vmatpush.msra.mxu1 %v14379_v62  ;;  %v1153_v62 = vand.u32 4294901760, %v14607_v11  ;;  %v14722_v8 = vand.u32 4294901760, %v122_v20 }
  0x6e   :  { %1093 = vmatpush.msrb.mxu0 %v14572_v15  ;;  %1039 = vmatpush.msra.mxu2 %v859_v26  ;;  %v14659_v26 = vsub.f32 %v128_v19, %v14623_v58  ;;  %v20338_v39 = vand.u32 4294901760, %v14639_v1  ;;  %v1149_v38 = vand.u32 4294901760, %v1148_v52  ;;  %v14680_v2 = vsub.f32 %v126_v4, %v14650_v61  ;;  %v149_v52 = vld [vmem:[%s20290_s2 + $0x1f8] sm:$0xff] }
  0x6f   :  { %1078 = vmatpush.msra.mxu3 %v14392_v9  ;;  %1041 = vmatmul.f32.vlgmr.msra.gmra.mxu2 %v14456_v55  ;;  %v1154_v0 = vsub.f32 %v14607_v11, %v1153_v62  ;;  %v14754_v48 = vsub.f32 %v122_v20, %v14722_v8  ;;  %v14763_v19 = vsub.f32 %v56_v63, %v14731_v54  ;;  %v14802_v63 = vand.u32 4294901760, %v149_v52 }
  0x70   :  { %1095 = vmatpush.msrb.mxu0 %v14577_v60  ;;  %1246 = vmatpush.msrb.mxu2 %v14580_v23  ;;  %v20335_v32 = vand.u32 4294901760, %v14659_v26  ;;  %v1166_v6 = vsub.f32 %v14639_v1, %v20338_v39  ;;  %v20333_v13 = vand.u32 4294901760, %v14680_v2  ;;  %v1190_v4 = vsub.f32 %v14707_v57, %v20332_v12 }
  0x71   :  { %960 = vmatpush.msra.mxu1 %v14392_v9  ;;  %1080 = vmatpush.msra.mxu3 %v14415_v7  ;;  %v124_v9 = vld [vmem:[%s20290_s2 + $0x130] sm:$0xff]  ;;  %v1155_v51 = vand.u32 4294901760, %v1154_v0  ;;  %v118_v0 = vld [vmem:[%s20290_s2 + $0x100] sm:$0xff]  ;;  %v1124_v50 = vand.u32 4294901760, %v14763_v19 }
  0x72   :  { %1082 = vmatmul.f32.vlgmr.msra.gmra.mxu3 %v14456_v55  ;;  %1097 = vmatpush.msrb.mxu0 %v14599_v43  ;;  %v14675_v55 = vsub.f32 %v127_v5, %v14643_v42  ;;  %v1172_v37 = vsub.f32 %v14659_v26, %v20335_v32  ;;  %v1167_v31 = vand.u32 4294901760, %v1166_v6  ;;  %v1184_v40 = vsub.f32 %v14680_v2, %v20333_v13  ;;  %v144_v32 = vld [vmem:[%s20290_s2 + $0x1d0] sm:$0xff] }
  0x73   :  { %1249 = vmatpush.msrb.mxu2 %v14594_v16  ;;  %1304 = vmatpush.msrb.mxu3 %v14562_v14  ;;  %v141_v16 = vld [vmem:[%s20290_s2 + $0x1b8] sm:$0xff] }
  0x74   :  { %962 = vmatpush.msra.mxu1 %v14415_v7  ;;  %1099 = vmatpush.msrb.mxu0 %v14603_v3  ;;  %v14691_v7 = vand.u32 4294901760, %v124_v9  ;;  %v20334_v41 = vand.u32 4294901760, %v14675_v55  ;;  %v1173_v24 = vand.u32 4294901760, %v1172_v37 }
  0x75   :  { %966 = vmatmul.f32.vlgmr.msra.gmra.mxu1 %v752_v17  ;;  %1252 = vmatpush.msrb.mxu2 %v14607_v11  ;;  %v14703_v17 = vand.u32 4294901760, %v123_v45  ;;  %v140_v11 = vld [vmem:[%s20290_s2 + $0x1b0] sm:$0xff] }
  0x76   :  { %1144 = vmatpush.msrb.mxu1 %v1143_v10  ;;  %1306 = vmatpush.msrb.mxu3 %v14572_v15  ;;  %v14725_v18 = vsub.f32 %v124_v9, %v14691_v7  ;;  %v1178_v59 = vsub.f32 %v14675_v55, %v20334_v41  ;;  %v20327_v9 = vand.u32 4294901760, %v14754_v48 }
  0x77   :  { %1101 = vmatpush.msrb.mxu0 %v14623_v58  ;;  %1255 = vmatpush.msrb.mxu2 %v14626_v21  ;;  %v14742_v33 = vsub.f32 %v123_v45, %v14703_v17  ;;  %v72_v45 = vld [vmem:[%s20492_s19 + $0x90] sm:$0xff] }
  0x78   :  { %1150 = vmatpush.msrb.mxu1 %v1149_v38  ;;  %1308 = vmatpush.msrb.mxu3 %v14577_v60  ;;  %v20330_v36 = vand.u32 4294901760, %v14725_v18  ;;  %v1179_v5 = vand.u32 4294901760, %v1178_v59  ;;  %v14789_v38 = vsub.f32 %v120_v27, %v14750_v22  ;;  %v14811_v37 = vand.u32 4294901760, %v72_v45 }
  0x79   :  { %1045 = vmatmul.f32.gmra.mxu2 %v14507_v56  ;;  %1103 = vmatpush.msrb.mxu0 %v14643_v42  ;;  %v20328_v25 = vand.u32 4294901760, %v14742_v33  ;;  %v1208_v27 = vsub.f32 %v14754_v48, %v20327_v9 }
  0x7a   :  { %1156 = vmatpush.msrb.mxu1 %v1155_v51  ;;  %1258 = vmatpush.msrb.mxu2 %v14639_v1  ;;  %v1196_v49 = vsub.f32 %v14725_v18, %v20330_v36  ;;  %v1191_v51 = vand.u32 4294901760, %v1190_v4 }
  0x7b   :  { %1310 = vmatpush.msrb.mxu3 %v14599_v43  ;;  %927 = vmatmul.f32.gmra.mxu0 %v14518_v53  ;;  %v14771_v53 = vsub.f32 %v121_v44, %v14738_v47  ;;  %v1202_v6 = vsub.f32 %v14742_v33, %v20328_v25  ;;  %v14806_v44 = vand.u32 4294901760, %v118_v0  ;;  %v14844_v25 = vsub.f32 %v72_v45, %v14811_v37  ;;  %v145_v45 = vld [vmem:[%s20290_s2 + $0x1d8] sm:$0xff] }
  0x7c   :  { %1086 = vmatmul.f32.gmra.mxu3 %v14507_v56  ;;  %1105 = vmatpush.msrb.mxu0 %v14650_v61  ;;  %v119_v56 = vld [vmem:[%s20290_s2 + $0x108] sm:$0xff]  ;;  %v14879_v41 = vand.u32 4294901760, %v145_v45 }
  0x7d   :  { %1162 = vmatpush.msrb.mxu1 %v1161_v29  ;;  %1261 = vmatpush.msrb.mxu2 %v14659_v26  ;;  %v14782_v10 = vand.u32 4294901760, %v119_v56  ;;  %v20329_v20 = vand.u32 4294901760, %v14771_v53  ;;  %v148_v29 = vld [vmem:[%s20290_s2 + $0x1f0] sm:$0xff]  ;;  %v1203_v4 = vand.u32 4294901760, %v1202_v6  ;;  %v14841_v9 = vsub.f32 %v118_v0, %v14806_v44 }
  0x7e   :  { %1312 = vmatpush.msrb.mxu3 %v14603_v3  ;;  %972 = vmatmul.f32.gmra.mxu1 %v760_v46  ;;  %v1185_v46 = vand.u32 4294901760, %v1184_v40  ;;  %v20331_v40 = vand.u32 4294901760, %v14789_v38  ;;  %v20340_v13 = vand.u32 4294901760, %v14844_v25  ;;  %v14910_v23 = vsub.f32 %v145_v45, %v14879_v41 }
  0x7f   :  { %1107 = vmatpush.msrb.mxu0 %v14672_v34  ;;  %1168 = vmatpush.msrb.mxu1 %v1167_v31  ;;  %v1197_v31 = vand.u32 4294901760, %v1196_v49  ;;  %v14818_v59 = vsub.f32 %v119_v56, %v14782_v10  ;;  %v1214_v56 = vsub.f32 %v14771_v53, %v20329_v20  ;;  %v14836_v49 = vand.u32 4294901760, %v148_v29 }
  0x80   :  { %1264 = vmatpush.msrb.mxu2 %v14675_v55  ;;  %1314 = vmatpush.msrb.mxu3 %v14623_v58  ;;  %v1220_v6 = vsub.f32 %v14789_v38, %v20331_v40 }
  0x81   :  { %1109 = vmatpush.msrb.mxu0 %v14691_v7  ;;  %1174 = vmatpush.msrb.mxu1 %v1173_v24  ;;  %v1125_v24 = vsub.f32 %v14763_v19, %v1124_v50  ;;  %v20336_v20 = vand.u32 4294901760, %v14818_v59  ;;  %v14864_v40 = vsub.f32 %v148_v29, %v14836_v49 }
  0x82   :  { %1267 = vmatpush.msrb.mxu2 %v14680_v2  ;;  %1316 = vmatpush.msrb.mxu3 %v14643_v42 }
  0x83   :  { %1111 = vmatpush.msrb.mxu0 %v14703_v17  ;;  %1180 = vmatpush.msrb.mxu1 %v1179_v5  ;;  %v147_v5 = vld [vmem:[%s20290_s2 + $0x1e8] sm:$0xff]  ;;  %v1126_v0 = vand.u32 4294901760, %v1125_v24  ;;  %v20339_v24 = vand.u32 4294901760, %v14841_v9 }
  0x84   :  { %1270 = vmatpush.msrb.mxu2 %v14707_v57  ;;  %1318 = vmatpush.msrb.mxu3 %v14650_v61  ;;  %v14854_v36 = vand.u32 4294901760, %v147_v5 }
  0x85   :  { %1113 = vmatpush.msrb.mxu0 %v14722_v8  ;;  %1186 = vmatpush.msrb.mxu1 %v1185_v46  ;;  %v14834_v46 = vsub.f32 %v149_v52, %v14802_v63  ;;  %v1209_v52 = vand.u32 4294901760, %v1208_v27 }
  0x86   :  { %1273 = vmatpush.msrb.mxu2 %v14725_v18  ;;  %1320 = vmatpush.msrb.mxu3 %v14672_v34  ;;  %v14877_v29 = vsub.f32 %v147_v5, %v14854_v36 }
  0x87   :  { %1115 = vmatpush.msrb.mxu0 %v14738_v47  ;;  %1192 = vmatpush.msrb.mxu1 %v1191_v51  ;;  %v146_v51 = vld [vmem:[%s20290_s2 + $0x1e0] sm:$0xff]  ;;  %v20337_v27 = vand.u32 4294901760, %v14834_v46 }
  0x88   :  { %1276 = vmatpush.msrb.mxu2 %v14742_v33  ;;  %1322 = vmatpush.msrb.mxu3 %v14691_v7  ;;  %v14866_v12 = vand.u32 4294901760, %v146_v51  ;;  %v20343_v39 = vand.u32 4294901760, %v14877_v29 }
  0x89   :  { %1117 = vmatpush.msrb.mxu0 %v14750_v22  ;;  %1198 = vmatpush.msrb.mxu1 %v1197_v31  ;;  %v1215_v31 = vand.u32 4294901760, %v1214_v56  ;;  %v1226_v56 = vsub.f32 %v14818_v59, %v20336_v20  ;;  %v143_v20 = vld [vmem:[%s20290_s2 + $0x1c8] sm:$0xff] }
  0x8a   :  { %1279 = vmatpush.msrb.mxu2 %v14754_v48  ;;  %1324 = vmatpush.msrb.mxu3 %v14703_v17  ;;  %v14891_v5 = vsub.f32 %v146_v51, %v14866_v12 }
  0x8b   :  { %1119 = vmatpush.msrb.mxu0 %v14782_v10  ;;  %1204 = vmatpush.msrb.mxu1 %v1203_v4  ;;  %v1221_v4 = vand.u32 4294901760, %v1220_v6  ;;  %v20342_v6 = vand.u32 4294901760, %v14864_v40  ;;  %v1227_v51 = vand.u32 4294901760, %v1226_v56  ;;  %v20345_v56 = vand.u32 4294901760, %v14910_v23 }
  0x8c   :  { %1282 = vmatpush.msrb.mxu2 %v14771_v53  ;;  %1326 = vmatpush.msrb.mxu3 %v14722_v8 }
  0x8d   :  { %1121 = vmatpush.msrb.mxu0 %v14806_v44  ;;  %1210 = vmatpush.msrb.mxu1 %v1209_v52  ;;  %v1514_v52 = vsub.f32 %v14834_v46, %v20337_v27  ;;  %v14905_v27 = vand.u32 4294901760, %v144_v32  ;;  %v1520_v45 = vsub.f32 %v14864_v40, %v20342_v6  ;;  %v1526_v6 = vsub.f32 %v14877_v29, %v20343_v39 }
  0x8e   :  { %1285 = vmatpush.msrb.mxu2 %v14789_v38  ;;  %1328 = vmatpush.msrb.mxu3 %v14738_v47 }
  0x8f   :  { %1127 = vmatmul.f32.vlgmr.msrb.gmra.mxu0 %v1126_v0  ;;  %1216 = vmatpush.msrb.mxu1 %v1215_v31  ;;  %v1232_v0 = vsub.f32 %v14841_v9, %v20339_v24  ;;  %v1133_v31 = vsub.f32 %v14844_v25, %v20340_v13  ;;  %20519 = vst [vmem:[#allocation5_spill] sm:$0xff] %v14905_v27  ;;  %v14918_v24 = vand.u32 4294901760, %v143_v20 }
  0x90   :  { %1351 = vmatpush.msra.mxu0 %v1141_v35  ;;  %1288 = vmatpush.msrb.mxu2 %v14818_v59  ;;  %v142_v35 = vld [vmem:[%s20290_s2 + $0x1c0] sm:$0xff]  ;;  %v14933_v28 = vsub.f32 %v144_v32, %v14905_v27 }
  0x91   :  { %1330 = vmatpush.msrb.mxu3 %v14750_v22  ;;  %1222 = vmatpush.msrb.mxu1 %v1221_v4  ;;  %v1515_v4 = vand.u32 4294901760, %v1514_v52  ;;  %v1134_v13 = vand.u32 4294901760, %v1133_v31  ;;  %v14935_v52 = vand.u32 4294901760, %v142_v35  ;;  %v14950_v32 = vsub.f32 %v143_v20, %v14918_v24 }
  0x92   :  { %1355 = vmatpush.msra.mxu0 %v1147_v30  ;;  %1291 = vmatpush.msrb.mxu2 %v14841_v9  ;;  %v1233_v30 = vand.u32 4294901760, %v1232_v0  ;;  %v14952_v0 = vand.u32 4294901760, %v141_v16  ;;  %v1521_v31 = vand.u32 4294901760, %v1520_v45  ;;  %v14965_v20 = vand.u32 4294901760, %v140_v11 }
  0x93   :  { %1332 = vmatpush.msrb.mxu3 %v14782_v10  ;;  %1294 = vmatmul.f32.vlgmr.msrb.gmra.mxu2 %v14763_v19  ;;  %v139_v19 = vld [vmem:[%s20290_s2 + $0x1a8] sm:$0xff]  ;;  %v1527_v45 = vand.u32 4294901760, %v1526_v6  ;;  %v20523_v6 = vand.u32 4294901760, %v14659_v26 }
  0x94   :  { %1359 = vmatpush.msra.mxu0 %v1153_v62  ;;  %1463 = vmatpush.msra.mxu2 %v14802_v63  ;;  %v20520_v62 = vand.u32 4294901760, %v14626_v21  ;;  %v20344_v21 = vand.u32 4294901760, %v14933_v28 }
  0x95   :  { %1228 = vmatpush.msrb.mxu1 %v1227_v51  ;;  %1334 = vmatpush.msrb.mxu3 %v14806_v44  ;;  %v20521_v51 = vand.u32 4294901760, %v14891_v5 }
  0x96   :  { %1338 = vmatmul.f32.vlgmr.msrb.gmra.mxu3 %v1124_v50  ;;  %1363 = vmatpush.msra.mxu0 %v20520_v62  ;;  %v14963_v50 = vsub.f32 %v142_v35, %v14935_v52  ;;  %v1538_v62 = vsub.f32 %v14910_v23, %v20345_v56  ;;  %v20346_v35 = vand.u32 4294901760, %v14950_v32 }
  0x97   :  { %1465 = vmatpush.msra.mxu2 %v14836_v49  ;;  %1516 = vmatpush.msra.mxu3 %v1515_v4  ;;  %v1532_v39 = vsub.f32 %v14891_v5, %v20521_v51  ;;  %v20522_v4 = vand.u32 4294901760, %v14639_v1  ;;  %v14982_v1 = vand.u32 4294901760, %v139_v19 }
  0x98   :  { %1234 = vmatpush.msrb.mxu1 %v1233_v30  ;;  %1135 = vmatmul.f32.gmra.mxu0 %v1134_v13  ;;  %v138_v13 = vld [vmem:[%s20290_s2 + $0x1a0] sm:$0xff]  ;;  %v14980_v30 = vsub.f32 %v141_v16, %v14952_v0  ;;  %v20347_v16 = vand.u32 4294901760, %v14963_v50 }
  0x99   :  { %1236 = vmatmul.f32.vlgmr.msrb.gmra.mxu1 %v14731_v54  ;;  %1367 = vmatpush.msra.mxu0 %v20522_v4  ;;  %v1533_v51 = vand.u32 4294901760, %v1532_v39  ;;  %v137_v4 = vld [vmem:[%s20290_s2 + $0x198] sm:$0xff]  ;;  %v14998_v26 = vand.u32 4294901760, %v138_v13  ;;  %v1539_v39 = vand.u32 4294901760, %v1538_v62 }
  0x9a   :  { %1422 = vmatpush.msra.mxu1 %v14562_v14  ;;  %1467 = vmatpush.msra.mxu2 %v14854_v36  ;;  %v1544_v14 = vsub.f32 %v14933_v28, %v20344_v21  ;;  %v20348_v21 = vand.u32 4294901760, %v14980_v30  ;;  %v15011_v56 = vand.u32 4294901760, %v137_v4 }
  0x9b   :  { %1522 = vmatpush.msra.mxu3 %v1521_v31  ;;  %1371 = vmatpush.msra.mxu0 %v20523_v6  ;;  %v14996_v31 = vsub.f32 %v140_v11, %v14965_v20  ;;  %v20524_v6 = vand.u32 4294901760, %v14675_v55  ;;  %v15009_v11 = vsub.f32 %v139_v19, %v14982_v1  ;;  %v20526_v55 = vand.u32 4294901760, %v14680_v2 }
  0x9c   :  { %1424 = vmatpush.msra.mxu1 %v14572_v15  ;;  %1469 = vmatpush.msra.mxu2 %v14866_v12  ;;  %v1550_v15 = vsub.f32 %v14950_v32, %v20346_v35  ;;  %v1545_v62 = vand.u32 4294901760, %v1544_v14  ;;  %v1556_v19 = vsub.f32 %v14963_v50, %v20347_v16  ;;  %v15026_v35 = vsub.f32 %v138_v13, %v14998_v26 }
  0x9d   :  { %1528 = vmatpush.msra.mxu3 %v1527_v45  ;;  %1299 = vmatmul.f32.gmra.mxu2 %v14844_v25  ;;  %v136_v45 = vld [vmem:[%s20290_s2 + $0x190] sm:$0xff]  ;;  %v1562_v13 = vsub.f32 %v14980_v30, %v20348_v21  ;;  %v20527_v16 = vand.u32 4294901760, %v14707_v57 }
  0x9e   :  { %1375 = vmatpush.msra.mxu0 %v20524_v6  ;;  %1426 = vmatpush.msra.mxu1 %v14577_v60  ;;  %v20525_v60 = vand.u32 4294901760, %v14844_v25  ;;  %v20351_v6 = vand.u32 4294901760, %v14996_v31  ;;  %v57_v25 = vld [vmem:[%s20492_s19 + $0x18] sm:$0xff]  ;;  %v15036_v2 = vand.u32 4294901760, %v136_v45  ;;  %v1551_v14 = vand.u32 4294901760, %v1550_v15 }
  0x9f   :  { %1471 = vmatpush.msra.mxu2 %v14879_v41  ;;  %1534 = vmatpush.msra.mxu3 %v1533_v51  ;;  %v135_v51 = vld [vmem:[%s20290_s2 + $0x188] sm:$0xff]  ;;  %v15054_v15 = vand.u32 4294901760, %v57_v25  ;;  %v1557_v21 = vand.u32 4294901760, %v1556_v19 }
  0xa0   :  { %1344 = vmatmul.f32.gmra.mxu3 %v20525_v60  ;;  %1379 = vmatpush.msra.mxu0 %v20526_v55  ;;  %v15044_v55 = vsub.f32 %v137_v4, %v15011_v56  ;;  %v1568_v4 = vsub.f32 %v14996_v31, %v20351_v6  ;;  %v1579_v60 = vand.u32 4294901760, %v15026_v35 }
  0xa1   :  { %1428 = vmatpush.msra.mxu1 %v14599_v43  ;;  %1473 = vmatpush.msra.mxu2 %v14905_v27  ;;  %v134_v43 = vld [vmem:[%s20290_s2 + $0x180] sm:$0xff]  ;;  %v20528_v27 = vand.u32 4294901760, %v14725_v18  ;;  %v20530_v18 = vand.u32 4294901760, %v14742_v33 }
  0xa2   :  { %1540 = vmatpush.msra.mxu3 %v1539_v39  ;;  %1240 = vmatmul.f32.gmra.mxu1 %v14811_v37  ;;  %v15052_v39 = vand.u32 4294901760, %v135_v51  ;;  %v15067_v57 = vand.u32 4294901760, %v134_v43  ;;  %v1585_v6 = vand.u32 4294901760, %v15044_v55 }
  0xa3   :  { %1383 = vmatpush.msra.mxu0 %v20527_v16  ;;  %1430 = vmatpush.msra.mxu1 %v14603_v3  ;;  %v15065_v3 = vsub.f32 %v136_v45, %v15036_v2  ;;  %v1563_v16 = vand.u32 4294901760, %v1562_v13  ;;  %v1569_v45 = vand.u32 4294901760, %v1568_v4  ;;  %v20531_v13 = vand.u32 4294901760, %v14754_v48  ;;  %v73_v48 = vld [vmem:[%s20492_s19 + $0x98] sm:$0xff] }
  0xa4   :  { %1475 = vmatpush.msra.mxu2 %v14918_v24  ;;  %1546 = vmatpush.msra.mxu3 %v1545_v62  ;;  %v20529_v62 = vand.u32 4294901760, %v15009_v11  ;;  %v15092_v33 = vsub.f32 %v134_v43, %v15067_v57 }
  0xa5   :  { %1387 = vmatpush.msra.mxu0 %v20528_v27  ;;  %1432 = vmatpush.msra.mxu1 %v14623_v58  ;;  %v15078_v58 = vsub.f32 %v135_v51, %v15052_v39  ;;  %v15081_v27 = vsub.f32 %v57_v25, %v15054_v15  ;;  %v20532_v25 = vand.u32 4294901760, %v14771_v53 }
  0xa6   :  { %1477 = vmatpush.msra.mxu2 %v14935_v52  ;;  %1552 = vmatpush.msra.mxu3 %v1551_v14  ;;  %v1574_v19 = vsub.f32 %v15009_v11, %v20529_v62  ;;  %v1580_v14 = vsub.f32 %v15026_v35, %v1579_v60  ;;  %v1603_v62 = vand.u32 4294901760, %v15092_v33 }
  0xa7   :  { %1391 = vmatpush.msra.mxu0 %v20530_v18  ;;  %1434 = vmatpush.msra.mxu1 %v14643_v42  ;;  %v1591_v42 = vand.u32 4294901760, %v15065_v3  ;;  %v1496_v43 = vand.u32 4294901760, %v15081_v27  ;;  %v20534_v18 = vand.u32 4294901760, %v14818_v59 }
  0xa8   :  { %1479 = vmatpush.msra.mxu2 %v14952_v0  ;;  %1558 = vmatpush.msra.mxu3 %v1557_v21  ;;  %v1575_v51 = vand.u32 4294901760, %v1574_v19  ;;  %v1586_v21 = vsub.f32 %v15044_v55, %v1585_v6  ;;  %v1581_v4 = vand.u32 4294901760, %v1580_v14 }
  0xa9   :  { %1395 = vmatpush.msra.mxu0 %v20531_v13  ;;  %1436 = vmatpush.msra.mxu1 %v14650_v61  ;;  %v1597_v61 = vand.u32 4294901760, %v15078_v58  ;;  %v1592_v53 = vsub.f32 %v15065_v3, %v1591_v42 }
  0xaa   :  { %1481 = vmatpush.msra.mxu2 %v14965_v20  ;;  %1564 = vmatpush.msra.mxu3 %v1563_v16  ;;  %v20533_v16 = vand.u32 4294901760, %v14789_v38  ;;  %v1587_v19 = vand.u32 4294901760, %v1586_v21  ;;  %v1497_v38 = vsub.f32 %v15081_v27, %v1496_v43  ;;  %v20537_v21 = vand.u32 4294901760, %v14864_v40 }
  0xab   :  { %1399 = vmatpush.msra.mxu0 %v20532_v25  ;;  %1438 = vmatpush.msra.mxu1 %v14672_v34  ;;  %v15114_v34 = vand.u32 4294901760, %v73_v48  ;;  %v1593_v59 = vand.u32 4294901760, %v1592_v53  ;;  %v157_v25 = vld [vmem:[%s20290_s2 + $0x238] sm:$0xff] }
  0xac   :  { %1483 = vmatpush.msra.mxu2 %v14982_v1  ;;  %1570 = vmatpush.msra.mxu3 %v1569_v45  ;;  %v20535_v45 = vand.u32 4294901760, %v14841_v9  ;;  %v1498_v9 = vand.u32 4294901760, %v1497_v38  ;;  %v155_v38 = vld [vmem:[%s20290_s2 + $0x228] sm:$0xff] }
  0xad   :  { %1403 = vmatpush.msra.mxu0 %v20533_v16  ;;  %1440 = vmatpush.msra.mxu1 %v14691_v7  ;;  %v1598_v7 = vsub.f32 %v15078_v58, %v1597_v61  ;;  %v15134_v14 = vsub.f32 %v73_v48, %v15114_v34 }
  0xae   :  { %1485 = vmatpush.msra.mxu2 %v14998_v26  ;;  %1576 = vmatpush.msra.mxu3 %v1575_v51 }
  0xaf   :  { %1407 = vmatpush.msra.mxu0 %v20534_v18  ;;  %1442 = vmatpush.msra.mxu1 %v14703_v17  ;;  %v1604_v17 = vsub.f32 %v15092_v33, %v1603_v62  ;;  %v1599_v13 = vand.u32 4294901760, %v1598_v7  ;;  %v1504_v51 = vand.u32 4294901760, %v15134_v14 }
  0xb0   :  { %1487 = vmatpush.msra.mxu2 %v15011_v56  ;;  %1582 = vmatpush.msra.mxu3 %v1581_v4 }
  0xb1   :  { %1411 = vmatpush.msra.mxu0 %v20535_v45  ;;  %1444 = vmatpush.msra.mxu1 %v14722_v8  ;;  %v1605_v8 = vand.u32 4294901760, %v1604_v17 }
  0xb2   :  { %1489 = vmatpush.msra.mxu2 %v15036_v2  ;;  %1588 = vmatpush.msra.mxu3 %v1587_v19  ;;  %v15320_v19 = vand.u32 4294901760, %v157_v25 }
  0xb3   :  { %1413 = vmatmul.f32.vlgmr.msra.gmra.mxu0 %v14731_v54  ;;  %1446 = vmatpush.msra.mxu1 %v14738_v47  ;;  %v20536_v47 = vand.u32 4294901760, %v14834_v46 }
  0xb4   :  { %1618 = vmatpush.msrb.mxu0 %v14834_v46  ;;  %1491 = vmatpush.msra.mxu2 %v15052_v39  ;;  %v20538_v46 = vand.u32 4294901760, %v14877_v29 }
  0xb5   :  { %1594 = vmatpush.msra.mxu3 %v1593_v59  ;;  %1448 = vmatpush.msra.mxu1 %v14750_v22  ;;  %v1505_v22 = vsub.f32 %v15134_v14, %v1504_v51 }
  0xb6   :  { %1621 = vmatpush.msrb.mxu0 %v14864_v40  ;;  %1493 = vmatpush.msra.mxu2 %v15067_v57  ;;  %v20543_v40 = vld [vmem:[#allocation5_spill] sm:$0xff] }
  0xb7   :  { %1600 = vmatpush.msra.mxu3 %v1599_v13  ;;  %1499 = vmatmul.f32.vlgmr.msra.gmra.mxu2 %v1498_v9 }
  0xb8   :  { %1624 = vmatpush.msrb.mxu0 %v14877_v29  ;;  %1723 = vmatpush.msrb.mxu2 %v20536_v47  ;;  %v163_v29 = vld [vmem:[%s20290_s2 + $0x268] sm:$0xff]  ;;  %v58_v47 = vld [vmem:[%s20492_s19 + $0x20] sm:$0xff] }
  0xb9   :  { %1450 = vmatpush.msra.mxu1 %v14782_v10  ;;  %1606 = vmatpush.msra.mxu3 %v1605_v8  ;;  %v1506_v10 = vand.u32 4294901760, %v1505_v22  ;;  %v15355_v8 = vsub.f32 %v157_v25, %v15320_v19 }
  0xba   :  { %1608 = vmatmul.f32.vlgmr.msra.gmra.mxu3 %v15054_v15  ;;  %1627 = vmatpush.msrb.mxu0 %v14891_v5 }
  0xbb   :  { %1727 = vmatpush.msrb.mxu2 %v20537_v21  ;;  %1794 = vmatpush.msrb.mxu3 %v14802_v63  ;;  %v153_v21 = vld [vmem:[%s20290_s2 + $0x218] sm:$0xff] }
  0xbc   :  { %1452 = vmatpush.msra.mxu1 %v14806_v44  ;;  %1417 = vmatmul.f32.gmra.mxu0 %v14811_v37  ;;  %v20539_v44 = vand.u32 4294901760, %v14891_v5  ;;  %v20547_v5 = vand.u32 4294901760, %v15009_v11 }
  0xbd   :  { %1454 = vmatmul.f32.vlgmr.msra.gmra.mxu1 %v14731_v54  ;;  %1630 = vmatpush.msrb.mxu0 %v14910_v23  ;;  %v20540_v54 = vand.u32 4294901760, %v14910_v23 }
  0xbe   :  { %1676 = vmatpush.msrb.mxu1 %v14802_v63  ;;  %1731 = vmatpush.msrb.mxu2 %v20538_v46  ;;  %v20541_v63 = vand.u32 4294901760, %v14933_v28 }
  0xbf   :  { %1796 = vmatpush.msrb.mxu3 %v14836_v49  ;;  %1633 = vmatpush.msrb.mxu0 %v14933_v28  ;;  %v20544_v28 = vand.u32 4294901760, %v14963_v50 }
  0xc0   :  { %1678 = vmatpush.msrb.mxu1 %v14836_v49  ;;  %1735 = vmatpush.msrb.mxu2 %v20539_v44  ;;  %v20546_v49 = vand.u32 4294901760, %v14996_v31 }
  0xc1   :  { %1798 = vmatpush.msrb.mxu3 %v14854_v36  ;;  %1507 = vmatmul.f32.gmra.mxu2 %v1506_v10 }
  0xc2   :  { %1636 = vmatpush.msrb.mxu0 %v14950_v32  ;;  %1680 = vmatpush.msrb.mxu1 %v14854_v36  ;;  %v20542_v36 = vand.u32 4294901760, %v14950_v32 }
  0xc3   :  { %1739 = vmatpush.msrb.mxu2 %v20540_v54  ;;  %1800 = vmatpush.msrb.mxu3 %v14866_v12 }
  0xc4   :  { %1612 = vmatmul.f32.gmra.mxu3 %v15114_v34  ;;  %1639 = vmatpush.msrb.mxu0 %v14963_v50  ;;  %v161_v50 = vld [vmem:[%s20290_s2 + $0x258] sm:$0xff] }
  0xc5   :  { %1682 = vmatpush.msrb.mxu1 %v14866_v12  ;;  %1743 = vmatpush.msrb.mxu2 %v20541_v63  ;;  %v20545_v12 = vand.u32 4294901760, %v14980_v30 }
  0xc6   :  { %1802 = vmatpush.msrb.mxu3 %v14879_v41  ;;  %1458 = vmatmul.f32.gmra.mxu1 %v14811_v37  ;;  %v164_v37 = vld [vmem:[%s20290_s2 + $0x270] sm:$0xff] }
  0xc7   :  { %1642 = vmatpush.msrb.mxu0 %v14980_v30  ;;  %1684 = vmatpush.msrb.mxu1 %v14879_v41  ;;  %v165_v41 = vld [vmem:[%s20290_s2 + $0x278] sm:$0xff]  ;;  %v15218_v23 = vand.u32 4294901760, %v164_v37  ;;  %v15251_v30 = vand.u32 4294901760, %v161_v50 }
  0xc8   :  { %1747 = vmatpush.msrb.mxu2 %v20542_v36  ;;  %1804 = vmatpush.msrb.mxu3 %v20543_v40  ;;  %v152_v36 = vld [vmem:[%s20290_s2 + $0x210] sm:$0xff] }
  0xc9   :  { %1645 = vmatpush.msrb.mxu0 %v14996_v31  ;;  %1686 = vmatpush.msrb.mxu1 %v20543_v40  ;;  %v15379_v40 = vand.u32 4294901760, %v58_v47 }
  0xca   :  { %1751 = vmatpush.msrb.mxu2 %v20544_v28  ;;  %1806 = vmatpush.msrb.mxu3 %v14918_v24 }
  0xcb   :  { %1648 = vmatpush.msrb.mxu0 %v15009_v11  ;;  %1688 = vmatpush.msrb.mxu1 %v14918_v24  ;;  %v15208_v24 = vand.u32 4294901760, %v165_v41  ;;  %v160_v11 = vld [vmem:[%s20290_s2 + $0x250] sm:$0xff] }
  0xcc   :  { %1755 = vmatpush.msrb.mxu2 %v20545_v12  ;;  %1808 = vmatpush.msrb.mxu3 %v14935_v52  ;;  %v20357_v12 = vand.u32 4294901760, %v15355_v8 }
  0xcd   :  { %1651 = vmatpush.msrb.mxu0 %v15026_v35  ;;  %1690 = vmatpush.msrb.mxu1 %v14935_v52  ;;  %v15225_v52 = vand.u32 4294901760, %v163_v29  ;;  %v15228_v32 = vsub.f32 %v165_v41, %v15208_v24  ;;  %v15386_v41 = vand.u32 4294901760, %v153_v21 }
  0xce   :  { %1759 = vmatpush.msrb.mxu2 %v20546_v49  ;;  %1810 = vmatpush.msrb.mxu3 %v14952_v0 }
  0xcf   :  { %1654 = vmatpush.msrb.mxu0 %v15044_v55  ;;  %1692 = vmatpush.msrb.mxu1 %v14952_v0  ;;  %v162_v0 = vld [vmem:[%s20290_s2 + $0x260] sm:$0xff]  ;;  %v15255_v31 = vsub.f32 %v163_v29, %v15225_v52 }
  0xd0   :  { %1763 = vmatpush.msrb.mxu2 %v20547_v5  ;;  %1812 = vmatpush.msrb.mxu3 %v14965_v20  ;;  %v15246_v35 = vand.u32 4294901760, %v162_v0  ;;  %v15398_v5 = vand.u32 4294901760, %v152_v36 }
  0xd1   :  { %1657 = vmatpush.msrb.mxu0 %v15065_v3  ;;  %1694 = vmatpush.msrb.mxu1 %v14965_v20  ;;  %v15242_v20 = vsub.f32 %v164_v37, %v15218_v23 }
  0xd2   :  { %1767 = vmatpush.msrb.mxu2 %v1579_v60  ;;  %1814 = vmatpush.msrb.mxu3 %v14982_v1  ;;  %v15271_v60 = vand.u32 4294901760, %v160_v11  ;;  %v15274_v55 = vsub.f32 %v162_v0, %v15246_v35 }
  0xd3   :  { %1660 = vmatpush.msrb.mxu0 %v15078_v58  ;;  %1696 = vmatpush.msrb.mxu1 %v14982_v1  ;;  %v1885_v1 = vand.u32 4294901760, %v15228_v32  ;;  %v15287_v58 = vsub.f32 %v161_v50, %v15251_v30 }
  0xd4   :  { %1771 = vmatpush.msrb.mxu2 %v1585_v6  ;;  %1816 = vmatpush.msrb.mxu3 %v14998_v26  ;;  %v159_v6 = vld [vmem:[%s20290_s2 + $0x248] sm:$0xff]  ;;  %v15307_v4 = vsub.f32 %v160_v11, %v15271_v60  ;;  %v15411_v11 = vsub.f32 %v58_v47, %v15379_v40 }
  0xd5   :  { %1663 = vmatpush.msrb.mxu0 %v15092_v33  ;;  %1698 = vmatpush.msrb.mxu1 %v14998_v26  ;;  %v1891_v26 = vand.u32 4294901760, %v15242_v20  ;;  %v1886_v3 = vsub.f32 %v15228_v32, %v1885_v1 }
  0xd6   :  { %1775 = vmatpush.msrb.mxu2 %v1591_v42  ;;  %1818 = vmatpush.msrb.mxu3 %v15011_v56  ;;  %v15291_v42 = vand.u32 4294901760, %v159_v6  ;;  %v20360_v59 = vand.u32 4294901760, %v15307_v4 }
  0xd7   :  { %1666 = vmatmul.f32.vlgmr.msrb.gmra.mxu0 %v15081_v27  ;;  %1700 = vmatpush.msrb.mxu1 %v15011_v56  ;;  %v158_v56 = vld [vmem:[%s20290_s2 + $0x240] sm:$0xff]  ;;  %v1892_v33 = vsub.f32 %v15242_v20, %v1891_v26  ;;  %v1887_v16 = vand.u32 4294901760, %v1886_v3 }
  0xd8   :  { %1835 = vmatpush.msra.mxu0 %v15208_v24  ;;  %1779 = vmatpush.msrb.mxu2 %v1597_v61  ;;  %v15298_v48 = vand.u32 4294901760, %v158_v56  ;;  %v20366_v61 = vand.u32 4294901760, %v15274_v55  ;;  %v154_v27 = vld [vmem:[%s20290_s2 + $0x220] sm:$0xff]  ;;  %v1916_v46 = vsub.f32 %v15307_v4, %v20360_v59  ;;  %v176_v59 = vld [vmem:[%s20290_s2 + $0x2d0] sm:$0xff] }
  0xd9   :  { %1820 = vmatpush.msrb.mxu3 %v15036_v2  ;;  %1702 = vmatpush.msrb.mxu1 %v15036_v2  ;;  %v1897_v2 = vand.u32 4294901760, %v15255_v31  ;;  %v1893_v18 = vand.u32 4294901760, %v1892_v33  ;;  %v15370_v44 = vand.u32 4294901760, %v154_v27  ;;  %v181_v33 = vld [vmem:[%s20290_s2 + $0x2f8] sm:$0xff] }
  0xda   :  { %1837 = vmatpush.msra.mxu0 %v15218_v23  ;;  %1783 = vmatpush.msrb.mxu2 %v1603_v62  ;;  %v20363_v62 = vand.u32 4294901760, %v15287_v58  ;;  %v15328_v7 = vsub.f32 %v158_v56, %v15298_v48  ;;  %v1904_v45 = vsub.f32 %v15274_v55, %v20366_v61  ;;  %v1917_v29 = vand.u32 4294901760, %v1916_v46 }
  0xdb   :  { %1822 = vmatpush.msrb.mxu3 %v15052_v39  ;;  %1785 = vmatmul.f32.vlgmr.msrb.gmra.mxu2 %v15054_v15  ;;  %v1898_v53 = vsub.f32 %v15255_v31, %v1897_v2  ;;  %v15402_v50 = vsub.f32 %v154_v27, %v15370_v44  ;;  %v1934_v56 = vsub.f32 %v15355_v8, %v20357_v12  ;;  %v15450_v47 = vand.u32 4294901760, %v181_v33 }
  0xdc   :  { %1839 = vmatpush.msra.mxu0 %v15225_v52  ;;  %1990 = vmatpush.msra.mxu2 %v15228_v32  ;;  %v1910_v13 = vsub.f32 %v15287_v58, %v20363_v62  ;;  %v20358_v22 = vand.u32 4294901760, %v15328_v7  ;;  %v1905_v10 = vand.u32 4294901760, %v1904_v45  ;;  %v1868_v45 = vand.u32 4294901760, %v15411_v11 }
  0xdd   :  { %1704 = vmatpush.msrb.mxu1 %v15052_v39  ;;  %1824 = vmatpush.msrb.mxu3 %v15067_v57  ;;  %v156_v39 = vld [vmem:[%s20290_s2 + $0x230] sm:$0xff]  ;;  %v1899_v17 = vand.u32 4294901760, %v1898_v53  ;;  %v150_v53 = vld [vmem:[%s20290_s2 + $0x200] sm:$0xff] }
  0xde   :  { %1826 = vmatmul.f32.vlgmr.msrb.gmra.mxu3 %v15054_v15  ;;  %1841 = vmatpush.msra.mxu0 %v15246_v35  ;;  %v15323_v15 = vsub.f32 %v159_v6, %v15291_v42  ;;  %v1911_v63 = vand.u32 4294901760, %v1910_v13  ;;  %v1928_v49 = vsub.f32 %v15328_v7, %v20358_v22 }
  0xdf   :  { %1993 = vmatpush.msra.mxu2 %v15242_v20  ;;  %2048 = vmatpush.msra.mxu3 %v15208_v24  ;;  %v173_v20 = vld [vmem:[%s20290_s2 + $0x2b8] sm:$0xff] }
  0xe0   :  { %1706 = vmatpush.msrb.mxu1 %v15067_v57  ;;  %1671 = vmatmul.f32.gmra.mxu0 %v15134_v14  ;;  %v15339_v57 = vand.u32 4294901760, %v156_v39  ;;  %v20359_v9 = vand.u32 4294901760, %v15323_v15  ;;  %v15419_v14 = vsub.f32 %v153_v21, %v15386_v41  ;;  %v15454_v21 = vand.u32 4294901760, %v150_v53 }
  0xe1   :  { %1710 = vmatmul.f32.vlgmr.msrb.gmra.mxu1 %v1496_v43  ;;  %1843 = vmatpush.msra.mxu0 %v15251_v30  ;;  %v15351_v43 = vand.u32 4294901760, %v155_v38 }
  0xe2   :  { %1888 = vmatpush.msra.mxu1 %v1887_v16  ;;  %1996 = vmatpush.msra.mxu2 %v15255_v31  ;;  %v15373_v54 = vsub.f32 %v156_v39, %v15339_v57  ;;  %v1922_v28 = vsub.f32 %v15323_v15, %v20359_v9  ;;  %v20352_v39 = vand.u32 4294901760, %v15402_v50  ;;  %v20354_v27 = vand.u32 4294901760, %v15419_v14  ;;  %v172_v31 = vld [vmem:[%s20290_s2 + $0x2b0] sm:$0xff] }
  0xe3   :  { %2050 = vmatpush.msra.mxu3 %v15218_v23  ;;  %1845 = vmatpush.msra.mxu0 %v15271_v60  ;;  %v15390_v37 = vsub.f32 %v155_v38, %v15351_v43  ;;  %v74_v38 = vld [vmem:[%s20492_s19 + $0xa0] sm:$0xff] }
  0xe4   :  { %1894 = vmatpush.msra.mxu1 %v1893_v18  ;;  %1999 = vmatpush.msra.mxu2 %v15274_v55  ;;  %v20355_v0 = vand.u32 4294901760, %v15373_v54  ;;  %v1923_v6 = vand.u32 4294901760, %v1922_v28  ;;  %v15437_v18 = vsub.f32 %v152_v36, %v15398_v5  ;;  %v15459_v46 = vand.u32 4294901760, %v74_v38 }
  0xe5   :  { %2052 = vmatpush.msra.mxu3 %v15225_v52  ;;  %1789 = vmatmul.f32.gmra.mxu2 %v15114_v34  ;;  %v20353_v3 = vand.u32 4294901760, %v15390_v37  ;;  %v1952_v36 = vsub.f32 %v15402_v50, %v20352_v39  ;;  %v15489_v39 = vsub.f32 %v150_v53, %v15454_v21 }
  0xe6   :  { %1847 = vmatpush.msra.mxu0 %v15291_v42  ;;  %1900 = vmatpush.msra.mxu1 %v1899_v17  ;;  %v1940_v25 = vsub.f32 %v15373_v54, %v20355_v0  ;;  %v1935_v17 = vand.u32 4294901760, %v1934_v56 }
  0xe7   :  { %2002 = vmatpush.msra.mxu2 %v15287_v58  ;;  %2054 = vmatpush.msra.mxu3 %v15246_v35  ;;  %v1946_v13 = vsub.f32 %v15390_v37, %v20353_v3  ;;  %v15492_v3 = vsub.f32 %v74_v38, %v15459_v46  ;;  %v177_v38 = vld [vmem:[%s20290_s2 + $0x2d8] sm:$0xff] }
  0xe8   :  { %1830 = vmatmul.f32.gmra.mxu3 %v15114_v34  ;;  %1849 = vmatpush.msra.mxu0 %v15298_v48  ;;  %v151_v34 = vld [vmem:[%s20290_s2 + $0x208] sm:$0xff]  ;;  %v15527_v9 = vand.u32 4294901760, %v177_v38 }
  0xe9   :  { %1906 = vmatpush.msra.mxu1 %v1905_v10  ;;  %2005 = vmatpush.msra.mxu2 %v15307_v4  ;;  %v15430_v16 = vand.u32 4294901760, %v151_v34  ;;  %v180_v10 = vld [vmem:[%s20290_s2 + $0x2f0] sm:$0xff]  ;;  %v1947_v56 = vand.u32 4294901760, %v1946_v13  ;;  %v20365_v22 = vand.u32 4294901760, %v15492_v3 }
  0xea   :  { %2056 = vmatpush.msra.mxu3 %v15251_v30  ;;  %1716 = vmatmul.f32.gmra.mxu1 %v1504_v51  ;;  %v1929_v51 = vand.u32 4294901760, %v1928_v49  ;;  %v20356_v49 = vand.u32 4294901760, %v15437_v18  ;;  %v15558_v32 = vsub.f32 %v177_v38, %v15527_v9 }
  0xeb   :  { %1851 = vmatpush.msra.mxu0 %v15320_v19  ;;  %1912 = vmatpush.msra.mxu1 %v1911_v63  ;;  %v1941_v63 = vand.u32 4294901760, %v1940_v25  ;;  %v15466_v28 = vsub.f32 %v151_v34, %v15430_v16  ;;  %v1958_v34 = vsub.f32 %v15419_v14, %v20354_v27  ;;  %v15484_v25 = vand.u32 4294901760, %v180_v10 }
  0xec   :  { %2008 = vmatpush.msra.mxu2 %v15323_v15  ;;  %2058 = vmatpush.msra.mxu3 %v15271_v60  ;;  %v1964_v13 = vsub.f32 %v15437_v18, %v20356_v49 }
  0xed   :  { %1853 = vmatpush.msra.mxu0 %v15339_v57  ;;  %1918 = vmatpush.msra.mxu1 %v1917_v29  ;;  %v1869_v29 = vsub.f32 %v15411_v11, %v1868_v45  ;;  %v20361_v27 = vand.u32 4294901760, %v15466_v28  ;;  %v15512_v49 = vsub.f32 %v180_v10, %v15484_v25 }
  0xee   :  { %2011 = vmatpush.msra.mxu2 %v15328_v7  ;;  %2060 = vmatpush.msra.mxu3 %v15291_v42 }
  0xef   :  { %1855 = vmatpush.msra.mxu0 %v15351_v43  ;;  %1924 = vmatpush.msra.mxu1 %v1923_v6  ;;  %v179_v6 = vld [vmem:[%s20290_s2 + $0x2e8] sm:$0xff]  ;;  %v1870_v53 = vand.u32 4294901760, %v1869_v29  ;;  %v20364_v29 = vand.u32 4294901760, %v15489_v39 }
  0xf0   :  { %2014 = vmatpush.msra.mxu2 %v15355_v8  ;;  %2062 = vmatpush.msra.mxu3 %v15298_v48  ;;  %v15502_v0 = vand.u32 4294901760, %v179_v6 }
  0xf1   :  { %1857 = vmatpush.msra.mxu0 %v15370_v44  ;;  %1930 = vmatpush.msra.mxu1 %v1929_v51  ;;  %v15482_v51 = vsub.f32 %v181_v33, %v15450_v47  ;;  %v1953_v33 = vand.u32 4294901760, %v1952_v36 }
  0xf2   :  { %2017 = vmatpush.msra.mxu2 %v15373_v54  ;;  %2064 = vmatpush.msra.mxu3 %v15320_v19  ;;  %v15525_v10 = vsub.f32 %v179_v6, %v15502_v0 }
  0xf3   :  { %1859 = vmatpush.msra.mxu0 %v15386_v41  ;;  %1936 = vmatpush.msra.mxu1 %v1935_v17  ;;  %v178_v17 = vld [vmem:[%s20290_s2 + $0x2e0] sm:$0xff]  ;;  %v20362_v36 = vand.u32 4294901760, %v15482_v51 }
  0xf4   :  { %2020 = vmatpush.msra.mxu2 %v15390_v37  ;;  %2066 = vmatpush.msra.mxu3 %v15339_v57  ;;  %v15514_v12 = vand.u32 4294901760, %v178_v17  ;;  %v20368_v62 = vand.u32 4294901760, %v15525_v10 }
  0xf5   :  { %1861 = vmatpush.msra.mxu0 %v15398_v5  ;;  %1942 = vmatpush.msra.mxu1 %v1941_v63  ;;  %v1959_v63 = vand.u32 4294901760, %v1958_v34  ;;  %v1970_v34 = vsub.f32 %v15466_v28, %v20361_v27  ;;  %v175_v27 = vld [vmem:[%s20290_s2 + $0x2c8] sm:$0xff] }
  0xf6   :  { %2023 = vmatpush.msra.mxu2 %v15402_v50  ;;  %2068 = vmatpush.msra.mxu3 %v15351_v43  ;;  %v15539_v6 = vsub.f32 %v178_v17, %v15514_v12 }
  0xf7   :  { %1863 = vmatpush.msra.mxu0 %v15430_v16  ;;  %1948 = vmatpush.msra.mxu1 %v1947_v56  ;;  %v1965_v56 = vand.u32 4294901760, %v1964_v13  ;;  %v20367_v13 = vand.u32 4294901760, %v15512_v49  ;;  %v1971_v17 = vand.u32 4294901760, %v1970_v34  ;;  %v20370_v34 = vand.u32 4294901760, %v15558_v32 }
  0xf8   :  { %2026 = vmatpush.msra.mxu2 %v15419_v14  ;;  %2070 = vmatpush.msra.mxu3 %v15370_v44 }
  0xf9   :  { %1865 = vmatpush.msra.mxu0 %v15454_v21  ;;  %1954 = vmatpush.msra.mxu1 %v1953_v33  ;;  %v2258_v33 = vsub.f32 %v15482_v51, %v20362_v36  ;;  %v15553_v36 = vand.u32 4294901760, %v176_v59  ;;  %v2264_v38 = vsub.f32 %v15512_v49, %v20367_v13  ;;  %v2270_v13 = vsub.f32 %v15525_v10, %v20368_v62 }
  0xfa   :  { %2029 = vmatpush.msra.mxu2 %v15437_v18  ;;  %2072 = vmatpush.msra.mxu3 %v15386_v41 }
  0xfb   :  { %1871 = vmatmul.f32.vlgmr.msra.gmra.mxu0 %v1870_v53  ;;  %1960 = vmatpush.msra.mxu1 %v1959_v63  ;;  %v1976_v53 = vsub.f32 %v15489_v39, %v20364_v29  ;;  %v1877_v63 = vsub.f32 %v15492_v3, %v20365_v22  ;;  %20548 = vst [vmem:[#allocation5_spill] sm:$0xff] %v15553_v36  ;;  %v15566_v29 = vand.u32 4294901760, %v175_v27 }
  0xfc   :  { %2095 = vmatpush.msrb.mxu0 %v1885_v1  ;;  %2032 = vmatpush.msra.mxu2 %v15466_v28  ;;  %v174_v1 = vld [vmem:[%s20290_s2 + $0x2c0] sm:$0xff]  ;;  %v15581_v61 = vsub.f32 %v176_v59, %v15553_v36 }
  0xfd   :  { %2074 = vmatpush.msra.mxu3 %v15398_v5  ;;  %1966 = vmatpush.msra.mxu1 %v1965_v56  ;;  %v2259_v56 = vand.u32 4294901760, %v2258_v33  ;;  %v1878_v22 = vand.u32 4294901760, %v1877_v63  ;;  %v15583_v33 = vand.u32 4294901760, %v174_v1  ;;  %v15598_v59 = vsub.f32 %v175_v27, %v15566_v29 }
  0xfe   :  { %2099 = vmatpush.msrb.mxu0 %v1891_v26  ;;  %2035 = vmatpush.msra.mxu2 %v15489_v39  ;;  %v1977_v26 = vand.u32 4294901760, %v1976_v53  ;;  %v15600_v53 = vand.u32 4294901760, %v173_v20  ;;  %v2265_v63 = vand.u32 4294901760, %v2264_v38  ;;  %v15613_v27 = vand.u32 4294901760, %v172_v31 }
  0xff   :  { %2076 = vmatpush.msra.mxu3 %v15430_v16  ;;  %2038 = vmatmul.f32.vlgmr.msra.gmra.mxu2 %v15411_v11  ;;  %v171_v11 = vld [vmem:[%s20290_s2 + $0x2a8] sm:$0xff]  ;;  %v2271_v38 = vand.u32 4294901760, %v2270_v13  ;;  %v20552_v13 = vand.u32 4294901760, %v15307_v4 }
 0x100   :  { %2103 = vmatpush.msrb.mxu0 %v1897_v2  ;;  %2207 = vmatpush.msrb.mxu2 %v15450_v47  ;;  %v20549_v2 = vand.u32 4294901760, %v15274_v55  ;;  %v20369_v55 = vand.u32 4294901760, %v15581_v61 }
 0x101   :  { %1972 = vmatpush.msra.mxu1 %v1971_v17  ;;  %2078 = vmatpush.msra.mxu3 %v15454_v21  ;;  %v20550_v17 = vand.u32 4294901760, %v15539_v6 }
 0x102   :  { %2082 = vmatmul.f32.vlgmr.msra.gmra.mxu3 %v1868_v45  ;;  %2107 = vmatpush.msrb.mxu0 %v20549_v2  ;;  %v15611_v45 = vsub.f32 %v174_v1, %v15583_v33  ;;  %v2282_v2 = vsub.f32 %v15558_v32, %v20370_v34  ;;  %v20371_v1 = vand.u32 4294901760, %v15598_v59 }
 0x103   :  { %2209 = vmatpush.msrb.mxu2 %v15484_v25  ;;  %2260 = vmatpush.msrb.mxu3 %v2259_v56  ;;  %v2276_v62 = vsub.f32 %v15539_v6, %v20550_v17  ;;  %v20551_v56 = vand.u32 4294901760, %v15287_v58  ;;  %v15630_v58 = vand.u32 4294901760, %v171_v11 }
 0x104   :  { %1978 = vmatpush.msra.mxu1 %v1977_v26  ;;  %1879 = vmatmul.f32.gmra.mxu0 %v1878_v22  ;;  %v170_v22 = vld [vmem:[%s20290_s2 + $0x2a0] sm:$0xff]  ;;  %v15628_v26 = vsub.f32 %v173_v20, %v15600_v53  ;;  %v20372_v20 = vand.u32 4294901760, %v15611_v45 }
 0x105   :  { %1980 = vmatmul.f32.vlgmr.msra.gmra.mxu1 %v15379_v40  ;;  %2111 = vmatpush.msrb.mxu0 %v20551_v56  ;;  %v2277_v17 = vand.u32 4294901760, %v2276_v62  ;;  %v169_v56 = vld [vmem:[%s20290_s2 + $0x298] sm:$0xff]  ;;  %v15646_v4 = vand.u32 4294901760, %v170_v22  ;;  %v2283_v62 = vand.u32 4294901760, %v2282_v2 }
 0x106   :  { %2166 = vmatpush.msrb.mxu1 %v15208_v24  ;;  %2211 = vmatpush.msrb.mxu2 %v15502_v0  ;;  %v2288_v24 = vsub.f32 %v15581_v61, %v20369_v55  ;;  %v20373_v55 = vand.u32 4294901760, %v15628_v26  ;;  %v15659_v34 = vand.u32 4294901760, %v169_v56 }
 0x107   :  { %2266 = vmatpush.msrb.mxu3 %v2265_v63  ;;  %2115 = vmatpush.msrb.mxu0 %v20552_v13  ;;  %v15644_v63 = vsub.f32 %v172_v31, %v15613_v27  ;;  %v20553_v13 = vand.u32 4294901760, %v15323_v15  ;;  %v15657_v31 = vsub.f32 %v171_v11, %v15630_v58  ;;  %v20555_v15 = vand.u32 4294901760, %v15328_v7 }
 0x108   :  { %2168 = vmatpush.msrb.mxu1 %v15218_v23  ;;  %2213 = vmatpush.msrb.mxu2 %v15514_v12  ;;  %v2294_v23 = vsub.f32 %v15598_v59, %v20371_v1  ;;  %v2289_v2 = vand.u32 4294901760, %v2288_v24  ;;  %v2300_v11 = vsub.f32 %v15611_v45, %v20372_v20  ;;  %v15674_v1 = vsub.f32 %v170_v22, %v15646_v4 }
 0x109   :  { %2272 = vmatpush.msrb.mxu3 %v2271_v38  ;;  %2043 = vmatmul.f32.gmra.mxu2 %v15492_v3  ;;  %v168_v38 = vld [vmem:[%s20290_s2 + $0x290] sm:$0xff]  ;;  %v2306_v22 = vsub.f32 %v15628_v26, %v20373_v55  ;;  %v20556_v20 = vand.u32 4294901760, %v15355_v8 }
 0x10a   :  { %2119 = vmatpush.msrb.mxu0 %v20553_v13  ;;  %2170 = vmatpush.msrb.mxu1 %v15225_v52  ;;  %v20554_v52 = vand.u32 4294901760, %v15492_v3  ;;  %v20376_v13 = vand.u32 4294901760, %v15644_v63  ;;  %v59_v3 = vld [vmem:[%s20492_s19 + $0x28] sm:$0xff]  ;;  %v15684_v7 = vand.u32 4294901760, %v168_v38  ;;  %v2295_v24 = vand.u32 4294901760, %v2294_v23 }
 0x10b   :  { %2215 = vmatpush.msrb.mxu2 %v15527_v9  ;;  %2278 = vmatpush.msrb.mxu3 %v2277_v17  ;;  %v167_v17 = vld [vmem:[%s20290_s2 + $0x288] sm:$0xff]  ;;  %v15702_v23 = vand.u32 4294901760, %v59_v3  ;;  %v2301_v55 = vand.u32 4294901760, %v2300_v11 }
 0x10c   :  { %2088 = vmatmul.f32.gmra.mxu3 %v20554_v52  ;;  %2123 = vmatpush.msrb.mxu0 %v20555_v15  ;;  %v15692_v15 = vsub.f32 %v169_v56, %v15659_v34  ;;  %v2312_v56 = vsub.f32 %v15644_v63, %v20376_v13  ;;  %v2323_v52 = vand.u32 4294901760, %v15674_v1 }
 0x10d   :  { %2172 = vmatpush.msrb.mxu1 %v15246_v35  ;;  %2217 = vmatpush.msrb.mxu2 %v15553_v36  ;;  %v166_v35 = vld [vmem:[%s20290_s2 + $0x280] sm:$0xff]  ;;  %v20557_v36 = vand.u32 4294901760, %v15373_v54  ;;  %v20559_v54 = vand.u32 4294901760, %v15390_v37 }
 0x10e   :  { %2284 = vmatpush.msrb.mxu3 %v2283_v62  ;;  %1984 = vmatmul.f32.gmra.mxu1 %v15459_v46  ;;  %v15700_v62 = vand.u32 4294901760, %v167_v17  ;;  %v15715_v8 = vand.u32 4294901760, %v166_v35  ;;  %v2329_v13 = vand.u32 4294901760, %v15692_v15 }
 0x10f   :  { %2127 = vmatpush.msrb.mxu0 %v20556_v20  ;;  %2174 = vmatpush.msrb.mxu1 %v15251_v30  ;;  %v15713_v30 = vsub.f32 %v168_v38, %v15684_v7  ;;  %v2307_v20 = vand.u32 4294901760, %v2306_v22  ;;  %v2313_v38 = vand.u32 4294901760, %v2312_v56  ;;  %v20560_v22 = vand.u32 4294901760, %v15402_v50  ;;  %v75_v50 = vld [vmem:[%s20492_s19 + $0xa8] sm:$0xff] }
 0x110   :  { %2219 = vmatpush.msrb.mxu2 %v15566_v29  ;;  %2290 = vmatpush.msrb.mxu3 %v2289_v2  ;;  %v20558_v2 = vand.u32 4294901760, %v15657_v31  ;;  %v15740_v37 = vsub.f32 %v166_v35, %v15715_v8 }
 0x111   :  { %2131 = vmatpush.msrb.mxu0 %v20557_v36  ;;  %2176 = vmatpush.msrb.mxu1 %v15271_v60  ;;  %v15726_v60 = vsub.f32 %v167_v17, %v15700_v62  ;;  %v15729_v36 = vsub.f32 %v59_v3, %v15702_v23  ;;  %v20561_v3 = vand.u32 4294901760, %v15419_v14 }
 0x112   :  { %2221 = vmatpush.msrb.mxu2 %v15583_v33  ;;  %2296 = vmatpush.msrb.mxu3 %v2295_v24  ;;  %v2318_v11 = vsub.f32 %v15657_v31, %v20558_v2  ;;  %v2324_v24 = vsub.f32 %v15674_v1, %v2323_v52  ;;  %v2347_v2 = vand.u32 4294901760, %v15740_v37 }
 0x113   :  { %2135 = vmatpush.msrb.mxu0 %v20559_v54  ;;  %2178 = vmatpush.msrb.mxu1 %v15291_v42  ;;  %v2335_v42 = vand.u32 4294901760, %v15713_v30  ;;  %v2240_v35 = vand.u32 4294901760, %v15729_v36  ;;  %v20563_v54 = vand.u32 4294901760, %v15466_v28 }
 0x114   :  { %2223 = vmatpush.msrb.mxu2 %v15600_v53  ;;  %2302 = vmatpush.msrb.mxu3 %v2301_v55  ;;  %v2319_v17 = vand.u32 4294901760, %v2318_v11  ;;  %v2330_v55 = vsub.f32 %v15692_v15, %v2329_v13  ;;  %v2325_v56 = vand.u32 4294901760, %v2324_v24 }
 0x115   :  { %2139 = vmatpush.msrb.mxu0 %v20560_v22  ;;  %2180 = vmatpush.msrb.mxu1 %v15298_v48  ;;  %v2341_v48 = vand.u32 4294901760, %v15726_v60  ;;  %v2336_v14 = vsub.f32 %v15713_v30, %v2335_v42 }
 0x116   :  { %2225 = vmatpush.msrb.mxu2 %v15613_v27  ;;  %2308 = vmatpush.msrb.mxu3 %v2307_v20  ;;  %v20562_v20 = vand.u32 4294901760, %v15437_v18  ;;  %v2331_v11 = vand.u32 4294901760, %v2330_v55  ;;  %v2241_v18 = vsub.f32 %v15729_v36, %v2240_v35  ;;  %v20566_v55 = vand.u32 4294901760, %v15512_v49 }
 0x117   :  { %2143 = vmatpush.msrb.mxu0 %v20561_v3  ;;  %2182 = vmatpush.msrb.mxu1 %v15320_v19  ;;  %v15762_v19 = vand.u32 4294901760, %v75_v50  ;;  %v2337_v28 = vand.u32 4294901760, %v2336_v14  ;;  %v189_v3 = vld [vmem:[%s20290_s2 + $0x338] sm:$0xff] }
 0x118   :  { %2227 = vmatpush.msrb.mxu2 %v15630_v58  ;;  %2314 = vmatpush.msrb.mxu3 %v2313_v38  ;;  %v20564_v38 = vand.u32 4294901760, %v15489_v39  ;;  %v2242_v39 = vand.u32 4294901760, %v2241_v18  ;;  %v187_v18 = vld [vmem:[%s20290_s2 + $0x328] sm:$0xff] }
 0x119   :  { %2147 = vmatpush.msrb.mxu0 %v20562_v20  ;;  %2184 = vmatpush.msrb.mxu1 %v15339_v57  ;;  %v2342_v57 = vsub.f32 %v15726_v60, %v2341_v48  ;;  %v15782_v24 = vsub.f32 %v75_v50, %v15762_v19 }
 0x11a   :  { %2229 = vmatpush.msrb.mxu2 %v15646_v4  ;;  %2320 = vmatpush.msrb.mxu3 %v2319_v17 }
 0x11b   :  { %2151 = vmatpush.msrb.mxu0 %v20563_v54  ;;  %2186 = vmatpush.msrb.mxu1 %v15351_v43  ;;  %v2348_v43 = vsub.f32 %v15740_v37, %v2347_v2  ;;  %v2343_v22 = vand.u32 4294901760, %v2342_v57  ;;  %v2248_v17 = vand.u32 4294901760, %v15782_v24 }
 0x11c   :  { %2231 = vmatpush.msrb.mxu2 %v15659_v34  ;;  %2326 = vmatpush.msrb.mxu3 %v2325_v56 }
 0x11d   :  { %2155 = vmatpush.msrb.mxu0 %v20564_v38  ;;  %2188 = vmatpush.msrb.mxu1 %v15370_v44  ;;  %v2349_v44 = vand.u32 4294901760, %v2348_v43 }
 0x11e   :  { %2233 = vmatpush.msrb.mxu2 %v15684_v7  ;;  %2332 = vmatpush.msrb.mxu3 %v2331_v11  ;;  %v15968_v11 = vand.u32 4294901760, %v189_v3 }
 0x11f   :  { %2157 = vmatmul.f32.vlgmr.msrb.gmra.mxu0 %v15379_v40  ;;  %2190 = vmatpush.msrb.mxu1 %v15386_v41  ;;  %v20565_v41 = vand.u32 4294901760, %v15482_v51 }
 0x120   :  { %2362 = vmatpush.msra.mxu0 %v15482_v51  ;;  %2235 = vmatpush.msrb.mxu2 %v15700_v62  ;;  %v20567_v51 = vand.u32 4294901760, %v15525_v10 }
 0x121   :  { %2338 = vmatpush.msrb.mxu3 %v2337_v28  ;;  %2192 = vmatpush.msrb.mxu1 %v15398_v5  ;;  %v2249_v5 = vsub.f32 %v15782_v24, %v2248_v17 }
 0x122   :  { %2365 = vmatpush.msra.mxu0 %v15512_v49  ;;  %2237 = vmatpush.msrb.mxu2 %v15715_v8  ;;  %v20572_v49 = vld [vmem:[#allocation5_spill] sm:$0xff] }
 0x123   :  { %2344 = vmatpush.msrb.mxu3 %v2343_v22  ;;  %2243 = vmatmul.f32.vlgmr.msrb.gmra.mxu2 %v2242_v39 }
 0x124   :  { %2368 = vmatpush.msra.mxu0 %v15525_v10  ;;  %2467 = vmatpush.msra.mxu2 %v20565_v41  ;;  %v195_v10 = vld [vmem:[%s20290_s2 + $0x368] sm:$0xff]  ;;  %v60_v41 = vld [vmem:[%s20492_s19 + $0x30] sm:$0xff] }
 0x125   :  { %2194 = vmatpush.msrb.mxu1 %v15430_v16  ;;  %2350 = vmatpush.msrb.mxu3 %v2349_v44  ;;  %v2250_v16 = vand.u32 4294901760, %v2249_v5  ;;  %v16003_v44 = vsub.f32 %v189_v3, %v15968_v11 }
 0x126   :  { %2352 = vmatmul.f32.vlgmr.msrb.gmra.mxu3 %v15702_v23  ;;  %2371 = vmatpush.msra.mxu0 %v15539_v6 }
 0x127   :  { %2471 = vmatpush.msra.mxu2 %v20566_v55  ;;  %2538 = vmatpush.msra.mxu3 %v15450_v47  ;;  %v185_v55 = vld [vmem:[%s20290_s2 + $0x318] sm:$0xff] }
 0x128   :  { %2196 = vmatpush.msrb.mxu1 %v15454_v21  ;;  %2161 = vmatmul.f32.gmra.mxu0 %v15459_v46  ;;  %v20568_v21 = vand.u32 4294901760, %v15539_v6  ;;  %v20576_v6 = vand.u32 4294901760, %v15657_v31 }
 0x129   :  { %2198 = vmatmul.f32.vlgmr.msrb.gmra.mxu1 %v15379_v40  ;;  %2374 = vmatpush.msra.mxu0 %v15558_v32  ;;  %v20569_v40 = vand.u32 4294901760, %v15558_v32 }
 0x12a   :  { %2420 = vmatpush.msra.mxu1 %v15450_v47  ;;  %2475 = vmatpush.msra.mxu2 %v20567_v51  ;;  %v20570_v47 = vand.u32 4294901760, %v15581_v61 }
 0x12b   :  { %2540 = vmatpush.msra.mxu3 %v15484_v25  ;;  %2377 = vmatpush.msra.mxu0 %v15581_v61  ;;  %v20573_v61 = vand.u32 4294901760, %v15611_v45 }
 0x12c   :  { %2422 = vmatpush.msra.mxu1 %v15484_v25  ;;  %2479 = vmatpush.msra.mxu2 %v20568_v21  ;;  %v20575_v25 = vand.u32 4294901760, %v15644_v63 }
 0x12d   :  { %2542 = vmatpush.msra.mxu3 %v15502_v0  ;;  %2251 = vmatmul.f32.gmra.mxu2 %v2250_v16 }
 0x12e   :  { %2380 = vmatpush.msra.mxu0 %v15598_v59  ;;  %2424 = vmatpush.msra.mxu1 %v15502_v0  ;;  %v20571_v0 = vand.u32 4294901760, %v15598_v59 }
 0x12f   :  { %2483 = vmatpush.msra.mxu2 %v20569_v40  ;;  %2544 = vmatpush.msra.mxu3 %v15514_v12 }
 0x130   :  { %2356 = vmatmul.f32.gmra.mxu3 %v15762_v19  ;;  %2383 = vmatpush.msra.mxu0 %v15611_v45  ;;  %v193_v45 = vld [vmem:[%s20290_s2 + $0x358] sm:$0xff] }
 0x131   :  { %2426 = vmatpush.msra.mxu1 %v15514_v12  ;;  %2487 = vmatpush.msra.mxu2 %v20570_v47  ;;  %v20574_v12 = vand.u32 4294901760, %v15628_v26 }
 0x132   :  { %2546 = vmatpush.msra.mxu3 %v15527_v9  ;;  %2202 = vmatmul.f32.gmra.mxu1 %v15459_v46  ;;  %v196_v46 = vld [vmem:[%s20290_s2 + $0x370] sm:$0xff] }
 0x133   :  { %2386 = vmatpush.msra.mxu0 %v15628_v26  ;;  %2428 = vmatpush.msra.mxu1 %v15527_v9  ;;  %v197_v9 = vld [vmem:[%s20290_s2 + $0x378] sm:$0xff]  ;;  %v15866_v32 = vand.u32 4294901760, %v196_v46  ;;  %v15899_v26 = vand.u32 4294901760, %v193_v45 }
 0x134   :  { %2491 = vmatpush.msra.mxu2 %v20571_v0  ;;  %2548 = vmatpush.msra.mxu3 %v20572_v49  ;;  %v184_v0 = vld [vmem:[%s20290_s2 + $0x310] sm:$0xff] }
 0x135   :  { %2389 = vmatpush.msra.mxu0 %v15644_v63  ;;  %2430 = vmatpush.msra.mxu1 %v20572_v49  ;;  %v16027_v49 = vand.u32 4294901760, %v60_v41 }
 0x136   :  { %2495 = vmatpush.msra.mxu2 %v20573_v61  ;;  %2550 = vmatpush.msra.mxu3 %v15566_v29 }
 0x137   :  { %2392 = vmatpush.msra.mxu0 %v15657_v31  ;;  %2432 = vmatpush.msra.mxu1 %v15566_v29  ;;  %v15856_v29 = vand.u32 4294901760, %v197_v9  ;;  %v192_v31 = vld [vmem:[%s20290_s2 + $0x350] sm:$0xff] }
 0x138   :  { %2499 = vmatpush.msra.mxu2 %v20574_v12  ;;  %2552 = vmatpush.msra.mxu3 %v15583_v33  ;;  %v20382_v12 = vand.u32 4294901760, %v16003_v44 }
 0x139   :  { %2395 = vmatpush.msra.mxu0 %v15674_v1  ;;  %2434 = vmatpush.msra.mxu1 %v15583_v33  ;;  %v15873_v33 = vand.u32 4294901760, %v195_v10  ;;  %v15876_v59 = vsub.f32 %v197_v9, %v15856_v29  ;;  %v16034_v9 = vand.u32 4294901760, %v185_v55 }
 0x13a   :  { %2503 = vmatpush.msra.mxu2 %v20575_v25  ;;  %2554 = vmatpush.msra.mxu3 %v15600_v53 }
 0x13b   :  { %2398 = vmatpush.msra.mxu0 %v15692_v15  ;;  %2436 = vmatpush.msra.mxu1 %v15600_v53  ;;  %v194_v53 = vld [vmem:[%s20290_s2 + $0x360] sm:$0xff]  ;;  %v15903_v63 = vsub.f32 %v195_v10, %v15873_v33 }
 0x13c   :  { %2507 = vmatpush.msra.mxu2 %v20576_v6  ;;  %2556 = vmatpush.msra.mxu3 %v15613_v27  ;;  %v15894_v1 = vand.u32 4294901760, %v194_v53  ;;  %v16046_v6 = vand.u32 4294901760, %v184_v0 }
 0x13d   :  { %2401 = vmatpush.msra.mxu0 %v15713_v30  ;;  %2438 = vmatpush.msra.mxu1 %v15613_v27  ;;  %v15890_v27 = vsub.f32 %v196_v46, %v15866_v32 }
 0x13e   :  { %2511 = vmatpush.msra.mxu2 %v2323_v52  ;;  %2558 = vmatpush.msra.mxu3 %v15630_v58  ;;  %v15919_v52 = vand.u32 4294901760, %v192_v31  ;;  %v15922_v15 = vsub.f32 %v194_v53, %v15894_v1 }
 0x13f   :  { %2404 = vmatpush.msra.mxu0 %v15726_v60  ;;  %2440 = vmatpush.msra.mxu1 %v15630_v58  ;;  %v2629_v58 = vand.u32 4294901760, %v15876_v59  ;;  %v15935_v60 = vsub.f32 %v193_v45, %v15899_v26 }
 0x140   :  { %2515 = vmatpush.msra.mxu2 %v2329_v13  ;;  %2560 = vmatpush.msra.mxu3 %v15646_v4  ;;  %v191_v13 = vld [vmem:[%s20290_s2 + $0x348] sm:$0xff]  ;;  %v15955_v56 = vsub.f32 %v192_v31, %v15919_v52  ;;  %v16059_v31 = vsub.f32 %v60_v41, %v16027_v49 }
 0x141   :  { %2407 = vmatpush.msra.mxu0 %v15740_v37  ;;  %2442 = vmatpush.msra.mxu1 %v15646_v4  ;;  %v2635_v4 = vand.u32 4294901760, %v15890_v27  ;;  %v2630_v30 = vsub.f32 %v15876_v59, %v2629_v58 }
 0x142   :  { %2519 = vmatpush.msra.mxu2 %v2335_v42  ;;  %2562 = vmatpush.msra.mxu3 %v15659_v34  ;;  %v15939_v42 = vand.u32 4294901760, %v191_v13  ;;  %v20385_v28 = vand.u32 4294901760, %v15955_v56 }
 0x143   :  { %2410 = vmatmul.f32.vlgmr.msra.gmra.mxu0 %v15729_v36  ;;  %2444 = vmatpush.msra.mxu1 %v15659_v34  ;;  %v190_v34 = vld [vmem:[%s20290_s2 + $0x340] sm:$0xff]  ;;  %v2636_v37 = vsub.f32 %v15890_v27, %v2635_v4  ;;  %v2631_v20 = vand.u32 4294901760, %v2630_v30 }
 0x144   :  { %2579 = vmatpush.msrb.mxu0 %v15856_v29  ;;  %2523 = vmatpush.msra.mxu2 %v2341_v48  ;;  %v15946_v50 = vand.u32 4294901760, %v190_v34  ;;  %v20391_v48 = vand.u32 4294901760, %v15922_v15  ;;  %v186_v36 = vld [vmem:[%s20290_s2 + $0x320] sm:$0xff]  ;;  %v2660_v51 = vsub.f32 %v15955_v56, %v20385_v28  ;;  %v208_v28 = vld [vmem:[%s20290_s2 + $0x3d0] sm:$0xff] }
 0x145   :  { %2564 = vmatpush.msra.mxu3 %v15684_v7  ;;  %2446 = vmatpush.msra.mxu1 %v15684_v7  ;;  %v2641_v7 = vand.u32 4294901760, %v15903_v63  ;;  %v2637_v54 = vand.u32 4294901760, %v2636_v37  ;;  %v16018_v21 = vand.u32 4294901760, %v186_v36  ;;  %v213_v37 = vld [vmem:[%s20290_s2 + $0x3f8] sm:$0xff] }
 0x146   :  { %2581 = vmatpush.msrb.mxu0 %v15866_v32  ;;  %2527 = vmatpush.msra.mxu2 %v2347_v2  ;;  %v20388_v2 = vand.u32 4294901760, %v15935_v60  ;;  %v15976_v57 = vsub.f32 %v190_v34, %v15946_v50  ;;  %v2648_v38 = vsub.f32 %v15922_v15, %v20391_v48  ;;  %v2661_v10 = vand.u32 4294901760, %v2660_v51 }
 0x147   :  { %2566 = vmatpush.msra.mxu3 %v15700_v62  ;;  %2529 = vmatmul.f32.vlgmr.msra.gmra.mxu2 %v15702_v23  ;;  %v2642_v14 = vsub.f32 %v15903_v63, %v2641_v7  ;;  %v16050_v45 = vsub.f32 %v186_v36, %v16018_v21  ;;  %v2678_v34 = vsub.f32 %v16003_v44, %v20382_v12  ;;  %v16098_v41 = vand.u32 4294901760, %v213_v37 }
 0x148   :  { %2583 = vmatpush.msrb.mxu0 %v15873_v33  ;;  %2734 = vmatpush.msrb.mxu2 %v15876_v59  ;;  %v2654_v22 = vsub.f32 %v15935_v60, %v20388_v2  ;;  %v20383_v5 = vand.u32 4294901760, %v15976_v57  ;;  %v2649_v16 = vand.u32 4294901760, %v2648_v38  ;;  %v2612_v38 = vand.u32 4294901760, %v16059_v31 }
 0x149   :  { %2448 = vmatpush.msra.mxu1 %v15700_v62  ;;  %2568 = vmatpush.msra.mxu3 %v15715_v8  ;;  %v188_v62 = vld [vmem:[%s20290_s2 + $0x330] sm:$0xff]  ;;  %v2643_v43 = vand.u32 4294901760, %v2642_v14  ;;  %v182_v14 = vld [vmem:[%s20290_s2 + $0x300] sm:$0xff] }
 0x14a   :  { %2570 = vmatmul.f32.vlgmr.msra.gmra.mxu3 %v15702_v23  ;;  %2585 = vmatpush.msrb.mxu0 %v15894_v1  ;;  %v15971_v23 = vsub.f32 %v191_v13, %v15939_v42  ;;  %v2655_v47 = vand.u32 4294901760, %v2654_v22  ;;  %v2672_v25 = vsub.f32 %v15976_v57, %v20383_v5 }
 0x14b   :  { %2737 = vmatpush.msrb.mxu2 %v15890_v27  ;;  %2792 = vmatpush.msrb.mxu3 %v15856_v29  ;;  %v205_v27 = vld [vmem:[%s20290_s2 + $0x3b8] sm:$0xff] }
 0x14c   :  { %2450 = vmatpush.msra.mxu1 %v15715_v8  ;;  %2415 = vmatmul.f32.gmra.mxu0 %v15782_v24  ;;  %v15987_v8 = vand.u32 4294901760, %v188_v62  ;;  %v20384_v39 = vand.u32 4294901760, %v15971_v23  ;;  %v16067_v24 = vsub.f32 %v185_v55, %v16034_v9  ;;  %v16102_v55 = vand.u32 4294901760, %v182_v14 }
 0x14d   :  { %2454 = vmatmul.f32.vlgmr.msra.gmra.mxu1 %v2240_v35  ;;  %2587 = vmatpush.msrb.mxu0 %v15899_v26  ;;  %v15999_v35 = vand.u32 4294901760, %v187_v18 }
 0x14e   :  { %2632 = vmatpush.msrb.mxu1 %v2631_v20  ;;  %2740 = vmatpush.msrb.mxu2 %v15903_v63  ;;  %v16021_v40 = vsub.f32 %v188_v62, %v15987_v8  ;;  %v2666_v61 = vsub.f32 %v15971_v23, %v20384_v39  ;;  %v20377_v62 = vand.u32 4294901760, %v16050_v45  ;;  %v20379_v36 = vand.u32 4294901760, %v16067_v24  ;;  %v204_v63 = vld [vmem:[%s20290_s2 + $0x3b0] sm:$0xff] }
 0x14f   :  { %2794 = vmatpush.msrb.mxu3 %v15866_v32  ;;  %2589 = vmatpush.msrb.mxu0 %v15919_v52  ;;  %v16038_v46 = vsub.f32 %v187_v18, %v15999_v35  ;;  %v76_v18 = vld [vmem:[%s20492_s19 + $0xb0] sm:$0xff] }
 0x150   :  { %2638 = vmatpush.msrb.mxu1 %v2637_v54  ;;  %2743 = vmatpush.msrb.mxu2 %v15922_v15  ;;  %v20380_v53 = vand.u32 4294901760, %v16021_v40  ;;  %v2667_v13 = vand.u32 4294901760, %v2666_v61  ;;  %v16085_v54 = vsub.f32 %v184_v0, %v16046_v6  ;;  %v16107_v51 = vand.u32 4294901760, %v76_v18 }
 0x151   :  { %2796 = vmatpush.msrb.mxu3 %v15873_v33  ;;  %2533 = vmatmul.f32.gmra.mxu2 %v15762_v19  ;;  %v20378_v30 = vand.u32 4294901760, %v16038_v46  ;;  %v2696_v0 = vsub.f32 %v16050_v45, %v20377_v62  ;;  %v16137_v62 = vsub.f32 %v182_v14, %v16102_v55 }
 0x152   :  { %2591 = vmatpush.msrb.mxu0 %v15939_v42  ;;  %2644 = vmatpush.msrb.mxu1 %v2643_v43  ;;  %v2684_v3 = vsub.f32 %v16021_v40, %v20380_v53  ;;  %v2679_v43 = vand.u32 4294901760, %v2678_v34 }
 0x153   :  { %2746 = vmatpush.msrb.mxu2 %v15935_v60  ;;  %2798 = vmatpush.msrb.mxu3 %v15894_v1  ;;  %v2690_v22 = vsub.f32 %v16038_v46, %v20378_v30  ;;  %v16140_v30 = vsub.f32 %v76_v18, %v16107_v51  ;;  %v209_v18 = vld [vmem:[%s20290_s2 + $0x3d8] sm:$0xff] }
 0x154   :  { %2574 = vmatmul.f32.gmra.mxu3 %v15762_v19  ;;  %2593 = vmatpush.msrb.mxu0 %v15946_v50  ;;  %v183_v19 = vld [vmem:[%s20290_s2 + $0x308] sm:$0xff]  ;;  %v16175_v39 = vand.u32 4294901760, %v209_v18 }
 0x155   :  { %2650 = vmatpush.msrb.mxu1 %v2649_v16  ;;  %2749 = vmatpush.msrb.mxu2 %v15955_v56  ;;  %v16078_v20 = vand.u32 4294901760, %v183_v19  ;;  %v212_v16 = vld [vmem:[%s20290_s2 + $0x3f0] sm:$0xff]  ;;  %v2691_v34 = vand.u32 4294901760, %v2690_v22  ;;  %v20390_v5 = vand.u32 4294901760, %v16140_v30 }
 0x156   :  { %2800 = vmatpush.msrb.mxu3 %v15899_v26  ;;  %2460 = vmatmul.f32.gmra.mxu1 %v2248_v17  ;;  %v2673_v17 = vand.u32 4294901760, %v2672_v25  ;;  %v20381_v25 = vand.u32 4294901760, %v16085_v54  ;;  %v16206_v59 = vsub.f32 %v209_v18, %v16175_v39 }
 0x157   :  { %2595 = vmatpush.msrb.mxu0 %v15968_v11  ;;  %2656 = vmatpush.msrb.mxu1 %v2655_v47  ;;  %v2685_v47 = vand.u32 4294901760, %v2684_v3  ;;  %v16114_v61 = vsub.f32 %v183_v19, %v16078_v20  ;;  %v2702_v19 = vsub.f32 %v16067_v24, %v20379_v36  ;;  %v16132_v3 = vand.u32 4294901760, %v212_v16 }
 0x158   :  { %2752 = vmatpush.msrb.mxu2 %v15971_v23  ;;  %2802 = vmatpush.msrb.mxu3 %v15919_v52  ;;  %v2708_v22 = vsub.f32 %v16085_v54, %v20381_v25 }
 0x159   :  { %2597 = vmatpush.msrb.mxu0 %v15987_v8  ;;  %2662 = vmatpush.msrb.mxu1 %v2661_v10  ;;  %v2613_v10 = vsub.f32 %v16059_v31, %v2612_v38  ;;  %v20386_v36 = vand.u32 4294901760, %v16114_v61  ;;  %v16160_v25 = vsub.f32 %v212_v16, %v16132_v3 }
 0x15a   :  { %2755 = vmatpush.msrb.mxu2 %v15976_v57  ;;  %2804 = vmatpush.msrb.mxu3 %v15939_v42 }
 0x15b   :  { %2599 = vmatpush.msrb.mxu0 %v15999_v35  ;;  %2668 = vmatpush.msrb.mxu1 %v2667_v13  ;;  %v211_v13 = vld [vmem:[%s20290_s2 + $0x3e8] sm:$0xff]  ;;  %v2614_v14 = vand.u32 4294901760, %v2613_v10  ;;  %v20389_v10 = vand.u32 4294901760, %v16137_v62 }
 0x15c   :  { %2758 = vmatpush.msrb.mxu2 %v16003_v44  ;;  %2806 = vmatpush.msrb.mxu3 %v15946_v50  ;;  %v16150_v53 = vand.u32 4294901760, %v211_v13 }
 0x15d   :  { %2601 = vmatpush.msrb.mxu0 %v16018_v21  ;;  %2674 = vmatpush.msrb.mxu1 %v2673_v17  ;;  %v16130_v17 = vsub.f32 %v213_v37, %v16098_v41  ;;  %v2697_v37 = vand.u32 4294901760, %v2696_v0 }
 0x15e   :  { %2761 = vmatpush.msrb.mxu2 %v16021_v40  ;;  %2808 = vmatpush.msrb.mxu3 %v15968_v11  ;;  %v16173_v16 = vsub.f32 %v211_v13, %v16150_v53 }
 0x15f   :  { %2603 = vmatpush.msrb.mxu0 %v16034_v9  ;;  %2680 = vmatpush.msrb.mxu1 %v2679_v43  ;;  %v210_v43 = vld [vmem:[%s20290_s2 + $0x3e0] sm:$0xff]  ;;  %v20387_v0 = vand.u32 4294901760, %v16130_v17 }
 0x160   :  { %2764 = vmatpush.msrb.mxu2 %v16038_v46  ;;  %2810 = vmatpush.msrb.mxu3 %v15987_v8  ;;  %v16162_v12 = vand.u32 4294901760, %v210_v43  ;;  %v20393_v2 = vand.u32 4294901760, %v16173_v16 }
 0x161   :  { %2605 = vmatpush.msrb.mxu0 %v16046_v6  ;;  %2686 = vmatpush.msrb.mxu1 %v2685_v47  ;;  %v2703_v47 = vand.u32 4294901760, %v2702_v19  ;;  %v2714_v19 = vsub.f32 %v16114_v61, %v20386_v36  ;;  %v207_v36 = vld [vmem:[%s20290_s2 + $0x3c8] sm:$0xff] }
 0x162   :  { %2767 = vmatpush.msrb.mxu2 %v16050_v45  ;;  %2812 = vmatpush.msrb.mxu3 %v15999_v35  ;;  %v16187_v13 = vsub.f32 %v210_v43, %v16162_v12 }
 0x163   :  { %2607 = vmatpush.msrb.mxu0 %v16078_v20  ;;  %2692 = vmatpush.msrb.mxu1 %v2691_v34  ;;  %v2709_v34 = vand.u32 4294901760, %v2708_v22  ;;  %v20392_v22 = vand.u32 4294901760, %v16160_v25  ;;  %v2715_v43 = vand.u32 4294901760, %v2714_v19  ;;  %v20395_v19 = vand.u32 4294901760, %v16206_v59 }
 0x164   :  { %2770 = vmatpush.msrb.mxu2 %v16067_v24  ;;  %2814 = vmatpush.msrb.mxu3 %v16018_v21 }
 0x165   :  { %2609 = vmatpush.msrb.mxu0 %v16102_v55  ;;  %2698 = vmatpush.msrb.mxu1 %v2697_v37  ;;  %v3002_v37 = vsub.f32 %v16130_v17, %v20387_v0  ;;  %v16201_v0 = vand.u32 4294901760, %v208_v28  ;;  %v3008_v18 = vsub.f32 %v16160_v25, %v20392_v22  ;;  %v3014_v22 = vsub.f32 %v16173_v16, %v20393_v2 }
 0x166   :  { %2773 = vmatpush.msrb.mxu2 %v16085_v54  ;;  %2816 = vmatpush.msrb.mxu3 %v16034_v9 }
 0x167   :  { %2615 = vmatmul.f32.vlgmr.msrb.gmra.mxu0 %v2614_v14  ;;  %2704 = vmatpush.msrb.mxu1 %v2703_v47  ;;  %v2720_v14 = vsub.f32 %v16137_v62, %v20389_v10  ;;  %v2621_v47 = vsub.f32 %v16140_v30, %v20390_v5  ;;  %20577 = vst [vmem:[#allocation5_spill] sm:$0xff] %v16201_v0  ;;  %v16214_v10 = vand.u32 4294901760, %v207_v36 }
 0x168   :  { %2839 = vmatpush.msra.mxu0 %v2629_v58  ;;  %2776 = vmatpush.msrb.mxu2 %v16114_v61  ;;  %v206_v58 = vld [vmem:[%s20290_s2 + $0x3c0] sm:$0xff]  ;;  %v16229_v48 = vsub.f32 %v208_v28, %v16201_v0 }
 0x169   :  { %2818 = vmatpush.msrb.mxu3 %v16046_v6  ;;  %2710 = vmatpush.msrb.mxu1 %v2709_v34  ;;  %v3003_v34 = vand.u32 4294901760, %v3002_v37  ;;  %v2622_v5 = vand.u32 4294901760, %v2621_v47  ;;  %v16231_v37 = vand.u32 4294901760, %v206_v58  ;;  %v16246_v28 = vsub.f32 %v207_v36, %v16214_v10 }
 0x16a   :  { %2843 = vmatpush.msra.mxu0 %v2635_v4  ;;  %2779 = vmatpush.msrb.mxu2 %v16137_v62  ;;  %v2721_v4 = vand.u32 4294901760, %v2720_v14  ;;  %v16248_v14 = vand.u32 4294901760, %v205_v27  ;;  %v3009_v47 = vand.u32 4294901760, %v3008_v18  ;;  %v16261_v36 = vand.u32 4294901760, %v204_v63 }
 0x16b   :  { %2820 = vmatpush.msrb.mxu3 %v16078_v20  ;;  %2782 = vmatmul.f32.vlgmr.msrb.gmra.mxu2 %v16059_v31  ;;  %v203_v31 = vld [vmem:[%s20290_s2 + $0x3a8] sm:$0xff]  ;;  %v3015_v18 = vand.u32 4294901760, %v3014_v22  ;;  %v20581_v22 = vand.u32 4294901760, %v15955_v56 }
 0x16c   :  { %2847 = vmatpush.msra.mxu0 %v2641_v7  ;;  %2951 = vmatpush.msra.mxu2 %v16098_v41  ;;  %v20578_v7 = vand.u32 4294901760, %v15922_v15  ;;  %v20394_v15 = vand.u32 4294901760, %v16229_v48 }
 0x16d   :  { %2716 = vmatpush.msrb.mxu1 %v2715_v43  ;;  %2822 = vmatpush.msrb.mxu3 %v16102_v55  ;;  %v20579_v43 = vand.u32 4294901760, %v16187_v13 }
 0x16e   :  { %2826 = vmatmul.f32.vlgmr.msrb.gmra.mxu3 %v2612_v38  ;;  %2851 = vmatpush.msra.mxu0 %v20578_v7  ;;  %v16259_v38 = vsub.f32 %v206_v58, %v16231_v37  ;;  %v3026_v7 = vsub.f32 %v16206_v59, %v20395_v19  ;;  %v20396_v58 = vand.u32 4294901760, %v16246_v28 }
 0x16f   :  { %2953 = vmatpush.msra.mxu2 %v16132_v3  ;;  %3004 = vmatpush.msra.mxu3 %v3003_v34  ;;  %v3020_v2 = vsub.f32 %v16187_v13, %v20579_v43  ;;  %v20580_v34 = vand.u32 4294901760, %v15935_v60  ;;  %v16278_v60 = vand.u32 4294901760, %v203_v31 }
 0x170   :  { %2722 = vmatpush.msrb.mxu1 %v2721_v4  ;;  %2623 = vmatmul.f32.gmra.mxu0 %v2622_v5  ;;  %v202_v5 = vld [vmem:[%s20290_s2 + $0x3a0] sm:$0xff]  ;;  %v16276_v4 = vsub.f32 %v205_v27, %v16248_v14  ;;  %v20397_v27 = vand.u32 4294901760, %v16259_v38 }
 0x171   :  { %2724 = vmatmul.f32.vlgmr.msrb.gmra.mxu1 %v16027_v49  ;;  %2855 = vmatpush.msra.mxu0 %v20580_v34  ;;  %v3021_v43 = vand.u32 4294901760, %v3020_v2  ;;  %v201_v34 = vld [vmem:[%s20290_s2 + $0x398] sm:$0xff]  ;;  %v16294_v56 = vand.u32 4294901760, %v202_v5  ;;  %v3027_v2 = vand.u32 4294901760, %v3026_v7 }
 0x172   :  { %2910 = vmatpush.msra.mxu1 %v15856_v29  ;;  %2955 = vmatpush.msra.mxu2 %v16150_v53  ;;  %v3032_v29 = vsub.f32 %v16229_v48, %v20394_v15  ;;  %v20398_v15 = vand.u32 4294901760, %v16276_v4  ;;  %v16307_v19 = vand.u32 4294901760, %v201_v34 }
 0x173   :  { %3010 = vmatpush.msra.mxu3 %v3009_v47  ;;  %2859 = vmatpush.msra.mxu0 %v20581_v22  ;;  %v16292_v47 = vsub.f32 %v204_v63, %v16261_v36  ;;  %v20582_v22 = vand.u32 4294901760, %v15971_v23  ;;  %v16305_v63 = vsub.f32 %v203_v31, %v16278_v60  ;;  %v20584_v23 = vand.u32 4294901760, %v15976_v57 }
 0x174   :  { %2912 = vmatpush.msra.mxu1 %v15866_v32  ;;  %2957 = vmatpush.msra.mxu2 %v16162_v12  ;;  %v3038_v32 = vsub.f32 %v16246_v28, %v20396_v58  ;;  %v3033_v7 = vand.u32 4294901760, %v3032_v29  ;;  %v3044_v31 = vsub.f32 %v16259_v38, %v20397_v27  ;;  %v16322_v58 = vsub.f32 %v202_v5, %v16294_v56 }
 0x175   :  { %3016 = vmatpush.msra.mxu3 %v3015_v18  ;;  %2787 = vmatmul.f32.gmra.mxu2 %v16140_v30  ;;  %v200_v18 = vld [vmem:[%s20290_s2 + $0x390] sm:$0xff]  ;;  %v3050_v5 = vsub.f32 %v16276_v4, %v20398_v15  ;;  %v20585_v27 = vand.u32 4294901760, %v16003_v44 }
 0x176   :  { %2863 = vmatpush.msra.mxu0 %v20582_v22  ;;  %2914 = vmatpush.msra.mxu1 %v15873_v33  ;;  %v20583_v33 = vand.u32 4294901760, %v16140_v30  ;;  %v20401_v22 = vand.u32 4294901760, %v16292_v47  ;;  %v61_v30 = vld [vmem:[%s20492_s19 + $0x38] sm:$0xff]  ;;  %v16332_v57 = vand.u32 4294901760, %v200_v18  ;;  %v3039_v29 = vand.u32 4294901760, %v3038_v32 }
 0x177   :  { %2959 = vmatpush.msra.mxu2 %v16175_v39  ;;  %3022 = vmatpush.msra.mxu3 %v3021_v43  ;;  %v199_v43 = vld [vmem:[%s20290_s2 + $0x388] sm:$0xff]  ;;  %v16350_v32 = vand.u32 4294901760, %v61_v30  ;;  %v3045_v15 = vand.u32 4294901760, %v3044_v31 }
 0x178   :  { %2832 = vmatmul.f32.gmra.mxu3 %v20583_v33  ;;  %2867 = vmatpush.msra.mxu0 %v20584_v23  ;;  %v16340_v23 = vsub.f32 %v201_v34, %v16307_v19  ;;  %v3056_v34 = vsub.f32 %v16292_v47, %v20401_v22  ;;  %v3067_v33 = vand.u32 4294901760, %v16322_v58 }
 0x179   :  { %2916 = vmatpush.msra.mxu1 %v15894_v1  ;;  %2961 = vmatpush.msra.mxu2 %v16201_v0  ;;  %v198_v1 = vld [vmem:[%s20290_s2 + $0x380] sm:$0xff]  ;;  %v20586_v0 = vand.u32 4294901760, %v16021_v40  ;;  %v20588_v40 = vand.u32 4294901760, %v16038_v46 }
 0x17a   :  { %3028 = vmatpush.msra.mxu3 %v3027_v2  ;;  %2728 = vmatmul.f32.gmra.mxu1 %v16107_v51  ;;  %v16348_v2 = vand.u32 4294901760, %v199_v43  ;;  %v16363_v44 = vand.u32 4294901760, %v198_v1  ;;  %v3073_v22 = vand.u32 4294901760, %v16340_v23 }
 0x17b   :  { %2871 = vmatpush.msra.mxu0 %v20585_v27  ;;  %2918 = vmatpush.msra.mxu1 %v15899_v26  ;;  %v16361_v26 = vsub.f32 %v200_v18, %v16332_v57  ;;  %v3051_v27 = vand.u32 4294901760, %v3050_v5  ;;  %v3057_v18 = vand.u32 4294901760, %v3056_v34  ;;  %v20589_v5 = vand.u32 4294901760, %v16050_v45  ;;  %v77_v45 = vld [vmem:[%s20492_s19 + $0xb8] sm:$0xff] }
 0x17c   :  { %2963 = vmatpush.msra.mxu2 %v16214_v10  ;;  %3034 = vmatpush.msra.mxu3 %v3033_v7  ;;  %v20587_v7 = vand.u32 4294901760, %v16305_v63  ;;  %v16388_v46 = vsub.f32 %v198_v1, %v16363_v44 }
 0x17d   :  { %2875 = vmatpush.msra.mxu0 %v20586_v0  ;;  %2920 = vmatpush.msra.mxu1 %v15919_v52  ;;  %v16374_v52 = vsub.f32 %v199_v43, %v16348_v2  ;;  %v16377_v0 = vsub.f32 %v61_v30, %v16350_v32  ;;  %v20590_v30 = vand.u32 4294901760, %v16067_v24 }
 0x17e   :  { %2965 = vmatpush.msra.mxu2 %v16231_v37  ;;  %3040 = vmatpush.msra.mxu3 %v3039_v29  ;;  %v3062_v31 = vsub.f32 %v16305_v63, %v20587_v7  ;;  %v3068_v29 = vsub.f32 %v16322_v58, %v3067_v33  ;;  %v3091_v7 = vand.u32 4294901760, %v16388_v46 }
 0x17f   :  { %2879 = vmatpush.msra.mxu0 %v20588_v40  ;;  %2922 = vmatpush.msra.mxu1 %v15939_v42  ;;  %v3079_v42 = vand.u32 4294901760, %v16361_v26  ;;  %v2984_v1 = vand.u32 4294901760, %v16377_v0  ;;  %v20592_v40 = vand.u32 4294901760, %v16114_v61 }
 0x180   :  { %2967 = vmatpush.msra.mxu2 %v16248_v14  ;;  %3046 = vmatpush.msra.mxu3 %v3045_v15  ;;  %v3063_v43 = vand.u32 4294901760, %v3062_v31  ;;  %v3074_v15 = vsub.f32 %v16340_v23, %v3073_v22  ;;  %v3069_v34 = vand.u32 4294901760, %v3068_v29 }
 0x181   :  { %2883 = vmatpush.msra.mxu0 %v20589_v5  ;;  %2924 = vmatpush.msra.mxu1 %v15946_v50  ;;  %v3085_v50 = vand.u32 4294901760, %v16374_v52  ;;  %v3080_v24 = vsub.f32 %v16361_v26, %v3079_v42 }
 0x182   :  { %2969 = vmatpush.msra.mxu2 %v16261_v36  ;;  %3052 = vmatpush.msra.mxu3 %v3051_v27  ;;  %v20591_v27 = vand.u32 4294901760, %v16085_v54  ;;  %v3075_v31 = vand.u32 4294901760, %v3074_v15  ;;  %v2985_v54 = vsub.f32 %v16377_v0, %v2984_v1  ;;  %v20595_v15 = vand.u32 4294901760, %v16160_v25 }
 0x183   :  { %2887 = vmatpush.msra.mxu0 %v20590_v30  ;;  %2926 = vmatpush.msra.mxu1 %v15968_v11  ;;  %v16410_v11 = vand.u32 4294901760, %v77_v45  ;;  %v3081_v61 = vand.u32 4294901760, %v3080_v24  ;;  %v221_v30 = vld [vmem:[%s20290_s2 + $0x438] sm:$0xff] }
 0x184   :  { %2971 = vmatpush.msra.mxu2 %v16278_v60  ;;  %3058 = vmatpush.msra.mxu3 %v3057_v18  ;;  %v20593_v18 = vand.u32 4294901760, %v16137_v62  ;;  %v2986_v62 = vand.u32 4294901760, %v2985_v54  ;;  %v219_v54 = vld [vmem:[%s20290_s2 + $0x428] sm:$0xff] }
 0x185   :  { %2891 = vmatpush.msra.mxu0 %v20591_v27  ;;  %2928 = vmatpush.msra.mxu1 %v15987_v8  ;;  %v3086_v8 = vsub.f32 %v16374_v52, %v3085_v50  ;;  %v16430_v29 = vsub.f32 %v77_v45, %v16410_v11 }
 0x186   :  { %2973 = vmatpush.msra.mxu2 %v16294_v56  ;;  %3064 = vmatpush.msra.mxu3 %v3063_v43 }
 0x187   :  { %2895 = vmatpush.msra.mxu0 %v20592_v40  ;;  %2930 = vmatpush.msra.mxu1 %v15999_v35  ;;  %v3092_v35 = vsub.f32 %v16388_v46, %v3091_v7  ;;  %v3087_v5 = vand.u32 4294901760, %v3086_v8  ;;  %v2992_v43 = vand.u32 4294901760, %v16430_v29 }
 0x188   :  { %2975 = vmatpush.msra.mxu2 %v16307_v19  ;;  %3070 = vmatpush.msra.mxu3 %v3069_v34 }
 0x189   :  { %2899 = vmatpush.msra.mxu0 %v20593_v18  ;;  %2932 = vmatpush.msra.mxu1 %v16018_v21  ;;  %v3093_v21 = vand.u32 4294901760, %v3092_v35 }
 0x18a   :  { %2977 = vmatpush.msra.mxu2 %v16332_v57  ;;  %3076 = vmatpush.msra.mxu3 %v3075_v31  ;;  %v16616_v31 = vand.u32 4294901760, %v221_v30 }
 0x18b   :  { %2901 = vmatmul.f32.vlgmr.msra.gmra.mxu0 %v16027_v49  ;;  %2934 = vmatpush.msra.mxu1 %v16034_v9  ;;  %v20594_v9 = vand.u32 4294901760, %v16130_v17 }
 0x18c   :  { %3106 = vmatpush.msrb.mxu0 %v16130_v17  ;;  %2979 = vmatpush.msra.mxu2 %v16348_v2  ;;  %v20596_v17 = vand.u32 4294901760, %v16173_v16 }
 0x18d   :  { %3082 = vmatpush.msra.mxu3 %v3081_v61  ;;  %2936 = vmatpush.msra.mxu1 %v16046_v6  ;;  %v2993_v6 = vsub.f32 %v16430_v29, %v2992_v43 }
 0x18e   :  { %3109 = vmatpush.msrb.mxu0 %v16160_v25  ;;  %2981 = vmatpush.msra.mxu2 %v16363_v44  ;;  %v20601_v25 = vld [vmem:[#allocation5_spill] sm:$0xff] }
 0x18f   :  { %3088 = vmatpush.msra.mxu3 %v3087_v5  ;;  %2987 = vmatmul.f32.vlgmr.msra.gmra.mxu2 %v2986_v62 }
 0x190   :  { %3112 = vmatpush.msrb.mxu0 %v16173_v16  ;;  %3211 = vmatpush.msrb.mxu2 %v20594_v9  ;;  %v227_v16 = vld [vmem:[%s20290_s2 + $0x468] sm:$0xff]  ;;  %v62_v9 = vld [vmem:[%s20492_s19 + $0x40] sm:$0xff] }
 0x191   :  { %2938 = vmatpush.msra.mxu1 %v16078_v20  ;;  %3094 = vmatpush.msra.mxu3 %v3093_v21  ;;  %v2994_v20 = vand.u32 4294901760, %v2993_v6  ;;  %v16651_v21 = vsub.f32 %v221_v30, %v16616_v31 }
 0x192   :  { %3096 = vmatmul.f32.vlgmr.msra.gmra.mxu3 %v16350_v32  ;;  %3115 = vmatpush.msrb.mxu0 %v16187_v13 }
 0x193   :  { %3215 = vmatpush.msrb.mxu2 %v20595_v15  ;;  %3282 = vmatpush.msrb.mxu3 %v16098_v41  ;;  %v217_v15 = vld [vmem:[%s20290_s2 + $0x418] sm:$0xff] }
 0x194   :  { %2940 = vmatpush.msra.mxu1 %v16102_v55  ;;  %2905 = vmatmul.f32.gmra.mxu0 %v16107_v51  ;;  %v20597_v55 = vand.u32 4294901760, %v16187_v13  ;;  %v20605_v13 = vand.u32 4294901760, %v16305_v63 }
 0x195   :  { %2942 = vmatmul.f32.vlgmr.msra.gmra.mxu1 %v16027_v49  ;;  %3118 = vmatpush.msrb.mxu0 %v16206_v59  ;;  %v20598_v49 = vand.u32 4294901760, %v16206_v59 }
 0x196   :  { %3164 = vmatpush.msrb.mxu1 %v16098_v41  ;;  %3219 = vmatpush.msrb.mxu2 %v20596_v17  ;;  %v20599_v41 = vand.u32 4294901760, %v16229_v48 }
 0x197   :  { %3284 = vmatpush.msrb.mxu3 %v16132_v3  ;;  %3121 = vmatpush.msrb.mxu0 %v16229_v48  ;;  %v20602_v48 = vand.u32 4294901760, %v16259_v38 }
 0x198   :  { %3166 = vmatpush.msrb.mxu1 %v16132_v3  ;;  %3223 = vmatpush.msrb.mxu2 %v20597_v55  ;;  %v20604_v3 = vand.u32 4294901760, %v16292_v47 }
 0x199   :  { %3286 = vmatpush.msrb.mxu3 %v16150_v53  ;;  %2995 = vmatmul.f32.gmra.mxu2 %v2994_v20 }
 0x19a   :  { %3124 = vmatpush.msrb.mxu0 %v16246_v28  ;;  %3168 = vmatpush.msrb.mxu1 %v16150_v53  ;;  %v20600_v53 = vand.u32 4294901760, %v16246_v28 }
 0x19b   :  { %3227 = vmatpush.msrb.mxu2 %v20598_v49  ;;  %3288 = vmatpush.msrb.mxu3 %v16162_v12 }
 0x19c   :  { %3100 = vmatmul.f32.gmra.mxu3 %v16410_v11  ;;  %3127 = vmatpush.msrb.mxu0 %v16259_v38  ;;  %v225_v38 = vld [vmem:[%s20290_s2 + $0x458] sm:$0xff] }
 0x19d   :  { %3170 = vmatpush.msrb.mxu1 %v16162_v12  ;;  %3231 = vmatpush.msrb.mxu2 %v20599_v41  ;;  %v20603_v12 = vand.u32 4294901760, %v16276_v4 }
 0x19e   :  { %3290 = vmatpush.msrb.mxu3 %v16175_v39  ;;  %2946 = vmatmul.f32.gmra.mxu1 %v16107_v51  ;;  %v228_v51 = vld [vmem:[%s20290_s2 + $0x470] sm:$0xff] }
 0x19f   :  { %3130 = vmatpush.msrb.mxu0 %v16276_v4  ;;  %3172 = vmatpush.msrb.mxu1 %v16175_v39  ;;  %v229_v39 = vld [vmem:[%s20290_s2 + $0x478] sm:$0xff]  ;;  %v16514_v59 = vand.u32 4294901760, %v228_v51  ;;  %v16547_v4 = vand.u32 4294901760, %v225_v38 }
 0x1a0   :  { %3235 = vmatpush.msrb.mxu2 %v20600_v53  ;;  %3292 = vmatpush.msrb.mxu3 %v20601_v25  ;;  %v216_v53 = vld [vmem:[%s20290_s2 + $0x410] sm:$0xff] }
 0x1a1   :  { %3133 = vmatpush.msrb.mxu0 %v16292_v47  ;;  %3174 = vmatpush.msrb.mxu1 %v20601_v25  ;;  %v16675_v25 = vand.u32 4294901760, %v62_v9 }
 0x1a2   :  { %3239 = vmatpush.msrb.mxu2 %v20602_v48  ;;  %3294 = vmatpush.msrb.mxu3 %v16214_v10 }
 0x1a3   :  { %3136 = vmatpush.msrb.mxu0 %v16305_v63  ;;  %3176 = vmatpush.msrb.mxu1 %v16214_v10  ;;  %v16504_v10 = vand.u32 4294901760, %v229_v39  ;;  %v224_v63 = vld [vmem:[%s20290_s2 + $0x450] sm:$0xff] }
 0x1a4   :  { %3243 = vmatpush.msrb.mxu2 %v20603_v12  ;;  %3296 = vmatpush.msrb.mxu3 %v16231_v37  ;;  %v20407_v12 = vand.u32 4294901760, %v16651_v21 }
 0x1a5   :  { %3139 = vmatpush.msrb.mxu0 %v16322_v58  ;;  %3178 = vmatpush.msrb.mxu1 %v16231_v37  ;;  %v16521_v37 = vand.u32 4294901760, %v227_v16  ;;  %v16524_v28 = vsub.f32 %v229_v39, %v16504_v10  ;;  %v16682_v39 = vand.u32 4294901760, %v217_v15 }
 0x1a6   :  { %3247 = vmatpush.msrb.mxu2 %v20604_v3  ;;  %3298 = vmatpush.msrb.mxu3 %v16248_v14 }
 0x1a7   :  { %3142 = vmatpush.msrb.mxu0 %v16340_v23  ;;  %3180 = vmatpush.msrb.mxu1 %v16248_v14  ;;  %v226_v14 = vld [vmem:[%s20290_s2 + $0x460] sm:$0xff]  ;;  %v16551_v47 = vsub.f32 %v227_v16, %v16521_v37 }
 0x1a8   :  { %3251 = vmatpush.msrb.mxu2 %v20605_v13  ;;  %3300 = vmatpush.msrb.mxu3 %v16261_v36  ;;  %v16542_v58 = vand.u32 4294901760, %v226_v14  ;;  %v16694_v13 = vand.u32 4294901760, %v216_v53 }
 0x1a9   :  { %3145 = vmatpush.msrb.mxu0 %v16361_v26  ;;  %3182 = vmatpush.msrb.mxu1 %v16261_v36  ;;  %v16538_v36 = vsub.f32 %v228_v51, %v16514_v59 }
 0x1aa   :  { %3255 = vmatpush.msrb.mxu2 %v3067_v33  ;;  %3302 = vmatpush.msrb.mxu3 %v16278_v60  ;;  %v16567_v33 = vand.u32 4294901760, %v224_v63  ;;  %v16570_v23 = vsub.f32 %v226_v14, %v16542_v58 }
 0x1ab   :  { %3148 = vmatpush.msrb.mxu0 %v16374_v52  ;;  %3184 = vmatpush.msrb.mxu1 %v16278_v60  ;;  %v3373_v60 = vand.u32 4294901760, %v16524_v28  ;;  %v16583_v52 = vsub.f32 %v225_v38, %v16547_v4 }
 0x1ac   :  { %3259 = vmatpush.msrb.mxu2 %v3073_v22  ;;  %3304 = vmatpush.msrb.mxu3 %v16294_v56  ;;  %v223_v22 = vld [vmem:[%s20290_s2 + $0x448] sm:$0xff]  ;;  %v16603_v34 = vsub.f32 %v224_v63, %v16567_v33  ;;  %v16707_v63 = vsub.f32 %v62_v9, %v16675_v25 }
 0x1ad   :  { %3151 = vmatpush.msrb.mxu0 %v16388_v46  ;;  %3186 = vmatpush.msrb.mxu1 %v16294_v56  ;;  %v3379_v56 = vand.u32 4294901760, %v16538_v36  ;;  %v3374_v26 = vsub.f32 %v16524_v28, %v3373_v60 }
 0x1ae   :  { %3263 = vmatpush.msrb.mxu2 %v3079_v42  ;;  %3306 = vmatpush.msrb.mxu3 %v16307_v19  ;;  %v16587_v42 = vand.u32 4294901760, %v223_v22  ;;  %v20410_v61 = vand.u32 4294901760, %v16603_v34 }
 0x1af   :  { %3154 = vmatmul.f32.vlgmr.msrb.gmra.mxu0 %v16377_v0  ;;  %3188 = vmatpush.msrb.mxu1 %v16307_v19  ;;  %v222_v19 = vld [vmem:[%s20290_s2 + $0x440] sm:$0xff]  ;;  %v3380_v46 = vsub.f32 %v16538_v36, %v3379_v56  ;;  %v3375_v27 = vand.u32 4294901760, %v3374_v26 }
 0x1b0   :  { %3323 = vmatpush.msra.mxu0 %v16504_v10  ;;  %3267 = vmatpush.msrb.mxu2 %v3085_v50  ;;  %v16594_v45 = vand.u32 4294901760, %v222_v19  ;;  %v20414_v50 = vand.u32 4294901760, %v16570_v23  ;;  %v218_v0 = vld [vmem:[%s20290_s2 + $0x420] sm:$0xff]  ;;  %v3404_v17 = vsub.f32 %v16603_v34, %v20410_v61  ;;  %v240_v61 = vld [vmem:[%s20290_s2 + $0x4d0] sm:$0xff] }
 0x1b1   :  { %3308 = vmatpush.msrb.mxu3 %v16332_v57  ;;  %3190 = vmatpush.msrb.mxu1 %v16332_v57  ;;  %v3385_v57 = vand.u32 4294901760, %v16551_v47  ;;  %v3381_v40 = vand.u32 4294901760, %v3380_v46  ;;  %v16666_v55 = vand.u32 4294901760, %v218_v0  ;;  %v245_v46 = vld [vmem:[%s20290_s2 + $0x4f8] sm:$0xff] }
 0x1b2   :  { %3325 = vmatpush.msra.mxu0 %v16514_v59  ;;  %3271 = vmatpush.msrb.mxu2 %v3091_v7  ;;  %v20411_v7 = vand.u32 4294901760, %v16583_v52  ;;  %v16624_v8 = vsub.f32 %v222_v19, %v16594_v45  ;;  %v3392_v18 = vsub.f32 %v16570_v23, %v20414_v50  ;;  %v3405_v16 = vand.u32 4294901760, %v3404_v17 }
 0x1b3   :  { %3310 = vmatpush.msrb.mxu3 %v16348_v2  ;;  %3273 = vmatmul.f32.vlgmr.msrb.gmra.mxu2 %v16350_v32  ;;  %v3386_v24 = vsub.f32 %v16551_v47, %v3385_v57  ;;  %v16698_v38 = vsub.f32 %v218_v0, %v16666_v55  ;;  %v3422_v19 = vsub.f32 %v16651_v21, %v20407_v12  ;;  %v16746_v9 = vand.u32 4294901760, %v245_v46 }
 0x1b4   :  { %3327 = vmatpush.msra.mxu0 %v16521_v37  ;;  %3478 = vmatpush.msra.mxu2 %v16524_v28  ;;  %v3398_v5 = vsub.f32 %v16583_v52, %v20411_v7  ;;  %v20408_v6 = vand.u32 4294901760, %v16624_v8  ;;  %v3393_v20 = vand.u32 4294901760, %v3392_v18  ;;  %v20417_v18 = vand.u32 4294901760, %v16707_v63  ;;  %v16828_v7 = vpop.f32.mrf.mxu0 }
 0x1b5   :  { %3192 = vmatpush.msrb.mxu1 %v16348_v2  ;;  %3312 = vmatpush.msrb.mxu3 %v16363_v44  ;;  %v220_v2 = vld [vmem:[%s20290_s2 + $0x430] sm:$0xff]  ;;  %v3387_v35 = vand.u32 4294901760, %v3386_v24  ;;  %v214_v24 = vld [vmem:[%s20290_s2 + $0x400] sm:$0xff]  ;;  %20606 = vst [vmem:[#allocation5_spill] sm:$0xff] %v16828_v7 }
 0x1b6   :  { %3314 = vmatmul.f32.vlgmr.msrb.gmra.mxu3 %v16350_v32  ;;  %3329 = vmatpush.msra.mxu0 %v16542_v58  ;;  %v16619_v32 = vsub.f32 %v223_v22, %v16587_v42  ;;  %v3399_v41 = vand.u32 4294901760, %v3398_v5  ;;  %v3416_v3 = vsub.f32 %v16624_v8, %v20408_v6 }
 0x1b7   :  { %3481 = vmatpush.msra.mxu2 %v16538_v36  ;;  %3536 = vmatpush.msra.mxu3 %v16504_v10  ;;  %v237_v36 = vld [vmem:[%s20290_s2 + $0x4b8] sm:$0xff] }
 0x1b8   :  { %3194 = vmatpush.msrb.mxu1 %v16363_v44  ;;  %3159 = vmatmul.f32.gmra.mxu0 %v16430_v29  ;;  %v16635_v44 = vand.u32 4294901760, %v220_v2  ;;  %v20409_v62 = vand.u32 4294901760, %v16619_v32  ;;  %v16715_v29 = vsub.f32 %v217_v15, %v16682_v39  ;;  %v16750_v15 = vand.u32 4294901760, %v214_v24 }
 0x1b9   :  { %3198 = vmatmul.f32.vlgmr.msrb.gmra.mxu1 %v2984_v1  ;;  %3331 = vmatpush.msra.mxu0 %v16547_v4  ;;  %v16647_v1 = vand.u32 4294901760, %v219_v54 }
 0x1ba   :  { %3376 = vmatpush.msra.mxu1 %v3375_v27  ;;  %3484 = vmatpush.msra.mxu2 %v16551_v47  ;;  %v16669_v49 = vsub.f32 %v220_v2, %v16635_v44  ;;  %v3410_v48 = vsub.f32 %v16619_v32, %v20409_v62  ;;  %v20402_v2 = vand.u32 4294901760, %v16698_v38  ;;  %v20404_v0 = vand.u32 4294901760, %v16715_v29  ;;  %v236_v47 = vld [vmem:[%s20290_s2 + $0x4b0] sm:$0xff] }
 0x1bb   :  { %3538 = vmatpush.msra.mxu3 %v16514_v59  ;;  %3333 = vmatpush.msra.mxu0 %v16567_v33  ;;  %v16686_v51 = vsub.f32 %v219_v54, %v16647_v1  ;;  %v78_v54 = vld [vmem:[%s20492_s19 + $0xc0] sm:$0xff] }
 0x1bc   :  { %3382 = vmatpush.msra.mxu1 %v3381_v40  ;;  %3487 = vmatpush.msra.mxu2 %v16570_v23  ;;  %v20405_v14 = vand.u32 4294901760, %v16669_v49  ;;  %v3411_v22 = vand.u32 4294901760, %v3410_v48  ;;  %v16733_v40 = vsub.f32 %v216_v53, %v16694_v13  ;;  %v16755_v17 = vand.u32 4294901760, %v78_v54 }
 0x1bd   :  { %3540 = vmatpush.msra.mxu3 %v16521_v37  ;;  %3277 = vmatmul.f32.gmra.mxu2 %v16410_v11  ;;  %v20403_v26 = vand.u32 4294901760, %v16686_v51  ;;  %v3440_v53 = vsub.f32 %v16698_v38, %v20402_v2  ;;  %v16785_v2 = vsub.f32 %v214_v24, %v16750_v15 }
 0x1be   :  { %3335 = vmatpush.msra.mxu0 %v16587_v42  ;;  %3388 = vmatpush.msra.mxu1 %v3387_v35  ;;  %v3428_v30 = vsub.f32 %v16669_v49, %v20405_v14  ;;  %v3423_v35 = vand.u32 4294901760, %v3422_v19 }
 0x1bf   :  { %3490 = vmatpush.msra.mxu2 %v16583_v52  ;;  %3542 = vmatpush.msra.mxu3 %v16542_v58  ;;  %v3434_v5 = vsub.f32 %v16686_v51, %v20403_v26  ;;  %v16788_v26 = vsub.f32 %v78_v54, %v16755_v17  ;;  %v241_v54 = vld [vmem:[%s20290_s2 + $0x4d8] sm:$0xff] }
 0x1c0   :  { %3318 = vmatmul.f32.gmra.mxu3 %v16410_v11  ;;  %3337 = vmatpush.msra.mxu0 %v16594_v45  ;;  %v215_v11 = vld [vmem:[%s20290_s2 + $0x408] sm:$0xff]  ;;  %v16823_v62 = vand.u32 4294901760, %v241_v54 }
 0x1c1   :  { %3394 = vmatpush.msra.mxu1 %v3393_v20  ;;  %3493 = vmatpush.msra.mxu2 %v16603_v34  ;;  %v16726_v27 = vand.u32 4294901760, %v215_v11  ;;  %v244_v20 = vld [vmem:[%s20290_s2 + $0x4f0] sm:$0xff]  ;;  %v3435_v19 = vand.u32 4294901760, %v3434_v5  ;;  %v20416_v6 = vand.u32 4294901760, %v16788_v26 }
 0x1c2   :  { %3544 = vmatpush.msra.mxu3 %v16547_v4  ;;  %3204 = vmatmul.f32.gmra.mxu1 %v2992_v43  ;;  %v3417_v43 = vand.u32 4294901760, %v3416_v3  ;;  %v20406_v3 = vand.u32 4294901760, %v16733_v40  ;;  %v16856_v28 = vsub.f32 %v241_v54, %v16823_v62 }
 0x1c3   :  { %3339 = vmatpush.msra.mxu0 %v16616_v31  ;;  %3400 = vmatpush.msra.mxu1 %v3399_v41  ;;  %v3429_v41 = vand.u32 4294901760, %v3428_v30  ;;  %v16762_v48 = vsub.f32 %v215_v11, %v16726_v27  ;;  %v3446_v11 = vsub.f32 %v16715_v29, %v20404_v0  ;;  %v16780_v30 = vand.u32 4294901760, %v244_v20 }
 0x1c4   :  { %3496 = vmatpush.msra.mxu2 %v16619_v32  ;;  %3546 = vmatpush.msra.mxu3 %v16567_v33  ;;  %v3452_v5 = vsub.f32 %v16733_v40, %v20406_v3 }
 0x1c5   :  { %3341 = vmatpush.msra.mxu0 %v16635_v44  ;;  %3406 = vmatpush.msra.mxu1 %v3405_v16  ;;  %v3357_v16 = vsub.f32 %v16707_v63, %v20417_v18  ;;  %v20412_v0 = vand.u32 4294901760, %v16762_v48  ;;  %v16808_v3 = vsub.f32 %v244_v20, %v16780_v30 }
 0x1c6   :  { %3499 = vmatpush.msra.mxu2 %v16624_v8  ;;  %3548 = vmatpush.msra.mxu3 %v16587_v42 }
 0x1c7   :  { %3343 = vmatpush.msra.mxu0 %v16647_v1  ;;  %3412 = vmatpush.msra.mxu1 %v3411_v22  ;;  %v243_v22 = vld [vmem:[%s20290_s2 + $0x4e8] sm:$0xff]  ;;  %v3358_v24 = vand.u32 4294901760, %v3357_v16  ;;  %v20415_v16 = vand.u32 4294901760, %v16785_v2 }
 0x1c8   :  { %3502 = vmatpush.msra.mxu2 %v16651_v21  ;;  %3550 = vmatpush.msra.mxu3 %v16594_v45  ;;  %v16798_v14 = vand.u32 4294901760, %v243_v22 }
 0x1c9   :  { %3345 = vmatpush.msra.mxu0 %v16666_v55  ;;  %3418 = vmatpush.msra.mxu1 %v3417_v43  ;;  %v16778_v43 = vsub.f32 %v245_v46, %v16746_v9  ;;  %v3441_v46 = vand.u32 4294901760, %v3440_v53 }
 0x1ca   :  { %3505 = vmatpush.msra.mxu2 %v16669_v49  ;;  %3552 = vmatpush.msra.mxu3 %v16616_v31  ;;  %v16821_v20 = vsub.f32 %v243_v22, %v16798_v14  ;;  %v20418_v22 = vand.u32 4294901760, %v16808_v3 }
 0x1cb   :  { %3347 = vmatpush.msra.mxu0 %v16682_v39  ;;  %3424 = vmatpush.msra.mxu1 %v3423_v35  ;;  %v242_v35 = vld [vmem:[%s20290_s2 + $0x4e0] sm:$0xff]  ;;  %v20413_v53 = vand.u32 4294901760, %v16778_v43 }
 0x1cc   :  { %3508 = vmatpush.msra.mxu2 %v16686_v51  ;;  %3554 = vmatpush.msra.mxu3 %v16635_v44  ;;  %v16810_v12 = vand.u32 4294901760, %v242_v35  ;;  %v3752_v54 = vsub.f32 %v16808_v3, %v20418_v22  ;;  %v20609_v22 = vand.u32 4294901760, %v16821_v20 }
 0x1cd   :  { %3349 = vmatpush.msra.mxu0 %v16694_v13  ;;  %3430 = vmatpush.msra.mxu1 %v3429_v41  ;;  %v3447_v41 = vand.u32 4294901760, %v3446_v11  ;;  %v3458_v11 = vsub.f32 %v16762_v48, %v20412_v0  ;;  %v239_v0 = vld [vmem:[%s20290_s2 + $0x4c8] sm:$0xff] }
 0x1ce   :  { %3511 = vmatpush.msra.mxu2 %v16698_v38  ;;  %3556 = vmatpush.msra.mxu3 %v16647_v1 }
 0x1cf   :  { %3351 = vmatpush.msra.mxu0 %v16726_v27  ;;  %3436 = vmatpush.msra.mxu1 %v3435_v19  ;;  %v3453_v19 = vand.u32 4294901760, %v3452_v5  ;;  %v16837_v5 = vsub.f32 %v242_v35, %v16810_v12  ;;  %v3459_v35 = vand.u32 4294901760, %v3458_v11  ;;  %v3758_v11 = vsub.f32 %v16821_v20, %v20609_v22 }
 0x1d0   :  { %3514 = vmatpush.msra.mxu2 %v16715_v29  ;;  %3558 = vmatpush.msra.mxu3 %v16666_v55  ;;  %v3753_v22 = vand.u32 4294901760, %v3752_v54 }
 0x1d1   :  { %3353 = vmatpush.msra.mxu0 %v16750_v15  ;;  %3442 = vmatpush.msra.mxu1 %v3441_v46  ;;  %v3746_v46 = vsub.f32 %v16778_v43, %v20413_v53  ;;  %v16851_v53 = vand.u32 4294901760, %v240_v61  ;;  %v3759_v54 = vand.u32 4294901760, %v3758_v11  ;;  %v20618_v11 = vand.u32 4294901760, %v16603_v34 }
 0x1d2   :  { %3517 = vmatpush.msra.mxu2 %v16733_v40  ;;  %3560 = vmatpush.msra.mxu3 %v16682_v39 }
 0x1d3   :  { %3359 = vmatmul.f32.vlgmr.msra.gmra.mxu0 %v3358_v24  ;;  %3448 = vmatpush.msra.mxu1 %v3447_v41  ;;  %v3464_v24 = vsub.f32 %v16785_v2, %v20415_v16  ;;  %v3365_v41 = vsub.f32 %v16788_v26, %v20416_v6  ;;  %20607 = vst [vmem:[#allocation6_spill] sm:$0xff] %v16851_v53  ;;  %v16864_v16 = vand.u32 4294901760, %v239_v0  ;;  %v16866_v6 = vpop.f32.mrf.mxu2 }
 0x1d4   :  { %3583 = vmatpush.msrb.mxu0 %v3373_v60  ;;  %3520 = vmatpush.msra.mxu2 %v16762_v48  ;;  %v238_v60 = vld [vmem:[%s20290_s2 + $0x4c0] sm:$0xff]  ;;  %20608 = vst [vmem:[#allocation7_spill] sm:$0xff] %v16866_v6  ;;  %v16881_v50 = vsub.f32 %v240_v61, %v16851_v53  ;;  %v20611_v61 = vand.u32 4294901760, %v16707_v63  ;;  %v20613_v6 = vand.u32 4294901760, %v16837_v5 }
 0x1d5   :  { %3562 = vmatpush.msra.mxu3 %v16694_v13  ;;  %3454 = vmatpush.msra.mxu1 %v3453_v19  ;;  %v3747_v19 = vand.u32 4294901760, %v3746_v46  ;;  %v3366_v18 = vand.u32 4294901760, %v3365_v41  ;;  %v16883_v46 = vand.u32 4294901760, %v238_v60  ;;  %v16900_v41 = vsub.f32 %v239_v0, %v16864_v16 }
 0x1d6   :  { %3587 = vmatpush.msrb.mxu0 %v3379_v56  ;;  %3523 = vmatpush.msra.mxu2 %v16785_v2  ;;  %v3465_v56 = vand.u32 4294901760, %v3464_v24  ;;  %v20612_v24 = vand.u32 4294901760, %v16570_v23  ;;  %v3764_v7 = vsub.f32 %v16837_v5, %v20613_v6  ;;  %v16913_v23 = vpop.f32.mrf.mxu0  ;;  %v20419_v0 = vand.u32 4294901760, %v16881_v50 }
 0x1d7   :  { %3564 = vmatpush.msra.mxu3 %v16726_v27  ;;  %3526 = vmatmul.f32.vlgmr.msra.gmra.mxu2 %v16707_v63  ;;  %v235_v63 = vld [vmem:[%s20290_s2 + $0x4a8] sm:$0xff]  ;;  %20615 = vst [vmem:[#allocation10_spill] sm:$0xff] %v16913_v23  ;;  %v20616_v6 = vand.u32 4294901760, %v16583_v52 }
 0x1d8   :  { %3591 = vmatpush.msrb.mxu0 %v3385_v57  ;;  %3695 = vmatpush.msrb.mxu2 %v16746_v9  ;;  %v16893_v57 = vpop.f32.mrf.mxu3  ;;  %v16936_v52 = vand.u32 4294901760, %v235_v63 }
 0x1d9   :  { %3460 = vmatpush.msra.mxu1 %v3459_v35  ;;  %3566 = vmatpush.msra.mxu3 %v16750_v15  ;;  %20610 = vst [vmem:[#allocation8_spill] sm:$0xff] %v16893_v57  ;;  %v16902_v35 = vand.u32 4294901760, %v237_v36  ;;  %v20617_v57 = vand.u32 4294901760, %v16856_v28 }
 0x1da   :  { %3570 = vmatmul.f32.vlgmr.msra.gmra.mxu3 %v20611_v61  ;;  %3595 = vmatpush.msrb.mxu0 %v20612_v24  ;;  %v16911_v61 = vpop.f32.mrf.mxu1  ;;  %v16917_v24 = vsub.f32 %v238_v60, %v16883_v46  ;;  %v20420_v60 = vand.u32 4294901760, %v16900_v41 }
 0x1db   :  { %3697 = vmatpush.msrb.mxu2 %v16780_v30  ;;  %3748 = vmatpush.msrb.mxu3 %v3747_v19  ;;  %20614 = vst [vmem:[#allocation9_spill] sm:$0xff] %v16911_v61  ;;  %v16919_v19 = vand.u32 4294901760, %v236_v47  ;;  %v3770_v61 = vsub.f32 %v16856_v28, %v20617_v57  ;;  %v3765_v57 = vand.u32 4294901760, %v3764_v7  ;;  %v16954_v7 = vpop.f32.mrf.mxu2 }
 0x1dc   :  { %3466 = vmatpush.msra.mxu1 %v3465_v56  ;;  %3367 = vmatmul.f32.gmra.mxu0 %v3366_v18  ;;  %v234_v18 = vld [vmem:[%s20290_s2 + $0x4a0] sm:$0xff]  ;;  %v16934_v56 = vsub.f32 %v237_v36, %v16902_v35  ;;  %20619 = vst [vmem:[#allocation11_spill] sm:$0xff] %v16954_v7  ;;  %v16965_v36 = vsub.f32 %v235_v63, %v16936_v52  ;;  %v20624_v63 = vand.u32 4294901760, %v16917_v24 }
 0x1dd   :  { %3468 = vmatmul.f32.vlgmr.msra.gmra.mxu1 %v16675_v25  ;;  %3599 = vmatpush.msrb.mxu0 %v20616_v6  ;;  %v233_v6 = vld [vmem:[%s20290_s2 + $0x498] sm:$0xff]  ;;  %v16952_v34 = vand.u32 4294901760, %v234_v18 }
 0x1de   :  { %3654 = vmatpush.msrb.mxu1 %v16504_v10  ;;  %3699 = vmatpush.msrb.mxu2 %v16798_v14  ;;  %v3776_v10 = vsub.f32 %v16881_v50, %v20419_v0  ;;  %v3782_v0 = vsub.f32 %v16900_v41, %v20420_v60  ;;  %v16967_v23 = vand.u32 4294901760, %v233_v6  ;;  %v3788_v60 = vsub.f32 %v16917_v24, %v20624_v63 }
 0x1df   :  { %3754 = vmatpush.msrb.mxu3 %v3753_v22  ;;  %3603 = vmatpush.msrb.mxu0 %v20618_v11  ;;  %v16950_v22 = vsub.f32 %v236_v47, %v16919_v19  ;;  %v3771_v11 = vand.u32 4294901760, %v3770_v61  ;;  %v232_v61 = vld [vmem:[%s20290_s2 + $0x490] sm:$0xff]  ;;  %v16984_v7 = vsub.f32 %v234_v18, %v16952_v34 }
 0x1e0   :  { %3656 = vmatpush.msrb.mxu1 %v16514_v59  ;;  %3701 = vmatpush.msrb.mxu2 %v16810_v12  ;;  %v20620_v59 = vand.u32 4294901760, %v16619_v32  ;;  %v16973_v32 = vpop.f32.mrf.mxu3  ;;  %v3783_v18 = vand.u32 4294901760, %v3782_v0  ;;  %v17004_v47 = vsub.f32 %v233_v6, %v16967_v23 }
 0x1e1   :  { %3760 = vmatpush.msrb.mxu3 %v3759_v54  ;;  %3531 = vmatmul.f32.gmra.mxu2 %v16788_v26  ;;  %20621 = vst [vmem:[#allocation12_spill] sm:$0xff] %v16973_v32  ;;  %v20623_v54 = vand.u32 4294901760, %v16624_v8  ;;  %v16994_v8 = vand.u32 4294901760, %v232_v61  ;;  %v20627_v32 = vand.u32 4294901760, %v16651_v21  ;;  %v20628_v6 = vand.u32 4294901760, %v16950_v22 }
 0x1e2   :  { %3607 = vmatpush.msrb.mxu0 %v20620_v59  ;;  %3658 = vmatpush.msrb.mxu1 %v16521_v37  ;;  %v20622_v37 = vand.u32 4294901760, %v16788_v26  ;;  %v3777_v59 = vand.u32 4294901760, %v3776_v10  ;;  %v63_v26 = vld [vmem:[%s20492_s19 + $0x48] sm:$0xff]  ;;  %v16996_v10 = vpop.f32.mrf.mxu1 }
 0x1e3   :  { %3703 = vmatpush.msrb.mxu2 %v16823_v62  ;;  %3766 = vmatpush.msrb.mxu3 %v3765_v57  ;;  %v231_v57 = vld [vmem:[%s20290_s2 + $0x488] sm:$0xff]  ;;  %20625 = vst [vmem:[#allocation13_spill] sm:$0xff] %v16996_v10  ;;  %v17014_v0 = vand.u32 4294901760, %v63_v26  ;;  %v3800_v63 = vsub.f32 %v16950_v22, %v20628_v6  ;;  %v3811_v10 = vand.u32 4294901760, %v16984_v7  ;;  %v3817_v6 = vand.u32 4294901760, %v17004_v47 }
 0x1e4   :  { %3576 = vmatmul.f32.gmra.mxu3 %v20622_v37  ;;  %3611 = vmatpush.msrb.mxu0 %v20623_v54  ;;  %v20626_v37 = vand.u32 4294901760, %v16934_v56 }
 0x1e5   :  { %3660 = vmatpush.msrb.mxu1 %v16542_v58  ;;  %3705 = vmatpush.msrb.mxu2 %v16851_v53  ;;  %v230_v58 = vld [vmem:[%s20290_s2 + $0x480] sm:$0xff]  ;;  %v20629_v53 = vand.u32 4294901760, %v16669_v49  ;;  %v20631_v49 = vand.u32 4294901760, %v16686_v51 }
 0x1e6   :  { %3772 = vmatpush.msrb.mxu3 %v3771_v11  ;;  %3472 = vmatmul.f32.gmra.mxu1 %v16755_v17  ;;  %v3794_v54 = vsub.f32 %v16934_v56, %v20626_v37  ;;  %v17012_v11 = vand.u32 4294901760, %v231_v57  ;;  %v3789_v37 = vand.u32 4294901760, %v3788_v60  ;;  %v17027_v21 = vand.u32 4294901760, %v230_v58 }
 0x1e7   :  { %3615 = vmatpush.msrb.mxu0 %v20627_v32  ;;  %3662 = vmatpush.msrb.mxu1 %v16547_v4  ;;  %v17025_v4 = vsub.f32 %v232_v61, %v16994_v8  ;;  %v20630_v32 = vand.u32 4294901760, %v16965_v36  ;;  %v3801_v61 = vand.u32 4294901760, %v3800_v63  ;;  %v20633_v63 = vand.u32 4294901760, %v16715_v29 }
 0x1e8   :  { %3707 = vmatpush.msrb.mxu2 %v16864_v16  ;;  %3778 = vmatpush.msrb.mxu3 %v3777_v59  ;;  %v3795_v60 = vand.u32 4294901760, %v3794_v54  ;;  %v20632_v54 = vand.u32 4294901760, %v16698_v38  ;;  %v17052_v51 = vsub.f32 %v230_v58, %v17027_v21  ;;  %v79_v38 = vld [vmem:[%s20492_s19 + $0xc8] sm:$0xff] }
 0x1e9   :  { %3619 = vmatpush.msrb.mxu0 %v20629_v53  ;;  %3664 = vmatpush.msrb.mxu1 %v16567_v33  ;;  %v3806_v59 = vsub.f32 %v16965_v36, %v20630_v32  ;;  %v17038_v33 = vsub.f32 %v231_v57, %v17012_v11  ;;  %v17041_v53 = vsub.f32 %v63_v26, %v17014_v0 }
 0x1ea   :  { %3709 = vmatpush.msrb.mxu2 %v16883_v46  ;;  %3784 = vmatpush.msrb.mxu3 %v3783_v18  ;;  %v3812_v18 = vsub.f32 %v16984_v7, %v3811_v10  ;;  %v3818_v26 = vsub.f32 %v17004_v47, %v3817_v6  ;;  %v3835_v32 = vand.u32 4294901760, %v17052_v51 }
 0x1eb   :  { %3623 = vmatpush.msrb.mxu0 %v20631_v49  ;;  %3666 = vmatpush.msrb.mxu1 %v16587_v42  ;;  %v3823_v42 = vand.u32 4294901760, %v17025_v4  ;;  %v3807_v57 = vand.u32 4294901760, %v3806_v59  ;;  %v3728_v58 = vand.u32 4294901760, %v17041_v53  ;;  %v20635_v49 = vand.u32 4294901760, %v16762_v48 }
 0x1ec   :  { %3711 = vmatpush.msrb.mxu2 %v16902_v35  ;;  %3790 = vmatpush.msrb.mxu3 %v3789_v37  ;;  %v3813_v37 = vand.u32 4294901760, %v3812_v18  ;;  %v3819_v59 = vand.u32 4294901760, %v3818_v26 }
 0x1ed   :  { %3627 = vmatpush.msrb.mxu0 %v20632_v54  ;;  %3668 = vmatpush.msrb.mxu1 %v16594_v45  ;;  %v3829_v45 = vand.u32 4294901760, %v17038_v33  ;;  %v3824_v29 = vsub.f32 %v17025_v4, %v3823_v42  ;;  %v17096_v54 = vpop.f32.mrf.mxu0 }
 0x1ee   :  { %3713 = vmatpush.msrb.mxu2 %v16919_v19  ;;  %3796 = vmatpush.msrb.mxu3 %v3795_v60  ;;  %v20634_v60 = vand.u32 4294901760, %v16733_v40  ;;  %v3729_v40 = vsub.f32 %v17041_v53, %v3728_v58  ;;  %20637 = vst [vmem:[#allocation14_spill] sm:$0xff] %v17096_v54 }
 0x1ef   :  { %3631 = vmatpush.msrb.mxu0 %v20633_v63  ;;  %3670 = vmatpush.msrb.mxu1 %v16616_v31  ;;  %v17074_v31 = vand.u32 4294901760, %v79_v38  ;;  %v3825_v48 = vand.u32 4294901760, %v3824_v29  ;;  %v17116_v63 = vpop.f32.mrf.mxu3 }
 0x1f0   :  { %3715 = vmatpush.msrb.mxu2 %v16936_v52  ;;  %3802 = vmatpush.msrb.mxu3 %v3801_v61  ;;  %v20636_v61 = vand.u32 4294901760, %v16785_v2  ;;  %20640 = vst [vmem:[#allocation16_spill] sm:$0xff] %v17116_v63 }
 0x1f1   :  { %3635 = vmatpush.msrb.mxu0 %v20634_v60  ;;  %3672 = vmatpush.msrb.mxu1 %v16635_v44  ;;  %v3830_v44 = vsub.f32 %v17038_v33, %v3829_v45  ;;  %v17094_v18 = vsub.f32 %v79_v38, %v17074_v31  ;;  %v17107_v38 = vpop.f32.mrf.mxu2 }
 0x1f2   :  { %3717 = vmatpush.msrb.mxu2 %v16952_v34  ;;  %3808 = vmatpush.msrb.mxu3 %v3807_v57  ;;  %v3730_v57 = vand.u32 4294901760, %v3729_v40  ;;  %20638 = vst [vmem:[#allocation15_spill] sm:$0xff] %v17107_v38 }
 0x1f3   :  { %3639 = vmatpush.msrb.mxu0 %v20635_v49  ;;  %3674 = vmatpush.msrb.mxu1 %v16647_v1  ;;  %v3836_v1 = vsub.f32 %v17052_v51, %v3835_v32  ;;  %v3831_v2 = vand.u32 4294901760, %v3830_v44  ;;  %v3736_v26 = vand.u32 4294901760, %v17094_v18 }
 0x1f4   :  { %3719 = vmatpush.msrb.mxu2 %v16967_v23  ;;  %3814 = vmatpush.msrb.mxu3 %v3813_v37  ;;  %v20641_v37 = vand.u32 4294901760, %v16808_v3 }
 0x1f5   :  { %3643 = vmatpush.msrb.mxu0 %v20636_v61  ;;  %3676 = vmatpush.msrb.mxu1 %v16666_v55  ;;  %v3837_v55 = vand.u32 4294901760, %v3836_v1  ;;  %v253_v61 = vld [vmem:[%s20290_s2 + $0x538] sm:$0xff] }
 0x1f6   :  { %3721 = vmatpush.msrb.mxu2 %v16994_v8  ;;  %3820 = vmatpush.msrb.mxu3 %v3819_v59 }
 0x1f7   :  { %3645 = vmatmul.f32.vlgmr.msrb.gmra.mxu0 %v16675_v25  ;;  %3678 = vmatpush.msrb.mxu1 %v16682_v39  ;;  %v20639_v39 = vand.u32 4294901760, %v16778_v43 }
 0x1f8   :  { %3850 = vmatpush.msra.mxu0 %v16778_v43  ;;  %3723 = vmatpush.msrb.mxu2 %v17012_v11  ;;  %v17123_v43 = vpop.f32.mrf.mxu0 }
 0x1f9   :  { %3826 = vmatpush.msrb.mxu3 %v3825_v48  ;;  %3680 = vmatpush.msrb.mxu1 %v16694_v13  ;;  %v3737_v13 = vsub.f32 %v17094_v18, %v3736_v26  ;;  %20642 = vst [vmem:[#allocation17_spill] sm:$0xff] %v17123_v43  ;;  %v17139_v29 = vpop.f32.mrf.mxu2 }
 0x1fa   :  { %3853 = vmatpush.msra.mxu0 %v16808_v3  ;;  %3725 = vmatpush.msrb.mxu2 %v17027_v21  ;;  %v20644_v3 = vand.u32 4294901760, %v16821_v20  ;;  %20646 = vst [vmem:[#allocation19_spill] sm:$0xff] %v17139_v29 }
 0x1fb   :  { %3832 = vmatpush.msrb.mxu3 %v3831_v2  ;;  %3731 = vmatmul.f32.vlgmr.msrb.gmra.mxu2 %v3730_v57  ;;  %v3738_v60 = vand.u32 4294901760, %v3737_v13  ;;  %v17302_v13 = vand.u32 4294901760, %v253_v61 }
 0x1fc   :  { %3856 = vmatpush.msra.mxu0 %v16821_v20  ;;  %3955 = vmatpush.msra.mxu2 %v20639_v39  ;;  %v252_v39 = vld [vmem:[%s20290_s2 + $0x530] sm:$0xff] }
 0x1fd   :  { %3682 = vmatpush.msrb.mxu1 %v16726_v27  ;;  %3838 = vmatpush.msrb.mxu3 %v3837_v55  ;;  %v17127_v27 = vpop.f32.mrf.mxu1 }
 0x1fe   :  { %3840 = vmatmul.f32.vlgmr.msrb.gmra.mxu3 %v17014_v0  ;;  %3859 = vmatpush.msra.mxu0 %v16837_v5  ;;  %20643 = vst [vmem:[#allocation18_spill] sm:$0xff] %v17127_v27 }
 0x1ff   :  { %3959 = vmatpush.msra.mxu2 %v20641_v37  ;;  %4026 = vmatpush.msra.mxu3 %v16746_v9 }
 0x200   :  { %3684 = vmatpush.msrb.mxu1 %v16750_v15  ;;  %3649 = vmatmul.f32.gmra.mxu0 %v16755_v17  ;;  %v20645_v15 = vand.u32 4294901760, %v16837_v5  ;;  %v20652_v5 = vld [vmem:[#allocation6_spill] sm:$0xff]  ;;  %v17236_v59 = vpop.f32.mrf.mxu0 }
 0x201   :  { %3686 = vmatmul.f32.vlgmr.msrb.gmra.mxu1 %v16675_v25  ;;  %3862 = vmatpush.msra.mxu0 %v16856_v28  ;;  %v20647_v25 = vand.u32 4294901760, %v16856_v28  ;;  %v20655_v28 = vand.u32 4294901760, %v16950_v22  ;;  %20657 = vst [vmem:[#allocation6_spill] sm:$0xff] %v17236_v59  ;;  %v17267_v44 = vpop.f32.mrf.mxu2  ;;  %v272_v59 = vld [vmem:[%s20290_s2 + $0x5d0] sm:$0xff] }
 0x202   :  { %3908 = vmatpush.msra.mxu1 %v16746_v9  ;;  %3963 = vmatpush.msra.mxu2 %v20644_v3  ;;  %v17147_v9 = vpop.f32.mrf.mxu3  ;;  %20658 = vst [vmem:[#allocation22_spill] sm:$0xff] %v17267_v44  ;;  %v17547_v29 = vand.u32 4294901760, %v272_v59 }
 0x203   :  { %4028 = vmatpush.msra.mxu3 %v16780_v30  ;;  %3865 = vmatpush.msra.mxu0 %v16881_v50  ;;  %20648 = vst [vmem:[#allocation20_spill] sm:$0xff] %v17147_v9  ;;  %v271_v9 = vld [vmem:[%s20290_s2 + $0x5c8] sm:$0xff] }
 0x204   :  { %3910 = vmatpush.msra.mxu1 %v16780_v30  ;;  %3967 = vmatpush.msra.mxu2 %v20645_v15  ;;  %v20649_v30 = vand.u32 4294901760, %v16881_v50  ;;  %v20653_v50 = vand.u32 4294901760, %v16917_v24  ;;  %20674 = vst [vmem:[#allocation30_spill] sm:$0xff] %v17547_v29  ;;  %v17577_v43 = vsub.f32 %v272_v59, %v17547_v29 }
 0x205   :  { %4030 = vmatpush.msra.mxu3 %v16798_v14  ;;  %3739 = vmatmul.f32.gmra.mxu2 %v3738_v60  ;;  %v17154_v20 = vpop.f32.mrf.mxu1 }
 0x206   :  { %3868 = vmatpush.msra.mxu0 %v16900_v41  ;;  %3912 = vmatpush.msra.mxu1 %v16798_v14  ;;  %20650 = vst [vmem:[#allocation21_spill] sm:$0xff] %v17154_v20  ;;  %v20651_v14 = vand.u32 4294901760, %v16900_v41  ;;  %v259_v41 = vld [vmem:[%s20290_s2 + $0x568] sm:$0xff] }
 0x207   :  { %3971 = vmatpush.msra.mxu2 %v20647_v25  ;;  %4032 = vmatpush.msra.mxu3 %v16810_v12  ;;  %v251_v25 = vld [vmem:[%s20290_s2 + $0x528] sm:$0xff] }
 0x208   :  { %3844 = vmatmul.f32.gmra.mxu3 %v17074_v31  ;;  %3871 = vmatpush.msra.mxu0 %v16917_v24  ;;  %v17309_v60 = vpop.f32.mrf.mxu0 }
 0x209   :  { %3914 = vmatpush.msra.mxu1 %v16810_v12  ;;  %3975 = vmatpush.msra.mxu2 %v20649_v30  ;;  %v20654_v12 = vand.u32 4294901760, %v16934_v56  ;;  %20661 = vst [vmem:[#allocation25_spill] sm:$0xff] %v17309_v60 }
 0x20a   :  { %4034 = vmatpush.msra.mxu3 %v16823_v62  ;;  %3690 = vmatmul.f32.gmra.mxu1 %v16755_v17  ;;  %v260_v17 = vld [vmem:[%s20290_s2 + $0x570] sm:$0xff]  ;;  %v17289_v2 = vpop.f32.mrf.mxu3 }
 0x20b   :  { %3874 = vmatpush.msra.mxu0 %v16934_v56  ;;  %3916 = vmatpush.msra.mxu1 %v16823_v62  ;;  %v261_v62 = vld [vmem:[%s20290_s2 + $0x578] sm:$0xff]  ;;  %v17194_v24 = vand.u32 4294901760, %v260_v17  ;;  %20659 = vst [vmem:[#allocation23_spill] sm:$0xff] %v17289_v2 }
 0x20c   :  { %3979 = vmatpush.msra.mxu2 %v20651_v14  ;;  %4036 = vmatpush.msra.mxu3 %v20652_v5 }
 0x20d   :  { %3877 = vmatpush.msra.mxu0 %v16950_v22  ;;  %3918 = vmatpush.msra.mxu1 %v20652_v5  ;;  %v17218_v22 = vsub.f32 %v260_v17, %v17194_v24  ;;  %v17307_v37 = vpop.f32.mrf.mxu1  ;;  %v64_v17 = vld [vmem:[%s20492_s19 + $0x50] sm:$0xff] }
 0x20e   :  { %3983 = vmatpush.msra.mxu2 %v20653_v50  ;;  %4038 = vmatpush.msra.mxu3 %v16864_v16  ;;  %20660 = vst [vmem:[#allocation24_spill] sm:$0xff] %v17307_v37 }
 0x20f   :  { %3880 = vmatpush.msra.mxu0 %v16965_v36  ;;  %3920 = vmatpush.msra.mxu1 %v16864_v16  ;;  %v17184_v16 = vand.u32 4294901760, %v261_v62 }
 0x210   :  { %3987 = vmatpush.msra.mxu2 %v20654_v12  ;;  %4040 = vmatpush.msra.mxu3 %v16883_v46  ;;  %v17341_v12 = vsub.f32 %v253_v61, %v17302_v13 }
 0x211   :  { %3883 = vmatpush.msra.mxu0 %v16984_v7  ;;  %3922 = vmatpush.msra.mxu1 %v16883_v46  ;;  %v20656_v46 = vand.u32 4294901760, %v16965_v36  ;;  %v17204_v56 = vsub.f32 %v261_v62, %v17184_v16  ;;  %v258_v36 = vld [vmem:[%s20290_s2 + $0x560] sm:$0xff] }
 0x212   :  { %3991 = vmatpush.msra.mxu2 %v20655_v28  ;;  %4042 = vmatpush.msra.mxu3 %v16902_v35  ;;  %v17222_v7 = vand.u32 4294901760, %v258_v36 }
 0x213   :  { %3886 = vmatpush.msra.mxu0 %v17004_v47  ;;  %3924 = vmatpush.msra.mxu1 %v16902_v35  ;;  %v17201_v35 = vand.u32 4294901760, %v259_v41  ;;  %v20432_v47 = vand.u32 4294901760, %v17204_v56 }
 0x214   :  { %3995 = vmatpush.msra.mxu2 %v20656_v46  ;;  %4044 = vmatpush.msra.mxu3 %v16919_v19  ;;  %v17252_v49 = vsub.f32 %v258_v36, %v17222_v7  ;;  %v17351_v46 = vpop.f32.mrf.mxu2 }
 0x215   :  { %3889 = vmatpush.msra.mxu0 %v17025_v4  ;;  %3926 = vmatpush.msra.mxu1 %v16919_v19  ;;  %v257_v19 = vld [vmem:[%s20290_s2 + $0x558] sm:$0xff]  ;;  %v255_v4 = vld [vmem:[%s20290_s2 + $0x548] sm:$0xff]  ;;  %20662 = vst [vmem:[#allocation26_spill] sm:$0xff] %v17351_v46 }
 0x216   :  { %3999 = vmatpush.msra.mxu2 %v3811_v10  ;;  %4046 = vmatpush.msra.mxu3 %v16936_v52  ;;  %v17231_v10 = vsub.f32 %v259_v41, %v17201_v35  ;;  %v17271_v40 = vand.u32 4294901760, %v255_v4  ;;  %v20429_v48 = vand.u32 4294901760, %v17252_v49  ;;  %v249_v41 = vld [vmem:[%s20290_s2 + $0x518] sm:$0xff] }
 0x217   :  { %3892 = vmatpush.msra.mxu0 %v17038_v33  ;;  %3928 = vmatpush.msra.mxu1 %v16936_v52  ;;  %v17227_v52 = vand.u32 4294901760, %v257_v19  ;;  %v4118_v33 = vsub.f32 %v17204_v56, %v20432_v47  ;;  %v276_v47 = vld [vmem:[%s20290_s2 + $0x5f0] sm:$0xff] }
 0x218   :  { %4003 = vmatpush.msra.mxu2 %v3817_v6  ;;  %4048 = vmatpush.msra.mxu3 %v16952_v34  ;;  %v256_v6 = vld [vmem:[%s20290_s2 + $0x550] sm:$0xff]  ;;  %v4136_v30 = vsub.f32 %v17252_v49, %v20429_v48 }
 0x219   :  { %3895 = vmatpush.msra.mxu0 %v17052_v51  ;;  %3930 = vmatpush.msra.mxu1 %v16952_v34  ;;  %v20431_v34 = vand.u32 4294901760, %v17218_v22  ;;  %v4119_v57 = vand.u32 4294901760, %v4118_v33  ;;  %v248_v33 = vld [vmem:[%s20290_s2 + $0x510] sm:$0xff] }
 0x21a   :  { %4007 = vmatpush.msra.mxu2 %v3823_v42  ;;  %4050 = vmatpush.msra.mxu3 %v16967_v23  ;;  %v17249_v42 = vand.u32 4294901760, %v256_v6  ;;  %v4137_v36 = vand.u32 4294901760, %v4136_v30 }
 0x21b   :  { %3898 = vmatmul.f32.vlgmr.msra.gmra.mxu0 %v17041_v53  ;;  %3932 = vmatpush.msra.mxu1 %v16967_v23  ;;  %v254_v23 = vld [vmem:[%s20290_s2 + $0x540] sm:$0xff]  ;;  %v4124_v51 = vsub.f32 %v17218_v22, %v20431_v34 }
 0x21c   :  { %4067 = vmatpush.msrb.mxu0 %v17184_v16  ;;  %4011 = vmatpush.msra.mxu2 %v3829_v45  ;;  %v17265_v45 = vsub.f32 %v257_v19, %v17227_v52  ;;  %v17287_v1 = vsub.f32 %v256_v6, %v17249_v42  ;;  %v250_v53 = vld [vmem:[%s20290_s2 + $0x520] sm:$0xff]  ;;  %v17562_v20 = vpop.f32.mrf.mxu2 }
 0x21d   :  { %4052 = vmatpush.msra.mxu3 %v16994_v8  ;;  %3934 = vmatpush.msra.mxu1 %v16994_v8  ;;  %v20430_v8 = vand.u32 4294901760, %v17231_v10  ;;  %v4125_v3 = vand.u32 4294901760, %v4124_v51  ;;  %v17358_v6 = vand.u32 4294901760, %v250_v53  ;;  %v17367_v51 = vand.u32 4294901760, %v64_v17  ;;  %20676 = vst [vmem:[#allocation31_spill] sm:$0xff] %v17562_v20 }
 0x21e   :  { %4069 = vmatpush.msrb.mxu0 %v17194_v24  ;;  %4015 = vmatpush.msra.mxu2 %v3835_v32  ;;  %v17278_v32 = vand.u32 4294901760, %v254_v23  ;;  %v20424_v14 = vand.u32 4294901760, %v17287_v1 }
 0x21f   :  { %4054 = vmatpush.msra.mxu3 %v17012_v11  ;;  %4017 = vmatmul.f32.vlgmr.msra.gmra.mxu2 %v17014_v0  ;;  %v4130_v55 = vsub.f32 %v17231_v10, %v20430_v8 }
 0x220   :  { %4071 = vmatpush.msrb.mxu0 %v17201_v35  ;;  %4222 = vmatpush.msrb.mxu2 %v17204_v56  ;;  %v17314_v15 = vsub.f32 %v254_v23, %v17278_v32  ;;  %v4148_v19 = vsub.f32 %v17287_v1, %v20424_v14  ;;  %v17394_v14 = vpop.f32.mrf.mxu1 }
 0x221   :  { %3936 = vmatpush.msra.mxu1 %v17012_v11  ;;  %4056 = vmatpush.msra.mxu3 %v17027_v21  ;;  %v20427_v11 = vand.u32 4294901760, %v17265_v45  ;;  %v4131_v5 = vand.u32 4294901760, %v4130_v55  ;;  %v20426_v55 = vand.u32 4294901760, %v17341_v12  ;;  %20664 = vst [vmem:[#allocation28_spill] sm:$0xff] %v17394_v14  ;;  %v17476_v14 = vand.u32 4294901760, %v276_v47 }
 0x222   :  { %4058 = vmatmul.f32.vlgmr.msra.gmra.mxu3 %v17014_v0  ;;  %4073 = vmatpush.msrb.mxu0 %v17222_v7  ;;  %v17305_v0 = vsub.f32 %v255_v4, %v17271_v40  ;;  %v20425_v28 = vand.u32 4294901760, %v17314_v15 }
 0x223   :  { %4225 = vmatpush.msrb.mxu2 %v17218_v22  ;;  %4280 = vmatpush.msrb.mxu3 %v17184_v16  ;;  %v4142_v50 = vsub.f32 %v17265_v45, %v20427_v11  ;;  %v80_v11 = vld [vmem:[%s20492_s19 + $0xd0] sm:$0xff] }
 0x224   :  { %3938 = vmatpush.msra.mxu1 %v17027_v21  ;;  %3903 = vmatmul.f32.gmra.mxu0 %v17094_v18  ;;  %v17325_v21 = vand.u32 4294901760, %v252_v39  ;;  %v20423_v62 = vand.u32 4294901760, %v17305_v0  ;;  %v4160_v30 = vsub.f32 %v17314_v15, %v20425_v28 }
 0x225   :  { %3942 = vmatmul.f32.vlgmr.msra.gmra.mxu1 %v3728_v58  ;;  %4075 = vmatpush.msrb.mxu0 %v17227_v52  ;;  %v17337_v58 = vand.u32 4294901760, %v251_v25  ;;  %v4143_v23 = vand.u32 4294901760, %v4142_v50  ;;  %v17388_v50 = vand.u32 4294901760, %v248_v33 }
 0x226   :  { %4120 = vmatpush.msrb.mxu1 %v4119_v57  ;;  %4228 = vmatpush.msrb.mxu2 %v17231_v10  ;;  %v17361_v4 = vsub.f32 %v252_v39, %v17325_v21  ;;  %v4154_v61 = vsub.f32 %v17305_v0, %v20423_v62  ;;  %v17374_v57 = vand.u32 4294901760, %v249_v41 }
 0x227   :  { %4282 = vmatpush.msrb.mxu3 %v17194_v24  ;;  %4077 = vmatpush.msrb.mxu0 %v17249_v42  ;;  %v17378_v39 = vsub.f32 %v251_v25, %v17337_v58  ;;  %v17392_v25 = vsub.f32 %v250_v53, %v17358_v6  ;;  %v4166_v53 = vsub.f32 %v17341_v12, %v20426_v55 }
 0x228   :  { %4126 = vmatpush.msrb.mxu1 %v4125_v3  ;;  %4231 = vmatpush.msrb.mxu2 %v17252_v49  ;;  %v17380_v3 = vpop.f32.mrf.mxu3  ;;  %v20428_v62 = vand.u32 4294901760, %v17361_v4  ;;  %v17411_v18 = vsub.f32 %v249_v41, %v17374_v57  ;;  %v246_v41 = vld [vmem:[%s20290_s2 + $0x500] sm:$0xff] }
 0x229   :  { %4284 = vmatpush.msrb.mxu3 %v17201_v35  ;;  %4021 = vmatmul.f32.gmra.mxu2 %v17074_v31  ;;  %20663 = vst [vmem:[#allocation27_spill] sm:$0xff] %v17380_v3  ;;  %v20433_v28 = vand.u32 4294901760, %v17378_v39  ;;  %v20434_v55 = vand.u32 4294901760, %v17392_v25  ;;  %v17446_v34 = vand.u32 4294901760, %v246_v41 }
 0x22a   :  { %4079 = vmatpush.msrb.mxu0 %v17271_v40  ;;  %4132 = vmatpush.msrb.mxu1 %v4131_v5  ;;  %v4149_v5 = vand.u32 4294901760, %v4148_v19  ;;  %v4155_v19 = vand.u32 4294901760, %v4154_v61 }
 0x22b   :  { %4234 = vmatpush.msrb.mxu2 %v17265_v45  ;;  %4286 = vmatpush.msrb.mxu3 %v17222_v7  ;;  %v4178_v48 = vsub.f32 %v17378_v39, %v20433_v28  ;;  %v4184_v28 = vsub.f32 %v17392_v25, %v20434_v55 }
 0x22c   :  { %4062 = vmatmul.f32.gmra.mxu3 %v17074_v31  ;;  %4081 = vmatpush.msrb.mxu0 %v17278_v32  ;;  %v247_v31 = vld [vmem:[%s20290_s2 + $0x508] sm:$0xff] }
 0x22d   :  { %4138 = vmatpush.msrb.mxu1 %v4137_v36  ;;  %4237 = vmatpush.msrb.mxu2 %v17287_v1  ;;  %v17403_v36 = vsub.f32 %v64_v17, %v17367_v51  ;;  %v277_v17 = vld [vmem:[%s20290_s2 + $0x5f8] sm:$0xff]  ;;  %v17422_v61 = vand.u32 4294901760, %v247_v31 }
 0x22e   :  { %4288 = vmatpush.msrb.mxu3 %v17227_v52  ;;  %3948 = vmatmul.f32.gmra.mxu1 %v3736_v26  ;;  %v4161_v26 = vand.u32 4294901760, %v4160_v30  ;;  %v17429_v30 = vsub.f32 %v248_v33, %v17388_v50  ;;  %v17442_v8 = vand.u32 4294901760, %v277_v17 }
 0x22f   :  { %4083 = vmatpush.msrb.mxu0 %v17302_v13  ;;  %4144 = vmatpush.msrb.mxu1 %v4143_v23  ;;  %v4172_v23 = vsub.f32 %v17361_v4, %v20428_v62  ;;  %v4167_v62 = vand.u32 4294901760, %v4166_v53  ;;  %v17458_v33 = vsub.f32 %v247_v31, %v17422_v61  ;;  %v20665_v3 = vand.u32 4294901760, %v17403_v36 }
 0x230   :  { %4240 = vmatpush.msrb.mxu2 %v17305_v0  ;;  %4290 = vmatpush.msrb.mxu3 %v17249_v42  ;;  %v20666_v31 = vand.u32 4294901760, %v17411_v18  ;;  %v20681_v59 = vand.u32 4294901760, %v17403_v36 }
 0x231   :  { %4085 = vmatpush.msrb.mxu0 %v17325_v21  ;;  %4150 = vmatpush.msrb.mxu1 %v4149_v5  ;;  %v4173_v53 = vand.u32 4294901760, %v4172_v23  ;;  %v4101_v46 = vsub.f32 %v17403_v36, %v20665_v3  ;;  %v4179_v23 = vand.u32 4294901760, %v4178_v48  ;;  %v17474_v5 = vsub.f32 %v277_v17, %v17442_v8  ;;  %v274_v48 = vld [vmem:[%s20290_s2 + $0x5e0] sm:$0xff] }
 0x232   :  { %4243 = vmatpush.msrb.mxu2 %v17314_v15  ;;  %4292 = vmatpush.msrb.mxu3 %v17271_v40  ;;  %v4190_v55 = vsub.f32 %v17411_v18, %v20666_v31  ;;  %v17481_v3 = vsub.f32 %v246_v41, %v17446_v34  ;;  %v20667_v17 = vand.u32 4294901760, %v17429_v30  ;;  %v273_v41 = vld [vmem:[%s20290_s2 + $0x5d8] sm:$0xff]  ;;  %v17506_v60 = vand.u32 4294901760, %v274_v48 }
 0x233   :  { %4087 = vmatpush.msrb.mxu0 %v17337_v58  ;;  %4156 = vmatpush.msrb.mxu1 %v4155_v19  ;;  %v17451_v19 = vand.u32 4294901760, %v80_v11  ;;  %v17519_v37 = vand.u32 4294901760, %v273_v41 }
 0x234   :  { %4246 = vmatpush.msrb.mxu2 %v17341_v12  ;;  %4294 = vmatpush.msrb.mxu3 %v17278_v32  ;;  %v4196_v31 = vsub.f32 %v17429_v30, %v20667_v17  ;;  %v17504_v17 = vsub.f32 %v276_v47, %v17476_v14 }
 0x235   :  { %4089 = vmatpush.msrb.mxu0 %v17358_v6  ;;  %4162 = vmatpush.msrb.mxu1 %v4161_v26  ;;  %v275_v26 = vld [vmem:[%s20290_s2 + $0x5e8] sm:$0xff]  ;;  %v17484_v2 = vsub.f32 %v80_v11, %v17451_v19  ;;  %v4102_v11 = vand.u32 4294901760, %v4101_v46  ;;  %v17524_v46 = vpop.f32.mrf.mxu0 }
 0x236   :  { %4249 = vmatpush.msrb.mxu2 %v17361_v4  ;;  %4296 = vmatpush.msrb.mxu3 %v17302_v13  ;;  %v17494_v44 = vand.u32 4294901760, %v275_v26  ;;  %20669 = vst [vmem:[#allocation29_spill] sm:$0xff] %v17524_v46  ;;  %v20671_v46 = vand.u32 4294901760, %v17204_v56  ;;  %v17552_v56 = vsub.f32 %v273_v41, %v17519_v37  ;;  %v20677_v41 = vand.u32 4294901760, %v17504_v17 }
 0x237   :  { %4091 = vmatpush.msrb.mxu0 %v17374_v57  ;;  %4168 = vmatpush.msrb.mxu1 %v4167_v62  ;;  %v4185_v62 = vand.u32 4294901760, %v4184_v28  ;;  %v4191_v28 = vand.u32 4294901760, %v4190_v55  ;;  %v20668_v55 = vand.u32 4294901760, %v17458_v33 }
 0x238   :  { %4252 = vmatpush.msrb.mxu2 %v17378_v39  ;;  %4298 = vmatpush.msrb.mxu3 %v17325_v21  ;;  %v17517_v47 = vsub.f32 %v275_v26, %v17494_v44 }
 0x239   :  { %4093 = vmatpush.msrb.mxu0 %v17388_v50  ;;  %4174 = vmatpush.msrb.mxu1 %v4173_v53  ;;  %v4202_v53 = vsub.f32 %v17458_v33, %v20668_v55  ;;  %v17533_v55 = vsub.f32 %v274_v48, %v17506_v60 }
 0x23a   :  { %4255 = vmatpush.msrb.mxu2 %v17392_v25  ;;  %4300 = vmatpush.msrb.mxu3 %v17337_v58 }
 0x23b   :  { %4095 = vmatpush.msrb.mxu0 %v17422_v61  ;;  %4180 = vmatpush.msrb.mxu1 %v4179_v23  ;;  %v4197_v23 = vand.u32 4294901760, %v4196_v31  ;;  %v4203_v48 = vand.u32 4294901760, %v4202_v53  ;;  %v20683_v27 = vand.u32 4294901760, %v17533_v55 }
 0x23c   :  { %4258 = vmatpush.msrb.mxu2 %v17411_v18  ;;  %4302 = vmatpush.msrb.mxu3 %v17358_v6 }
 0x23d   :  { %4097 = vmatpush.msrb.mxu0 %v17446_v34  ;;  %4186 = vmatpush.msrb.mxu1 %v4185_v62  ;;  %v20670_v62 = vand.u32 4294901760, %v17474_v5  ;;  %v4508_v54 = vsub.f32 %v17533_v55, %v20683_v27  ;;  %v20686_v27 = vand.u32 4294901760, %v17265_v45 }
 0x23e   :  { %4261 = vmatpush.msrb.mxu2 %v17429_v30  ;;  %4304 = vmatpush.msrb.mxu3 %v17374_v57 }
 0x23f   :  { %4103 = vmatmul.f32.vlgmr.msrb.gmra.mxu0 %v4102_v11  ;;  %4192 = vmatpush.msrb.mxu1 %v4191_v28  ;;  %v4490_v31 = vsub.f32 %v17474_v5, %v20670_v62  ;;  %v20672_v11 = vand.u32 4294901760, %v17481_v3  ;;  %v20673_v62 = vand.u32 4294901760, %v17484_v2 }
 0x240   :  { %4327 = vmatpush.msra.mxu0 %v20671_v46  ;;  %4264 = vmatpush.msrb.mxu2 %v17458_v33  ;;  %v270_v46 = vld [vmem:[%s20290_s2 + $0x5c0] sm:$0xff] }
 0x241   :  { %v4208_v28 = vsub.f32 %v17481_v3, %v20672_v11  ;;  %v4109_v26 = vsub.f32 %v17484_v2, %v20673_v62  ;;  %4306 = vmatpush.msrb.mxu3 %v17388_v50  ;;  %4198 = vmatpush.msrb.mxu1 %v4197_v23  ;;  %v20675_v11 = vand.u32 4294901760, %v17218_v22  ;;  %v17560_v62 = vand.u32 4294901760, %v271_v9  ;;  %v269_v22 = vld [vmem:[%s20290_s2 + $0x5b8] sm:$0xff] }
 0x242   :  { %4267 = vmatpush.msrb.mxu2 %v17481_v3  ;;  %v4491_v53 = vand.u32 4294901760, %v4490_v31  ;;  %v4496_v23 = vsub.f32 %v17504_v17, %v20677_v41  ;;  %v17579_v31 = vand.u32 4294901760, %v270_v46  ;;  %v20679_v41 = vand.u32 4294901760, %v17517_v47 }
 0x243   :  { %4331 = vmatpush.msra.mxu0 %v20675_v11  ;;  %4308 = vmatpush.msrb.mxu3 %v17422_v61  ;;  %v20678_v11 = vand.u32 4294901760, %v17231_v10  ;;  %v4209_v20 = vand.u32 4294901760, %v4208_v28  ;;  %v4110_v38 = vand.u32 4294901760, %v4109_v26  ;;  %v268_v10 = vld [vmem:[%s20290_s2 + $0x5b0] sm:$0xff]  ;;  %v17589_v28 = vpop.f32.mrf.mxu3  ;;  %v20682_v26 = vand.u32 4294901760, %v17252_v49  ;;  %v17609_v49 = vpop.f32.mrf.mxu1 }
 0x244   :  { %4270 = vmatmul.f32.vlgmr.msrb.gmra.mxu2 %v17403_v36  ;;  %4204 = vmatpush.msrb.mxu1 %v4203_v48  ;;  %v4502_v63 = vsub.f32 %v17517_v47, %v20679_v41  ;;  %20680 = vst [vmem:[#allocation32_spill] sm:$0xff] %v17589_v28  ;;  %v17596_v48 = vsub.f32 %v271_v9, %v17560_v62  ;;  %v4497_v41 = vand.u32 4294901760, %v4496_v23  ;;  %v267_v36 = vld [vmem:[%s20290_s2 + $0x5a8] sm:$0xff]  ;;  %v20435_v9 = vand.u32 4294901760, %v17577_v43 }
 0x245   :  { %4335 = vmatpush.msra.mxu0 %v20678_v11  ;;  %4439 = vmatpush.msra.mxu2 %v17442_v8  ;;  %v17598_v11 = vand.u32 4294901760, %v269_v22  ;;  %20685 = vst [vmem:[#allocation34_spill] sm:$0xff] %v17609_v49  ;;  %v20687_v28 = vand.u32 4294901760, %v17552_v56  ;;  %v17632_v45 = vand.u32 4294901760, %v267_v36 }
 0x246   :  { %4310 = vmatpush.msrb.mxu3 %v17446_v34  ;;  %4210 = vmatpush.msrb.mxu1 %v4209_v20  ;;  %v4503_v23 = vand.u32 4294901760, %v4502_v63  ;;  %v20436_v20 = vand.u32 4294901760, %v17596_v48  ;;  %v20688_v63 = vand.u32 4294901760, %v17287_v1 }
 0x247   :  { %4314 = vmatmul.f32.vlgmr.msrb.gmra.mxu3 %v20681_v59  ;;  %4339 = vmatpush.msra.mxu0 %v20682_v26  ;;  %v17607_v59 = vpop.f32.mrf.mxu0  ;;  %v17613_v26 = vsub.f32 %v270_v46, %v17579_v31  ;;  %v17630_v46 = vsub.f32 %v269_v22, %v17598_v11  ;;  %v17661_v22 = vsub.f32 %v267_v36, %v17632_v45 }
 0x248   :  { %4441 = vmatpush.msra.mxu2 %v17476_v14  ;;  %4492 = vmatpush.msra.mxu3 %v4491_v53  ;;  %20684 = vst [vmem:[#allocation33_spill] sm:$0xff] %v17607_v59  ;;  %v17615_v53 = vand.u32 4294901760, %v268_v10  ;;  %v4514_v59 = vsub.f32 %v17552_v56, %v20687_v28  ;;  %v4509_v28 = vand.u32 4294901760, %v4508_v54  ;;  %v17650_v54 = vpop.f32.mrf.mxu2 }
 0x249   :  { %4111 = vmatmul.f32.gmra.mxu0 %v4110_v38  ;;  %4212 = vmatmul.f32.vlgmr.msrb.gmra.mxu1 %v17367_v51  ;;  %v266_v38 = vld [vmem:[%s20290_s2 + $0x5a0] sm:$0xff]  ;;  %20689 = vst [vmem:[#allocation35_spill] sm:$0xff] %v17650_v54  ;;  %v20694_v36 = vand.u32 4294901760, %v17613_v26 }
 0x24a   :  { %4343 = vmatpush.msra.mxu0 %v20686_v27  ;;  %4398 = vmatpush.msra.mxu1 %v17184_v16  ;;  %v265_v27 = vld [vmem:[%s20290_s2 + $0x598] sm:$0xff]  ;;  %v4520_v16 = vsub.f32 %v17577_v43, %v20435_v9  ;;  %v17648_v1 = vand.u32 4294901760, %v266_v38  ;;  %v4526_v9 = vsub.f32 %v17596_v48, %v20436_v20 }
 0x24b   :  { %4443 = vmatpush.msra.mxu2 %v17494_v44  ;;  %4498 = vmatpush.msra.mxu3 %v4497_v41  ;;  %v17646_v41 = vsub.f32 %v268_v10, %v17615_v53  ;;  %v17663_v49 = vand.u32 4294901760, %v265_v27  ;;  %v4532_v20 = vsub.f32 %v17613_v26, %v20694_v36 }
 0x24c   :  { %4347 = vmatpush.msra.mxu0 %v20688_v63  ;;  %4400 = vmatpush.msra.mxu1 %v17194_v24  ;;  %v4515_v63 = vand.u32 4294901760, %v4514_v59  ;;  %v20690_v24 = vand.u32 4294901760, %v17305_v0  ;;  %v264_v59 = vld [vmem:[%s20290_s2 + $0x590] sm:$0xff]  ;;  %v17669_v0 = vpop.f32.mrf.mxu3  ;;  %v17680_v54 = vsub.f32 %v266_v38, %v17648_v1  ;;  %v4527_v38 = vand.u32 4294901760, %v4526_v9 }
 0x24d   :  { %4445 = vmatpush.msra.mxu2 %v17506_v60  ;;  %4504 = vmatpush.msra.mxu3 %v4503_v23  ;;  %20691 = vst [vmem:[#allocation36_spill] sm:$0xff] %v17669_v0  ;;  %v20693_v23 = vand.u32 4294901760, %v17314_v15  ;;  %v17690_v15 = vand.u32 4294901760, %v264_v59  ;;  %v17700_v10 = vsub.f32 %v265_v27, %v17663_v49  ;;  %v20697_v0 = vand.u32 4294901760, %v17341_v12 }
 0x24e   :  { %4275 = vmatmul.f32.gmra.mxu2 %v17484_v2  ;;  %4351 = vmatpush.msra.mxu0 %v20690_v24  ;;  %v4521_v24 = vand.u32 4294901760, %v4520_v16  ;;  %v17692_v16 = vpop.f32.mrf.mxu1  ;;  %v20698_v27 = vand.u32 4294901760, %v17646_v41 }
 0x24f   :  { %4402 = vmatpush.msra.mxu1 %v17201_v35  ;;  %4447 = vmatpush.msra.mxu2 %v17519_v37  ;;  %v20692_v35 = vand.u32 4294901760, %v17484_v2  ;;  %v65_v2 = vld [vmem:[%s20492_s19 + $0x58] sm:$0xff]  ;;  %20695 = vst [vmem:[#allocation37_spill] sm:$0xff] %v17692_v16  ;;  %v4555_v16 = vand.u32 4294901760, %v17680_v54 }
 0x250   :  { %4510 = vmatpush.msra.mxu3 %v4509_v28  ;;  %4355 = vmatpush.msra.mxu0 %v20693_v23  ;;  %v263_v28 = vld [vmem:[%s20290_s2 + $0x588] sm:$0xff]  ;;  %v17710_v9 = vand.u32 4294901760, %v65_v2  ;;  %v4544_v36 = vsub.f32 %v17646_v41, %v20698_v27  ;;  %v4561_v27 = vand.u32 4294901760, %v17700_v10 }
 0x251   :  { %4320 = vmatmul.f32.gmra.mxu3 %v20692_v35  ;;  %4404 = vmatpush.msra.mxu1 %v17222_v7  ;;  %v20696_v35 = vand.u32 4294901760, %v17630_v46  ;;  %v262_v7 = vld [vmem:[%s20290_s2 + $0x580] sm:$0xff] }
 0x252   :  { %4449 = vmatpush.msra.mxu2 %v17547_v29  ;;  %4516 = vmatpush.msra.mxu3 %v4515_v63  ;;  %v17708_v63 = vand.u32 4294901760, %v263_v28  ;;  %v20699_v29 = vand.u32 4294901760, %v17361_v4  ;;  %v17723_v12 = vand.u32 4294901760, %v262_v7  ;;  %v20701_v4 = vand.u32 4294901760, %v17378_v39 }
 0x253   :  { %4216 = vmatmul.f32.gmra.mxu1 %v17451_v19  ;;  %v4538_v23 = vsub.f32 %v17630_v46, %v20696_v35  ;;  %4359 = vmatpush.msra.mxu0 %v20697_v0  ;;  %v4533_v35 = vand.u32 4294901760, %v4532_v20  ;;  %v20700_v0 = vand.u32 4294901760, %v17661_v22 }
 0x254   :  { %4406 = vmatpush.msra.mxu1 %v17227_v52  ;;  %4451 = vmatpush.msra.mxu2 %v17560_v62  ;;  %v17721_v52 = vsub.f32 %v264_v59, %v17690_v15  ;;  %v4545_v59 = vand.u32 4294901760, %v4544_v36  ;;  %v17748_v39 = vsub.f32 %v262_v7, %v17723_v12  ;;  %v20703_v36 = vand.u32 4294901760, %v17411_v18 }
 0x255   :  { %4522 = vmatpush.msra.mxu3 %v4521_v24  ;;  %4363 = vmatpush.msra.mxu0 %v20699_v29  ;;  %v4539_v20 = vand.u32 4294901760, %v4538_v23  ;;  %v4550_v24 = vsub.f32 %v17661_v22, %v20700_v0  ;;  %v17734_v29 = vsub.f32 %v263_v28, %v17708_v63  ;;  %v20702_v23 = vand.u32 4294901760, %v17392_v25  ;;  %v81_v25 = vld [vmem:[%s20492_s19 + $0xd8] sm:$0xff] }
 0x256   :  { %4408 = vmatpush.msra.mxu1 %v17249_v42  ;;  %4453 = vmatpush.msra.mxu2 %v17579_v31  ;;  %v17737_v42 = vsub.f32 %v65_v2, %v17710_v9  ;;  %v4562_v2 = vsub.f32 %v17700_v10, %v4561_v27  ;;  %v4579_v0 = vand.u32 4294901760, %v17748_v39 }
 0x257   :  { %4528 = vmatpush.msra.mxu3 %v4527_v38  ;;  %4367 = vmatpush.msra.mxu0 %v20701_v4  ;;  %v4556_v38 = vsub.f32 %v17680_v54, %v4555_v16  ;;  %v4551_v28 = vand.u32 4294901760, %v4550_v24  ;;  %v20705_v4 = vand.u32 4294901760, %v17458_v33 }
 0x258   :  { %4410 = vmatpush.msra.mxu1 %v17271_v40  ;;  %4455 = vmatpush.msra.mxu2 %v17598_v11  ;;  %v4567_v40 = vand.u32 4294901760, %v17721_v52  ;;  %v4472_v7 = vand.u32 4294901760, %v17737_v42  ;;  %v4563_v24 = vand.u32 4294901760, %v4562_v2 }
 0x259   :  { %4534 = vmatpush.msra.mxu3 %v4533_v35  ;;  %4371 = vmatpush.msra.mxu0 %v20702_v23  ;;  %v4557_v35 = vand.u32 4294901760, %v4556_v38  ;;  %v17792_v23 = vpop.f32.mrf.mxu0 }
 0x25a   :  { %4412 = vmatpush.msra.mxu1 %v17278_v32  ;;  %4457 = vmatpush.msra.mxu2 %v17615_v53  ;;  %v4573_v32 = vand.u32 4294901760, %v17734_v29  ;;  %v4568_v18 = vsub.f32 %v17721_v52, %v4567_v40  ;;  %20707 = vst [vmem:[#allocation38_spill] sm:$0xff] %v17792_v23 }
 0x25b   :  { %4540 = vmatpush.msra.mxu3 %v4539_v20  ;;  %4375 = vmatpush.msra.mxu0 %v20703_v36  ;;  %v20704_v20 = vand.u32 4294901760, %v17429_v30  ;;  %v4473_v30 = vsub.f32 %v17737_v42, %v4472_v7  ;;  %v17812_v36 = vpop.f32.mrf.mxu3 }
 0x25c   :  { %4414 = vmatpush.msra.mxu1 %v17302_v13  ;;  %4459 = vmatpush.msra.mxu2 %v17632_v45  ;;  %v17770_v13 = vand.u32 4294901760, %v81_v25  ;;  %v4569_v33 = vand.u32 4294901760, %v4568_v18  ;;  %20710 = vst [vmem:[#allocation40_spill] sm:$0xff] %v17812_v36 }
 0x25d   :  { %4546 = vmatpush.msra.mxu3 %v4545_v59  ;;  %4379 = vmatpush.msra.mxu0 %v20704_v20  ;;  %v20706_v59 = vand.u32 4294901760, %v17481_v3  ;;  %v17821_v20 = vpop.f32.mrf.mxu1 }
 0x25e   :  { %4416 = vmatpush.msra.mxu1 %v17325_v21  ;;  %4461 = vmatpush.msra.mxu2 %v17648_v1  ;;  %v4574_v21 = vsub.f32 %v17734_v29, %v4573_v32  ;;  %v17790_v38 = vsub.f32 %v81_v25, %v17770_v13  ;;  %v17803_v25 = vpop.f32.mrf.mxu2  ;;  %20713 = vst [vmem:[#allocation42_spill] sm:$0xff] %v17821_v20 }
 0x25f   :  { %4552 = vmatpush.msra.mxu3 %v4551_v28  ;;  %4383 = vmatpush.msra.mxu0 %v20705_v4  ;;  %v4474_v28 = vand.u32 4294901760, %v4473_v30  ;;  %20708 = vst [vmem:[#allocation39_spill] sm:$0xff] %v17803_v25 }
 0x260   :  { %4418 = vmatpush.msra.mxu1 %v17337_v58  ;;  %4463 = vmatpush.msra.mxu2 %v17663_v49  ;;  %v4580_v58 = vsub.f32 %v17748_v39, %v4579_v0  ;;  %v4575_v3 = vand.u32 4294901760, %v4574_v21  ;;  %v4480_v2 = vand.u32 4294901760, %v17790_v38 }
 0x261   :  { %4558 = vmatpush.msra.mxu3 %v4557_v35  ;;  %4387 = vmatpush.msra.mxu0 %v20706_v59  ;;  %v20711_v35 = vand.u32 4294901760, %v17504_v17  ;;  %v285_v59 = vld [vmem:[%s20290_s2 + $0x638] sm:$0xff] }
 0x262   :  { %4420 = vmatpush.msra.mxu1 %v17358_v6  ;;  %4465 = vmatpush.msra.mxu2 %v17690_v15  ;;  %v4581_v6 = vand.u32 4294901760, %v4580_v58 }
 0x263   :  { %4564 = vmatpush.msra.mxu3 %v4563_v24  ;;  %4389 = vmatmul.f32.vlgmr.msra.gmra.mxu0 %v17367_v51 }
 0x264   :  { %4422 = vmatpush.msra.mxu1 %v17374_v57  ;;  %4594 = vmatpush.msrb.mxu0 %v17474_v5  ;;  %v20709_v57 = vand.u32 4294901760, %v17474_v5  ;;  %v17819_v5 = vpop.f32.mrf.mxu0 }
 0x265   :  { %4467 = vmatpush.msra.mxu2 %v17708_v63  ;;  %4570 = vmatpush.msra.mxu3 %v4569_v33  ;;  %20712 = vst [vmem:[#allocation41_spill] sm:$0xff] %v17819_v5 }
 0x266   :  { %4424 = vmatpush.msra.mxu1 %v17388_v50  ;;  %4597 = vmatpush.msrb.mxu0 %v17504_v17  ;;  %v4481_v50 = vsub.f32 %v17790_v38, %v4480_v2  ;;  %v20714_v17 = vand.u32 4294901760, %v17517_v47  ;;  %v17835_v18 = vpop.f32.mrf.mxu2 }
 0x267   :  { %4469 = vmatpush.msra.mxu2 %v17723_v12  ;;  %4576 = vmatpush.msra.mxu3 %v4575_v3  ;;  %20716 = vst [vmem:[#allocation43_spill] sm:$0xff] %v17835_v18  ;;  %v304_v18 = vld [vmem:[%s20290_s2 + $0x6d0] sm:$0xff] }
 0x268   :  { %4475 = vmatmul.f32.vlgmr.msra.gmra.mxu2 %v4474_v28  ;;  %4600 = vmatpush.msrb.mxu0 %v17517_v47  ;;  %v17850_v47 = vpop.f32.mrf.mxu1 }
 0x269   :  { %4699 = vmatpush.msrb.mxu2 %v20709_v57  ;;  %4426 = vmatpush.msra.mxu1 %v17422_v61  ;;  %v4482_v61 = vand.u32 4294901760, %v4481_v50  ;;  %20720 = vst [vmem:[#allocation45_spill] sm:$0xff] %v17850_v47  ;;  %v284_v57 = vld [vmem:[%s20290_s2 + $0x630] sm:$0xff]  ;;  %v17998_v50 = vand.u32 4294901760, %v285_v59 }
 0x26a   :  { %4582 = vmatpush.msra.mxu3 %v4581_v6  ;;  %4603 = vmatpush.msrb.mxu0 %v17533_v55 }
 0x26b   :  { %4584 = vmatmul.f32.vlgmr.msra.gmra.mxu3 %v17710_v9  ;;  %4703 = vmatpush.msrb.mxu2 %v20711_v35 }
 0x26c   :  { %4770 = vmatpush.msrb.mxu3 %v17442_v8  ;;  %4428 = vmatpush.msra.mxu1 %v17446_v34  ;;  %v20715_v34 = vand.u32 4294901760, %v17533_v55  ;;  %v20722_v55 = vld [vmem:[#allocation30_spill] sm:$0xff] }
 0x26d   :  { %4393 = vmatmul.f32.gmra.mxu0 %v17451_v19  ;;  %4430 = vmatmul.f32.vlgmr.msra.gmra.mxu1 %v17367_v51  ;;  %v17843_v51 = vpop.f32.mrf.mxu3 }
 0x26e   :  { %4606 = vmatpush.msrb.mxu0 %v17552_v56  ;;  %4652 = vmatpush.msrb.mxu1 %v17442_v8  ;;  %v20717_v8 = vand.u32 4294901760, %v17552_v56  ;;  %20718 = vst [vmem:[#allocation44_spill] sm:$0xff] %v17843_v51  ;;  %v20725_v56 = vand.u32 4294901760, %v17646_v41  ;;  %v17963_v21 = vpop.f32.mrf.mxu2  ;;  %v303_v51 = vld [vmem:[%s20290_s2 + $0x6c8] sm:$0xff] }
 0x26f   :  { %4707 = vmatpush.msrb.mxu2 %v20714_v17  ;;  %4772 = vmatpush.msrb.mxu3 %v17476_v14  ;;  %20728 = vst [vmem:[#allocation46_spill] sm:$0xff] %v17963_v21 }
 0x270   :  { %4609 = vmatpush.msrb.mxu0 %v17577_v43  ;;  %4654 = vmatpush.msrb.mxu1 %v17476_v14  ;;  %v20719_v14 = vand.u32 4294901760, %v17577_v43  ;;  %v20723_v43 = vand.u32 4294901760, %v17613_v26 }
 0x271   :  { %4711 = vmatpush.msrb.mxu2 %v20715_v34  ;;  %4774 = vmatpush.msrb.mxu3 %v17494_v44 }
 0x272   :  { %4483 = vmatmul.f32.gmra.mxu2 %v4482_v61  ;;  %4612 = vmatpush.msrb.mxu0 %v17596_v48  ;;  %v18005_v61 = vpop.f32.mrf.mxu1 }
 0x273   :  { %4656 = vmatpush.msrb.mxu1 %v17494_v44  ;;  %4715 = vmatpush.msrb.mxu2 %v20717_v8  ;;  %v20721_v44 = vand.u32 4294901760, %v17596_v48  ;;  %v291_v48 = vld [vmem:[%s20290_s2 + $0x668] sm:$0xff]  ;;  %20731 = vst [vmem:[#allocation49_spill] sm:$0xff] %v18005_v61 }
 0x274   :  { %4776 = vmatpush.msrb.mxu3 %v17506_v60  ;;  %4615 = vmatpush.msrb.mxu0 %v17613_v26  ;;  %v283_v8 = vld [vmem:[%s20290_s2 + $0x628] sm:$0xff] }
 0x275   :  { %4588 = vmatmul.f32.gmra.mxu3 %v17770_v13  ;;  %4658 = vmatpush.msrb.mxu1 %v17506_v60  ;;  %v20724_v60 = vand.u32 4294901760, %v17630_v46  ;;  %v17985_v3 = vpop.f32.mrf.mxu3 }
 0x276   :  { %4719 = vmatpush.msrb.mxu2 %v20719_v14  ;;  %4778 = vmatpush.msrb.mxu3 %v17519_v37  ;;  %20729 = vst [vmem:[#allocation47_spill] sm:$0xff] %v17985_v3 }
 0x277   :  { %4434 = vmatmul.f32.gmra.mxu1 %v17451_v19  ;;  %4618 = vmatpush.msrb.mxu0 %v17630_v46  ;;  %v292_v19 = vld [vmem:[%s20290_s2 + $0x670] sm:$0xff] }
 0x278   :  { %4660 = vmatpush.msrb.mxu1 %v17519_v37  ;;  %4723 = vmatpush.msrb.mxu2 %v20721_v44  ;;  %v293_v37 = vld [vmem:[%s20290_s2 + $0x678] sm:$0xff]  ;;  %v17890_v26 = vand.u32 4294901760, %v292_v19 }
 0x279   :  { %4780 = vmatpush.msrb.mxu3 %v20722_v55  ;;  %4621 = vmatpush.msrb.mxu0 %v17646_v41 }
 0x27a   :  { %4662 = vmatpush.msrb.mxu1 %v20722_v55  ;;  %4727 = vmatpush.msrb.mxu2 %v20723_v43  ;;  %v17914_v41 = vsub.f32 %v292_v19, %v17890_v26  ;;  %v66_v19 = vld [vmem:[%s20492_s19 + $0x60] sm:$0xff] }
 0x27b   :  { %4782 = vmatpush.msrb.mxu3 %v17560_v62  ;;  %4624 = vmatpush.msrb.mxu0 %v17661_v22 }
 0x27c   :  { %4664 = vmatpush.msrb.mxu1 %v17560_v62  ;;  %4731 = vmatpush.msrb.mxu2 %v20724_v60  ;;  %v17880_v62 = vand.u32 4294901760, %v293_v37  ;;  %v18037_v60 = vsub.f32 %v285_v59, %v17998_v50 }
 0x27d   :  { %4784 = vmatpush.msrb.mxu3 %v17579_v31  ;;  %4627 = vmatpush.msrb.mxu0 %v17680_v54 }
 0x27e   :  { %4666 = vmatpush.msrb.mxu1 %v17579_v31  ;;  %4735 = vmatpush.msrb.mxu2 %v20725_v56  ;;  %v20726_v31 = vand.u32 4294901760, %v17661_v22  ;;  %v17900_v46 = vsub.f32 %v293_v37, %v17880_v62  ;;  %v290_v22 = vld [vmem:[%s20290_s2 + $0x660] sm:$0xff] }
 0x27f   :  { %4786 = vmatpush.msrb.mxu3 %v17598_v11  ;;  %4630 = vmatpush.msrb.mxu0 %v17700_v10  ;;  %v17918_v54 = vand.u32 4294901760, %v290_v22 }
 0x280   :  { %4668 = vmatpush.msrb.mxu1 %v17598_v11  ;;  %4739 = vmatpush.msrb.mxu2 %v20726_v31  ;;  %v17897_v11 = vand.u32 4294901760, %v291_v48  ;;  %v20448_v10 = vand.u32 4294901760, %v17900_v46  ;;  %v18047_v31 = vpop.f32.mrf.mxu2 }
 0x281   :  { %4788 = vmatpush.msrb.mxu3 %v17615_v53  ;;  %4633 = vmatpush.msrb.mxu0 %v17721_v52  ;;  %v20447_v52 = vand.u32 4294901760, %v17914_v41  ;;  %v17948_v4 = vsub.f32 %v290_v22, %v17918_v54  ;;  %20732 = vst [vmem:[#allocation50_spill] sm:$0xff] %v18047_v31 }
 0x282   :  { %4670 = vmatpush.msrb.mxu1 %v17615_v53  ;;  %4743 = vmatpush.msrb.mxu2 %v4555_v16  ;;  %v289_v53 = vld [vmem:[%s20290_s2 + $0x658] sm:$0xff]  ;;  %v17920_v16 = vpop.f32.mrf.mxu0 }
 0x283   :  { %4790 = vmatpush.msrb.mxu3 %v17632_v45  ;;  %4636 = vmatpush.msrb.mxu0 %v17734_v29  ;;  %20727 = vst [vmem:[#allocation30_spill] sm:$0xff] %v17920_v16  ;;  %v4862_v29 = vsub.f32 %v17900_v46, %v20448_v10  ;;  %v20445_v33 = vand.u32 4294901760, %v17948_v4  ;;  %v308_v10 = vld [vmem:[%s20290_s2 + $0x6f0] sm:$0xff]  ;;  %v18243_v16 = vand.u32 4294901760, %v304_v18 }
 0x284   :  { %4672 = vmatpush.msrb.mxu1 %v17632_v45  ;;  %4747 = vmatpush.msrb.mxu2 %v4561_v27  ;;  %v17925_v45 = vand.u32 4294901760, %v289_v53  ;;  %v17929_v27 = vsub.f32 %v291_v48, %v17897_v11  ;;  %v281_v48 = vld [vmem:[%s20290_s2 + $0x618] sm:$0xff] }
 0x285   :  { %4792 = vmatpush.msrb.mxu3 %v17648_v1  ;;  %4639 = vmatpush.msrb.mxu0 %v17748_v39  ;;  %v4868_v39 = vsub.f32 %v17914_v41, %v20447_v52  ;;  %v4863_v28 = vand.u32 4294901760, %v4862_v29  ;;  %v4880_v14 = vsub.f32 %v17948_v4, %v20445_v33  ;;  %v280_v29 = vld [vmem:[%s20290_s2 + $0x610] sm:$0xff]  ;;  %v18273_v25 = vsub.f32 %v304_v18, %v18243_v16 }
 0x286   :  { %4674 = vmatpush.msrb.mxu1 %v17648_v1  ;;  %4751 = vmatpush.msrb.mxu2 %v4567_v40  ;;  %v288_v1 = vld [vmem:[%s20290_s2 + $0x650] sm:$0xff]  ;;  %v287_v40 = vld [vmem:[%s20290_s2 + $0x648] sm:$0xff] }
 0x287   :  { %4794 = vmatpush.msrb.mxu3 %v17663_v49  ;;  %4642 = vmatmul.f32.vlgmr.msrb.gmra.mxu0 %v17737_v42  ;;  %v17945_v24 = vand.u32 4294901760, %v288_v1  ;;  %v17967_v30 = vand.u32 4294901760, %v287_v40  ;;  %v4869_v17 = vand.u32 4294901760, %v4868_v39  ;;  %v282_v42 = vld [vmem:[%s20290_s2 + $0x620] sm:$0xff]  ;;  %v4881_v22 = vand.u32 4294901760, %v4880_v14 }
 0x288   :  { %4676 = vmatpush.msrb.mxu1 %v17663_v49  ;;  %4811 = vmatpush.msra.mxu0 %v17880_v62  ;;  %v286_v49 = vld [vmem:[%s20290_s2 + $0x640] sm:$0xff]  ;;  %v18063_v39 = vand.u32 4294901760, %v66_v19  ;;  %v18258_v36 = vpop.f32.mrf.mxu2 }
 0x289   :  { %4755 = vmatpush.msrb.mxu2 %v4573_v32  ;;  %4796 = vmatpush.msrb.mxu3 %v17690_v15  ;;  %v17961_v32 = vsub.f32 %v289_v53, %v17925_v45  ;;  %v17983_v58 = vsub.f32 %v288_v1, %v17945_v24  ;;  %v18054_v1 = vand.u32 4294901760, %v282_v42  ;;  %20746 = vst [vmem:[#allocation55_spill] sm:$0xff] %v18258_v36 }
 0x28a   :  { %4678 = vmatpush.msrb.mxu1 %v17690_v15  ;;  %4813 = vmatpush.msra.mxu0 %v17890_v26  ;;  %v20446_v15 = vand.u32 4294901760, %v17929_v27  ;;  %v18003_v35 = vpop.f32.mrf.mxu0 }
 0x28b   :  { %4759 = vmatpush.msrb.mxu2 %v4579_v0  ;;  %4798 = vmatpush.msrb.mxu3 %v17708_v63  ;;  %v17974_v0 = vand.u32 4294901760, %v286_v49  ;;  %20730 = vst [vmem:[#allocation48_spill] sm:$0xff] %v18003_v35  ;;  %v20440_v44 = vand.u32 4294901760, %v17983_v58 }
 0x28c   :  { %4761 = vmatmul.f32.vlgmr.msrb.gmra.mxu2 %v17710_v9  ;;  %4815 = vmatpush.msra.mxu0 %v17897_v11  ;;  %v4874_v6 = vsub.f32 %v17929_v27, %v20446_v15 }
 0x28d   :  { %4966 = vmatpush.msra.mxu2 %v17900_v46  ;;  %4680 = vmatpush.msrb.mxu1 %v17708_v63  ;;  %v20443_v63 = vand.u32 4294901760, %v17961_v32  ;;  %v18010_v34 = vsub.f32 %v286_v49, %v17974_v0  ;;  %v4892_v53 = vsub.f32 %v17983_v58, %v20440_v44  ;;  %v18090_v44 = vpop.f32.mrf.mxu1 }
 0x28e   :  { %4800 = vmatpush.msrb.mxu3 %v17723_v12  ;;  %4817 = vmatpush.msra.mxu0 %v17918_v54  ;;  %v4875_v55 = vand.u32 4294901760, %v4874_v6  ;;  %v20442_v6 = vand.u32 4294901760, %v18037_v60  ;;  %20734 = vst [vmem:[#allocation52_spill] sm:$0xff] %v18090_v44  ;;  %v18172_v44 = vand.u32 4294901760, %v308_v10 }
 0x28f   :  { %4802 = vmatmul.f32.vlgmr.msrb.gmra.mxu3 %v17710_v9  ;;  %4969 = vmatpush.msra.mxu2 %v17914_v41  ;;  %v18001_v9 = vsub.f32 %v287_v40, %v17967_v30  ;;  %v4886_v43 = vsub.f32 %v17961_v32, %v20443_v63  ;;  %v20441_v56 = vand.u32 4294901760, %v18010_v34  ;;  %v82_v63 = vld [vmem:[%s20492_s19 + $0xe0] sm:$0xff] }
 0x290   :  { %5024 = vmatpush.msra.mxu3 %v17880_v62  ;;  %4682 = vmatpush.msrb.mxu1 %v17723_v12  ;;  %v18021_v12 = vand.u32 4294901760, %v284_v57 }
 0x291   :  { %4647 = vmatmul.f32.gmra.mxu0 %v17790_v38  ;;  %4686 = vmatmul.f32.vlgmr.msrb.gmra.mxu1 %v4472_v7  ;;  %v18033_v7 = vand.u32 4294901760, %v283_v8  ;;  %v20439_v37 = vand.u32 4294901760, %v18001_v9  ;;  %v4887_v49 = vand.u32 4294901760, %v4886_v43  ;;  %v4904_v14 = vsub.f32 %v18010_v34, %v20441_v56 }
 0x292   :  { %4819 = vmatpush.msra.mxu0 %v17925_v45  ;;  %4864 = vmatpush.msra.mxu1 %v4863_v28  ;;  %v18057_v40 = vsub.f32 %v284_v57, %v18021_v12  ;;  %v18070_v28 = vand.u32 4294901760, %v281_v48  ;;  %v18084_v43 = vand.u32 4294901760, %v280_v29 }
 0x293   :  { %4972 = vmatpush.msra.mxu2 %v17929_v27  ;;  %5026 = vmatpush.msra.mxu3 %v17890_v26  ;;  %v4898_v59 = vsub.f32 %v18001_v9, %v20439_v37  ;;  %v18074_v57 = vsub.f32 %v283_v8, %v18033_v7  ;;  %v18088_v8 = vsub.f32 %v282_v42, %v18054_v1 }
 0x294   :  { %4821 = vmatpush.msra.mxu0 %v17945_v24  ;;  %4870 = vmatpush.msra.mxu1 %v4869_v17  ;;  %v18076_v17 = vpop.f32.mrf.mxu3  ;;  %v20444_v37 = vand.u32 4294901760, %v18057_v40  ;;  %v4910_v42 = vsub.f32 %v18037_v60, %v20442_v6  ;;  %v18107_v38 = vsub.f32 %v281_v48, %v18070_v28  ;;  %v278_v48 = vld [vmem:[%s20290_s2 + $0x600] sm:$0xff] }
 0x295   :  { %4975 = vmatpush.msra.mxu2 %v17948_v4  ;;  %5028 = vmatpush.msra.mxu3 %v17897_v11  ;;  %20733 = vst [vmem:[#allocation51_spill] sm:$0xff] %v18076_v17  ;;  %v20449_v56 = vand.u32 4294901760, %v18074_v57  ;;  %v20450_v6 = vand.u32 4294901760, %v18088_v8  ;;  %v18142_v52 = vand.u32 4294901760, %v278_v48  ;;  %v18277_v20 = vpop.f32.mrf.mxu1 }
 0x296   :  { %4765 = vmatmul.f32.gmra.mxu2 %v17770_v13  ;;  %4823 = vmatpush.msra.mxu0 %v17967_v30  ;;  %20749 = vst [vmem:[#allocation56_spill] sm:$0xff] %v18277_v20 }
 0x297   :  { %4876 = vmatpush.msra.mxu1 %v4875_v55  ;;  %4978 = vmatpush.msra.mxu2 %v17961_v32  ;;  %v4893_v55 = vand.u32 4294901760, %v4892_v53  ;;  %v4899_v53 = vand.u32 4294901760, %v4898_v59  ;;  %v4922_v33 = vsub.f32 %v18074_v57, %v20449_v56  ;;  %v4928_v56 = vsub.f32 %v18088_v8, %v20450_v6 }
 0x298   :  { %5030 = vmatpush.msra.mxu3 %v17918_v54  ;;  %4825 = vmatpush.msra.mxu0 %v17974_v0 }
 0x299   :  { %4806 = vmatmul.f32.gmra.mxu3 %v17770_v13  ;;  %4882 = vmatpush.msra.mxu1 %v4881_v22  ;;  %v279_v13 = vld [vmem:[%s20290_s2 + $0x608] sm:$0xff]  ;;  %v18099_v22 = vsub.f32 %v66_v19, %v18063_v39  ;;  %v309_v19 = vld [vmem:[%s20290_s2 + $0x6f8] sm:$0xff] }
 0x29a   :  { %4981 = vmatpush.msra.mxu2 %v17983_v58  ;;  %5032 = vmatpush.msra.mxu3 %v17925_v45  ;;  %v18118_v59 = vand.u32 4294901760, %v279_v13  ;;  %v18138_v15 = vand.u32 4294901760, %v309_v19 }
 0x29b   :  { %4692 = vmatmul.f32.gmra.mxu1 %v4480_v2  ;;  %4827 = vmatpush.msra.mxu0 %v17998_v50  ;;  %v4905_v2 = vand.u32 4294901760, %v4904_v14  ;;  %v18125_v14 = vsub.f32 %v280_v29, %v18084_v43  ;;  %v20735_v17 = vand.u32 4294901760, %v18099_v22  ;;  %v20752_v18 = vand.u32 4294901760, %v18099_v22 }
 0x29c   :  { %4888 = vmatpush.msra.mxu1 %v4887_v49  ;;  %4984 = vmatpush.msra.mxu2 %v18001_v9  ;;  %v4916_v49 = vsub.f32 %v18057_v40, %v20444_v37  ;;  %v4911_v37 = vand.u32 4294901760, %v4910_v42  ;;  %v18154_v29 = vsub.f32 %v279_v13, %v18118_v59  ;;  %v20736_v13 = vand.u32 4294901760, %v18107_v38 }
 0x29d   :  { %5034 = vmatpush.msra.mxu3 %v17945_v24  ;;  %4829 = vmatpush.msra.mxu0 %v18021_v12  ;;  %v4845_v31 = vsub.f32 %v18099_v22, %v20735_v17  ;;  %v18177_v17 = vsub.f32 %v278_v48, %v18142_v52  ;;  %v305_v48 = vld [vmem:[%s20290_s2 + $0x6d8] sm:$0xff] }
 0x29e   :  { %4894 = vmatpush.msra.mxu1 %v4893_v55  ;;  %4987 = vmatpush.msra.mxu2 %v18010_v34  ;;  %v4917_v42 = vand.u32 4294901760, %v4916_v49  ;;  %v4923_v49 = vand.u32 4294901760, %v4922_v33  ;;  %v4934_v6 = vsub.f32 %v18107_v38, %v20736_v13  ;;  %v18170_v55 = vsub.f32 %v309_v19, %v18138_v15  ;;  %v306_v33 = vld [vmem:[%s20290_s2 + $0x6e0] sm:$0xff] }
 0x29f   :  { %5036 = vmatpush.msra.mxu3 %v17967_v30  ;;  %4831 = vmatpush.msra.mxu0 %v18033_v7  ;;  %v20737_v19 = vand.u32 4294901760, %v18125_v14  ;;  %v18202_v35 = vand.u32 4294901760, %v306_v33  ;;  %v18215_v61 = vand.u32 4294901760, %v305_v48 }
 0x2a0   :  { %4900 = vmatpush.msra.mxu1 %v4899_v53  ;;  %4990 = vmatpush.msra.mxu2 %v18037_v60  ;;  %v18147_v53 = vand.u32 4294901760, %v82_v63 }
 0x2a1   :  { %5038 = vmatpush.msra.mxu3 %v17974_v0  ;;  %4833 = vmatpush.msra.mxu0 %v18054_v1  ;;  %v4940_v13 = vsub.f32 %v18125_v14, %v20737_v19  ;;  %v18200_v19 = vsub.f32 %v308_v10, %v18172_v44 }
 0x2a2   :  { %4906 = vmatpush.msra.mxu1 %v4905_v2  ;;  %4993 = vmatpush.msra.mxu2 %v18057_v40  ;;  %v307_v2 = vld [vmem:[%s20290_s2 + $0x6e8] sm:$0xff]  ;;  %v18180_v3 = vsub.f32 %v82_v63, %v18147_v53  ;;  %v4846_v63 = vand.u32 4294901760, %v4845_v31  ;;  %v18220_v31 = vpop.f32.mrf.mxu0 }
 0x2a3   :  { %5040 = vmatpush.msra.mxu3 %v17998_v50  ;;  %4835 = vmatpush.msra.mxu0 %v18070_v28  ;;  %v18190_v21 = vand.u32 4294901760, %v307_v2  ;;  %20739 = vst [vmem:[#allocation53_spill] sm:$0xff] %v18220_v31  ;;  %v20741_v31 = vand.u32 4294901760, %v17900_v46  ;;  %v18248_v46 = vsub.f32 %v305_v48, %v18215_v61  ;;  %v20747_v48 = vand.u32 4294901760, %v18200_v19 }
 0x2a4   :  { %4912 = vmatpush.msra.mxu1 %v4911_v37  ;;  %4996 = vmatpush.msra.mxu2 %v18074_v57  ;;  %v4929_v37 = vand.u32 4294901760, %v4928_v56  ;;  %v4935_v56 = vand.u32 4294901760, %v4934_v6  ;;  %v20738_v6 = vand.u32 4294901760, %v18154_v29 }
 0x2a5   :  { %5042 = vmatpush.msra.mxu3 %v18021_v12  ;;  %4837 = vmatpush.msra.mxu0 %v18084_v43  ;;  %v18213_v10 = vsub.f32 %v307_v2, %v18190_v21 }
 0x2a6   :  { %4918 = vmatpush.msra.mxu1 %v4917_v42  ;;  %4999 = vmatpush.msra.mxu2 %v18088_v8  ;;  %v4946_v42 = vsub.f32 %v18154_v29, %v20738_v6  ;;  %v18229_v6 = vsub.f32 %v306_v33, %v18202_v35 }
 0x2a7   :  { %5044 = vmatpush.msra.mxu3 %v18033_v7  ;;  %4839 = vmatpush.msra.mxu0 %v18118_v59 }
 0x2a8   :  { %4924 = vmatpush.msra.mxu1 %v4923_v49  ;;  %5002 = vmatpush.msra.mxu2 %v18107_v38  ;;  %v4941_v49 = vand.u32 4294901760, %v4940_v13  ;;  %v4947_v33 = vand.u32 4294901760, %v4946_v42 }
 0x2a9   :  { %5046 = vmatpush.msra.mxu3 %v18054_v1  ;;  %4841 = vmatpush.msra.mxu0 %v18142_v52 }
 0x2aa   :  { %4930 = vmatpush.msra.mxu1 %v4929_v37  ;;  %5005 = vmatpush.msra.mxu2 %v18125_v14  ;;  %v20740_v37 = vand.u32 4294901760, %v18170_v55 }
 0x2ab   :  { %5048 = vmatpush.msra.mxu3 %v18070_v28  ;;  %4847 = vmatmul.f32.vlgmr.msra.gmra.mxu0 %v4846_v63  ;;  %v20742_v63 = vand.u32 4294901760, %v18177_v17 }
 0x2ac   :  { %4936 = vmatpush.msra.mxu1 %v4935_v56  ;;  %v5234_v13 = vsub.f32 %v18170_v55, %v20740_v37  ;;  %5071 = vmatpush.msrb.mxu0 %v20741_v31  ;;  %v20743_v37 = vand.u32 4294901760, %v18180_v3  ;;  %v302_v31 = vld [vmem:[%s20290_s2 + $0x6c0] sm:$0xff] }
 0x2ad   :  { %5008 = vmatpush.msra.mxu2 %v18154_v29  ;;  %v4952_v56 = vsub.f32 %v18177_v17, %v20742_v63  ;;  %5050 = vmatpush.msra.mxu3 %v18084_v43  ;;  %v20744_v63 = vand.u32 4294901760, %v17914_v41  ;;  %v301_v41 = vld [vmem:[%s20290_s2 + $0x6b8] sm:$0xff] }
 0x2ae   :  { %v4853_v2 = vsub.f32 %v18180_v3, %v20743_v37  ;;  %4942 = vmatpush.msra.mxu1 %v4941_v49  ;;  %v18256_v37 = vand.u32 4294901760, %v303_v51  ;;  %v5235_v42 = vand.u32 4294901760, %v5234_v13  ;;  %v5240_v49 = vsub.f32 %v18200_v19, %v20747_v48 }
 0x2af   :  { %5075 = vmatpush.msrb.mxu0 %v20744_v63  ;;  %5011 = vmatpush.msra.mxu2 %v18177_v17  ;;  %v20748_v63 = vand.u32 4294901760, %v17929_v27  ;;  %v4953_v36 = vand.u32 4294901760, %v4952_v56  ;;  %v18275_v13 = vand.u32 4294901760, %v302_v31  ;;  %v20750_v48 = vand.u32 4294901760, %v18213_v10  ;;  %v18287_v56 = vpop.f32.mrf.mxu3 }
 0x2b0   :  { %20745 = vst [vmem:[#allocation54_spill] sm:$0xff] %v18256_v37  ;;  %5052 = vmatpush.msra.mxu3 %v18118_v59  ;;  %5014 = vmatmul.f32.vlgmr.msra.gmra.mxu2 %v18099_v22  ;;  %v4854_v5 = vand.u32 4294901760, %v4853_v2  ;;  %v300_v2 = vld [vmem:[%s20290_s2 + $0x6b0] sm:$0xff]  ;;  %v18296_v20 = vand.u32 4294901760, %v301_v41  ;;  %v20754_v27 = vand.u32 4294901760, %v18229_v6  ;;  %v299_v22 = vld [vmem:[%s20290_s2 + $0x6a8] sm:$0xff] }
 0x2b1   :  { %5079 = vmatpush.msrb.mxu0 %v20748_v63  ;;  %5183 = vmatpush.msrb.mxu2 %v18138_v15  ;;  %v5246_v47 = vsub.f32 %v18213_v10, %v20750_v48  ;;  %20751 = vst [vmem:[#allocation57_spill] sm:$0xff] %v18287_v56  ;;  %v20753_v63 = vand.u32 4294901760, %v17948_v4  ;;  %v5241_v48 = vand.u32 4294901760, %v5240_v49  ;;  %v18309_v4 = vsub.f32 %v302_v31, %v18275_v13 }
 0x2b2   :  { %4948 = vmatpush.msra.mxu1 %v4947_v33  ;;  %5054 = vmatpush.msra.mxu3 %v18142_v52  ;;  %v18294_v33 = vsub.f32 %v303_v51, %v18256_v37  ;;  %v5252_v23 = vsub.f32 %v18229_v6, %v20754_v27  ;;  %v20451_v51 = vand.u32 4294901760, %v18273_v25  ;;  %v20757_v27 = vand.u32 4294901760, %v18248_v46 }
 0x2b3   :  { %5058 = vmatmul.f32.vlgmr.msra.gmra.mxu3 %v20752_v18  ;;  %5083 = vmatpush.msrb.mxu0 %v20753_v63  ;;  %v18305_v18 = vpop.f32.mrf.mxu0  ;;  %v18311_v63 = vand.u32 4294901760, %v300_v2  ;;  %v5247_v49 = vand.u32 4294901760, %v5246_v47  ;;  %v18326_v31 = vsub.f32 %v301_v41, %v18296_v20  ;;  %v20758_v47 = vand.u32 4294901760, %v17983_v58 }
 0x2b4   :  { %5185 = vmatpush.msrb.mxu2 %v18172_v44  ;;  %5236 = vmatpush.msrb.mxu3 %v5235_v42  ;;  %20755 = vst [vmem:[#allocation58_spill] sm:$0xff] %v18305_v18  ;;  %v20756_v42 = vand.u32 4294901760, %v17961_v32  ;;  %v5258_v56 = vsub.f32 %v18248_v46, %v20757_v27  ;;  %v18328_v32 = vand.u32 4294901760, %v299_v22  ;;  %v297_v27 = vld [vmem:[%s20290_s2 + $0x698] sm:$0xff] }
 0x2b5   :  { %4954 = vmatpush.msra.mxu1 %v4953_v36  ;;  %4855 = vmatmul.f32.gmra.mxu0 %v4854_v5  ;;  %v298_v36 = vld [vmem:[%s20290_s2 + $0x6a0] sm:$0xff]  ;;  %v20452_v5 = vand.u32 4294901760, %v18294_v33  ;;  %v18359_v18 = vand.u32 4294901760, %v297_v27 }
 0x2b6   :  { %4956 = vmatmul.f32.vlgmr.msra.gmra.mxu1 %v18063_v39  ;;  %5087 = vmatpush.msrb.mxu0 %v20756_v42  ;;  %v5253_v42 = vand.u32 4294901760, %v5252_v23  ;;  %v18344_v58 = vand.u32 4294901760, %v298_v36  ;;  %v18346_v23 = vpop.f32.mrf.mxu2  ;;  %v18357_v41 = vsub.f32 %v299_v22, %v18328_v32 }
 0x2b7   :  { %5142 = vmatpush.msrb.mxu1 %v17880_v62  ;;  %5187 = vmatpush.msrb.mxu2 %v18190_v21  ;;  %v5264_v62 = vsub.f32 %v18273_v25, %v20451_v51  ;;  %20760 = vst [vmem:[#allocation60_spill] sm:$0xff] %v18346_v23  ;;  %v5270_v51 = vsub.f32 %v18294_v33, %v20452_v5  ;;  %v20766_v5 = vand.u32 4294901760, %v18309_v4 }
 0x2b8   :  { %5242 = vmatpush.msrb.mxu3 %v5241_v48  ;;  %5091 = vmatpush.msrb.mxu0 %v20758_v47  ;;  %v18342_v48 = vsub.f32 %v300_v2, %v18311_v63  ;;  %v5259_v47 = vand.u32 4294901760, %v5258_v56  ;;  %v296_v56 = vld [vmem:[%s20290_s2 + $0x690] sm:$0xff]  ;;  %v18398_v23 = vsub.f32 %v297_v27, %v18359_v18 }
 0x2b9   :  { %5144 = vmatpush.msrb.mxu1 %v17890_v26  ;;  %5189 = vmatpush.msrb.mxu2 %v18202_v35  ;;  %v20761_v26 = vand.u32 4294901760, %v18001_v9  ;;  %v20764_v9 = vand.u32 4294901760, %v18180_v3  ;;  %v5265_v22 = vand.u32 4294901760, %v5264_v62  ;;  %v5276_v2 = vsub.f32 %v18309_v4, %v20766_v5 }
 0x2ba   :  { %20759 = vst [vmem:[#allocation59_spill] sm:$0xff] %v18342_v48  ;;  %5248 = vmatpush.msrb.mxu3 %v5247_v49  ;;  %5019 = vmatmul.f32.gmra.mxu2 %v18180_v3  ;;  %v18364_v49 = vpop.f32.mrf.mxu1  ;;  %v67_v3 = vld [vmem:[%s20492_s19 + $0x68] sm:$0xff]  ;;  %v18390_v5 = vand.u32 4294901760, %v296_v56  ;;  %v20768_v62 = vand.u32 4294901760, %v18326_v31  ;;  %v20770_v27 = vand.u32 4294901760, %v18342_v48 }
 0x2bb   :  { %5095 = vmatpush.msrb.mxu0 %v20761_v26  ;;  %5146 = vmatpush.msrb.mxu1 %v17897_v11  ;;  %20762 = vst [vmem:[#allocation61_spill] sm:$0xff] %v18364_v49  ;;  %v18367_v11 = vpop.f32.mrf.mxu3  ;;  %v20765_v26 = vand.u32 4294901760, %v18010_v34  ;;  %v18378_v49 = vsub.f32 %v298_v36, %v18344_v58  ;;  %v18386_v34 = vpop.f32.mrf.mxu0  ;;  %v5271_v36 = vand.u32 4294901760, %v5270_v51  ;;  %v18408_v51 = vand.u32 4294901760, %v67_v3 }
 0x2bc   :  { %5191 = vmatpush.msrb.mxu2 %v18215_v61  ;;  %5254 = vmatpush.msrb.mxu3 %v5253_v42  ;;  %20763 = vst [vmem:[#allocation62_spill] sm:$0xff] %v18367_v11  ;;  %v295_v42 = vld [vmem:[%s20290_s2 + $0x688] sm:$0xff]  ;;  %v20769_v11 = vand.u32 4294901760, %v18037_v60  ;;  %v13733_v60 = vld [vmem:[%s20291_s3] ss:$0 sm:$0xff]  ;;  %s13865_s3 = smov 48  }
 0x2bd   :  { %5064 = vmatmul.f32.gmra.mxu3 %v20764_v9  ;;  %5099 = vmatpush.msrb.mxu0 %v20765_v26  ;;  %20767 = vst [vmem:[#allocation63_spill] sm:$0xff] %v18386_v34  ;;  %v5282_v9 = vsub.f32 %v18326_v31, %v20768_v62  ;;  %v5277_v62 = vand.u32 4294901760, %v5276_v2  ;;  %v5288_v26 = vsub.f32 %v18342_v48, %v20770_v27  ;;  %v20772_v27 = vand.u32 4294901760, %v18357_v41 }
 0x2be   :  { %5148 = vmatpush.msrb.mxu1 %v17918_v54  ;;  %5193 = vmatpush.msrb.mxu2 %v18243_v16  ;;  %v294_v54 = vld [vmem:[%s20290_s2 + $0x680] sm:$0xff] }
 0x2bf   :  { %5260 = vmatpush.msrb.mxu3 %v5259_v47  ;;  %4960 = vmatmul.f32.gmra.mxu1 %v18147_v53  ;;  %v18406_v47 = vand.u32 4294901760, %v295_v42  ;;  %v5283_v2 = vand.u32 4294901760, %v5282_v9  ;;  %v5294_v34 = vsub.f32 %v18357_v41, %v20772_v27  ;;  %v20774_v9 = vand.u32 4294901760, %v18378_v49  ;;  %v20775_v27 = vld [vmem:[#allocation5_spill] sm:$0xff] }
 0x2c0   :  { %5103 = vmatpush.msrb.mxu0 %v20769_v11  ;;  %5150 = vmatpush.msrb.mxu1 %v17925_v45  ;;  %v20771_v45 = vand.u32 4294901760, %v18057_v40  ;;  %v18422_v11 = vsub.f32 %v296_v56, %v18390_v5  ;;  %v20773_v40 = vand.u32 4294901760, %v18074_v57  ;;  %v18440_v56 = vsub.f32 %v67_v3, %v18408_v51  ;;  %v18454_v3 = vpop.f32.mrf.mxu2 }
 0x2c1   :  { %5195 = vmatpush.msrb.mxu2 %v18256_v37  ;;  %5266 = vmatpush.msrb.mxu3 %v5265_v22  ;;  %v18424_v22 = vand.u32 4294901760, %v294_v54  ;;  %v385_v37 = vadd.f32 %v13733_v60, %v20775_v27  ;;  %v20776_v57 = vand.u32 4294901760, %v18088_v8  ;;  %v83_v8 = vld [vmem:[%s20492_s19 + $0xe8] sm:$0xff] }
 0x2c2   :  { %5107 = vmatpush.msrb.mxu0 %v20771_v45  ;;  %5152 = vmatpush.msrb.mxu1 %v17945_v24  ;;  %v18431_v48 = vpop.f32.mrf.mxu1  ;;  %v18437_v24 = vsub.f32 %v295_v42, %v18406_v47  ;;  %v5300_v45 = vsub.f32 %v18378_v49, %v20774_v9  ;;  %v20778_v9 = vand.u32 4294901760, %v18107_v38  ;;  %v20782_v38 = vand.u32 4294901760, %v18422_v11 }
 0x2c3   :  { %5197 = vmatpush.msrb.mxu2 %v18275_v13  ;;  %5272 = vmatpush.msrb.mxu3 %v5271_v36  ;;  %v5289_v36 = vand.u32 4294901760, %v5288_v26  ;;  %v18452_v42 = vsub.f32 %v294_v54, %v18424_v22  ;;  %v5295_v26 = vand.u32 4294901760, %v5294_v34  ;;  %v18470_v34 = vpop.f32.mrf.mxu3  ;;  %v20783_v54 = vld [vmem:[#allocation10_spill] sm:$0xff] }
 0x2c4   :  { %5111 = vmatpush.msrb.mxu0 %v20773_v40  ;;  %5154 = vmatpush.msrb.mxu1 %v17967_v30  ;;  %20779 = vst [vmem:[#allocation5_spill] sm:$0xff] %v18470_v34  ;;  %v5301_v27 = vand.u32 4294901760, %v5300_v45  ;;  %v20781_v30 = vand.u32 4294901760, %v18125_v14  ;;  %v393_v34 = vadd.f32 %v13733_v60, %v20783_v54  ;;  %v20786_v45 = vand.u32 4294901760, %v18440_v56  ;;  %v20787_v60 = vld [vmem:[#allocation7_spill] sm:$0xff] }
 0x2c5   :  { %5199 = vmatpush.msrb.mxu2 %v18296_v20  ;;  %5278 = vmatpush.msrb.mxu3 %v5277_v62  ;;  %v20777_v62 = vand.u32 4294901760, %v18398_v23 }
 0x2c6   :  { %5115 = vmatpush.msrb.mxu0 %v20776_v57  ;;  %5156 = vmatpush.msrb.mxu1 %v17974_v0  ;;  %v18463_v0 = vpop.f32.mrf.mxu0  ;;  %v20780_v57 = vld [vmem:[#allocation9_spill] sm:$0xff] }
 0x2c7   :  { %5201 = vmatpush.msrb.mxu2 %v18311_v63  ;;  %5284 = vmatpush.msrb.mxu3 %v5283_v2  ;;  %v5306_v40 = vsub.f32 %v18398_v23, %v20777_v62  ;;  %v494_v62 = vadd.f32 %v20780_v57, %v385_v37  ;;  %v18481_v2 = vand.u32 4294901760, %v83_v8  ;;  %v20784_v37 = vand.u32 4294901760, %v18154_v29 }
 0x2c8   :  { %5119 = vmatpush.msrb.mxu0 %v20778_v9  ;;  %5158 = vmatpush.msrb.mxu1 %v17998_v50  ;;  %v5312_v50 = vsub.f32 %v18422_v11, %v20782_v38  ;;  %v5323_v9 = vand.u32 4294901760, %v18452_v42  ;;  %v20788_v29 = vand.u32 4294901760, %v18177_v17  ;;  %v20789_v38 = vld [vmem:[#allocation13_spill] sm:$0xff] }
 0x2c9   :  { %5203 = vmatpush.msrb.mxu2 %v18328_v32  ;;  %5290 = vmatpush.msrb.mxu3 %v5289_v36  ;;  %v5307_v36 = vand.u32 4294901760, %v5306_v40  ;;  %v552_v54 = vadd.f32 %v20787_v60, %v494_v62  ;;  %v18505_v57 = vsub.f32 %v83_v8, %v18481_v2  ;;  %v18513_v62 = vpop.f32.mrf.mxu2  ;;  %v20790_v8 = vld [vmem:[#allocation8_spill] sm:$0xff] }
 0x2ca   :  { %5123 = vmatpush.msrb.mxu0 %v20781_v30  ;;  %5160 = vmatpush.msrb.mxu1 %v18021_v12  ;;  %v20785_v12 = vand.u32 4294901760, %v18437_v24  ;;  %v5217_v30 = vsub.f32 %v18440_v56, %v20786_v45  ;;  %v5324_v40 = vsub.f32 %v18452_v42, %v5323_v9 }
 0x2cb   :  { %5205 = vmatpush.msrb.mxu2 %v18344_v58  ;;  %5296 = vmatpush.msrb.mxu3 %v5295_v26  ;;  %v18496_v26 = vpop.f32.mrf.mxu1  ;;  %v18521_v60 = vpop.f32.mrf.mxu3 }
 0x2cc   :  { %5127 = vmatpush.msrb.mxu0 %v20784_v37  ;;  %5162 = vmatpush.msrb.mxu1 %v18033_v7  ;;  %v5318_v14 = vsub.f32 %v18437_v24, %v20785_v12  ;;  %v5313_v7 = vand.u32 4294901760, %v5312_v50  ;;  %v498_v37 = vadd.f32 %v20789_v38, %v393_v34  ;;  %v5218_v17 = vand.u32 4294901760, %v5217_v30  ;;  %v20791_v12 = vld [vmem:[#allocation11_spill] sm:$0xff]  ;;  %20792 = vst [vmem:[#allocation9_spill] sm:$0xff] %v18521_v60 }
 0x2cd   :  { %5207 = vmatpush.msrb.mxu2 %v18359_v18  ;;  %5302 = vmatpush.msrb.mxu3 %v5301_v27  ;;  %v596_v50 = vadd.f32 %v20790_v8, %v552_v54  ;;  %v5325_v34 = vand.u32 4294901760, %v5324_v40 }
 0x2ce   :  { %5131 = vmatpush.msrb.mxu0 %v20788_v29  ;;  %5164 = vmatpush.msrb.mxu1 %v18054_v1  ;;  %v18509_v27 = vpop.f32.mrf.mxu0  ;;  %v5319_v1 = vand.u32 4294901760, %v5318_v14  ;;  %v557_v45 = vadd.f32 %v20791_v12, %v498_v37  ;;  %v20794_v14 = vld [vmem:[#allocation14_spill] sm:$0xff]  ;;  %v20795_v29 = vld [vmem:[#allocation12_spill] sm:$0xff]  ;;  %v20805_v12 = vld [vmem:[#allocation21_spill] sm:$0xff] }
 0x2cf   :  { %5209 = vmatpush.msrb.mxu2 %v18390_v5  ;;  %5308 = vmatpush.msrb.mxu3 %v5307_v36  ;;  %v20460_v36 = vand.u32 4294901760, %v18505_v57 }
 0x2d0   :  { %5133 = vmatmul.f32.vlgmr.msrb.gmra.mxu0 %v18063_v39  ;;  %5166 = vmatpush.msrb.mxu1 %v18070_v28  ;;  %v20793_v28 = vand.u32 4294901760, %v18170_v55 }
 0x2d1   :  { %5338 = vmatpush.msra.mxu0 %v18170_v55  ;;  %5211 = vmatpush.msrb.mxu2 %v18406_v47  ;;  %v5225_v54 = vsub.f32 %v18505_v57, %v20460_v36  ;;  %v20796_v55 = vand.u32 4294901760, %v18200_v19  ;;  %v18541_v40 = vpop.f32.mrf.mxu2 }
 0x2d2   :  { %5314 = vmatpush.msrb.mxu3 %v5313_v7  ;;  %5168 = vmatpush.msrb.mxu1 %v18084_v43  ;;  %v671_v43 = vadd.f32 %v20794_v14, %v596_v50  ;;  %v602_v7 = vadd.f32 %v20795_v29, %v557_v45  ;;  %20797 = vst [vmem:[#allocation10_spill] sm:$0xff] %v18541_v40  ;;  %v20802_v50 = vand.u32 4294901760, %v18213_v10  ;;  %v20810_v14 = vand.u32 4294901760, %v18273_v25 }
 0x2d3   :  { %5341 = vmatpush.msra.mxu0 %v18200_v19  ;;  %5213 = vmatpush.msrb.mxu2 %v18424_v22  ;;  %v18529_v30 = vpop.f32.mrf.mxu1  ;;  %v18551_v8 = vpop.f32.mrf.mxu3 }
 0x2d4   :  { %5320 = vmatpush.msrb.mxu3 %v5319_v1  ;;  %5219 = vmatmul.f32.vlgmr.msrb.gmra.mxu2 %v5218_v17  ;;  %v5226_v1 = vand.u32 4294901760, %v5225_v54  ;;  %v20800_v17 = vld [vmem:[#allocation17_spill] sm:$0xff]  ;;  %20801 = vst [vmem:[#allocation13_spill] sm:$0xff] %v18551_v8 }
 0x2d5   :  { %5344 = vmatpush.msra.mxu0 %v18213_v10  ;;  %5443 = vmatpush.msra.mxu2 %v20793_v28  ;;  %v675_v19 = vadd.f32 %v20800_v17, %v602_v7  ;;  %v20807_v10 = vand.u32 4294901760, %v18248_v46  ;;  %v20820_v17 = vld [vmem:[#allocation54_spill] sm:$0xff] }
 0x2d6   :  { %5170 = vmatpush.msrb.mxu1 %v18118_v59  ;;  %5326 = vmatpush.msrb.mxu3 %v5325_v34  ;;  %v20798_v59 = vld [vmem:[#allocation18_spill] sm:$0xff]  ;;  %v18546_v37 = vpop.f32.mrf.mxu0 }
 0x2d7   :  { %5328 = vmatmul.f32.vlgmr.msrb.gmra.mxu3 %v18408_v51  ;;  %5347 = vmatpush.msra.mxu0 %v18229_v6  ;;  %v712_v38 = vadd.f32 %v20798_v59, %v671_v43  ;;  %20799 = vst [vmem:[#allocation7_spill] sm:$0xff] %v18546_v37  ;;  %v716_v45 = vadd.f32 %v20805_v12, %v675_v19  ;;  %v20817_v59 = vld [vmem:[#allocation59_spill] sm:$0xff]  ;;  %v20822_v19 = vand.u32 4294901760, %v18326_v31 }
 0x2d8   :  { %5447 = vmatpush.msra.mxu2 %v20796_v55  ;;  %5514 = vmatpush.msra.mxu3 %v18138_v15  ;;  %v20826_v12 = vand.u32 4294901760, %v20817_v59 }
 0x2d9   :  { %5172 = vmatpush.msrb.mxu1 %v18142_v52  ;;  %5137 = vmatmul.f32.gmra.mxu0 %v18147_v53  ;;  %v20803_v52 = vand.u32 4294901760, %v18229_v6  ;;  %v18580_v54 = vpop.f32.mrf.mxu2 }
 0x2da   :  { %5174 = vmatmul.f32.vlgmr.msrb.gmra.mxu1 %v18063_v39  ;;  %5350 = vmatpush.msra.mxu0 %v18248_v46  ;;  %v20804_v39 = vld [vmem:[#allocation15_spill] sm:$0xff]  ;;  %20812 = vst [vmem:[#allocation14_spill] sm:$0xff] %v18580_v54  ;;  %v20813_v46 = vld [vmem:[#allocation6_spill] sm:$0xff]  ;;  %v20886_v54 = vld [vmem:[#allocation44_spill] sm:$0xff] }
 0x2db   :  { %5396 = vmatpush.msra.mxu1 %v18138_v15  ;;  %5451 = vmatpush.msra.mxu2 %v20802_v50  ;;  %v757_v34 = vadd.f32 %v20804_v39, %v712_v38  ;;  %v18566_v15 = vpop.f32.mrf.mxu1  ;;  %v18587_v7 = vpop.f32.mrf.mxu3  ;;  %v324_v50 = vld [vmem:[%s20290_s2 + $0x770] sm:$0xff] }
 0x2dc   :  { %5516 = vmatpush.msra.mxu3 %v18172_v44  ;;  %5353 = vmatpush.msra.mxu0 %v18273_v25  ;;  %20806 = vst [vmem:[#allocation8_spill] sm:$0xff] %v18566_v15  ;;  %v20816_v25 = vld [vmem:[#allocation24_spill] sm:$0xff]  ;;  %v20887_v15 = vld [vmem:[#allocation46_spill] sm:$0xff] }
 0x2dd   :  { %5398 = vmatpush.msra.mxu1 %v18172_v44  ;;  %5455 = vmatpush.msra.mxu2 %v20803_v52  ;;  %v20808_v44 = vld [vmem:[#allocation16_spill] sm:$0xff]  ;;  %20814 = vst [vmem:[#allocation12_spill] sm:$0xff] %v18587_v7  ;;  %v20824_v52 = vld [vmem:[#allocation25_spill] sm:$0xff] }
 0x2de   :  { %5518 = vmatpush.msra.mxu3 %v18190_v21  ;;  %5227 = vmatmul.f32.gmra.mxu2 %v5226_v1  ;;  %v866_v6 = vadd.f32 %v20808_v44, %v757_v34  ;;  %v18574_v28 = vpop.f32.mrf.mxu0  ;;  %v20819_v1 = vand.u32 4294901760, %v18309_v4  ;;  %v20829_v44 = vand.u32 4294901760, %v18357_v41 }
 0x2df   :  { %5356 = vmatpush.msra.mxu0 %v18294_v33  ;;  %5400 = vmatpush.msra.mxu1 %v18190_v21  ;;  %20809 = vst [vmem:[#allocation11_spill] sm:$0xff] %v18574_v28  ;;  %v20811_v21 = vld [vmem:[#allocation19_spill] sm:$0xff] }
 0x2e0   :  { %5459 = vmatpush.msra.mxu2 %v20807_v10  ;;  %5520 = vmatpush.msra.mxu3 %v18202_v35  ;;  %v765_v43 = vadd.f32 %v20811_v21, %v716_v45  ;;  %v924_v29 = vadd.f32 %v20813_v46, %v866_v6  ;;  %v18635_v6 = vand.u32 4294901760, %v324_v50  ;;  %v20832_v46 = vand.u32 4294901760, %v18378_v49 }
 0x2e1   :  { %5332 = vmatmul.f32.gmra.mxu3 %v18481_v2  ;;  %5359 = vmatpush.msra.mxu0 %v18309_v4  ;;  %v18616_v34 = vpop.f32.mrf.mxu2 }
 0x2e2   :  { %5402 = vmatpush.msra.mxu1 %v18202_v35  ;;  %5463 = vmatpush.msra.mxu2 %v20810_v14  ;;  %v20815_v35 = vand.u32 4294901760, %v18294_v33  ;;  %v968_v55 = vadd.f32 %v20816_v25, %v924_v29  ;;  %v325_v33 = vld [vmem:[%s20290_s2 + $0x778] sm:$0xff]  ;;  %20825 = vst [vmem:[#allocation17_spill] sm:$0xff] %v18616_v34  ;;  %v20830_v14 = vld [vmem:[#allocation23_spill] sm:$0xff]  ;;  %v20833_v25 = vld [vmem:[#allocation29_spill] sm:$0xff] }
 0x2e3   :  { %5522 = vmatpush.msra.mxu3 %v18215_v61  ;;  %5178 = vmatmul.f32.gmra.mxu1 %v18147_v53  ;;  %v20818_v53 = vld [vmem:[#allocation20_spill] sm:$0xff]  ;;  %v18630_v10 = vpop.f32.mrf.mxu3 }
 0x2e4   :  { %5362 = vmatpush.msra.mxu0 %v18326_v31  ;;  %5404 = vmatpush.msra.mxu1 %v18215_v61  ;;  %v870_v38 = vadd.f32 %v20818_v53, %v765_v43  ;;  %v18599_v61 = vpop.f32.mrf.mxu1  ;;  %v18621_v31 = vand.u32 4294901760, %v325_v33  ;;  %20828 = vst [vmem:[#allocation21_spill] sm:$0xff] %v18630_v10  ;;  %v20835_v53 = vld [vmem:[#allocation34_spill] sm:$0xff]  ;;  %v20870_v10 = vld [vmem:[#allocation45_spill] sm:$0xff] }
 0x2e5   :  { %5467 = vmatpush.msra.mxu2 %v20815_v35  ;;  %5524 = vmatpush.msra.mxu3 %v18243_v16  ;;  %20821 = vst [vmem:[#allocation18_spill] sm:$0xff] %v18599_v61  ;;  %v322_v35 = vld [vmem:[%s20290_s2 + $0x760] sm:$0xff] }
 0x2e6   :  { %5365 = vmatpush.msra.mxu0 %v20817_v59  ;;  %5406 = vmatpush.msra.mxu1 %v18243_v16  ;;  %v20823_v16 = vld [vmem:[#allocation22_spill] sm:$0xff]  ;;  %v929_v39 = vadd.f32 %v20824_v52, %v870_v38  ;;  %v18623_v45 = vpop.f32.mrf.mxu0  ;;  %v18662_v59 = vsub.f32 %v324_v50, %v18635_v6  ;;  %v20841_v52 = vand.u32 4294901760, %v18437_v24 }
 0x2e7   :  { %5471 = vmatpush.msra.mxu2 %v20819_v1  ;;  %5526 = vmatpush.msra.mxu3 %v20820_v17  ;;  %v1043_v4 = vadd.f32 %v20823_v16, %v968_v55  ;;  %20827 = vst [vmem:[#allocation15_spill] sm:$0xff] %v18623_v45 }
 0x2e8   :  { %5368 = vmatpush.msra.mxu0 %v18357_v41  ;;  %5408 = vmatpush.msra.mxu1 %v20820_v17  ;;  %v18647_v41 = vsub.f32 %v325_v33, %v18621_v31  ;;  %v20837_v17 = vld [vmem:[#allocation26_spill] sm:$0xff] }
 0x2e9   :  { %5475 = vmatpush.msra.mxu2 %v20822_v19  ;;  %5528 = vmatpush.msra.mxu3 %v18275_v13  ;;  %v1084_v21 = vadd.f32 %v20830_v14, %v1043_v4 }
 0x2ea   :  { %5371 = vmatpush.msra.mxu0 %v18378_v49  ;;  %5410 = vmatpush.msra.mxu1 %v18275_v13  ;;  %v323_v13 = vld [vmem:[%s20290_s2 + $0x768] sm:$0xff]  ;;  %v20834_v49 = vand.u32 4294901760, %v18398_v23  ;;  %v20459_v16 = vand.u32 4294901760, %v18647_v41 }
 0x2eb   :  { %5479 = vmatpush.msra.mxu2 %v20826_v12  ;;  %5530 = vmatpush.msra.mxu3 %v18296_v20  ;;  %v18644_v29 = vand.u32 4294901760, %v323_v13  ;;  %v1129_v55 = vadd.f32 %v20833_v25, %v1084_v21  ;;  %v319_v12 = vld [vmem:[%s20290_s2 + $0x748] sm:$0xff]  ;;  %v20843_v21 = vld [vmem:[#allocation27_spill] sm:$0xff] }
 0x2ec   :  { %5374 = vmatpush.msra.mxu0 %v18398_v23  ;;  %5412 = vmatpush.msra.mxu1 %v18296_v20  ;;  %v20831_v20 = vld [vmem:[#allocation28_spill] sm:$0xff]  ;;  %v18665_v1 = vpop.f32.mrf.mxu1  ;;  %v20838_v23 = vand.u32 4294901760, %v18422_v11  ;;  %v18723_v25 = vand.u32 4294901760, %v319_v12 }
 0x2ed   :  { %5483 = vmatpush.msra.mxu2 %v20829_v44  ;;  %5532 = vmatpush.msra.mxu3 %v18311_v63  ;;  %v974_v43 = vadd.f32 %v20831_v20, %v929_v39  ;;  %v1238_v38 = vadd.f32 %v20835_v53, %v1129_v55  ;;  %20836 = vst [vmem:[#allocation16_spill] sm:$0xff] %v18665_v1  ;;  %v20458_v39 = vand.u32 4294901760, %v18662_v59  ;;  %v20845_v55 = vld [vmem:[#allocation33_spill] sm:$0xff]  ;;  %v20846_v53 = vld [vmem:[#allocation32_spill] sm:$0xff] }
 0x2ee   :  { %5377 = vmatpush.msra.mxu0 %v18422_v11  ;;  %5414 = vmatpush.msra.mxu1 %v18311_v63  ;;  %v321_v63 = vld [vmem:[%s20290_s2 + $0x758] sm:$0xff]  ;;  %v18679_v4 = vsub.f32 %v323_v13, %v18644_v29  ;;  %v18684_v50 = vpop.f32.mrf.mxu0  ;;  %v18688_v11 = vpop.f32.mrf.mxu2  ;;  %v20842_v13 = vld [vmem:[#allocation31_spill] sm:$0xff] }
 0x2ef   :  { %5487 = vmatpush.msra.mxu2 %v20832_v46  ;;  %5534 = vmatpush.msra.mxu3 %v18328_v32  ;;  %v1047_v33 = vadd.f32 %v20837_v17, %v974_v43  ;;  %v18675_v19 = vand.u32 4294901760, %v321_v63  ;;  %20839 = vst [vmem:[#allocation19_spill] sm:$0xff] %v18684_v50  ;;  %v1296_v44 = vadd.f32 %v20842_v13, %v1238_v38  ;;  %v18709_v43 = vpop.f32.mrf.mxu3 }
 0x2f0   :  { %5380 = vmatpush.msra.mxu0 %v18437_v24  ;;  %5416 = vmatpush.msra.mxu1 %v18328_v32  ;;  %v18669_v32 = vand.u32 4294901760, %v322_v35  ;;  %20840 = vst [vmem:[#allocation6_spill] sm:$0xff] %v18688_v11  ;;  %v318_v24 = vld [vmem:[%s20290_s2 + $0x740] sm:$0xff]  ;;  %v20457_v46 = vand.u32 4294901760, %v18679_v4 }
 0x2f1   :  { %5491 = vmatpush.msra.mxu2 %v20834_v49  ;;  %5536 = vmatpush.msra.mxu3 %v18344_v58  ;;  %v1088_v20 = vadd.f32 %v20843_v21, %v1047_v33  ;;  %20844 = vst [vmem:[#allocation24_spill] sm:$0xff] %v18709_v43  ;;  %v1340_v38 = vadd.f32 %v20846_v53, %v1296_v44 }
 0x2f2   :  { %5383 = vmatpush.msra.mxu0 %v18452_v42  ;;  %5418 = vmatpush.msra.mxu1 %v18344_v58  ;;  %v320_v58 = vld [vmem:[%s20290_s2 + $0x750] sm:$0xff]  ;;  %v18703_v14 = vsub.f32 %v322_v35, %v18669_v32  ;;  %v18719_v35 = vsub.f32 %v321_v63, %v18675_v19  ;;  %v5612_v42 = vsub.f32 %v18662_v59, %v20458_v39  ;;  %v317_v63 = vld [vmem:[%s20290_s2 + $0x738] sm:$0xff] }
 0x2f3   :  { %5495 = vmatpush.msra.mxu2 %v20838_v23  ;;  %5538 = vmatpush.msra.mxu3 %v18359_v18  ;;  %v1137_v49 = vadd.f32 %v20845_v55, %v1088_v20  ;;  %v5618_v44 = vsub.f32 %v18679_v4, %v20457_v46  ;;  %v316_v20 = vld [vmem:[%s20290_s2 + $0x730] sm:$0xff]  ;;  %v315_v46 = vld [vmem:[%s20290_s2 + $0x728] sm:$0xff] }
 0x2f4   :  { %5386 = vmatmul.f32.vlgmr.msra.gmra.mxu0 %v18440_v56  ;;  %5420 = vmatpush.msra.mxu1 %v18359_v18  ;;  %v18700_v18 = vand.u32 4294901760, %v320_v58  ;;  %v18737_v17 = vpop.f32.mrf.mxu1  ;;  %v20461_v33 = vand.u32 4294901760, %v18703_v14  ;;  %v5613_v53 = vand.u32 4294901760, %v5612_v42  ;;  %v20855_v42 = vld [vmem:[#allocation35_spill] sm:$0xff] }
 0x2f5   :  { %5555 = vmatpush.msrb.mxu0 %v18621_v31  ;;  %5499 = vmatpush.msra.mxu2 %v20841_v52  ;;  %20847 = vst [vmem:[#allocation59_spill] sm:$0xff] %v18737_v17  ;;  %v20848_v52 = vld [vmem:[#allocation37_spill] sm:$0xff] }
 0x2f6   :  { %5540 = vmatpush.msra.mxu3 %v18390_v5  ;;  %5422 = vmatpush.msra.mxu1 %v18390_v5  ;;  %v5606_v5 = vsub.f32 %v18647_v41, %v20459_v16  ;;  %v18743_v23 = vsub.f32 %v320_v58, %v18700_v18  ;;  %v1242_v13 = vadd.f32 %v20848_v52, %v1137_v49  ;;  %v18757_v58 = vand.u32 4294901760, %v317_v63  ;;  %v18763_v49 = vpop.f32.mrf.mxu2  ;;  %v18773_v39 = vpop.f32.mrf.mxu0  ;;  %v20856_v16 = vld [vmem:[#allocation42_spill] sm:$0xff] }
 0x2f7   :  { %5557 = vmatpush.msrb.mxu0 %v18635_v6  ;;  %5503 = vmatpush.msra.mxu2 %v5323_v9  ;;  %v18731_v9 = vand.u32 4294901760, %v318_v24  ;;  %20851 = vst [vmem:[#allocation54_spill] sm:$0xff] %v18763_v49  ;;  %v20862_v49 = vld [vmem:[#allocation39_spill] sm:$0xff] }
 0x2f8   :  { %5542 = vmatpush.msra.mxu3 %v18406_v47  ;;  %5505 = vmatmul.f32.vlgmr.msra.gmra.mxu2 %v18408_v51  ;;  %v5607_v21 = vand.u32 4294901760, %v5606_v5  ;;  %20849 = vst [vmem:[#allocation20_spill] sm:$0xff] %v18757_v58  ;;  %v20850_v5 = vld [vmem:[#allocation38_spill] sm:$0xff] }
 0x2f9   :  { %5559 = vmatpush.msrb.mxu0 %v18644_v29  ;;  %5710 = vmatpush.msrb.mxu2 %v18647_v41  ;;  %v1415_v55 = vadd.f32 %v20850_v5, %v1340_v38  ;;  %v18768_v52 = vsub.f32 %v318_v24, %v18731_v9  ;;  %20852 = vst [vmem:[#allocation22_spill] sm:$0xff] %v18773_v39  ;;  %v18781_v38 = vand.u32 4294901760, %v316_v20  ;;  %v20462_v24 = vand.u32 4294901760, %v18743_v23 }
 0x2fa   :  { %5424 = vmatpush.msra.mxu1 %v18406_v47  ;;  %5544 = vmatpush.msra.mxu3 %v18424_v22  ;;  %v1301_v5 = vadd.f32 %v20855_v42, %v1242_v13  ;;  %v18786_v47 = vpop.f32.mrf.mxu3  ;;  %v18797_v13 = vand.u32 4294901760, %v315_v46  ;;  %v313_v42 = vld [vmem:[%s20290_s2 + $0x718] sm:$0xff] }
 0x2fb   :  { %5546 = vmatmul.f32.vlgmr.msra.gmra.mxu3 %v18408_v51  ;;  %5561 = vmatpush.msrb.mxu0 %v18669_v32  ;;  %v18760_v51 = vsub.f32 %v319_v12, %v18723_v25  ;;  %v20853_v12 = vand.u32 4294901760, %v18440_v56  ;;  %20854 = vst [vmem:[#allocation25_spill] sm:$0xff] %v18781_v38  ;;  %v1456_v36 = vadd.f32 %v20856_v16, %v1415_v55  ;;  %v5619_v56 = vand.u32 4294901760, %v5618_v44  ;;  %v68_v44 = vld [vmem:[%s20492_s19 + $0x70] sm:$0xff] }
 0x2fc   :  { %5713 = vmatpush.msrb.mxu2 %v18662_v59  ;;  %5768 = vmatpush.msrb.mxu3 %v18621_v31  ;;  %20857 = vst [vmem:[#allocation23_spill] sm:$0xff] %v18786_v47  ;;  %v20861_v47 = vld [vmem:[#allocation36_spill] sm:$0xff]  ;;  %v18827_v11 = vand.u32 4294901760, %v68_v44 }
 0x2fd   :  { %5426 = vmatpush.msra.mxu1 %v18424_v22  ;;  %5391 = vmatmul.f32.gmra.mxu0 %v18505_v57  ;;  %v5624_v22 = vsub.f32 %v18703_v14, %v20461_v33  ;;  %v314_v33 = vld [vmem:[%s20290_s2 + $0x720] sm:$0xff]  ;;  %20859 = vst [vmem:[#allocation28_spill] sm:$0xff] %v18797_v13  ;;  %v1346_v55 = vadd.f32 %v20861_v47, %v1301_v5  ;;  %v20864_v47 = vand.u32 4294901760, %v18760_v51  ;;  %v20865_v5 = vld [vmem:[#allocation41_spill] sm:$0xff] }
 0x2fe   :  { %5430 = vmatmul.f32.vlgmr.msra.gmra.mxu1 %v20853_v12  ;;  %5563 = vmatpush.msrb.mxu0 %v18675_v19  ;;  %v20858_v12 = vand.u32 4294901760, %v18719_v35  ;;  %v18816_v16 = vand.u32 4294901760, %v314_v33  ;;  %v1501_v43 = vadd.f32 %v20862_v49, %v1456_v36  ;;  %v18840_v49 = vsub.f32 %v315_v46, %v18797_v13  ;;  %v18848_v1 = vpop.f32.mrf.mxu0  ;;  %v18859_v34 = vpop.f32.mrf.mxu2 }
 0x2ff   :  { %5608 = vmatpush.msrb.mxu1 %v5607_v21  ;;  %5716 = vmatpush.msrb.mxu2 %v18679_v4  ;;  %v18801_v21 = vsub.f32 %v317_v63, %v18757_v58  ;;  %v5636_v63 = vsub.f32 %v18743_v23, %v20462_v24  ;;  %v18829_v24 = vpop.f32.mrf.mxu1  ;;  %v5642_v36 = vsub.f32 %v18760_v51, %v20864_v47 }
 0x300   :  { %v5630_v39 = vsub.f32 %v18719_v35, %v20858_v12  ;;  %5770 = vmatpush.msrb.mxu3 %v18635_v6  ;;  %5565 = vmatpush.msrb.mxu0 %v18700_v18  ;;  %v5625_v12 = vand.u32 4294901760, %v5624_v22  ;;  %20860 = vst [vmem:[#allocation29_spill] sm:$0xff] %v18816_v16  ;;  %v312_v22 = vld [vmem:[%s20290_s2 + $0x710] sm:$0xff] }
 0x301   :  { %5614 = vmatpush.msrb.mxu1 %v5613_v53  ;;  %5719 = vmatpush.msrb.mxu2 %v18703_v14  ;;  %v18819_v53 = vsub.f32 %v316_v20, %v18781_v38  ;;  %20863 = vst [vmem:[#allocation34_spill] sm:$0xff] %v18829_v24  ;;  %v18836_v20 = vand.u32 4294901760, %v313_v42  ;;  %v20866_v24 = vand.u32 4294901760, %v18768_v52  ;;  %v5637_v47 = vand.u32 4294901760, %v5636_v63 }
 0x302   :  { %5772 = vmatpush.msrb.mxu3 %v18644_v29  ;;  %5509 = vmatmul.f32.gmra.mxu2 %v18481_v2  ;;  %v5631_v17 = vand.u32 4294901760, %v5630_v39  ;;  %20867 = vst [vmem:[#allocation26_spill] sm:$0xff] %v18848_v1  ;;  %v18851_v39 = vand.u32 4294901760, %v312_v22  ;;  %v18868_v63 = vsub.f32 %v68_v44, %v18827_v11  ;;  %v18879_v46 = vpop.f32.mrf.mxu3 }
 0x303   :  { %5567 = vmatpush.msrb.mxu0 %v18723_v25  ;;  %5620 = vmatpush.msrb.mxu1 %v5619_v56  ;;  %v1419_v56 = vadd.f32 %v20865_v5, %v1346_v55  ;;  %v5648_v50 = vsub.f32 %v18768_v52, %v20866_v24  ;;  %v18855_v55 = vsub.f32 %v314_v33, %v18816_v16  ;;  %v20872_v24 = vand.u32 4294901760, %v18505_v57 }
 0x304   :  { %5722 = vmatpush.msrb.mxu2 %v18719_v35  ;;  %5774 = vmatpush.msrb.mxu3 %v18669_v32  ;;  %20868 = vst [vmem:[#allocation31_spill] sm:$0xff] %v18851_v39  ;;  %v18876_v57 = vsub.f32 %v313_v42, %v18836_v20 }
 0x305   :  { %5550 = vmatmul.f32.gmra.mxu3 %v18481_v2  ;;  %5569 = vmatpush.msrb.mxu0 %v18731_v9  ;;  %v20869_v2 = vld [vmem:[#allocation40_spill] sm:$0xff]  ;;  %v1460_v45 = vadd.f32 %v20870_v10, %v1419_v56  ;;  %20871 = vst [vmem:[#allocation27_spill] sm:$0xff] %v18859_v34  ;;  %v20873_v10 = vand.u32 4294901760, %v18801_v21  ;;  %v5649_v44 = vand.u32 4294901760, %v5648_v50  ;;  %v18897_v50 = vsub.f32 %v312_v22, %v18851_v39  ;;  %v84_v56 = vld [vmem:[%s20492_s19 + $0xf0] sm:$0xff] }
 0x306   :  { %5626 = vmatpush.msrb.mxu1 %v5625_v12  ;;  %5725 = vmatpush.msrb.mxu2 %v18743_v23  ;;  %v1610_v5 = vadd.f32 %v20869_v2, %v1501_v43  ;;  %v311_v12 = vld [vmem:[%s20290_s2 + $0x708] sm:$0xff]  ;;  %v5643_v43 = vand.u32 4294901760, %v5642_v36  ;;  %20874 = vst [vmem:[#allocation33_spill] sm:$0xff] %v18876_v57  ;;  %v20875_v2 = vld [vmem:[#allocation30_spill] sm:$0xff]  ;;  %v20877_v36 = vand.u32 4294901760, %v18819_v53  ;;  %v20880_v34 = vld [vmem:[#allocation49_spill] sm:$0xff]  ;;  %v18935_v37 = vpop.f32.mrf.mxu2 }
 0x307   :  { %5776 = vmatpush.msrb.mxu3 %v18675_v19  ;;  %5436 = vmatmul.f32.gmra.mxu1 %v20872_v24  ;;  %v5654_v33 = vsub.f32 %v18801_v21, %v20873_v10  ;;  %20876 = vst [vmem:[#allocation32_spill] sm:$0xff] %v18879_v46  ;;  %v18890_v10 = vand.u32 4294901760, %v311_v12  ;;  %v18907_v7 = vpop.f32.mrf.mxu1 }
 0x308   :  { %5571 = vmatpush.msrb.mxu0 %v18757_v58  ;;  %5632 = vmatpush.msrb.mxu1 %v5631_v17  ;;  %v1668_v24 = vadd.f32 %v20875_v2, %v1610_v5  ;;  %v341_v17 = vld [vmem:[%s20290_s2 + $0x7f8] sm:$0xff]  ;;  %v5660_v42 = vsub.f32 %v18819_v53, %v20877_v36  ;;  %v310_v5 = vld [vmem:[%s20290_s2 + $0x700] sm:$0xff]  ;;  %20881 = vst [vmem:[#allocation38_spill] sm:$0xff] %v18907_v7  ;;  %v20882_v2 = vand.u32 4294901760, %v18840_v49 }
 0x309   :  { %5728 = vmatpush.msrb.mxu2 %v18760_v51  ;;  %5778 = vmatpush.msrb.mxu3 %v18700_v18  ;;  %20878 = vst [vmem:[#allocation37_spill] sm:$0xff] %v18890_v10  ;;  %v5655_v22 = vand.u32 4294901760, %v5654_v33  ;;  %v18930_v36 = vsub.f32 %v311_v12, %v18890_v10  ;;  %v339_v12 = vld [vmem:[%s20290_s2 + $0x7e8] sm:$0xff] }
 0x30a   :  { %5573 = vmatpush.msrb.mxu0 %v18781_v38  ;;  %5638 = vmatpush.msrb.mxu1 %v5637_v47  ;;  %v20879_v47 = vld [vmem:[#allocation43_spill] sm:$0xff]  ;;  %v1712_v1 = vadd.f32 %v20880_v34, %v1668_v24  ;;  %v5666_v61 = vsub.f32 %v18840_v49, %v20882_v2  ;;  %v18918_v34 = vand.u32 4294901760, %v310_v5  ;;  %v340_v24 = vld [vmem:[%s20290_s2 + $0x7f0] sm:$0xff]  ;;  %v5661_v33 = vand.u32 4294901760, %v5660_v42  ;;  %20888 = vst [vmem:[#allocation36_spill] sm:$0xff] %v18935_v37  ;;  %v18957_v40 = vpop.f32.mrf.mxu3 }
 0x30b   :  { %v1509_v46 = vadd.f32 %v20879_v47, %v1460_v45  ;;  %5731 = vmatpush.msrb.mxu2 %v18768_v52  ;;  %5780 = vmatpush.msrb.mxu3 %v18723_v25  ;;  %v18914_v47 = vand.u32 4294901760, %v341_v17  ;;  %v20885_v2 = vand.u32 4294901760, %v18855_v55  ;;  %v18954_v7 = vand.u32 4294901760, %v340_v24  ;;  %20894 = vst [vmem:[#allocation40_spill] sm:$0xff] %v18957_v40 }
 0x30c   :  { %5575 = vmatpush.msrb.mxu0 %v18797_v13  ;;  %5644 = vmatpush.msrb.mxu1 %v5643_v43  ;;  %20884 = vst [vmem:[#allocation42_spill] sm:$0xff] %v18918_v34  ;;  %v18923_v43 = vand.u32 4294901760, %v84_v56  ;;  %v1787_v8 = vadd.f32 %v20887_v15, %v1712_v1  ;;  %v5667_v15 = vand.u32 4294901760, %v5666_v61 }
 0x30d   :  { %20883 = vst [vmem:[#allocation35_spill] sm:$0xff] %v18914_v47  ;;  %5734 = vmatpush.msrb.mxu2 %v18801_v21  ;;  %5782 = vmatpush.msrb.mxu3 %v18731_v9  ;;  %v5672_v45 = vsub.f32 %v18855_v55, %v20885_v2  ;;  %v1614_v28 = vadd.f32 %v20886_v54, %v1509_v46  ;;  %v18945_v2 = vpop.f32.mrf.mxu0  ;;  %v20891_v54 = vand.u32 4294901760, %v18876_v57 }
 0x30e   :  { %5577 = vmatpush.msrb.mxu0 %v18816_v16  ;;  %5650 = vmatpush.msrb.mxu1 %v5649_v44  ;;  %v20889_v44 = vand.u32 4294901760, %v18868_v63  ;;  %20890 = vst [vmem:[#allocation39_spill] sm:$0xff] %v18945_v2  ;;  %v18952_v46 = vsub.f32 %v341_v17, %v18914_v47  ;;  %v18965_v61 = vsub.f32 %v84_v56, %v18923_v43  ;;  %v338_v17 = vld [vmem:[%s20290_s2 + $0x7e0] sm:$0xff]  ;;  %v18975_v2 = vand.u32 4294901760, %v339_v12  ;;  %v20897_v56 = vld [vmem:[#allocation52_spill] sm:$0xff] }
 0x30f   :  { %5737 = vmatpush.msrb.mxu2 %v18819_v53  ;;  %5784 = vmatpush.msrb.mxu3 %v18757_v58  ;;  %v5678_v1 = vsub.f32 %v18876_v57, %v20891_v54  ;;  %v20895_v54 = vand.u32 4294901760, %v18897_v50  ;;  %v18987_v40 = vsub.f32 %v340_v24, %v18954_v7  ;;  %v20901_v24 = vand.u32 4294901760, %v18930_v36 }
 0x310   :  { %v5589_v42 = vsub.f32 %v18868_v63, %v20889_v44  ;;  %5579 = vmatpush.msrb.mxu0 %v18836_v20  ;;  %5656 = vmatpush.msrb.mxu1 %v5655_v22  ;;  %20892 = vst [vmem:[#allocation41_spill] sm:$0xff] %v18952_v46  ;;  %v20893_v44 = vld [vmem:[#allocation48_spill] sm:$0xff]  ;;  %v18962_v22 = vsub.f32 %v310_v5, %v18918_v34  ;;  %v20896_v5 = vld [vmem:[#allocation47_spill] sm:$0xff] }
 0x311   :  { %v1673_v37 = vadd.f32 %v20893_v44, %v1614_v28  ;;  %5740 = vmatpush.msrb.mxu2 %v18840_v49  ;;  %5786 = vmatpush.msrb.mxu3 %v18781_v38  ;;  %v5673_v28 = vand.u32 4294901760, %v5672_v45  ;;  %v5684_v44 = vsub.f32 %v18897_v50, %v20895_v54  ;;  %v1828_v38 = vadd.f32 %v20896_v5, %v1787_v8  ;;  %v337_v45 = vld [vmem:[%s20290_s2 + $0x7d8] sm:$0xff] }
 0x312   :  { %5581 = vmatpush.msrb.mxu0 %v18851_v39  ;;  %5662 = vmatpush.msrb.mxu1 %v5661_v33  ;;  %v5590_v58 = vand.u32 4294901760, %v5589_v42  ;;  %v5679_v33 = vand.u32 4294901760, %v5678_v1  ;;  %20898 = vst [vmem:[#allocation45_spill] sm:$0xff] %v18987_v40  ;;  %v18989_v8 = vand.u32 4294901760, %v338_v17  ;;  %v5690_v1 = vsub.f32 %v18930_v36, %v20901_v24  ;;  %v336_v42 = vld [vmem:[%s20290_s2 + $0x7d0] sm:$0xff] }
 0x313   :  { %v1718_v60 = vadd.f32 %v20897_v56, %v1673_v37  ;;  %5743 = vmatpush.msrb.mxu2 %v18855_v55  ;;  %5788 = vmatpush.msrb.mxu3 %v18797_v13  ;;  %v20899_v37 = vld [vmem:[#allocation53_spill] sm:$0xff]  ;;  %v18996_v13 = vpop.f32.mrf.mxu1  ;;  %v20902_v56 = vld [vmem:[#allocation50_spill] sm:$0xff] }
 0x314   :  { %5583 = vmatpush.msrb.mxu0 %v18890_v10  ;;  %5668 = vmatpush.msrb.mxu1 %v5667_v15  ;;  %v1873_v5 = vadd.f32 %v20899_v37, %v1828_v38  ;;  %20900 = vst [vmem:[#allocation30_spill] sm:$0xff] %v18996_v13  ;;  %v5685_v15 = vand.u32 4294901760, %v5684_v44  ;;  %v19003_v38 = vsub.f32 %v339_v12, %v18975_v2  ;;  %v19005_v37 = vand.u32 4294901760, %v337_v45 }
 0x315   :  { %5746 = vmatpush.msrb.mxu2 %v18876_v57  ;;  %5790 = vmatpush.msrb.mxu3 %v18816_v16  ;;  %v1791_v54 = vadd.f32 %v20902_v56, %v1718_v60  ;;  %v19014_v13 = vpop.f32.mrf.mxu0  ;;  %v20905_v12 = vand.u32 4294901760, %v18952_v46  ;;  %v19021_v57 = vsub.f32 %v338_v17, %v18989_v8  ;;  %v335_v60 = vld [vmem:[%s20290_s2 + $0x7c8] sm:$0xff]  ;;  %v19026_v56 = vpop.f32.mrf.mxu2  ;;  %v5691_v16 = vand.u32 4294901760, %v5690_v1  ;;  %v20913_v1 = vld [vmem:[#allocation55_spill] sm:$0xff] }
 0x316   :  { %5585 = vmatpush.msrb.mxu0 %v18918_v34  ;;  %5674 = vmatpush.msrb.mxu1 %v5673_v28  ;;  %v20903_v28 = vld [vmem:[#allocation56_spill] sm:$0xff]  ;;  %20904 = vst [vmem:[#allocation43_spill] sm:$0xff] %v19014_v13 }
 0x317   :  { %5749 = vmatpush.msrb.mxu2 %v18897_v50  ;;  %5792 = vmatpush.msrb.mxu3 %v18836_v20  ;;  %v1982_v44 = vadd.f32 %v20903_v28, %v1873_v5  ;;  %v5978_v24 = vsub.f32 %v18952_v46, %v20905_v12  ;;  %20906 = vst [vmem:[#allocation49_spill] sm:$0xff] %v19026_v56  ;;  %v20907_v5 = vand.u32 4294901760, %v18647_v41  ;;  %v20909_v28 = vand.u32 4294901760, %v18965_v61  ;;  %v19048_v46 = vpop.f32.mrf.mxu3 }
 0x318   :  { %5591 = vmatmul.f32.vlgmr.msrb.gmra.mxu0 %v5590_v58  ;;  %5680 = vmatpush.msrb.mxu1 %v5679_v33  ;;  %v20908_v58 = vand.u32 4294901760, %v18962_v22  ;;  %v19037_v12 = vand.u32 4294901760, %v336_v42  ;;  %v19042_v41 = vsub.f32 %v337_v45, %v19005_v37  ;;  %20911 = vst [vmem:[#allocation44_spill] sm:$0xff] %v19048_v46 }
 0x319   :  { %5815 = vmatpush.msra.mxu0 %v20907_v5  ;;  %5752 = vmatpush.msrb.mxu2 %v18930_v36  ;;  %v5597_v17 = vsub.f32 %v18965_v61, %v20909_v28  ;;  %v334_v5 = vld [vmem:[%s20290_s2 + $0x7c0] sm:$0xff]  ;;  %v20912_v28 = vand.u32 4294901760, %v18662_v59  ;;  %v2040_v56 = vadd.f32 %v20913_v1, %v1982_v44  ;;  %v5979_v45 = vand.u32 4294901760, %v5978_v24  ;;  %v333_v59 = vld [vmem:[%s20290_s2 + $0x7b8] sm:$0xff] }
 0x31a   :  { %v5696_v33 = vsub.f32 %v18962_v22, %v20908_v58  ;;  %5794 = vmatpush.msrb.mxu3 %v18851_v39  ;;  %5686 = vmatpush.msrb.mxu1 %v5685_v15  ;;  %v20910_v58 = vld [vmem:[#allocation51_spill] sm:$0xff]  ;;  %v19053_v15 = vand.u32 4294901760, %v335_v60  ;;  %v20914_v39 = vand.u32 4294901760, %v18987_v40  ;;  %v19069_v46 = vsub.f32 %v336_v42, %v19037_v12  ;;  %v332_v42 = vld [vmem:[%s20290_s2 + $0x7b0] sm:$0xff] }
 0x31b   :  { %v1832_v13 = vadd.f32 %v20910_v58, %v1791_v54  ;;  %5819 = vmatpush.msra.mxu0 %v20912_v28  ;;  %5755 = vmatpush.msrb.mxu2 %v18962_v22  ;;  %v20915_v28 = vand.u32 4294901760, %v18679_v4  ;;  %v5598_v1 = vand.u32 4294901760, %v5597_v17  ;;  %v19071_v24 = vand.u32 4294901760, %v334_v5  ;;  %v20921_v17 = vld [vmem:[#allocation57_spill] sm:$0xff] }
 0x31c   :  { %5796 = vmatpush.msrb.mxu3 %v18890_v10  ;;  %5758 = vmatmul.f32.vlgmr.msrb.gmra.mxu2 %v18868_v63  ;;  %v5984_v54 = vsub.f32 %v18987_v40, %v20914_v39  ;;  %v5697_v44 = vand.u32 4294901760, %v5696_v33  ;;  %v20916_v10 = vld [vmem:[#allocation58_spill] sm:$0xff]  ;;  %v19074_v40 = vpop.f32.mrf.mxu1  ;;  %v20918_v58 = vand.u32 4294901760, %v19003_v38  ;;  %v20919_v33 = vand.u32 4294901760, %v18868_v63 }
 0x31d   :  { %5823 = vmatpush.msra.mxu0 %v20915_v28  ;;  %5927 = vmatpush.msra.mxu2 %v18914_v47  ;;  %v1881_v39 = vadd.f32 %v20916_v10, %v1832_v13  ;;  %20917 = vst [vmem:[#allocation46_spill] sm:$0xff] %v19074_v40  ;;  %v20920_v13 = vand.u32 4294901760, %v18703_v14  ;;  %v19091_v10 = vand.u32 4294901760, %v333_v59  ;;  %v2084_v40 = vadd.f32 %v20921_v17, %v2040_v56  ;;  %v331_v14 = vld [vmem:[%s20290_s2 + $0x7a8] sm:$0xff] }
 0x31e   :  { %5692 = vmatpush.msrb.mxu1 %v5691_v16  ;;  %5798 = vmatpush.msrb.mxu3 %v18918_v34  ;;  %v5990_v4 = vsub.f32 %v19003_v38, %v20918_v58  ;;  %v19089_v16 = vsub.f32 %v335_v60, %v19053_v15  ;;  %v20922_v58 = vld [vmem:[#allocation61_spill] sm:$0xff]  ;;  %v5985_v28 = vand.u32 4294901760, %v5984_v54  ;;  %v20923_v47 = vand.u32 4294901760, %v19021_v57  ;;  %v19102_v60 = vpop.f32.mrf.mxu2 }
 0x31f   :  { %5802 = vmatmul.f32.vlgmr.msrb.gmra.mxu3 %v20919_v33  ;;  %5827 = vmatpush.msra.mxu0 %v20920_v13  ;;  %v1986_v34 = vadd.f32 %v20922_v58, %v1881_v39  ;;  %v19106_v39 = vsub.f32 %v334_v5, %v19071_v24  ;;  %v19108_v33 = vand.u32 4294901760, %v332_v42  ;;  %v19111_v13 = vpop.f32.mrf.mxu0  ;;  %v330_v5 = vld [vmem:[%s20290_s2 + $0x7a0] sm:$0xff]  ;;  %v19122_v58 = vpop.f32.mrf.mxu3  ;;  %v20929_v56 = vand.u32 4294901760, %v18743_v23 }
 0x320   :  { %5929 = vmatpush.msra.mxu2 %v18954_v7  ;;  %5980 = vmatpush.msra.mxu3 %v5979_v45  ;;  %v5996_v63 = vsub.f32 %v19021_v57, %v20923_v47  ;;  %v20924_v45 = vld [vmem:[#allocation63_spill] sm:$0xff]  ;;  %v20925_v47 = vand.u32 4294901760, %v18719_v35  ;;  %v5991_v17 = vand.u32 4294901760, %v5990_v4  ;;  %20927 = vst [vmem:[#allocation48_spill] sm:$0xff] %v19122_v58  ;;  %v19128_v35 = vsub.f32 %v333_v59, %v19091_v10 }
 0x321   :  { %5698 = vmatpush.msrb.mxu1 %v5697_v44  ;;  %5599 = vmatmul.f32.gmra.mxu0 %v5598_v1  ;;  %v2159_v54 = vadd.f32 %v20924_v45, %v2084_v40  ;;  %v20926_v44 = vand.u32 4294901760, %v19042_v41  ;;  %v19130_v4 = vand.u32 4294901760, %v331_v14  ;;  %v20928_v45 = vld [vmem:[#allocation60_spill] sm:$0xff]  ;;  %v20930_v59 = vand.u32 4294901760, %v19069_v46 }
 0x322   :  { %5700 = vmatmul.f32.vlgmr.msrb.gmra.mxu1 %v18827_v11  ;;  %5831 = vmatpush.msra.mxu0 %v20925_v47  ;;  %v2045_v47 = vadd.f32 %v20928_v45, %v1986_v34  ;;  %v5997_v58 = vand.u32 4294901760, %v5996_v63  ;;  %v20477_v34 = vand.u32 4294901760, %v19106_v39  ;;  %v19148_v23 = vand.u32 4294901760, %v330_v5 }
 0x323   :  { %v6002_v1 = vsub.f32 %v19042_v41, %v20926_v44  ;;  %5886 = vmatpush.msra.mxu1 %v18621_v31  ;;  %5931 = vmatpush.msra.mxu2 %v18975_v2  ;;  %v2200_v44 = vadd.f32 %v18431_v48, %v2159_v54  ;;  %v329_v31 = vld [vmem:[%s20290_s2 + $0x798] sm:$0xff]  ;;  %v6008_v40 = vsub.f32 %v19069_v46, %v20930_v59  ;;  %v20931_v63 = vand.u32 4294901760, %v18760_v51 }
 0x324   :  { %5986 = vmatpush.msra.mxu3 %v5985_v28  ;;  %5835 = vmatpush.msra.mxu0 %v20929_v56  ;;  %v19146_v48 = vsub.f32 %v332_v42, %v19108_v33  ;;  %v19159_v42 = vsub.f32 %v331_v14, %v19130_v4  ;;  %v19161_v45 = vand.u32 4294901760, %v329_v31  ;;  %v20935_v14 = vand.u32 4294901760, %v18768_v52 }
 0x325   :  { %5888 = vmatpush.msra.mxu1 %v18635_v6  ;;  %5933 = vmatpush.msra.mxu2 %v18989_v8  ;;  %v6003_v28 = vand.u32 4294901760, %v6002_v1  ;;  %v20932_v6 = vand.u32 4294901760, %v19089_v16  ;;  %v20933_v1 = vld [vmem:[#allocation62_spill] sm:$0xff]  ;;  %v2245_v59 = vadd.f32 %v18454_v3, %v2200_v44  ;;  %v6020_v54 = vsub.f32 %v19106_v39, %v20477_v34  ;;  %v20939_v34 = vld [vmem:[#allocation5_spill] sm:$0xff] }
 0x326   :  { %5992 = vmatpush.msra.mxu3 %v5991_v17  ;;  %5763 = vmatmul.f32.gmra.mxu2 %v18965_v61  ;;  %v328_v17 = vld [vmem:[%s20290_s2 + $0x790] sm:$0xff]  ;;  %v2090_v51 = vadd.f32 %v20933_v1, %v2045_v47  ;;  %v19180_v3 = vsub.f32 %v330_v5, %v19148_v23  ;;  %v19195_v5 = vpop.f32.mrf.mxu2 }
 0x327   :  { %5839 = vmatpush.msra.mxu0 %v20931_v63  ;;  %5890 = vmatpush.msra.mxu1 %v18644_v29  ;;  %v6014_v56 = vsub.f32 %v19089_v16, %v20932_v6  ;;  %v19168_v29 = vpop.f32.mrf.mxu1  ;;  %v20934_v63 = vand.u32 4294901760, %v18965_v61  ;;  %v6009_v6 = vand.u32 4294901760, %v6008_v40  ;;  %v69_v61 = vld [vmem:[%s20492_s19 + $0x78] sm:$0xff]  ;;  %v19189_v40 = vpop.f32.mrf.mxu0  ;;  %v19193_v44 = vand.u32 4294901760, %v328_v17  ;;  %20937 = vst [vmem:[#allocation52_spill] sm:$0xff] %v19195_v5 }
 0x328   :  { %5935 = vmatpush.msra.mxu2 %v19005_v37  ;;  %5998 = vmatpush.msra.mxu3 %v5997_v58  ;;  %v327_v58 = vld [vmem:[%s20290_s2 + $0x788] sm:$0xff]  ;;  %v2163_v52 = vadd.f32 %v18463_v0, %v2090_v51  ;;  %20936 = vst [vmem:[#allocation47_spill] sm:$0xff] %v19189_v40  ;;  %v19203_v51 = vsub.f32 %v329_v31, %v19161_v45  ;;  %v19214_v5 = vand.u32 4294901760, %v69_v61  ;;  %v19217_v0 = vpop.f32.mrf.mxu3  ;;  %v6021_v31 = vand.u32 4294901760, %v6020_v54 }
 0x329   :  { %5808 = vmatmul.f32.gmra.mxu3 %v20934_v63  ;;  %5843 = vmatpush.msra.mxu0 %v20935_v14  ;;  %v6015_v1 = vand.u32 4294901760, %v6014_v56  ;;  %v20938_v63 = vand.u32 4294901760, %v19128_v35  ;;  %v2354_v47 = vadd.f32 %v20939_v34, %v2245_v59  ;;  %v19212_v56 = vand.u32 4294901760, %v327_v58 }
 0x32a   :  { %5892 = vmatpush.msra.mxu1 %v18669_v32  ;;  %5937 = vmatpush.msra.mxu2 %v19037_v12  ;;  %v326_v32 = vld [vmem:[%s20290_s2 + $0x780] sm:$0xff]  ;;  %v20941_v40 = vand.u32 4294901760, %v19146_v48  ;;  %v19228_v59 = vsub.f32 %v328_v17, %v19193_v44  ;;  %s13860_s2 = smov 120  }
 0x32b   :  { %6004 = vmatpush.msra.mxu3 %v6003_v28  ;;  %5704 = vmatmul.f32.gmra.mxu1 %v18923_v43  ;;  %v6026_v14 = vsub.f32 %v19128_v35, %v20938_v63  ;;  %v20940_v28 = vand.u32 4294901760, %v18801_v21  ;;  %v2204_v63 = vadd.f32 %v18496_v26, %v2163_v52  ;;  %v20479_v21 = vand.u32 4294901760, %v19180_v3 }
 0x32c   :  { %5894 = vmatpush.msra.mxu1 %v18675_v19  ;;  %5939 = vmatpush.msra.mxu2 %v19053_v15  ;;  %v6032_v34 = vsub.f32 %v19146_v48, %v20941_v40  ;;  %v20942_v19 = vand.u32 4294901760, %v18819_v53  ;;  %v19230_v26 = vand.u32 4294901760, %v326_v32  ;;  %v2412_v52 = vadd.f32 %v18509_v27, %v2354_v47 }
 0x32d   :  { %5847 = vmatpush.msra.mxu0 %v20940_v28  ;;  %6010 = vmatpush.msra.mxu3 %v6009_v6  ;;  %v6027_v54 = vand.u32 4294901760, %v6026_v14  ;;  %v20943_v6 = vand.u32 4294901760, %v19159_v42  ;;  %v20478_v53 = vand.u32 4294901760, %v19203_v51  ;;  %v19244_v17 = vsub.f32 %v327_v58, %v19212_v56 }
 0x32e   :  { %5896 = vmatpush.msra.mxu1 %v18700_v18  ;;  %5941 = vmatpush.msra.mxu2 %v19071_v24  ;;  %v20944_v18 = vand.u32 4294901760, %v18840_v49  ;;  %v19247_v27 = vsub.f32 %v69_v61, %v19214_v5  ;;  %v2253_v47 = vadd.f32 %v18513_v62, %v2204_v63  ;;  %v6033_v14 = vand.u32 4294901760, %v6032_v34  ;;  %v19262_v62 = vpop.f32.mrf.mxu2 }
 0x32f   :  { %5851 = vmatpush.msra.mxu0 %v20942_v19  ;;  %6016 = vmatpush.msra.mxu3 %v6015_v1  ;;  %v6038_v40 = vsub.f32 %v19159_v42, %v20943_v6  ;;  %v19238_v28 = vpop.f32.mrf.mxu1  ;;  %v2456_v1 = vadd.f32 %v18529_v30, %v2412_v52  ;;  %v6044_v49 = vsub.f32 %v19180_v3, %v20479_v21  ;;  %v20480_v58 = vand.u32 4294901760, %v19228_v59 }
 0x330   :  { %5898 = vmatpush.msra.mxu1 %v18723_v25  ;;  %5943 = vmatpush.msra.mxu2 %v19091_v10  ;;  %v20945_v25 = vand.u32 4294901760, %v18855_v55  ;;  %v19260_v61 = vsub.f32 %v326_v32, %v19230_v26  ;;  %v6050_v63 = vsub.f32 %v19203_v51, %v20478_v53  ;;  %v85_v55 = vld [vmem:[%s20492_s19 + $0xf8] sm:$0xff]  ;;  %v20948_v32 = vld [vmem:[#allocation20_spill] sm:$0xff]  ;;  %v20483_v19 = vand.u32 4294901760, %v19244_v17  ;;  %s13862_s19 = smov 80  }
 0x331   :  { %5855 = vmatpush.msra.mxu0 %v20944_v18  ;;  %6022 = vmatpush.msra.mxu3 %v6021_v31  ;;  %v6039_v30 = vand.u32 4294901760, %v6038_v40  ;;  %v20946_v31 = vld [vmem:[#allocation33_spill] sm:$0xff]  ;;  %v20481_v52 = vand.u32 4294901760, %v19247_v27  ;;  %v20950_v40 = vld [vmem:[#allocation10_spill] sm:$0xff]  ;;  %v6045_v53 = vand.u32 4294901760, %v6044_v49  ;;  %v20951_v21 = vand.u32 4294901760, %v18897_v50 }
 0x332   :  { %5900 = vmatpush.msra.mxu1 %v18731_v9  ;;  %5945 = vmatpush.msra.mxu2 %v19108_v33  ;;  %v19271_v9 = vpop.f32.mrf.mxu0  ;;  %v20947_v34 = vand.u32 4294901760, %v20946_v31  ;;  %v2531_v18 = vadd.f32 %v20950_v40, %v2456_v1  ;;  %v20952_v31 = vld [vmem:[#allocation25_spill] sm:$0xff]  ;;  %v20953_v1 = vld [vmem:[#allocation7_spill] sm:$0xff]  ;;  %v20954_v49 = vand.u32 4294901760, %v18930_v36  ;;  %v20955_v50 = vld [vmem:[#allocation28_spill] sm:$0xff]  ;;  %v20958_v36 = vand.u32 4294901760, %v18962_v22 }
 0x333   :  { %5859 = vmatpush.msra.mxu0 %v20945_v25  ;;  %6028 = vmatpush.msra.mxu3 %v6027_v54  ;;  %v20949_v54 = vld [vmem:[#allocation9_spill] sm:$0xff]  ;;  %v19280_v25 = vpop.f32.mrf.mxu3  ;;  %v5961_v40 = vsub.f32 %v19247_v27, %v20481_v52 }
 0x334   :  { %5902 = vmatpush.msra.mxu1 %v20948_v32  ;;  %v2358_v6 = vadd.f32 %v20949_v54, %v2253_v47  ;;  %5947 = vmatpush.msra.mxu2 %v19130_v4  ;;  %v20482_v32 = vand.u32 4294901760, %v19260_v61  ;;  %v19290_v47 = vand.u32 4294901760, %v85_v55 }
 0x335   :  { %5863 = vmatpush.msra.mxu0 %v20947_v34  ;;  %6034 = vmatpush.msra.mxu3 %v6033_v14  ;;  %v6056_v34 = vsub.f32 %v19228_v59, %v20480_v58  ;;  %v6051_v14 = vand.u32 4294901760, %v6050_v63  ;;  %v20959_v63 = vld [vmem:[#allocation29_spill] sm:$0xff] }
 0x336   :  { %5904 = vmatpush.msra.mxu1 %v20952_v31  ;;  %v2417_v54 = vadd.f32 %v20953_v1, %v2358_v6  ;;  %5949 = vmatpush.msra.mxu2 %v19148_v23  ;;  %v20956_v31 = vld [vmem:[#allocation13_spill] sm:$0xff]  ;;  %v20957_v6 = vld [vmem:[#allocation8_spill] sm:$0xff]  ;;  %v19315_v52 = vsub.f32 %v85_v55, %v19290_v47 }
 0x337   :  { %5867 = vmatpush.msra.mxu0 %v20951_v21  ;;  %6040 = vmatpush.msra.mxu3 %v6039_v30  ;;  %v6062_v21 = vsub.f32 %v19244_v17, %v20483_v19  ;;  %v2572_v58 = vadd.f32 %v20956_v31, %v2531_v18  ;;  %v19306_v30 = vpop.f32.mrf.mxu1  ;;  %v20960_v18 = vld [vmem:[#allocation11_spill] sm:$0xff]  ;;  %v20961_v31 = vld [vmem:[#allocation14_spill] sm:$0xff]  ;;  %v20963_v55 = vld [vmem:[#allocation41_spill] sm:$0xff] }
 0x338   :  { %5906 = vmatpush.msra.mxu1 %v20955_v50  ;;  %v2462_v1 = vadd.f32 %v20957_v6, %v2417_v54  ;;  %5951 = vmatpush.msra.mxu2 %v19161_v45  ;;  %v6068_v50 = vsub.f32 %v19260_v61, %v20482_v32  ;;  %v19325_v32 = vpop.f32.mrf.mxu2 }
 0x339   :  { %5871 = vmatpush.msra.mxu0 %v20954_v49  ;;  %6046 = vmatpush.msra.mxu3 %v6045_v53  ;;  %v6057_v49 = vand.u32 4294901760, %v6056_v34  ;;  %v2617_v54 = vadd.f32 %v20960_v18, %v2572_v58  ;;  %v6063_v22 = vand.u32 4294901760, %v6062_v21  ;;  %v5962_v34 = vand.u32 4294901760, %v5961_v40  ;;  %v20964_v58 = vld [vmem:[#allocation31_spill] sm:$0xff]  ;;  %v20966_v21 = vld [vmem:[#allocation12_spill] sm:$0xff] }
 0x33a   :  { %5908 = vmatpush.msra.mxu1 %v20959_v63  ;;  %5953 = vmatpush.msra.mxu2 %v19193_v44  ;;  %v19319_v53 = vpop.f32.mrf.mxu0  ;;  %v2535_v6 = vadd.f32 %v20961_v31, %v2462_v1  ;;  %v5968_v18 = vand.u32 4294901760, %v19315_v52  ;;  %v20967_v1 = vld [vmem:[#allocation17_spill] sm:$0xff] }
 0x33b   :  { %5875 = vmatpush.msra.mxu0 %v20958_v36  ;;  %6052 = vmatpush.msra.mxu3 %v6051_v14  ;;  %v20962_v36 = vld [vmem:[#allocation18_spill] sm:$0xff]  ;;  %v6069_v14 = vand.u32 4294901760, %v6068_v50  ;;  %v19331_v19 = vpop.f32.mrf.mxu3  ;;  %v20969_v31 = vld [vmem:[#allocation37_spill] sm:$0xff] }
 0x33c   :  { %5877 = vmatmul.f32.vlgmr.msra.gmra.mxu0 %v18827_v11  ;;  %5910 = vmatpush.msra.mxu1 %v18836_v20  ;;  %v2726_v63 = vadd.f32 %v20962_v36, %v2617_v54  ;;  %v20965_v20 = vld [vmem:[#allocation45_spill] sm:$0xff]  ;;  %v2576_v40 = vadd.f32 %v20966_v21, %v2535_v6  ;;  %v5969_v36 = vsub.f32 %v19315_v52, %v5968_v18  ;;  %v20974_v21 = vld [vmem:[#allocation16_spill] sm:$0xff] }
 0x33d   :  { %6082 = vmatpush.msrb.mxu0 %v20963_v55  ;;  %5955 = vmatpush.msra.mxu2 %v19212_v56  ;;  %v20971_v6 = vand.u32 4294901760, %v20965_v20 }
 0x33e   :  { %6058 = vmatpush.msra.mxu3 %v6057_v49  ;;  %5912 = vmatpush.msra.mxu1 %v20964_v58  ;;  %v2784_v54 = vadd.f32 %v20967_v1, %v2726_v63  ;;  %v20968_v49 = vand.u32 4294901760, %v20963_v55  ;;  %v20972_v63 = vld [vmem:[#allocation35_spill] sm:$0xff]  ;;  %v20973_v55 = vld [vmem:[#allocation21_spill] sm:$0xff] }
 0x33f   :  { %6085 = vmatpush.msrb.mxu0 %v20965_v20  ;;  %5957 = vmatpush.msra.mxu2 %v19230_v26  ;;  %v19340_v50 = vpop.f32.mrf.mxu1  ;;  %v5970_v20 = vand.u32 4294901760, %v5969_v36  ;;  %v20980_v36 = vand.u32 4294901760, %v19021_v57 }
 0x340   :  { %6064 = vmatpush.msra.mxu3 %v6063_v22  ;;  %5963 = vmatmul.f32.vlgmr.msra.gmra.mxu2 %v5962_v34  ;;  %v20970_v22 = vld [vmem:[#allocation15_spill] sm:$0xff]  ;;  %v2828_v58 = vadd.f32 %v20973_v55, %v2784_v54  ;;  %v20977_v54 = vand.u32 4294901760, %v19003_v38 }
 0x341   :  { %6088 = vmatpush.msrb.mxu0 %v19003_v38  ;;  %6187 = vmatpush.msrb.mxu2 %v20968_v49  ;;  %v2625_v34 = vadd.f32 %v20970_v22, %v2576_v40  ;;  %v20975_v49 = vld [vmem:[#allocation42_spill] sm:$0xff] }
 0x342   :  { %5914 = vmatpush.msra.mxu1 %v20969_v31  ;;  %6070 = vmatpush.msra.mxu3 %v6069_v14  ;;  %v19354_v14 = vpop.f32.mrf.mxu2  ;;  %v19358_v40 = vpop.f32.mrf.mxu0  ;;  %v20976_v31 = vld [vmem:[#allocation19_spill] sm:$0xff] }
 0x343   :  { %6072 = vmatmul.f32.vlgmr.msra.gmra.mxu3 %v19214_v5  ;;  %6091 = vmatpush.msrb.mxu0 %v19021_v57  ;;  %v2730_v1 = vadd.f32 %v20974_v21, %v2625_v34  ;;  %v2903_v22 = vadd.f32 %v20976_v31, %v2828_v58  ;;  %v20978_v34 = vld [vmem:[#allocation6_spill] sm:$0xff]  ;;  %v20979_v21 = vld [vmem:[#allocation59_spill] sm:$0xff]  ;;  %v20982_v58 = vld [vmem:[#allocation24_spill] sm:$0xff] }
 0x344   :  { %6191 = vmatpush.msrb.mxu2 %v20971_v6  ;;  %6258 = vmatpush.msrb.mxu3 %v20972_v63  ;;  %v19363_v6 = vpop.f32.mrf.mxu3 }
 0x345   :  { %5916 = vmatpush.msra.mxu1 %v20975_v49  ;;  %5881 = vmatmul.f32.gmra.mxu0 %v18923_v43  ;;  %v2789_v55 = vadd.f32 %v20978_v34, %v2730_v1  ;;  %v20987_v34 = vld [vmem:[#allocation34_spill] sm:$0xff] }
 0x346   :  { %5918 = vmatmul.f32.vlgmr.msra.gmra.mxu1 %v18827_v11  ;;  %6094 = vmatpush.msrb.mxu0 %v19042_v41  ;;  %v2944_v11 = vadd.f32 %v20979_v21, %v2903_v22  ;;  %v20986_v22 = vld [vmem:[#allocation23_spill] sm:$0xff] }
 0x347   :  { %6140 = vmatpush.msrb.mxu1 %v20972_v63  ;;  %6195 = vmatpush.msrb.mxu2 %v20977_v54  ;;  %v19378_v38 = vpop.f32.mrf.mxu1  ;;  %v20981_v63 = vand.u32 4294901760, %v19042_v41  ;;  %v2834_v1 = vadd.f32 %v20982_v58, %v2789_v55 }
 0x348   :  { %6260 = vmatpush.msrb.mxu3 %v18954_v7  ;;  %6097 = vmatpush.msrb.mxu0 %v19069_v46 }
 0x349   :  { %6142 = vmatpush.msrb.mxu1 %v18954_v7  ;;  %6199 = vmatpush.msrb.mxu2 %v20980_v36  ;;  %v20983_v7 = vld [vmem:[#allocation54_spill] sm:$0xff] }
 0x34a   :  { %6262 = vmatpush.msrb.mxu3 %v18975_v2  ;;  %5971 = vmatmul.f32.gmra.mxu2 %v5970_v20  ;;  %v2989_v49 = vadd.f32 %v20983_v7, %v2944_v11  ;;  %v19387_v57 = vpop.f32.mrf.mxu0  ;;  %v20985_v20 = vld [vmem:[#allocation22_spill] sm:$0xff]  ;;  %v19393_v31 = vpop.f32.mrf.mxu2  ;;  %v20990_v11 = vand.u32 4294901760, %v19106_v39 }
 0x34b   :  { %6100 = vmatpush.msrb.mxu0 %v19089_v16  ;;  %6144 = vmatpush.msrb.mxu1 %v18975_v2  ;;  %v20984_v2 = vand.u32 4294901760, %v19069_v46  ;;  %v2907_v41 = vadd.f32 %v20985_v20, %v2834_v1  ;;  %v20988_v46 = vand.u32 4294901760, %v19089_v16  ;;  %v20991_v16 = vld [vmem:[#allocation27_spill] sm:$0xff]  ;;  %v20993_v1 = vand.u32 4294901760, %v19128_v35 }
 0x34c   :  { %6203 = vmatpush.msrb.mxu2 %v20981_v63  ;;  %6264 = vmatpush.msrb.mxu3 %v18989_v8  ;;  %v3098_v54 = vadd.f32 %v20986_v22, %v2989_v49  ;;  %v20992_v63 = vld [vmem:[#allocation38_spill] sm:$0xff]  ;;  %v20996_v49 = vld [vmem:[#allocation36_spill] sm:$0xff]  ;;  %v20999_v22 = vand.u32 4294901760, %v19180_v3 }
 0x34d   :  { %6076 = vmatmul.f32.gmra.mxu3 %v19290_v47  ;;  %6103 = vmatpush.msrb.mxu0 %v19106_v39  ;;  %v2948_v55 = vadd.f32 %v20987_v34, %v2907_v41  ;;  %v20994_v39 = vand.u32 4294901760, %v19146_v48 }
 0x34e   :  { %6146 = vmatpush.msrb.mxu1 %v18989_v8  ;;  %6207 = vmatpush.msrb.mxu2 %v20984_v2  ;;  %v19401_v8 = vpop.f32.mrf.mxu3 }
 0x34f   :  { %6266 = vmatpush.msrb.mxu3 %v19005_v37  ;;  %5922 = vmatmul.f32.gmra.mxu1 %v18923_v43  ;;  %v20989_v43 = vld [vmem:[#allocation26_spill] sm:$0xff]  ;;  %v2997_v36 = vadd.f32 %v20991_v16, %v2948_v55  ;;  %v21002_v55 = vand.u32 4294901760, %v19203_v51 }
 0x350   :  { %6106 = vmatpush.msrb.mxu0 %v19128_v35  ;;  %6148 = vmatpush.msrb.mxu1 %v19005_v37  ;;  %v3156_v21 = vadd.f32 %v20989_v43, %v3098_v54  ;;  %v19412_v37 = vpop.f32.mrf.mxu1  ;;  %v20995_v35 = vld [vmem:[#allocation32_spill] sm:$0xff]  ;;  %v21001_v54 = vld [vmem:[#allocation30_spill] sm:$0xff]  ;;  %v21004_v43 = vand.u32 4294901760, %v19228_v59 }
 0x351   :  { %6211 = vmatpush.msrb.mxu2 %v20988_v46  ;;  %6268 = vmatpush.msrb.mxu3 %v19037_v12  ;;  %v3102_v7 = vadd.f32 %v20995_v35, %v2997_v36 }
 0x352   :  { %6109 = vmatpush.msrb.mxu0 %v19146_v48  ;;  %6150 = vmatpush.msrb.mxu1 %v19037_v12  ;;  %v3200_v58 = vadd.f32 %v20992_v63, %v3156_v21  ;;  %v19423_v12 = vpop.f32.mrf.mxu2  ;;  %v20998_v48 = vld [vmem:[#allocation39_spill] sm:$0xff]  ;;  %v21008_v63 = vand.u32 4294901760, %v19260_v61 }
 0x353   :  { %6215 = vmatpush.msrb.mxu2 %v20990_v11  ;;  %6270 = vmatpush.msrb.mxu3 %v19053_v15  ;;  %v3161_v41 = vadd.f32 %v20998_v48, %v3102_v7  ;;  %v21006_v11 = vld [vmem:[#allocation46_spill] sm:$0xff] }
 0x354   :  { %6112 = vmatpush.msrb.mxu0 %v19159_v42  ;;  %6152 = vmatpush.msrb.mxu1 %v19053_v15  ;;  %v19428_v15 = vpop.f32.mrf.mxu0  ;;  %v3275_v2 = vadd.f32 %v20996_v49, %v3200_v58  ;;  %v21012_v49 = vld [vmem:[#allocation47_spill] sm:$0xff] }
 0x355   :  { %6219 = vmatpush.msrb.mxu2 %v20993_v1  ;;  %6272 = vmatpush.msrb.mxu3 %v19071_v24  ;;  %v3206_v34 = vadd.f32 %v21001_v54, %v3161_v41 }
 0x356   :  { %6115 = vmatpush.msrb.mxu0 %v19180_v3  ;;  %6154 = vmatpush.msrb.mxu1 %v19071_v24  ;;  %v19434_v20 = vpop.f32.mrf.mxu3  ;;  %v20997_v24 = vand.u32 4294901760, %v19159_v42  ;;  %v21003_v3 = vld [vmem:[#allocation43_spill] sm:$0xff] }
 0x357   :  { %6223 = vmatpush.msrb.mxu2 %v20994_v39  ;;  %6274 = vmatpush.msrb.mxu3 %v19091_v10  ;;  %v21011_v39 = vld [vmem:[#allocation48_spill] sm:$0xff] }
 0x358   :  { %6118 = vmatpush.msrb.mxu0 %v19203_v51  ;;  %6156 = vmatpush.msrb.mxu1 %v19091_v10  ;;  %v21000_v10 = vld [vmem:[#allocation40_spill] sm:$0xff]  ;;  %v21005_v51 = vld [vmem:[#allocation49_spill] sm:$0xff] }
 0x359   :  { %6227 = vmatpush.msrb.mxu2 %v20997_v24  ;;  %6276 = vmatpush.msrb.mxu3 %v19108_v33  ;;  %v3316_v42 = vadd.f32 %v21000_v10, %v3275_v2  ;;  %v3279_v21 = vadd.f32 %v21005_v51, %v3206_v34 }
 0x35a   :  { %6121 = vmatpush.msrb.mxu0 %v19228_v59  ;;  %6158 = vmatpush.msrb.mxu1 %v19108_v33  ;;  %v19452_v33 = vpop.f32.mrf.mxu1  ;;  %v19466_v36 = vpop.f32.mrf.mxu2 }
 0x35b   :  { %6231 = vmatpush.msrb.mxu2 %v20999_v22  ;;  %6278 = vmatpush.msrb.mxu3 %v19130_v4  ;;  %v3361_v46 = vadd.f32 %v21003_v3, %v3316_v42 }
 0x35c   :  { %6124 = vmatpush.msrb.mxu0 %v19244_v17  ;;  %6160 = vmatpush.msrb.mxu1 %v19130_v4  ;;  %v19460_v4 = vpop.f32.mrf.mxu0 }
 0x35d   :  { %6235 = vmatpush.msrb.mxu2 %v21002_v55  ;;  %6280 = vmatpush.msrb.mxu3 %v19148_v23  ;;  %v3470_v16 = vadd.f32 %v21006_v11, %v3361_v46 }
 0x35e   :  { %6127 = vmatpush.msrb.mxu0 %v19260_v61  ;;  %6162 = vmatpush.msrb.mxu1 %v19148_v23  ;;  %v21007_v23 = vand.u32 4294901760, %v19244_v17  ;;  %v19472_v59 = vpop.f32.mrf.mxu3  ;;  %v21010_v61 = vand.u32 4294901760, %v19247_v27 }
 0x35f   :  { %6239 = vmatpush.msrb.mxu2 %v21004_v43  ;;  %6282 = vmatpush.msrb.mxu3 %v19161_v45  ;;  %v3528_v17 = vadd.f32 %v19102_v60, %v3470_v16 }
 0x360   :  { %6130 = vmatmul.f32.vlgmr.msrb.gmra.mxu0 %v19247_v27  ;;  %6164 = vmatpush.msrb.mxu1 %v19161_v45  ;;  %v21009_v45 = vld [vmem:[#allocation44_spill] sm:$0xff] }
 0x361   :  { %6243 = vmatpush.msrb.mxu2 %v21007_v23  ;;  %6284 = vmatpush.msrb.mxu3 %v19193_v44  ;;  %v3320_v58 = vadd.f32 %v21009_v45, %v3279_v21 }
 0x362   :  { %6166 = vmatpush.msrb.mxu1 %v19193_v44  ;;  %v4431_v1 = vpop.f32.mrf.mxu1  ;;  %v4476_v7 = vpop.f32.mrf.mxu2 }
 0x363   :  { %6247 = vmatpush.msrb.mxu2 %v21008_v63  ;;  %6286 = vmatpush.msrb.mxu3 %v19212_v56  ;;  %v3369_v44 = vadd.f32 %v19111_v13, %v3320_v58 }
 0x364   :  { %6249 = vmatmul.f32.vlgmr.msrb.gmra.mxu2 %v19214_v5  ;;  %6168 = vmatpush.msrb.mxu1 %v19212_v56  ;;  %v3572_v56 = vadd.f32 %v21011_v39, %v3528_v17  ;;  %v4394_v60 = vpop.f32.mrf.mxu0 }
 0x365   :  { %6288 = vmatpush.msrb.mxu3 %v19230_v26  ;;  %v3474_v35 = vadd.f32 %v19168_v29, %v3369_v44 }
 0x366   :  { %6290 = vmatmul.f32.vlgmr.msrb.gmra.mxu3 %v19214_v5  ;;  %6170 = vmatpush.msrb.mxu1 %v19230_v26  ;;  %v3647_v2 = vadd.f32 %v21012_v49, %v3572_v56  ;;  %v4585_v24 = vpop.f32.mrf.mxu3  ;;  %v21013_v5 = vld [vmem:[#allocation52_spill] sm:$0xff] }
 0x367   :  { %6174 = vmatmul.f32.vlgmr.msrb.gmra.mxu1 %v21010_v61  ;;  %v3533_v26 = vadd.f32 %v21013_v5, %v3474_v35 }
 0x368   :  { %6135 = vmatmul.f32.gmra.mxu0 %v19315_v52  ;;  %v3688_v13 = vadd.f32 %v19238_v28, %v3647_v2 }
 0x369   :  { %v3578_v48 = vadd.f32 %v19217_v0, %v3533_v26 }
 0x36a   :  { %v4435_v27 = vpop.f32.mrf.mxu1  ;;  %v3733_v29 = vadd.f32 %v19262_v62, %v3688_v13  ;;  %v4484_v10 = vpop.f32.mrf.mxu2 }
 0x36b   :  { %v3651_v22 = vadd.f32 %v19271_v9, %v3578_v48 }
 0x36c   :  { %6253 = vmatmul.f32.gmra.mxu2 %v19290_v47  ;;  %v4643_v41 = vpop.f32.mrf.mxu0  ;;  %v3842_v42 = vadd.f32 %v19280_v25, %v3733_v29 }
 0x36d   :  { %v3692_v54 = vadd.f32 %v19306_v30, %v3651_v22 }
 0x36e   :  { %6294 = vmatmul.f32.gmra.mxu3 %v19290_v47  ;;  %v4589_v34 = vpop.f32.mrf.mxu3  ;;  %v3900_v28 = vadd.f32 %v19319_v53, %v3842_v42 }
 0x36f   :  { %6180 = vmatmul.f32.gmra.mxu1 %v5968_v18  ;;  %v3741_v52 = vadd.f32 %v19325_v32, %v3692_v54 }
 0x370   :  { %v3944_v18 = vadd.f32 %v19340_v50, %v3900_v28 }
 0x371   :  { %v3846_v62 = vadd.f32 %v19331_v19, %v3741_v52 }
 0x372   :  { %v4687_v47 = vpop.f32.mrf.mxu1  ;;  %v4762_v55 = vpop.f32.mrf.mxu2  ;;  %v4019_v3 = vadd.f32 %v19354_v14, %v3944_v18 }
 0x373   :  { %v3905_v46 = vadd.f32 %v19358_v40, %v3846_v62 }
 0x374   :  { %v4648_v0 = vpop.f32.mrf.mxu0  ;;  %v4060_v25 = vadd.f32 %v19363_v6, %v4019_v3 }
 0x375   :  { %v3950_v30 = vadd.f32 %v19378_v38, %v3905_v46 }
 0x376   :  { %v4803_v9 = vpop.f32.mrf.mxu3  ;;  %v4105_v53 = vadd.f32 %v19387_v57, %v4060_v25 }
 0x377   :  { %v4023_v32 = vadd.f32 %v19393_v31, %v3950_v30 }
 0x378   :  { %v4214_v50 = vadd.f32 %v19412_v37, %v4105_v53 }
 0x379   :  { %v4064_v19 = vadd.f32 %v19401_v8, %v4023_v32 }
 0x37a   :  { %v4693_v43 = vpop.f32.mrf.mxu1  ;;  %v4766_v21 = vpop.f32.mrf.mxu2  ;;  %v4272_v14 = vadd.f32 %v19423_v12, %v4214_v50 }
 0x37b   :  { %v4113_v40 = vadd.f32 %v19428_v15, %v4064_v19 }
 0x37c   :  { %v4848_v51 = vpop.f32.mrf.mxu0  ;;  %v4316_v6 = vadd.f32 %v19434_v20, %v4272_v14  ;;  %v6307_v14 = vld [vmem:[%s20292_s4 + $0x18] sm:$0xff] }
 0x37d   :  { %v4218_v38 = vadd.f32 %v19452_v33, %v4113_v40 }
 0x37e   :  { %v4807_v11 = vpop.f32.mrf.mxu3  ;;  %v4391_v63 = vadd.f32 %v19460_v4, %v4316_v6  ;;  %v6306_v6 = vld [vmem:[%s20292_s4 + $0x10] sm:$0xff] }
 0x37f   :  { %v4277_v37 = vadd.f32 %v19466_v36, %v4218_v38 }
 0x380   :  { %v4432_v45 = vadd.f32 %v4431_v1, %v4391_v63 }
 0x381   :  { %v4322_v8 = vadd.f32 %v19472_v59, %v4277_v37 }
 0x382   :  { %v4957_v16 = vpop.f32.mrf.mxu1  ;;  %v5015_v23 = vpop.f32.mrf.mxu2  ;;  %v4477_v17 = vadd.f32 %v4476_v7, %v4432_v45  ;;  %v6305_v45 = vld [vmem:[%s20292_s4 + $0x8] sm:$0xff] }
 0x383   :  { %v4395_v44 = vadd.f32 %v4394_v60, %v4322_v8 }
 0x384   :  { %v4856_v57 = vpop.f32.mrf.mxu0  ;;  %v4586_v15 = vadd.f32 %v4585_v24, %v4477_v17  ;;  %v6358_v17 = vand.u32 4294901760, %v6305_v45 }
 0x385   :  { %v4436_v39 = vadd.f32 %v4435_v27, %v4395_v44  ;;  %v6304_v44 = vld [vmem:[%s20292_s4] sm:$0xff] }
 0x386   :  { %v5059_v31 = vpop.f32.mrf.mxu3  ;;  %v4644_v56 = vadd.f32 %v4643_v41, %v4586_v15 }
 0x387   :  { %v4485_v35 = vadd.f32 %v4484_v10, %v4436_v39  ;;  %v6404_v39 = vsub.f32 %v6305_v45, %v6358_v17 }
 0x388   :  { %v4688_v49 = vadd.f32 %v4687_v47, %v4644_v56 }
 0x389   :  { %v4590_v5 = vadd.f32 %v4589_v34, %v4485_v35 }
 0x38a   :  { %v4961_v58 = vpop.f32.mrf.mxu1  ;;  %v5020_v61 = vpop.f32.mrf.mxu2  ;;  %v4763_v26 = vadd.f32 %v4762_v55, %v4688_v49 }
 0x38b   :  { %v4649_v1 = vadd.f32 %v4648_v0, %v4590_v5 }
 0x38c   :  { %v5134_v12 = vpop.f32.mrf.mxu0  ;;  %v4804_v13 = vadd.f32 %v4803_v9, %v4763_v26 }
 0x38d   :  { %v4694_v48 = vadd.f32 %v4693_v43, %v4649_v1 }
 0x38e   :  { %v5065_v20 = vpop.f32.mrf.mxu3  ;;  %v4849_v7 = vadd.f32 %v4848_v51, %v4804_v13 }
 0x38f   :  { %v4767_v60 = vadd.f32 %v4766_v21, %v4694_v48 }
 0x390   :  { %v4958_v22 = vadd.f32 %v4957_v16, %v4849_v7  ;;  %v19524_v16 = vand.u32 4294901760, %v6307_v14 }
 0x391   :  { %v4808_v42 = vadd.f32 %v4807_v11, %v4767_v60 }
 0x392   :  { %v5175_v33 = vpop.f32.mrf.mxu1  ;;  %v5220_v2 = vpop.f32.mrf.mxu2  ;;  %v5016_v41 = vadd.f32 %v5015_v23, %v4958_v22  ;;  %v6392_v23 = vsub.f32 %v6307_v14, %v19524_v16  ;;  %6355 = vmatpush.msra.mxu0 %v19524_v16  ;;  %13708 = vmatpush.msra.mxu2 %v19524_v16 }
 0x393   :  { %v4857_v10 = vadd.f32 %v4856_v57, %v4808_v42  ;;  %v19530_v57 = vand.u32 4294901760, %v6306_v6 }
 0x394   :  { %v5138_v4 = vpop.f32.mrf.mxu0  ;;  %v5060_v28 = vadd.f32 %v5059_v31, %v5016_v41 }
 0x395   :  { %v4962_v47 = vadd.f32 %v4961_v58, %v4857_v10  ;;  %v6393_v58 = vand.u32 4294901760, %v6392_v23  ;;  %v6398_v8 = vsub.f32 %v6306_v6, %v19530_v57  ;;  %6357 = vmatpush.msra.mxu0 %v19530_v57  ;;  %13709 = vmatpush.msra.mxu2 %v19530_v57 }
 0x396   :  { %v5329_v36 = vpop.f32.mrf.mxu3  ;;  %v5135_v18 = vadd.f32 %v5134_v12, %v5060_v28 }
 0x397   :  { %v5021_v0 = vadd.f32 %v5020_v61, %v4962_v47  ;;  %v6394_v61 = vsub.f32 %v6392_v23, %v6393_v58  ;;  %v6399_v15 = vand.u32 4294901760, %v6398_v8  ;;  %6359 = vmatpush.msra.mxu0 %v6358_v17  ;;  %13710 = vmatpush.msra.mxu2 %v6358_v17 }
 0x398   :  { %v5176_v62 = vadd.f32 %v5175_v33, %v5135_v18  ;;  %v6360_v33 = vand.u32 4294901760, %v6304_v44 }
 0x399   :  { %v5066_v9 = vadd.f32 %v5065_v20, %v5021_v0  ;;  %v6395_v49 = vand.u32 4294901760, %v6394_v61 }
 0x39a   :  { %v5179_v59 = vpop.f32.mrf.mxu1  ;;  %v5228_v24 = vpop.f32.mrf.mxu2  ;;  %v5221_v46 = vadd.f32 %v5220_v2, %v5176_v62  ;;  %v6400_v2 = vsub.f32 %v6398_v8, %v6399_v15  ;;  %v6410_v26 = vsub.f32 %v6304_v44, %v6360_v33  ;;  %6361 = vmatpush.msra.mxu0 %v6360_v33  ;;  %13711 = vmatpush.msra.mxu2 %v6360_v33 }
 0x39b   :  { %v5139_v30 = vadd.f32 %v5138_v4, %v5066_v9  ;;  %v6405_v4 = vand.u32 4294901760, %v6404_v39  ;;  %6396 = vmatpush.msra.mxu1 %v6395_v49  ;;  %13712 = vmatpush.msra.mxu3 %v6395_v49 }
 0x39c   :  { %v5387_v29 = vpop.f32.mrf.mxu0  ;;  %v5330_v53 = vadd.f32 %v5329_v36, %v5221_v46  ;;  %v6401_v1 = vand.u32 4294901760, %v6400_v2  ;;  %6507 = vmatpush.msrb.mxu0 %v6393_v58  ;;  %6438 = vmatpush.msrb.mxu2 %v6392_v23 }
 0x39d   :  { %v5180_v51 = vadd.f32 %v5179_v59, %v5139_v30  ;;  %v6406_v13 = vsub.f32 %v6404_v39, %v6405_v4 }
 0x39e   :  { %v5333_v27 = vpop.f32.mrf.mxu3  ;;  %v5388_v50 = vadd.f32 %v5387_v29, %v5330_v53  ;;  %v6411_v29 = vand.u32 4294901760, %v6410_v26  ;;  %6402 = vmatpush.msra.mxu1 %v6401_v1  ;;  %13713 = vmatpush.msra.mxu3 %v6401_v1 }
 0x39f   :  { %v5229_v11 = vadd.f32 %v5228_v24, %v5180_v51  ;;  %v6407_v60 = vand.u32 4294901760, %v6406_v13  ;;  %6511 = vmatpush.msrb.mxu0 %v6399_v15  ;;  %6441 = vmatpush.msrb.mxu2 %v6398_v8 }
 0x3a0   :  { %v6412_v24 = vsub.f32 %v6410_v26, %v6411_v29 }
 0x3a1   :  { %v5334_v63 = vadd.f32 %v5333_v27, %v5229_v11  ;;  %6408 = vmatpush.msra.mxu1 %v6407_v60  ;;  %13714 = vmatpush.msra.mxu3 %v6407_v60 }
 0x3a2   :  { %v5431_v54 = vpop.f32.mrf.mxu1  ;;  %v5506_v52 = vpop.f32.mrf.mxu2  ;;  %v6413_v41 = vand.u32 4294901760, %v6412_v24  ;;  %6515 = vmatpush.msrb.mxu0 %v6405_v4  ;;  %6444 = vmatpush.msrb.mxu2 %v6404_v39 }
 0x3a3   :  { %v5432_v19 = vadd.f32 %v5431_v54, %v5388_v50 }
 0x3a4   :  { %v5392_v34 = vpop.f32.mrf.mxu0  ;;  %6414 = vmatpush.msra.mxu1 %v6413_v41  ;;  %13715 = vmatpush.msra.mxu3 %v6413_v41 }
 0x3a5   :  { %v5507_v31 = vadd.f32 %v5506_v52, %v5432_v19  ;;  %v5393_v12 = vadd.f32 %v5392_v34, %v5334_v63  ;;  %6519 = vmatpush.msrb.mxu0 %v6411_v29  ;;  %6447 = vmatpush.msrb.mxu2 %v6410_v26  ;;  %v6300_v63 = vld [vmem:[%s20289_s1] sm:$0xff] }
 0x3a6   :  { %v5547_v55 = vpop.f32.mrf.mxu3  ;;  %6542 = vmatpush.msrb.mxu1 %v19524_v16  ;;  %6472 = vmatpush.msrb.mxu3 %v19524_v16 }
 0x3a7   :  { %v5548_v20 = vadd.f32 %v5547_v55, %v5507_v31 }
 0x3a8   :  { %6544 = vmatpush.msrb.mxu1 %v19530_v57  ;;  %6474 = vmatpush.msrb.mxu3 %v19530_v57 }
 0x3aa   :  { %v5437_v3 = vpop.f32.mrf.mxu1  ;;  %v5510_v43 = vpop.f32.mrf.mxu2  ;;  %6546 = vmatpush.msrb.mxu1 %v6358_v17  ;;  %6476 = vmatpush.msrb.mxu3 %v6358_v17 }
 0x3ab   :  { %v5438_v56 = vadd.f32 %v5437_v3, %v5393_v12 }
 0x3ac   :  { %v5592_v25 = vpop.f32.mrf.mxu0  ;;  %6548 = vmatpush.msrb.mxu1 %v6360_v33  ;;  %6478 = vmatpush.msrb.mxu3 %v6360_v33 }
 0x3ad   :  { %v5593_v5 = vadd.f32 %v5592_v25, %v5548_v20  ;;  %v5511_v48 = vadd.f32 %v5510_v43, %v5438_v56  ;;  %v6301_v20 = vld [vmem:[%s20289_s1 + $0x8] sm:$0xff] }
 0x3ae   :  { %v5551_v32 = vpop.f32.mrf.mxu3 }
 0x3af   :  { %v5552_v27 = vadd.f32 %v5551_v32, %v5511_v48 }
 0x3b2   :  { %v5701_v21 = vpop.f32.mrf.mxu1  ;;  %v5759_v40 = vpop.f32.mrf.mxu2 }
 0x3b3   :  { %v5702_v59 = vadd.f32 %v5701_v21, %v5593_v5 }
 0x3b4   :  { %v5600_v38 = vpop.f32.mrf.mxu0 }
 0x3b5   :  { %v5760_v42 = vadd.f32 %v5759_v40, %v5702_v59  ;;  %v5601_v10 = vadd.f32 %v5600_v38, %v5552_v27  ;;  %v13734_v59 = vld [vmem:[%s20293_s5] ss:$0 sm:$0xff] }
 0x3b6   :  { %v5803_v37 = vpop.f32.mrf.mxu3 }
 0x3b7   :  { %v5804_v28 = vadd.f32 %v5803_v37, %v5760_v42 }
 0x3ba   :  { %v5705_v35 = vpop.f32.mrf.mxu1  ;;  %v5764_v7 = vpop.f32.mrf.mxu2 }
 0x3bb   :  { %v5706_v47 = vadd.f32 %v5705_v35, %v5601_v10 }
 0x3bc   :  { %v5878_v36 = vpop.f32.mrf.mxu0 }
 0x3bd   :  { %v5879_v18 = vadd.f32 %v5878_v36, %v5804_v28  ;;  %v5765_v0 = vadd.f32 %v5764_v7, %v5706_v47 }
 0x3be   :  { %v5809_v22 = vpop.f32.mrf.mxu3 }
 0x3bf   :  { %v5810_v9 = vadd.f32 %v5809_v22, %v5765_v0 }
 0x3c3   :  { %v5919_v54 = vpop.f32.mrf.mxu1  ;;  %v5964_v52 = vpop.f32.mrf.mxu2 }
 0x3c4   :  { %v5882_v34 = vpop.f32.mrf.mxu0  ;;  %v5920_v62 = vadd.f32 %v5919_v54, %v5879_v18 }
 0x3c5   :  { %v5883_v30 = vadd.f32 %v5882_v34, %v5810_v9 }
 0x3c6   :  { %v6073_v55 = vpop.f32.mrf.mxu3  ;;  %v5965_v46 = vadd.f32 %v5964_v52, %v5920_v62 }
 0x3c8   :  { %v6074_v53 = vadd.f32 %v6073_v55, %v5965_v46 }
 0x3cc   :  { %v5923_v3 = vpop.f32.mrf.mxu1 }
 0x3cd   :  { %v5972_v43 = vpop.f32.mrf.mxu2  ;;  %v5924_v51 = vadd.f32 %v5923_v3, %v5883_v30 }
 0x3cf   :  { %v5973_v11 = vadd.f32 %v5972_v43, %v5924_v51 }
 0x3d0   :  { %v6077_v32 = vpop.f32.mrf.mxu3 }
 0x3d1   :  { %v6078_v6 = vadd.f32 %v6077_v32, %v5973_v11 }
 0x3dd   :  { %v6131_v25 = vpop.f32.mrf.mxu0 }
 0x3de   :  { %v6132_v50 = vadd.f32 %v6131_v25, %v6074_v53 }
 0x3e4   :  { %v6175_v21 = vpop.f32.mrf.mxu1 }
 0x3e5   :  { %v6176_v19 = vadd.f32 %v6175_v21, %v6132_v50  ;;  %v6136_v16 = vpop.f32.mrf.mxu0 }
 0x3e6   :  { %v6137_v57 = vadd.f32 %v6136_v16, %v6078_v6 }
 0x3e7   :  { %v6250_v14 = vpop.f32.mrf.mxu2 }
 0x3e8   :  { %v6251_v40 = vadd.f32 %v6250_v14, %v6176_v19 }
 0x3e9   :  { %v6291_v38 = vpop.f32.mrf.mxu3 }
 0x3ea   :  { %v6292_v23 = vadd.f32 %v6291_v38, %v6251_v40 }
 0x3ec   :  { %v6298_v31 = vmul.f32 5.656854, %v6292_v23  ;;  %v6181_v37 = vpop.f32.mrf.mxu1 }
 0x3ed   :  { %v6182_v45 = vadd.f32 %v6181_v37, %v6137_v57 }
 0x3ee   :  { %v19550_v58 = vadd.f32 %v6300_v63, %v6298_v31 }
 0x3ef   :  { %v6254_v8 = vpop.f32.mrf.mxu2 }
 0x3f0   :  { %v6337_v17 = vsel %vm6335_vm0, %v19550_v58, 0  ;;  %v6255_v12 = vadd.f32 %v6254_v8, %v6182_v45 }
 0x3f1   :  { %v6362_v44 = vand.u32 4294901760, %v6337_v17  ;;  %v6295_v61 = vpop.f32.mrf.mxu3 }
 0x3f2   :  { %v6296_v15 = vadd.f32 %v6295_v61, %v6255_v12 }
 0x3f3   :  { %v6363_v39 = vsub.f32 %v6337_v17, %v6362_v44  ;;  %6416 = vmatmul.f32.vlgmr.msra.gmra.mxu1 %v6362_v44 }
 0x3f4   :  { %v6299_v56 = vmul.f32 5.656854, %v6296_v15 }
 0x3f5   :  { %v6364_v33 = vand.u32 4294901760, %v6363_v39 }
 0x3f6   :  { %v19557_v35 = vadd.f32 %v6301_v20, %v6299_v56 }
 0x3f7   :  { %v6365_v49 = vsub.f32 %v6363_v39, %v6364_v33 }
 0x3f8   :  { %v6340_v2 = vsel %vm6335_vm0, %v19557_v35, 0 }
 0x3f9   :  { %v6370_v4 = vand.u32 4294901760, %v6340_v2  ;;  %v6366_v5 = vand.u32 4294901760, %v6365_v49 }
 0x3fb   :  { %v6371_v26 = vsub.f32 %v6340_v2, %v6370_v4  ;;  %6367 = vmatmul.f32.vlgmr.msra.gmra.mxu0 %v6366_v5  ;;  %6420 = vmatmul.f32.vlgmr.msra.gmra.mxu3 %v6370_v4 }
 0x3fc   :  { %6550 = vmatmul.f32.vlgmr.msrb.gmra.mxu1 %v6362_v44 }
 0x3fd   :  { %v6372_v36 = vand.u32 4294901760, %v6371_v26 }
 0x3ff   :  { %v6373_v1 = vsub.f32 %v6371_v26, %v6372_v36 }
 0x401   :  { %v6374_v13 = vand.u32 4294901760, %v6373_v1 }
 0x403   :  { %6375 = vmatmul.f32.vlgmr.msra.gmra.mxu2 %v6374_v13  ;;  %6482 = vmatmul.f32.vlgmr.msrb.gmra.mxu3 %v6364_v33 }
 0x404   :  { %6521 = vmatmul.f32.vlgmr.msrb.gmra.mxu0 %v6362_v44  ;;  %6554 = vmatmul.f32.gmra.mxu1 %v6370_v4 }
 0x40b   :  { %6450 = vmatmul.f32.vlgmr.msrb.gmra.mxu2 %v6363_v39  ;;  %6488 = vmatmul.f32.gmra.mxu3 %v6372_v36 }
 0x40c   :  { %6525 = vmatmul.f32.gmra.mxu0 %v6370_v4 }
 0x413   :  { %6455 = vmatmul.f32.gmra.mxu2 %v6371_v26 }
 0x470   :  { %v6417_v60 = vpop.f32.mrf.mxu1 }
 0x478   :  { %v6368_v7 = vpop.f32.mrf.mxu0 }
 0x479   :  { %v6369_v22 = vadd.f32 %v13734_v59, %v6368_v7  ;;  %v6551_v47 = vpop.f32.mrf.mxu1 }
 0x47b   :  { %v6418_v24 = vadd.f32 %v6417_v60, %v6369_v22 }
 0x47e   :  { %v6421_v48 = vpop.f32.mrf.mxu3 }
 0x481   :  { %v6522_v54 = vpop.f32.mrf.mxu0  ;;  %v6555_v25 = vpop.f32.mrf.mxu1 }
 0x486   :  { %v6376_v29 = vpop.f32.mrf.mxu2  ;;  %v6483_v27 = vpop.f32.mrf.mxu3 }
 0x487   :  { %v6377_v10 = vadd.f32 %v13734_v59, %v6376_v29 }
 0x489   :  { %v6422_v18 = vadd.f32 %v6421_v48, %v6377_v10  ;;  %v6526_v9 = vpop.f32.mrf.mxu0 }
 0x48e   :  { %v6451_v42 = vpop.f32.mrf.mxu2  ;;  %v6489_v62 = vpop.f32.mrf.mxu3 }
 0x48f   :  { %v6452_v41 = vadd.f32 %v6451_v42, %v6418_v24 }
 0x491   :  { %v6484_v28 = vadd.f32 %v6483_v27, %v6452_v41 }
 0x493   :  { %v6523_v52 = vadd.f32 %v6522_v54, %v6484_v28 }
 0x495   :  { %v19564_v34 = vadd.f32 %v6551_v47, %v6523_v52 }
 0x496   :  { %v6456_v55 = vpop.f32.mrf.mxu2 }
 0x497   :  { %v6457_v0 = vadd.f32 %v6456_v55, %v6422_v18  ;;  %6559 = vrot.lane.b32.xlu0 %v19564_v34, %s13858_s27  ;;  %v6562_v43 = vsel %vm6561_vm1, %v19564_v34, 0 }
 0x498   :  { %v6583_v53 = vand.u32 4294901760, %v6562_v43 }
 0x499   :  { %v6490_v3 = vadd.f32 %v6489_v62, %v6457_v0 }
 0x49a   :  { %v6584_v51 = vsub.f32 %v6562_v43, %v6583_v53 }
 0x49b   :  { %v6527_v46 = vadd.f32 %v6526_v9, %v6490_v3 }
 0x49c   :  { %v6585_v32 = vand.u32 4294901760, %v6584_v51 }
 0x49d   :  { %v19568_v30 = vadd.f32 %v6555_v25, %v6527_v46 }
 0x49e   :  { %v6586_v11 = vsub.f32 %v6584_v51, %v6585_v32 }
 0x49f   :  { %6713 = vrot.lane.b32.xlu0 %v19568_v30, %s13858_s27  ;;  %v6715_v14 = vsel %vm6561_vm1, %v19568_v30, 0 }
 0x4a0   :  { %v6587_v40 = vand.u32 4294901760, %v6586_v11  ;;  %v6736_v6 = vand.u32 4294901760, %v6715_v14 }
 0x4a2   :  { %v6737_v31 = vsub.f32 %v6715_v14, %v6736_v6 }
 0x4a4   :  { %v6738_v17 = vand.u32 4294901760, %v6737_v31 }
 0x4a6   :  { %v6739_v39 = vsub.f32 %v6737_v31, %v6738_v17 }
 0x4a7   :  { %6889 = vrot.lane.b32.xlu0 %v19564_v34, %s13859_s28 }
 0x4a8   :  { %v6740_v49 = vand.u32 4294901760, %v6739_v39 }
 0x4af   :  { %7193 = vrot.lane.b32.xlu0 %v19564_v34, %s13860_s2 }
 0x4b7   :  { %7349 = vrot.lane.b32.xlu0 %v19568_v30, %s13861_s29 }
 0x4bf   :  { %7347 = vrot.lane.b32.xlu0 %v19568_v30, %s13860_s2 }
 0x4c7   :  { %7831 = vrot.lane.b32.xlu0 %v19564_v34, %s13862_s19 }
 0x509   :  { %v6560_v50 = vpop.permute.xlu0 %6559 }
 0x50a   :  { %v6564_v21 = vsel %vm6561_vm1, %v6560_v50, 0 }
 0x50b   :  { %v6581_v19 = vand.u32 4294901760, %v6564_v21 }
 0x50d   :  { %v6608_v16 = vsub.f32 %v6564_v21, %v6581_v19  ;;  %6582 = vmatpush.xpose.msra.mxu2 %v6581_v19  ;;  %6706 = vmatpush.xpose.msra.mxu1 %v6581_v19 }
 0x50f   :  { %v6609_v38 = vand.u32 4294901760, %v6608_v16 }
 0x510   :  { %6588 = vmatmul.f32.vlgmr.msra.gmra.mxu2 %v6587_v40  ;;  %6708 = vmatmul.f32.vlgmr.msra.gmra.mxu1 %v6583_v53 }
 0x511   :  { %6635 = vmatpush.xpose.msrb.mxu2 %v6608_v16  ;;  %v6610_v23 = vsub.f32 %v6608_v16, %v6609_v38  ;;  %6684 = vmatpush.xpose.msra.mxu0 %v6609_v38  ;;  %v6714_v57 = vpop.permute.xlu0 %6713 }
 0x512   :  { %v6717_v63 = vsel %vm6561_vm1, %v6714_v57, 0 }
 0x513   :  { %v6611_v37 = vand.u32 4294901760, %v6610_v23  ;;  %v6734_v45 = vand.u32 4294901760, %v6717_v63 }
 0x514   :  { %6686 = vmatmul.f32.vlgmr.msra.gmra.mxu0 %v6583_v53 }
 0x515   :  { %v6761_v8 = vsub.f32 %v6717_v63, %v6734_v45  ;;  %6612 = vmatpush.xpose.msra.mxu3 %v6611_v37  ;;  %6735 = vmatpush.xpose.msra.mxu2 %v6734_v45 }
 0x516   :  { %6811 = vmatpush.xpose.msrb.mxu1 %v6734_v45 }
 0x517   :  { %v6762_v12 = vand.u32 4294901760, %v6761_v8  ;;  %6788 = vmatpush.xpose.msrb.mxu0 %v6761_v8 }
 0x518   :  { %6614 = vmatmul.f32.vlgmr.msra.gmra.mxu3 %v6583_v53  ;;  %6638 = vmatmul.f32.vlgmr.msrb.gmra.mxu2 %v6584_v51 }
 0x519   :  { %6658 = vmatpush.xpose.msrb.mxu3 %v6581_v19  ;;  %v6763_v44 = vsub.f32 %v6761_v8, %v6762_v12  ;;  %6815 = vmatmul.f32.vlgmr.msrb.gmra.mxu1 %v6738_v17  ;;  %v6890_v61 = vpop.permute.xlu0 %6889 }
 0x51a   :  { %6837 = vmatpush.xpose.msrb.mxu2 %v6762_v12  ;;  %v6910_v15 = vand.u32 4294901760, %v6890_v61 }
 0x51b   :  { %v6764_v20 = vand.u32 4294901760, %v6763_v44 }
 0x51c   :  { %v6937_v56 = vsub.f32 %v6890_v61, %v6910_v15  ;;  %6791 = vmatmul.f32.vlgmr.msrb.gmra.mxu0 %v6737_v31 }
 0x51d   :  { %6911 = vmatpush.msra.mxu0 %v6910_v15  ;;  %6765 = vmatpush.xpose.msra.mxu3 %v6764_v20 }
 0x51e   :  { %v6938_v33 = vand.u32 4294901760, %v6937_v56 }
 0x520   :  { %v6939_v2 = vsub.f32 %v6937_v56, %v6938_v33  ;;  %6662 = vmatmul.f32.vlgmr.msrb.gmra.mxu3 %v6585_v32  ;;  %6741 = vmatmul.f32.vlgmr.msra.gmra.mxu2 %v6740_v49 }
 0x521   :  { %6859 = vmatpush.xpose.msrb.mxu3 %v6734_v45  ;;  %6964 = vmatpush.msra.mxu2 %v6937_v56  ;;  %v7194_v63 = vpop.permute.xlu0 %7193 }
 0x522   :  { %v6940_v4 = vand.u32 4294901760, %v6939_v2  ;;  %7013 = vmatpush.msrb.mxu0 %v6938_v33 }
 0x524   :  { %6941 = vmatpush.msra.mxu1 %v6940_v4 }
 0x526   :  { %7035 = vmatpush.msrb.mxu1 %v6910_v15 }
 0x528   :  { %6767 = vmatmul.f32.vlgmr.msra.gmra.mxu3 %v6736_v6  ;;  %6839 = vmatmul.f32.vlgmr.msrb.gmra.mxu2 %v6736_v6 }
 0x529   :  { %6987 = vmatpush.msra.mxu3 %v6910_v15  ;;  %v7350_v8 = vpop.permute.xlu0 %7349 }
 0x52a   :  { %v7353_v61 = vsel %vm6561_vm1, %v7350_v8, 0 }
 0x52b   :  { %v7370_v39 = vand.u32 4294901760, %v7353_v61 }
 0x52d   :  { %v7397_v4 = vsub.f32 %v7353_v61, %v7370_v39 }
 0x530   :  { %6861 = vmatmul.f32.vlgmr.msrb.gmra.mxu3 %v6736_v6 }
 0x58d   :  { %v6709_v29 = vpop.f32.mrf.mxu1 }
 0x591   :  { %v6687_v48 = vpop.f32.mrf.mxu0 }
 0x593   :  { %v6589_v5 = vpop.f32.mrf.mxu2 }
 0x596   :  { %v6816_v47 = vpop.f32.mrf.mxu1 }
 0x599   :  { %v6792_v10 = vpop.f32.mrf.mxu0 }
 0x59b   :  { %v6615_v26 = vpop.f32.mrf.mxu3  ;;  %v6639_v36 = vpop.f32.mrf.mxu2 }
 0x59c   :  { %v6616_v1 = vadd.f32 %v6615_v26, %v6589_v5 }
 0x59e   :  { %v6640_v13 = vadd.f32 %v6639_v36, %v6616_v1 }
 0x5a3   :  { %v6663_v59 = vpop.f32.mrf.mxu3  ;;  %v6742_v22 = vpop.f32.mrf.mxu2 }
 0x5a4   :  { %v6664_v7 = vadd.f32 %v6663_v59, %v6640_v13  ;;  %v7197_v13 = vsel %vm6561_vm1, %v7194_v63, 0  ;;  %v7398_v59 = vand.u32 4294901760, %v7397_v4 }
 0x5a6   :  { %v6688_v60 = vadd.f32 %v6687_v48, %v6664_v7 }
 0x5a8   :  { %v6710_v24 = vadd.f32 %v6709_v29, %v6688_v60  ;;  %v7218_v60 = vand.u32 4294901760, %v7197_v13 }
 0x5aa   :  { %v6865_v27 = vmul.f32 0.35355338, %v6710_v24 }
 0x5ab   :  { %v6768_v42 = vpop.f32.mrf.mxu3  ;;  %v6840_v18 = vpop.f32.mrf.mxu2 }
 0x5ac   :  { %v6769_v41 = vadd.f32 %v6768_v42, %v6742_v22  ;;  %v6867_v54 = vsel %vm6561_vm1, %v6865_v27, -inf }
 0x5ad   :  { %6868 = vmax.xlane.f32.xlu1 %v6867_v54  ;;  %v7219_v54 = vsub.f32 %v7197_v13, %v7218_v60 }
 0x5ae   :  { %v6793_v28 = vadd.f32 %v6792_v10, %v6769_v41 }
 0x5b0   :  { %v6817_v52 = vadd.f32 %v6816_v47, %v6793_v28  ;;  %v7348_v47 = vpop.permute.xlu0 %7347 }
 0x5b2   :  { %v6841_v55 = vadd.f32 %v6840_v18, %v6817_v52  ;;  %v7220_v52 = vand.u32 4294901760, %v7219_v54  ;;  %v7351_v18 = vsel %vm6561_vm1, %v7348_v47, 0 }
 0x5b3   :  { %v6862_v0 = vpop.f32.mrf.mxu3 }
 0x5b4   :  { %v6863_v62 = vadd.f32 %v6862_v0, %v6841_v55  ;;  %v7221_v55 = vsub.f32 %v7219_v54, %v7220_v52  ;;  %v7372_v0 = vand.u32 4294901760, %v7351_v18 }
 0x5b6   :  { %v6866_v3 = vmul.f32 0.35355338, %v6863_v62  ;;  %v7222_v62 = vand.u32 4294901760, %v7221_v55 }
 0x5b8   :  { %v6870_v9 = vsel %vm6561_vm1, %v6866_v3, -inf }
 0x5b9   :  { %6871 = vmax.xlane.f32.xlu1 %v6870_v9 }
 0x5d2   :  { %7041 = vrot.lane.b32.xlu1 %v19568_v30, %s13859_s28 }
 0x620   :  { %v6869_v46 = vpop.xlane.xlu1 %6868 }
 0x621   :  { %v6873_v25 = vsub.f32 %v6865_v27, %v6869_v46  ;;  %v7399_v27 = vsub.f32 %v7397_v4, %v7398_v59 }
 0x623   :  { %v6875_v43 = vmul.f32 1.442695, %v6873_v25  ;;  %v7400_v28 = vand.u32 4294901760, %v7399_v27 }
 0x625   :  { %13750 = vpow2.f32 %v6875_v43 }
 0x62b   :  { %v13751_v53 = vpop.eup %13750 }
 0x62c   :  { %v6872_v51 = vpop.xlane.xlu1 %6871  ;;  %v6879_v32 = vsel %vm6561_vm1, %v13751_v53, 0.0 }
 0x62d   :  { %v6874_v50 = vsub.f32 %v6866_v3, %v6872_v51  ;;  %6880 = vadd.xlane.f32.xlu2 %v6879_v32  ;;  %v7373_v3 = vsub.f32 %v7351_v18, %v7372_v0 }
 0x62f   :  { %v6877_v21 = vmul.f32 1.442695, %v6874_v50  ;;  %v7374_v9 = vand.u32 4294901760, %v7373_v3 }
 0x631   :  { %13752 = vpow2.f32 %v6877_v21  ;;  %v7375_v46 = vsub.f32 %v7373_v3, %v7374_v9 }
 0x633   :  { %v7376_v25 = vand.u32 4294901760, %v7375_v46 }
 0x637   :  { %v13753_v11 = vpop.eup %13752 }
 0x638   :  { %v6882_v19 = vsel %vm6561_vm1, %v13753_v11, 0.0 }
 0x639   :  { %6883 = vadd.xlane.f32.xlu2 %v6882_v19 }
 0x644   :  { %v7042_v14 = vpop.permute.xlu1 %7041 }
 0x645   :  { %v7062_v16 = vand.u32 4294901760, %v7042_v14 }
 0x647   :  { %v7089_v40 = vsub.f32 %v7042_v14, %v7062_v16  ;;  %7063 = vmatpush.msrb.mxu2 %v7062_v16 }
 0x649   :  { %v7090_v6 = vand.u32 4294901760, %v7089_v40 }
 0x64b   :  { %v7091_v38 = vsub.f32 %v7089_v40, %v7090_v6 }
 0x64d   :  { %v7092_v23 = vand.u32 4294901760, %v7091_v38 }
 0x64f   :  { %7093 = vmatpush.msrb.mxu3 %v7092_v23 }
 0x651   :  { %7195 = vrot.lane.b32.xlu2 %v19564_v34, %s13861_s29 }
 0x6a0   :  { %v6881_v57 = vpop.xlane.xlu2 %6880 }
 0x6a1   :  { %13754 = vrcp.f32 %v6881_v57 }
 0x6a7   :  { %v13755_v31 = vpop.eup %13754 }
 0x6a8   :  { %v6887_v37 = vmul.f32 %v13755_v31, %v13751_v53 }
 0x6aa   :  { %v6893_v45 = vsel %vm6561_vm1, %v6887_v37, 0 }
 0x6ab   :  { %v6912_v17 = vand.u32 4294901760, %v6893_v45 }
 0x6ac   :  { %v6884_v12 = vpop.xlane.xlu2 %6883 }
 0x6ad   :  { %v6913_v44 = vsub.f32 %v6893_v45, %v6912_v17  ;;  %13756 = vrcp.f32 %v6884_v12  ;;  %6943 = vmatmul.f32.vlgmr.msra.gmra.mxu1 %v6912_v17 }
 0x6ae   :  { %7139 = vmatpush.msra.mxu1 %v7062_v16 }
 0x6af   :  { %6967 = vmatmul.f32.vlgmr.msra.gmra.mxu2 %v6913_v44  ;;  %v6914_v15 = vand.u32 4294901760, %v6913_v44 }
 0x6b0   :  { %7165 = vmatpush.msra.mxu2 %v7090_v6 }
 0x6b1   :  { %6991 = vmatmul.f32.vlgmr.msra.gmra.mxu3 %v6914_v15  ;;  %v6915_v20 = vsub.f32 %v6913_v44, %v6914_v15 }
 0x6b2   :  { %7187 = vmatpush.msra.mxu3 %v7062_v16 }
 0x6b3   :  { %v13757_v56 = vpop.eup %13756  ;;  %v6916_v33 = vand.u32 4294901760, %v6915_v20 }
 0x6b4   :  { %v6888_v49 = vmul.f32 %v13757_v56, %v13753_v11  ;;  %v7196_v2 = vpop.permute.xlu2 %7195 }
 0x6b5   :  { %v7199_v5 = vsel %vm6561_vm1, %v7196_v2, 0  ;;  %6917 = vmatmul.f32.vlgmr.msra.gmra.mxu0 %v6916_v33  ;;  %7037 = vmatmul.f32.vlgmr.msrb.gmra.mxu1 %v6912_v17 }
 0x6b6   :  { %v7045_v26 = vsel %vm6561_vm1, %v6888_v49, 0  ;;  %v7216_v36 = vand.u32 4294901760, %v7199_v5  ;;  %7116 = vmatpush.msra.mxu0 %v7089_v40 }
 0x6b7   :  { %v7064_v1 = vand.u32 4294901760, %v7045_v26 }
 0x6b8   :  { %v7243_v48 = vsub.f32 %v7199_v5, %v7216_v36 }
 0x6b9   :  { %v7065_v7 = vsub.f32 %v7045_v26, %v7064_v1  ;;  %7095 = vmatmul.f32.vlgmr.msrb.gmra.mxu3 %v7064_v1 }
 0x6ba   :  { %v7244_v29 = vand.u32 4294901760, %v7243_v48  ;;  %7293 = vmatpush.xpose.msrb.mxu3 %v7216_v36 }
 0x6bb   :  { %v7066_v22 = vand.u32 4294901760, %v7065_v7 }
 0x6bc   :  { %v7245_v24 = vsub.f32 %v7243_v48, %v7244_v29 }
 0x6bd   :  { %7015 = vmatmul.f32.vlgmr.msrb.gmra.mxu0 %v6912_v17  ;;  %7143 = vmatmul.f32.vlgmr.msra.gmra.mxu1 %v7066_v22  ;;  %v7067_v42 = vsub.f32 %v7065_v7, %v7066_v22 }
 0x6be   :  { %v7246_v41 = vand.u32 4294901760, %v7245_v24  ;;  %7217 = vmatpush.xpose.msrb.mxu0 %v7216_v36 }
 0x6bf   :  { %v7068_v10 = vand.u32 4294901760, %v7067_v42 }
 0x6c0   :  { %7247 = vmatpush.xpose.msrb.mxu1 %v7246_v41 }
 0x6c1   :  { %7069 = vmatmul.f32.vlgmr.msrb.gmra.mxu2 %v7068_v10  ;;  %7189 = vmatmul.f32.vlgmr.msra.gmra.mxu3 %v7064_v1 }
 0x6c2   :  { %7270 = vmatpush.xpose.msrb.mxu2 %v7243_v48  ;;  %7401 = vmatpush.xpose.msra.mxu3 %v7400_v28 }
 0x6c4   :  { %7341 = vmatpush.xpose.msra.mxu1 %v7216_v36 }
 0x6c5   :  { %7119 = vmatmul.f32.vlgmr.msra.gmra.mxu0 %v7065_v7  ;;  %7249 = vmatmul.f32.vlgmr.msrb.gmra.mxu1 %v7218_v60 }
 0x6c6   :  { %7319 = vmatpush.xpose.msra.mxu0 %v7244_v29 }
 0x6c8   :  { %7447 = vmatpush.xpose.msrb.mxu1 %v7370_v39 }
 0x6c9   :  { %7167 = vmatmul.f32.vlgmr.msra.gmra.mxu2 %v7064_v1  ;;  %7297 = vmatmul.f32.vlgmr.msrb.gmra.mxu3 %v7220_v52 }
 0x6ca   :  { %7371 = vmatpush.xpose.msra.mxu2 %v7370_v39  ;;  %7495 = vmatpush.xpose.msrb.mxu3 %v7370_v39 }
 0x6cd   :  { %7223 = vmatmul.f32.vlgmr.msrb.gmra.mxu0 %v7222_v62  ;;  %7343 = vmatmul.f32.vlgmr.msra.gmra.mxu1 %v7218_v60 }
 0x6ce   :  { %7424 = vmatpush.xpose.msrb.mxu0 %v7397_v4 }
 0x6d1   :  { %7273 = vmatmul.f32.vlgmr.msrb.gmra.mxu2 %v7219_v54  ;;  %7403 = vmatmul.f32.vlgmr.msra.gmra.mxu3 %v7372_v0 }
 0x6d2   :  { %7473 = vmatpush.xpose.msrb.mxu2 %v7398_v59 }
 0x6d5   :  { %7321 = vmatmul.f32.vlgmr.msra.gmra.mxu0 %v7218_v60  ;;  %7451 = vmatmul.f32.vlgmr.msrb.gmra.mxu1 %v7374_v9 }
 0x6d9   :  { %7377 = vmatmul.f32.vlgmr.msra.gmra.mxu2 %v7376_v25  ;;  %7497 = vmatmul.f32.vlgmr.msrb.gmra.mxu3 %v7372_v0 }
 0x6dd   :  { %7427 = vmatmul.f32.vlgmr.msrb.gmra.mxu0 %v7373_v3 }
 0x6e1   :  { %7475 = vmatmul.f32.vlgmr.msrb.gmra.mxu2 %v7372_v0 }
 0x72a   :  { %v19602_v43 = vpop.f32.mrf.mxu1 }
 0x732   :  { %v19604_v53 = vpop.f32.mrf.mxu0  ;;  %v19608_v32 = vpop.f32.mrf.mxu1 }
 0x733   :  { %v19612_v21 = vpop.f32.mrf.mxu2 }
 0x734   :  { %v19606_v51 = vpop.f32.mrf.mxu3 }
 0x73a   :  { %v19610_v50 = vpop.f32.mrf.mxu0  ;;  %v19618_v14 = vpop.f32.mrf.mxu1 }
 0x73c   :  { %v19614_v11 = vpop.f32.mrf.mxu3 }
 0x742   :  { %v19616_v19 = vpop.f32.mrf.mxu0  ;;  %v7250_v23 = vpop.f32.mrf.mxu1 }
 0x744   :  { %v19620_v16 = vpop.f32.mrf.mxu2  ;;  %v19622_v40 = vpop.f32.mrf.mxu3 }
 0x74a   :  { %v7224_v6 = vpop.f32.mrf.mxu0  ;;  %v7344_v17 = vpop.f32.mrf.mxu1 }
 0x74b   :  { %v7251_v63 = vadd.f32 %v7250_v23, %v7224_v6  ;;  %v7832_v6 = vpop.permute.xlu0 %7831 }
 0x74c   :  { %v19624_v38 = vpop.f32.mrf.mxu2  ;;  %v7298_v57 = vpop.f32.mrf.mxu3 }
 0x752   :  { %v7322_v31 = vpop.f32.mrf.mxu0  ;;  %v7452_v2 = vpop.f32.mrf.mxu1 }
 0x754   :  { %v7274_v37 = vpop.f32.mrf.mxu2  ;;  %v7404_v61 = vpop.f32.mrf.mxu3 }
 0x755   :  { %v7275_v45 = vadd.f32 %v7274_v37, %v7251_v63 }
 0x757   :  { %v7299_v8 = vadd.f32 %v7298_v57, %v7275_v45  ;;  %v7835_v57 = vsel %vm6561_vm1, %v7832_v6, 0 }
 0x758   :  { %v7852_v63 = vand.u32 4294901760, %v7835_v57 }
 0x759   :  { %v7323_v12 = vadd.f32 %v7322_v31, %v7299_v8 }
 0x75a   :  { %v7428_v56 = vpop.f32.mrf.mxu0  ;;  %v7879_v37 = vsub.f32 %v7835_v57, %v7852_v63 }
 0x75b   :  { %v7345_v44 = vadd.f32 %v7344_v17, %v7323_v12 }
 0x75c   :  { %v7378_v15 = vpop.f32.mrf.mxu2  ;;  %v7498_v36 = vpop.f32.mrf.mxu3  ;;  %v7880_v12 = vand.u32 4294901760, %v7879_v37 }
 0x75d   :  { %v7405_v39 = vadd.f32 %v7404_v61, %v7378_v15  ;;  %v7501_v20 = vmul.f32 0.35355338, %v7345_v44 }
 0x75f   :  { %v7429_v33 = vadd.f32 %v7428_v56, %v7405_v39  ;;  %v7503_v49 = vsel %vm6561_vm1, %v7501_v20, -inf  ;;  %v7881_v39 = vsub.f32 %v7879_v37, %v7880_v12 }
 0x760   :  { %7504 = vmax.xlane.f32.xlu2 %v7503_v49 }
 0x761   :  { %v7453_v4 = vadd.f32 %v7452_v2, %v7429_v33  ;;  %v7882_v2 = vand.u32 4294901760, %v7881_v39 }
 0x764   :  { %v7476_v5 = vpop.f32.mrf.mxu2 }
 0x765   :  { %v7477_v26 = vadd.f32 %v7476_v5, %v7453_v4 }
 0x767   :  { %v7499_v1 = vadd.f32 %v7498_v36, %v7477_v26 }
 0x769   :  { %v7502_v13 = vmul.f32 0.35355338, %v7499_v1 }
 0x76b   :  { %v7506_v48 = vsel %vm6561_vm1, %v7502_v13, -inf }
 0x76c   :  { %7507 = vmax.xlane.f32.xlu1 %v7506_v48 }
 0x778   :  { %7677 = vrot.lane.b32.xlu2 %v19568_v30, %s13863_s30 }
 0x785   :  { %7525 = vrot.lane.b32.xlu1 %v19564_v34, %s13863_s30 }
 0x78d   :  { %7829 = vrot.lane.b32.xlu1 %v19564_v34, %s13864_s0 }
 0x7d3   :  { %v7505_v59 = vpop.xlane.xlu2 %7504 }
 0x7d4   :  { %v7509_v7 = vsub.f32 %v7501_v20, %v7505_v59 }
 0x7d6   :  { %v7511_v29 = vmul.f32 1.442695, %v7509_v7 }
 0x7d8   :  { %13758 = vpow2.f32 %v7511_v29 }
 0x7db   :  { %v7678_v41 = vpop.permute.xlu2 %7677 }
 0x7dc   :  { %v7698_v54 = vand.u32 4294901760, %v7678_v41 }
 0x7de   :  { %v13759_v60 = vpop.eup %13758  ;;  %v7725_v47 = vsub.f32 %v7678_v41, %v7698_v54 }
 0x7df   :  { %v7508_v22 = vpop.xlane.xlu1 %7507  ;;  %v7515_v24 = vsel %vm6561_vm1, %v13759_v60, 0.0 }
 0x7e0   :  { %v7510_v27 = vsub.f32 %v7502_v13, %v7508_v22  ;;  %7516 = vadd.xlane.f32.xlu0 %v7515_v24  ;;  %v7726_v52 = vand.u32 4294901760, %v7725_v47 }
 0x7e2   :  { %v7513_v42 = vmul.f32 1.442695, %v7510_v27  ;;  %v7727_v18 = vsub.f32 %v7725_v47, %v7726_v52 }
 0x7e4   :  { %13760 = vpow2.f32 %v7513_v42  ;;  %v7728_v62 = vand.u32 4294901760, %v7727_v18 }
 0x7ea   :  { %v13761_v10 = vpop.eup %13760 }
 0x7eb   :  { %v7518_v28 = vsel %vm6561_vm1, %v13761_v10, 0.0 }
 0x7ec   :  { %7519 = vadd.xlane.f32.xlu2 %v7518_v28 }
 0x7f4   :  { %7985 = vrot.lane.b32.xlu0 %v19568_v30, %s13862_s19 }
 0x7f7   :  { %v7526_v55 = vpop.permute.xlu1 %7525 }
 0x7f8   :  { %v7546_v0 = vand.u32 4294901760, %v7526_v55 }
 0x7fa   :  { %v7573_v3 = vsub.f32 %v7526_v55, %v7546_v0  ;;  %7547 = vmatpush.msra.mxu0 %v7546_v0  ;;  %7623 = vmatpush.msra.mxu3 %v7546_v0 }
 0x7fc   :  { %7729 = vmatpush.msrb.mxu3 %v7728_v62  ;;  %v7574_v9 = vand.u32 4294901760, %v7573_v3  ;;  %7600 = vmatpush.msra.mxu2 %v7573_v3 }
 0x7fe   :  { %7699 = vmatpush.msrb.mxu2 %v7698_v54  ;;  %v7575_v46 = vsub.f32 %v7573_v3, %v7574_v9  ;;  %7649 = vmatpush.msrb.mxu0 %v7574_v9 }
 0x7ff   :  { %v7830_v26 = vpop.permute.xlu1 %7829 }
 0x800   :  { %v7576_v25 = vand.u32 4294901760, %v7575_v46  ;;  %v7833_v59 = vsel %vm6561_vm1, %v7830_v26, 0 }
 0x802   :  { %7577 = vmatpush.msra.mxu1 %v7576_v25 }
 0x804   :  { %7671 = vmatpush.msrb.mxu1 %v7546_v0  ;;  %7983 = vrot.lane.b32.xlu2 %v19568_v30, %s13864_s0 }
 0x80c   :  { %8313 = vrot.lane.b32.xlu2 %v19568_v30, %s13865_s3 }
 0x853   :  { %v7517_v23 = vpop.xlane.xlu0 %7516 }
 0x854   :  { %13762 = vrcp.f32 %v7517_v23 }
 0x85a   :  { %v13763_v31 = vpop.eup %13762 }
 0x85b   :  { %v7523_v45 = vmul.f32 %v13763_v31, %v13759_v60  ;;  %v7854_v60 = vand.u32 4294901760, %v7833_v59 }
 0x85d   :  { %v7529_v8 = vsel %vm6561_vm1, %v7523_v45, 0  ;;  %v7855_v42 = vsub.f32 %v7833_v59, %v7854_v60 }
 0x85e   :  { %v7548_v17 = vand.u32 4294901760, %v7529_v8 }
 0x85f   :  { %v7520_v44 = vpop.xlane.xlu2 %7519  ;;  %v7856_v28 = vand.u32 4294901760, %v7855_v42 }
 0x860   :  { %v7549_v61 = vsub.f32 %v7529_v8, %v7548_v17  ;;  %13764 = vrcp.f32 %v7520_v44  ;;  %7579 = vmatmul.f32.vlgmr.msra.gmra.mxu1 %v7548_v17 }
 0x861   :  { %7775 = vmatpush.msra.mxu1 %v7698_v54 }
 0x862   :  { %7603 = vmatmul.f32.vlgmr.msra.gmra.mxu2 %v7549_v61  ;;  %v7550_v15 = vand.u32 4294901760, %v7549_v61 }
 0x863   :  { %7801 = vmatpush.msra.mxu2 %v7726_v52  ;;  %v7857_v52 = vsub.f32 %v7855_v42, %v7856_v28 }
 0x864   :  { %7627 = vmatmul.f32.vlgmr.msra.gmra.mxu3 %v7550_v15  ;;  %v7551_v20 = vsub.f32 %v7549_v61, %v7550_v15 }
 0x865   :  { %7823 = vmatpush.msra.mxu3 %v7698_v54  ;;  %v7858_v55 = vand.u32 4294901760, %v7857_v52 }
 0x866   :  { %v13765_v56 = vpop.eup %13764  ;;  %v7986_v33 = vpop.permute.xlu0 %7985  ;;  %v7552_v49 = vand.u32 4294901760, %v7551_v20 }
 0x867   :  { %v7524_v4 = vmul.f32 %v13765_v56, %v13761_v10  ;;  %v7989_v5 = vsel %vm6561_vm1, %v7986_v33, 0  ;;  %v7984_v10 = vpop.permute.xlu2 %7983 }
 0x868   :  { %v8006_v36 = vand.u32 4294901760, %v7989_v5  ;;  %7553 = vmatmul.f32.vlgmr.msra.gmra.mxu0 %v7552_v49  ;;  %7673 = vmatmul.f32.vlgmr.msrb.gmra.mxu1 %v7548_v17 }
 0x869   :  { %v7681_v1 = vsel %vm6561_vm1, %v7524_v4, 0  ;;  %7752 = vmatpush.msra.mxu0 %v7725_v47  ;;  %7883 = vmatpush.xpose.msrb.mxu1 %v7882_v2  ;;  %v7987_v47 = vsel %vm6561_vm1, %v7984_v10, 0 }
 0x86a   :  { %v7700_v13 = vand.u32 4294901760, %v7681_v1  ;;  %v8033_v48 = vsub.f32 %v7989_v5, %v8006_v36  ;;  %v8008_v18 = vand.u32 4294901760, %v7987_v47 }
 0x86c   :  { %v7701_v7 = vsub.f32 %v7681_v1, %v7700_v13  ;;  %v8034_v29 = vand.u32 4294901760, %v8033_v48  ;;  %7731 = vmatmul.f32.vlgmr.msrb.gmra.mxu3 %v7700_v13  ;;  %v8009_v0 = vsub.f32 %v7987_v47, %v8008_v18 }
 0x86d   :  { %7929 = vmatpush.xpose.msrb.mxu3 %v7852_v63 }
 0x86e   :  { %v7702_v22 = vand.u32 4294901760, %v7701_v7  ;;  %v8035_v24 = vsub.f32 %v8033_v48, %v8034_v29  ;;  %v8010_v62 = vand.u32 4294901760, %v8009_v0 }
 0x870   :  { %7651 = vmatmul.f32.vlgmr.msrb.gmra.mxu0 %v7548_v17  ;;  %7779 = vmatmul.f32.vlgmr.msra.gmra.mxu1 %v7702_v22  ;;  %v7703_v27 = vsub.f32 %v7701_v7, %v7702_v22  ;;  %v8036_v54 = vand.u32 4294901760, %v8035_v24  ;;  %v8011_v3 = vsub.f32 %v8009_v0, %v8010_v62 }
 0x871   :  { %7853 = vmatpush.xpose.msrb.mxu0 %v7852_v63  ;;  %7977 = vmatpush.xpose.msra.mxu1 %v7852_v63 }
 0x872   :  { %v7704_v41 = vand.u32 4294901760, %v7703_v27  ;;  %v8012_v9 = vand.u32 4294901760, %v8011_v3 }
 0x874   :  { %7705 = vmatmul.f32.vlgmr.msrb.gmra.mxu2 %v7704_v41  ;;  %7825 = vmatmul.f32.vlgmr.msra.gmra.mxu3 %v7700_v13 }
 0x875   :  { %7906 = vmatpush.xpose.msrb.mxu2 %v7879_v37  ;;  %8037 = vmatpush.xpose.msra.mxu3 %v8036_v54 }
 0x878   :  { %7755 = vmatmul.f32.vlgmr.msra.gmra.mxu0 %v7701_v7  ;;  %7885 = vmatmul.f32.vlgmr.msrb.gmra.mxu1 %v7854_v60 }
 0x879   :  { %7955 = vmatpush.xpose.msra.mxu0 %v7880_v12  ;;  %8083 = vmatpush.xpose.msrb.mxu1 %v8006_v36 }
 0x87c   :  { %7803 = vmatmul.f32.vlgmr.msra.gmra.mxu2 %v7700_v13  ;;  %7933 = vmatmul.f32.vlgmr.msrb.gmra.mxu3 %v7856_v28 }
 0x87d   :  { %8007 = vmatpush.xpose.msra.mxu2 %v8006_v36  ;;  %8131 = vmatpush.xpose.msrb.mxu3 %v8006_v36 }
 0x880   :  { %7859 = vmatmul.f32.vlgmr.msrb.gmra.mxu0 %v7858_v55  ;;  %7979 = vmatmul.f32.vlgmr.msra.gmra.mxu1 %v7854_v60 }
 0x881   :  { %8060 = vmatpush.xpose.msrb.mxu0 %v8033_v48 }
 0x884   :  { %7909 = vmatmul.f32.vlgmr.msrb.gmra.mxu2 %v7855_v42  ;;  %8039 = vmatmul.f32.vlgmr.msra.gmra.mxu3 %v8008_v18 }
 0x885   :  { %8109 = vmatpush.xpose.msrb.mxu2 %v8034_v29 }
 0x888   :  { %7957 = vmatmul.f32.vlgmr.msra.gmra.mxu0 %v7854_v60  ;;  %8087 = vmatmul.f32.vlgmr.msrb.gmra.mxu1 %v8010_v62  ;;  %v8314_v62 = vpop.permute.xlu2 %8313 }
 0x88c   :  { %8013 = vmatmul.f32.vlgmr.msra.gmra.mxu2 %v8012_v9  ;;  %8133 = vmatmul.f32.vlgmr.msrb.gmra.mxu3 %v8008_v18  ;;  %v8334_v9 = vand.u32 4294901760, %v8314_v62 }
 0x890   :  { %8063 = vmatmul.f32.vlgmr.msrb.gmra.mxu0 %v8009_v0 }
 0x894   :  { %8111 = vmatmul.f32.vlgmr.msrb.gmra.mxu2 %v8008_v18 }
 0x8dd   :  { %v19648_v46 = vpop.f32.mrf.mxu1 }
 0x8e5   :  { %v19650_v25 = vpop.f32.mrf.mxu0  ;;  %v19654_v23 = vpop.f32.mrf.mxu1 }
 0x8e6   :  { %v19658_v63 = vpop.f32.mrf.mxu2 }
 0x8e7   :  { %v19652_v6 = vpop.f32.mrf.mxu3 }
 0x8ed   :  { %v19656_v57 = vpop.f32.mrf.mxu0  ;;  %v19664_v45 = vpop.f32.mrf.mxu1 }
 0x8ef   :  { %v19660_v31 = vpop.f32.mrf.mxu3 }
 0x8f5   :  { %v19662_v37 = vpop.f32.mrf.mxu0  ;;  %v7886_v61 = vpop.f32.mrf.mxu1 }
 0x8f7   :  { %v19666_v8 = vpop.f32.mrf.mxu2  ;;  %v19668_v17 = vpop.f32.mrf.mxu3 }
 0x8fd   :  { %v7860_v12 = vpop.f32.mrf.mxu0  ;;  %v7980_v2 = vpop.f32.mrf.mxu1 }
 0x8fe   :  { %v7887_v39 = vadd.f32 %v7886_v61, %v7860_v12  ;;  %v8361_v12 = vsub.f32 %v8314_v62, %v8334_v9 }
 0x8ff   :  { %v19670_v44 = vpop.f32.mrf.mxu2  ;;  %v7934_v15 = vpop.f32.mrf.mxu3 }
 0x905   :  { %v7958_v20 = vpop.f32.mrf.mxu0  ;;  %v8088_v29 = vpop.f32.mrf.mxu1 }
 0x907   :  { %v7910_v56 = vpop.f32.mrf.mxu2  ;;  %v8040_v26 = vpop.f32.mrf.mxu3 }
 0x908   :  { %v7911_v33 = vadd.f32 %v7910_v56, %v7887_v39  ;;  %v8362_v39 = vand.u32 4294901760, %v8361_v12 }
 0x90a   :  { %v7935_v49 = vadd.f32 %v7934_v15, %v7911_v33 }
 0x90c   :  { %v7959_v4 = vadd.f32 %v7958_v20, %v7935_v49  ;;  %v8363_v20 = vsub.f32 %v8361_v12, %v8362_v39 }
 0x90d   :  { %v8064_v48 = vpop.f32.mrf.mxu0 }
 0x90e   :  { %v7981_v5 = vadd.f32 %v7980_v2, %v7959_v4  ;;  %v8364_v49 = vand.u32 4294901760, %v8363_v20 }
 0x90f   :  { %v8014_v36 = vpop.f32.mrf.mxu2  ;;  %v8134_v27 = vpop.f32.mrf.mxu3 }
 0x910   :  { %v8041_v1 = vadd.f32 %v8040_v26, %v8014_v36  ;;  %v8137_v13 = vmul.f32 0.35355338, %v7981_v5 }
 0x912   :  { %v8065_v59 = vadd.f32 %v8064_v48, %v8041_v1  ;;  %v8139_v7 = vsel %vm6561_vm1, %v8137_v13, -inf }
 0x913   :  { %8140 = vmax.xlane.f32.xlu1 %v8139_v7 }
 0x914   :  { %v8089_v60 = vadd.f32 %v8088_v29, %v8065_v59 }
 0x917   :  { %v8112_v22 = vpop.f32.mrf.mxu2 }
 0x918   :  { %v8113_v24 = vadd.f32 %v8112_v22, %v8089_v60 }
 0x91a   :  { %v8135_v42 = vadd.f32 %v8134_v27, %v8113_v24 }
 0x91c   :  { %v8138_v41 = vmul.f32 0.35355338, %v8135_v42 }
 0x91e   :  { %v8142_v54 = vsel %vm6561_vm1, %v8138_v41, -inf }
 0x91f   :  { %8143 = vmax.xlane.f32.xlu0 %v8142_v54 }
 0x933   :  { %8161 = vrot.lane.b32.xlu0 %v19564_v34, %s13865_s3 }
 0x93b   :  { %8465 = vrot.lane.b32.xlu0 %v19564_v34, %s13866_s17 }
 0x943   :  { %8619 = vrot.lane.b32.xlu0 %v19568_v30, %s13866_s17 }
 0x986   :  { %v8141_v10 = vpop.xlane.xlu1 %8140 }
 0x987   :  { %v8145_v28 = vsub.f32 %v8137_v13, %v8141_v10 }
 0x989   :  { %v8147_v47 = vmul.f32 1.442695, %v8145_v28 }
 0x98b   :  { %13766 = vpow2.f32 %v8147_v47 }
 0x991   :  { %v13767_v52 = vpop.eup %13766 }
 0x992   :  { %v8144_v18 = vpop.xlane.xlu0 %8143  ;;  %v8151_v55 = vsel %vm6561_vm1, %v13767_v52, 0.0 }
 0x993   :  { %v8146_v0 = vsub.f32 %v8138_v41, %v8144_v18  ;;  %8152 = vadd.xlane.f32.xlu2 %v8151_v55 }
 0x995   :  { %v8149_v3 = vmul.f32 1.442695, %v8146_v0 }
 0x997   :  { %13768 = vpow2.f32 %v8149_v3 }
 0x99d   :  { %v13769_v61 = vpop.eup %13768 }
 0x99e   :  { %v8154_v15 = vsel %vm6561_vm1, %v13769_v61, 0.0 }
 0x99f   :  { %8155 = vadd.xlane.f32.xlu1 %v8154_v15 }
 0x9a5   :  { %v8162_v56 = vpop.permute.xlu0 %8161 }
 0x9a6   :  { %v8182_v33 = vand.u32 4294901760, %v8162_v56 }
 0x9a8   :  { %v8209_v2 = vsub.f32 %v8162_v56, %v8182_v33  ;;  %8183 = vmatpush.msra.mxu0 %v8182_v33  ;;  %8259 = vmatpush.msra.mxu3 %v8182_v33 }
 0x9aa   :  { %8365 = vmatpush.msrb.mxu3 %v8364_v49  ;;  %v8210_v4 = vand.u32 4294901760, %v8209_v2  ;;  %8236 = vmatpush.msra.mxu2 %v8209_v2 }
 0x9ab   :  { %8621 = vrot.lane.b32.xlu2 %v19568_v30, %s13867_s18 }
 0x9ac   :  { %8335 = vmatpush.msrb.mxu2 %v8334_v9  ;;  %v8211_v5 = vsub.f32 %v8209_v2, %v8210_v4  ;;  %8285 = vmatpush.msrb.mxu0 %v8210_v4 }
 0x9ad   :  { %v8466_v10 = vpop.permute.xlu0 %8465 }
 0x9ae   :  { %v8212_v26 = vand.u32 4294901760, %v8211_v5  ;;  %v8469_v18 = vsel %vm6561_vm1, %v8466_v10, 0 }
 0x9af   :  { %v8490_v0 = vand.u32 4294901760, %v8469_v18 }
 0x9b0   :  { %8213 = vmatpush.msra.mxu1 %v8212_v26 }
 0x9b1   :  { %v8491_v15 = vsub.f32 %v8469_v18, %v8490_v0 }
 0x9b2   :  { %8307 = vmatpush.msrb.mxu1 %v8182_v33 }
 0x9b3   :  { %v8492_v56 = vand.u32 4294901760, %v8491_v15 }
 0x9b5   :  { %v8620_v20 = vpop.permute.xlu0 %8619  ;;  %v8493_v5 = vsub.f32 %v8491_v15, %v8492_v56 }
 0x9b6   :  { %v8623_v33 = vsel %vm6561_vm1, %v8620_v20, 0 }
 0x9b7   :  { %v8644_v26 = vand.u32 4294901760, %v8623_v33 }
 0x9b8   :  { %8467 = vrot.lane.b32.xlu1 %v19564_v34, %s13867_s18 }
 0xa06   :  { %v8153_v36 = vpop.xlane.xlu2 %8152 }
 0xa07   :  { %13770 = vrcp.f32 %v8153_v36 }
 0xa0d   :  { %v13771_v1 = vpop.eup %13770 }
 0xa0e   :  { %v8159_v13 = vmul.f32 %v13771_v1, %v13767_v52  ;;  %v8622_v22 = vpop.permute.xlu2 %8621 }
 0xa0f   :  { %v8625_v41 = vsel %vm6561_vm1, %v8622_v22, 0 }
 0xa10   :  { %v8165_v48 = vsel %vm6561_vm1, %v8159_v13, 0  ;;  %v8642_v47 = vand.u32 4294901760, %v8625_v41 }
 0xa11   :  { %v8184_v59 = vand.u32 4294901760, %v8165_v48 }
 0xa12   :  { %v8156_v7 = vpop.xlane.xlu1 %8155  ;;  %v8669_v62 = vsub.f32 %v8625_v41, %v8642_v47 }
 0xa13   :  { %v8185_v29 = vsub.f32 %v8165_v48, %v8184_v59  ;;  %13772 = vrcp.f32 %v8156_v7  ;;  %8215 = vmatmul.f32.vlgmr.msra.gmra.mxu1 %v8184_v59  ;;  %v8494_v48 = vand.u32 4294901760, %v8493_v5 }
 0xa14   :  { %8411 = vmatpush.msra.mxu1 %v8334_v9 }
 0xa15   :  { %8239 = vmatmul.f32.vlgmr.msra.gmra.mxu2 %v8185_v29  ;;  %v8186_v60 = vand.u32 4294901760, %v8185_v29 }
 0xa16   :  { %8437 = vmatpush.msra.mxu2 %v8362_v39 }
 0xa17   :  { %8263 = vmatmul.f32.vlgmr.msra.gmra.mxu3 %v8186_v60  ;;  %v8187_v24 = vsub.f32 %v8185_v29, %v8186_v60 }
 0xa18   :  { %8459 = vmatpush.msra.mxu3 %v8334_v9 }
 0xa19   :  { %v13773_v27 = vpop.eup %13772  ;;  %v8188_v42 = vand.u32 4294901760, %v8187_v24 }
 0xa1a   :  { %v8160_v54 = vmul.f32 %v13773_v27, %v13769_v61  ;;  %v8670_v61 = vand.u32 4294901760, %v8669_v62 }
 0xa1b   :  { %8189 = vmatmul.f32.vlgmr.msra.gmra.mxu0 %v8188_v42  ;;  %8309 = vmatmul.f32.vlgmr.msrb.gmra.mxu1 %v8184_v59 }
 0xa1c   :  { %v8317_v28 = vsel %vm6561_vm1, %v8160_v54, 0  ;;  %8388 = vmatpush.msra.mxu0 %v8361_v12  ;;  %v8671_v12 = vsub.f32 %v8669_v62, %v8670_v61 }
 0xa1d   :  { %v8336_v52 = vand.u32 4294901760, %v8317_v28 }
 0xa1e   :  { %v8672_v36 = vand.u32 4294901760, %v8671_v12 }
 0xa1f   :  { %v8337_v55 = vsub.f32 %v8317_v28, %v8336_v52  ;;  %8367 = vmatmul.f32.vlgmr.msrb.gmra.mxu3 %v8336_v52 }
 0xa21   :  { %v8338_v3 = vand.u32 4294901760, %v8337_v55 }
 0xa23   :  { %8287 = vmatmul.f32.vlgmr.msrb.gmra.mxu0 %v8184_v59  ;;  %8415 = vmatmul.f32.vlgmr.msra.gmra.mxu1 %v8338_v3  ;;  %v8339_v9 = vsub.f32 %v8337_v55, %v8338_v3  ;;  %v8645_v59 = vsub.f32 %v8623_v33, %v8644_v26 }
 0xa25   :  { %v8340_v39 = vand.u32 4294901760, %v8339_v9  ;;  %v8646_v60 = vand.u32 4294901760, %v8645_v59 }
 0xa27   :  { %8341 = vmatmul.f32.vlgmr.msrb.gmra.mxu2 %v8340_v39  ;;  %8461 = vmatmul.f32.vlgmr.msra.gmra.mxu3 %v8336_v52  ;;  %v8647_v22 = vsub.f32 %v8645_v59, %v8646_v60 }
 0xa29   :  { %v8648_v24 = vand.u32 4294901760, %v8647_v22 }
 0xa2a   :  { %v8468_v49 = vpop.permute.xlu1 %8467 }
 0xa2b   :  { %v8471_v2 = vsel %vm6561_vm1, %v8468_v49, 0  ;;  %8391 = vmatmul.f32.vlgmr.msra.gmra.mxu0 %v8337_v55 }
 0xa2c   :  { %v8488_v4 = vand.u32 4294901760, %v8471_v2 }
 0xa2e   :  { %v8515_v1 = vsub.f32 %v8471_v2, %v8488_v4  ;;  %8489 = vmatpush.xpose.msrb.mxu0 %v8488_v4  ;;  %8565 = vmatpush.xpose.msrb.mxu3 %v8488_v4 }
 0xa2f   :  { %8439 = vmatmul.f32.vlgmr.msra.gmra.mxu2 %v8336_v52 }
 0xa30   :  { %v8516_v13 = vand.u32 4294901760, %v8515_v1  ;;  %8542 = vmatpush.xpose.msrb.mxu2 %v8515_v1 }
 0xa31   :  { %8569 = vmatmul.f32.vlgmr.msrb.gmra.mxu3 %v8492_v56 }
 0xa32   :  { %8673 = vmatpush.xpose.msra.mxu3 %v8672_v36  ;;  %v8517_v7 = vsub.f32 %v8515_v1, %v8516_v13  ;;  %8591 = vmatpush.xpose.msra.mxu0 %v8516_v13 }
 0xa33   :  { %8495 = vmatmul.f32.vlgmr.msrb.gmra.mxu0 %v8494_v48 }
 0xa34   :  { %8643 = vmatpush.xpose.msra.mxu2 %v8642_v47  ;;  %v8518_v29 = vand.u32 4294901760, %v8517_v7 }
 0xa36   :  { %8767 = vmatpush.xpose.msrb.mxu3 %v8642_v47  ;;  %8696 = vmatpush.xpose.msrb.mxu0 %v8669_v62 }
 0xa37   :  { %8519 = vmatpush.xpose.msrb.mxu1 %v8518_v29  ;;  %8545 = vmatmul.f32.vlgmr.msrb.gmra.mxu2 %v8491_v15 }
 0xa38   :  { %8745 = vmatpush.xpose.msrb.mxu2 %v8670_v61 }
 0xa39   :  { %8675 = vmatmul.f32.vlgmr.msra.gmra.mxu3 %v8644_v26 }
 0xa3a   :  { %8521 = vmatmul.f32.vlgmr.msrb.gmra.mxu1 %v8490_v0 }
 0xa3b   :  { %8613 = vmatpush.xpose.msra.mxu1 %v8488_v4  ;;  %8593 = vmatmul.f32.vlgmr.msra.gmra.mxu0 %v8490_v0 }
 0xa3f   :  { %8719 = vmatpush.xpose.msrb.mxu1 %v8642_v47  ;;  %8649 = vmatmul.f32.vlgmr.msra.gmra.mxu2 %v8648_v24 }
 0xa41   :  { %8769 = vmatmul.f32.vlgmr.msrb.gmra.mxu3 %v8644_v26 }
 0xa42   :  { %8615 = vmatmul.f32.vlgmr.msra.gmra.mxu1 %v8490_v0 }
 0xa43   :  { %8699 = vmatmul.f32.vlgmr.msrb.gmra.mxu0 %v8645_v59 }
 0xa47   :  { %8747 = vmatmul.f32.vlgmr.msrb.gmra.mxu2 %v8644_v26 }
 0xa4a   :  { %8723 = vmatmul.f32.vlgmr.msrb.gmra.mxu1 %v8646_v60 }
 0xa90   :  { %v8216_v42 = vpop.f32.mrf.mxu1 }
 0xa98   :  { %v8190_v27 = vpop.f32.mrf.mxu0  ;;  %v8240_v10 = vpop.f32.mrf.mxu2 }
 0xa99   :  { %v19696_v28 = vpop.f32.mrf.mxu1 }
 0xa9a   :  { %v19692_v41 = vpop.f32.mrf.mxu3 }
 0xaa0   :  { %v19694_v54 = vpop.f32.mrf.mxu0 }
 0xaa1   :  { %v19704_v55 = vpop.f32.mrf.mxu1 }
 0xaa2   :  { %v19698_v52 = vpop.f32.mrf.mxu3 }
 0xaa8   :  { %v19700_v47 = vpop.f32.mrf.mxu0 }
 0xaaa   :  { %v19702_v18 = vpop.f32.mrf.mxu2  ;;  %v19706_v0 = vpop.f32.mrf.mxu3 }
 0xab0   :  { %v8496_v62 = vpop.f32.mrf.mxu0 }
 0xab2   :  { %v19708_v3 = vpop.f32.mrf.mxu2 }
 0xab4   :  { %v8570_v15 = vpop.f32.mrf.mxu3 }
 0xab7   :  { %v8522_v9 = vpop.f32.mrf.mxu1 }
 0xab8   :  { %v8523_v61 = vadd.f32 %v8522_v9, %v8496_v62  ;;  %v8594_v39 = vpop.f32.mrf.mxu0 }
 0xaba   :  { %v8546_v20 = vpop.f32.mrf.mxu2 }
 0xabb   :  { %v8547_v56 = vadd.f32 %v8546_v20, %v8523_v61 }
 0xabc   :  { %v8676_v4 = vpop.f32.mrf.mxu3 }
 0xabd   :  { %v8571_v12 = vadd.f32 %v8570_v15, %v8547_v56 }
 0xabf   :  { %v8616_v33 = vpop.f32.mrf.mxu1  ;;  %v8595_v49 = vadd.f32 %v8594_v39, %v8571_v12 }
 0xac0   :  { %v8700_v1 = vpop.f32.mrf.mxu0 }
 0xac1   :  { %v8617_v2 = vadd.f32 %v8616_v33, %v8595_v49 }
 0xac2   :  { %v8650_v5 = vpop.f32.mrf.mxu2 }
 0xac3   :  { %v8773_v26 = vmul.f32 0.35355338, %v8617_v2  ;;  %v8677_v36 = vadd.f32 %v8676_v4, %v8650_v5 }
 0xac4   :  { %v8770_v22 = vpop.f32.mrf.mxu3 }
 0xac5   :  { %v8775_v13 = vsel %vm6561_vm1, %v8773_v26, -inf  ;;  %v8701_v48 = vadd.f32 %v8700_v1, %v8677_v36  ;;  %v8217_v1 = vadd.f32 %v8216_v42, %v8190_v27  ;;  %v7581_v27 = vadd.f32 %v19648_v46, %v19650_v25 }
 0xac6   :  { %8776 = vmax.xlane.f32.xlu1 %v8775_v13 }
 0xac7   :  { %v8724_v59 = vpop.f32.mrf.mxu1 }
 0xac8   :  { %v8725_v7 = vadd.f32 %v8724_v59, %v8701_v48  ;;  %v8241_v48 = vadd.f32 %v8240_v10, %v8217_v1  ;;  %v7605_v10 = vadd.f32 %v19658_v63, %v7581_v27 }
 0xaca   :  { %v8748_v29 = vpop.f32.mrf.mxu2 }
 0xacb   :  { %v8749_v60 = vadd.f32 %v8748_v29, %v8725_v7  ;;  %v7733_v7 = vadd.f32 %v19660_v31, %v19666_v8  ;;  %v8265_v29 = vadd.f32 %v19692_v41, %v8241_v48  ;;  %v7629_v31 = vadd.f32 %v19652_v6, %v7605_v10 }
 0xacd   :  { %v8771_v24 = vadd.f32 %v8770_v22, %v8749_v60  ;;  %v8289_v42 = vadd.f32 %v19694_v54, %v8265_v29  ;;  %v7757_v60 = vadd.f32 %v19662_v37, %v7733_v7  ;;  %v7653_v25 = vadd.f32 %v19656_v57, %v7629_v31 }
 0xacf   :  { %v8774_v62 = vmul.f32 0.35355338, %v8771_v24  ;;  %v8311_v22 = vadd.f32 %v19696_v28, %v8289_v42  ;;  %v7781_v24 = vadd.f32 %v19664_v45, %v7757_v60  ;;  %v7675_v8 = vadd.f32 %v19654_v23, %v7653_v25 }
 0xad1   :  { %v8778_v9 = vsel %vm6561_vm1, %v8774_v62, -inf  ;;  %v7805_v46 = vadd.f32 %v19670_v44, %v7781_v24 }
 0xad2   :  { %8779 = vmax.xlane.f32.xlu2 %v8778_v9 }
 0xad3   :  { %v7827_v63 = vadd.f32 %v19668_v17, %v7805_v46 }
 0xaea   :  { %8797 = vrot.lane.b32.xlu2 %v19564_v34, %s13868_s20 }
 0xb39   :  { %v8777_v15 = vpop.xlane.xlu1 %8776 }
 0xb3a   :  { %v8781_v61 = vsub.f32 %v8773_v26, %v8777_v15 }
 0xb3c   :  { %v8783_v39 = vmul.f32 1.442695, %v8781_v61 }
 0xb3e   :  { %13774 = vpow2.f32 %v8783_v39 }
 0xb44   :  { %v13775_v20 = vpop.eup %13774 }
 0xb45   :  { %v8780_v56 = vpop.xlane.xlu2 %8779  ;;  %v8787_v12 = vsel %vm6561_vm1, %v13775_v20, 0.0 }
 0xb46   :  { %v8782_v33 = vsub.f32 %v8774_v62, %v8780_v56  ;;  %8788 = vadd.xlane.f32.xlu0 %v8787_v12 }
 0xb48   :  { %v8785_v49 = vmul.f32 1.442695, %v8782_v33 }
 0xb4a   :  { %13776 = vpow2.f32 %v8785_v49 }
 0xb4d   :  { %v8798_v2 = vpop.permute.xlu2 %8797 }
 0xb4e   :  { %v8818_v4 = vand.u32 4294901760, %v8798_v2 }
 0xb50   :  { %v13777_v5 = vpop.eup %13776  ;;  %v8845_v36 = vsub.f32 %v8798_v2, %v8818_v4  ;;  %8819 = vmatpush.msra.mxu0 %v8818_v4  ;;  %8895 = vmatpush.msra.mxu3 %v8818_v4 }
 0xb51   :  { %v8790_v34 = vsel %vm6561_vm1, %v13777_v5, 0.0 }
 0xb52   :  { %v8846_v26 = vand.u32 4294901760, %v8845_v36  ;;  %8791 = vadd.xlane.f32.xlu1 %v8790_v34  ;;  %8872 = vmatpush.msra.mxu2 %v8845_v36 }
 0xb54   :  { %v8847_v13 = vsub.f32 %v8845_v36, %v8846_v26  ;;  %8921 = vmatpush.msrb.mxu0 %v8846_v26  ;;  %v6311_v36 = vld [vmem:[%s20294_s6 + $0x10] sm:$0xff] }
 0xb56   :  { %v8848_v59 = vand.u32 4294901760, %v8847_v13  ;;  %v19753_v13 = vand.u32 4294901760, %v6311_v36 }
 0xb58   :  { %8849 = vmatpush.msra.mxu1 %v8848_v59  ;;  %v9198_v29 = vsub.f32 %v6311_v36, %v19753_v13 }
 0xb5a   :  { %8943 = vmatpush.msrb.mxu1 %v8818_v4  ;;  %8949 = vrot.lane.b32.xlu0 %v19568_v30, %s13868_s20  ;;  %v8369_v30 = vadd.f32 %v19698_v52, %v19702_v18  ;;  %v9199_v60 = vand.u32 4294901760, %v9198_v29 }
 0xb5c   :  { %v8393_v37 = vadd.f32 %v19700_v47, %v8369_v30  ;;  %v9200_v24 = vsub.f32 %v9198_v29, %v9199_v60 }
 0xb5e   :  { %v8417_v45 = vadd.f32 %v19704_v55, %v8393_v37  ;;  %v9201_v25 = vand.u32 4294901760, %v9200_v24 }
 0xb60   :  { %v8441_v6 = vadd.f32 %v19708_v3, %v8417_v45 }
 0xb62   :  { %9111 = vrot.lane.b32.xlu0 %v8311_v22, %s13869_s21  ;;  %v8463_v41 = vadd.f32 %v19706_v0, %v8441_v6 }
 0xb6a   :  { %9105 = vrot.lane.b32.xlu0 %v7827_v63, %s20486_s22 }
 0xb6b   :  { %9103 = vrot.lane.b32.xlu1 %v7675_v8, %s20486_s22  ;;  %s13668_s22 = sshll.u32 %s20304_s16, 4  ;;  %s13669_s22 = int_to_ptr.hbm [resolvable:$true] %s13668_s22 }
 0xb73   :  { %9113 = vrot.lane.b32.xlu1 %v8463_v41, %s13869_s21 }
 0xbb9   :  { %v8789_v57 = vpop.xlane.xlu0 %8788 }
 0xbba   :  { %13778 = vrcp.f32 %v8789_v57 }
 0xbc0   :  { %v13779_v44 = vpop.eup %13778 }
 0xbc1   :  { %v8795_v54 = vmul.f32 %v13779_v44, %v13775_v20 }
 0xbc3   :  { %v8801_v17 = vsel %vm6561_vm1, %v8795_v54, 0 }
 0xbc4   :  { %v8820_v23 = vand.u32 4294901760, %v8801_v17 }
 0xbc5   :  { %v8792_v28 = vpop.xlane.xlu1 %8791 }
 0xbc6   :  { %v8821_v52 = vsub.f32 %v8801_v17, %v8820_v23  ;;  %13780 = vrcp.f32 %v8792_v28  ;;  %8851 = vmatmul.f32.vlgmr.msra.gmra.mxu1 %v8820_v23 }
 0xbc8   :  { %8875 = vmatmul.f32.vlgmr.msra.gmra.mxu2 %v8821_v52  ;;  %v8822_v47 = vand.u32 4294901760, %v8821_v52 }
 0xbca   :  { %8899 = vmatmul.f32.vlgmr.msra.gmra.mxu3 %v8822_v47  ;;  %v8823_v18 = vsub.f32 %v8821_v52, %v8822_v47 }
 0xbcc   :  { %v13781_v55 = vpop.eup %13780  ;;  %v8950_v3 = vpop.permute.xlu0 %8949  ;;  %v8824_v0 = vand.u32 4294901760, %v8823_v18  ;;  %v6310_v18 = vld [vmem:[%s20294_s6 + $0x8] sm:$0xff] }
 0xbcd   :  { %v8796_v62 = vmul.f32 %v13781_v55, %v13777_v5  ;;  %v8970_v9 = vand.u32 4294901760, %v8950_v3  ;;  %v6312_v5 = vld [vmem:[%s20294_s6 + $0x18] sm:$0xff]  ;;  %v9158_v55 = vand.u32 4294901760, %v6310_v18 }
 0xbce   :  { %8825 = vmatmul.f32.vlgmr.msra.gmra.mxu0 %v8824_v0  ;;  %8945 = vmatmul.f32.vlgmr.msrb.gmra.mxu1 %v8820_v23  ;;  %v19751_v26 = vand.u32 4294901760, %v6312_v5 }
 0xbcf   :  { %v8953_v15 = vsel %vm6561_vm1, %v8796_v62, 0  ;;  %v8997_v61 = vsub.f32 %v8950_v3, %v8970_v9  ;;  %8971 = vmatpush.msrb.mxu2 %v8970_v9  ;;  %9047 = vmatpush.msra.mxu1 %v8970_v9  ;;  %v6309_v3 = vld [vmem:[%s20294_s6] sm:$0xff]  ;;  %v9204_v0 = vsub.f32 %v6310_v18, %v9158_v55 }
 0xbd0   :  { %v8972_v39 = vand.u32 4294901760, %v8953_v15  ;;  %v9192_v7 = vsub.f32 %v6312_v5, %v19751_v26  ;;  %v9160_v62 = vand.u32 4294901760, %v6309_v3 }
 0xbd1   :  { %v8998_v20 = vand.u32 4294901760, %v8997_v61  ;;  %9024 = vmatpush.msra.mxu0 %v8997_v61 }
 0xbd2   :  { %v8973_v56 = vsub.f32 %v8953_v15, %v8972_v39  ;;  %v9193_v42 = vand.u32 4294901760, %v9192_v7  ;;  %v9210_v15 = vsub.f32 %v6309_v3, %v9160_v62 }
 0xbd3   :  { %v8999_v12 = vsub.f32 %v8997_v61, %v8998_v20  ;;  %9073 = vmatpush.msra.mxu2 %v8998_v20 }
 0xbd4   :  { %v8974_v33 = vand.u32 4294901760, %v8973_v56  ;;  %v9194_v22 = vsub.f32 %v9192_v7, %v9193_v42 }
 0xbd5   :  { %v9000_v49 = vand.u32 4294901760, %v8999_v12 }
 0xbd6   :  { %8923 = vmatmul.f32.vlgmr.msrb.gmra.mxu0 %v8820_v23  ;;  %9051 = vmatmul.f32.vlgmr.msra.gmra.mxu1 %v8974_v33  ;;  %v8975_v2 = vsub.f32 %v8973_v56, %v8974_v33  ;;  %v9195_v46 = vand.u32 4294901760, %v9194_v22  ;;  %v6945_v33 = vadd.f32 %v19602_v43, %v19604_v53  ;;  %v7097_v43 = vadd.f32 %v19614_v11, %v19620_v16 }
 0xbd7   :  { %9001 = vmatpush.msrb.mxu3 %v9000_v49  ;;  %9155 = vmatpush.msrb.mxu0 %v19751_v26 }
 0xbd8   :  { %9003 = vmatmul.f32.vlgmr.msrb.gmra.mxu3 %v8972_v39  ;;  %v8976_v4 = vand.u32 4294901760, %v8975_v2  ;;  %9196 = vmatpush.msrb.mxu1 %v9195_v46  ;;  %v6969_v49 = vadd.f32 %v19612_v21, %v6945_v33 }
 0xbd9   :  { %9095 = vmatpush.msra.mxu3 %v8970_v9  ;;  %9157 = vmatpush.msrb.mxu0 %v19753_v13  ;;  %v9205_v9 = vand.u32 4294901760, %v9204_v0 }
 0xbda   :  { %8977 = vmatmul.f32.vlgmr.msrb.gmra.mxu2 %v8976_v4  ;;  %9202 = vmatpush.msrb.mxu1 %v9201_v25  ;;  %v6993_v2 = vadd.f32 %v19606_v51, %v6969_v49  ;;  %v13735_v25 = vld [vmem:[%s20295_s7] ss:$0 sm:$0xff]  ;;  %v13872_v49 = vmov 32.0  }
 0xbdb   :  { %9272 = vmatpush.msrb.mxu3 %v19751_v26  ;;  %9238 = vmatpush.msrb.mxu2 %v9192_v7  ;;  %v9206_v61 = vsub.f32 %v9204_v0, %v9205_v9  ;;  %13782 = vrcp.f32 %v13872_v49 }
 0xbdc   :  { %9159 = vmatpush.msrb.mxu0 %v9158_v55  ;;  %v7017_v4 = vadd.f32 %v19610_v50, %v6993_v2  ;;  %v7121_v50 = vadd.f32 %v19616_v19, %v7097_v43 }
 0xbdd   :  { %9274 = vmatpush.msrb.mxu3 %v19753_v13  ;;  %9241 = vmatpush.msrb.mxu2 %v9198_v29  ;;  %v9207_v20 = vand.u32 4294901760, %v9206_v61  ;;  %v9104_v5 = vpop.permute.xlu1 %9103 }
 0xbde   :  { %9027 = vmatmul.f32.vlgmr.msra.gmra.mxu0 %v8973_v56  ;;  %v7039_v36 = vadd.f32 %v19608_v32, %v7017_v4 }
 0xbdf   :  { %9276 = vmatpush.msrb.mxu3 %v9158_v55  ;;  %9244 = vmatpush.msrb.mxu2 %v9204_v0 }
 0xbe0   :  { %9097 = vmatmul.f32.vlgmr.msra.gmra.mxu3 %v8972_v39  ;;  %9161 = vmatpush.msrb.mxu0 %v9160_v62 }
 0xbe1   :  { %9278 = vmatpush.msrb.mxu3 %v9160_v62  ;;  %9247 = vmatpush.msrb.mxu2 %v9210_v15  ;;  %v13783_v2 = vpop.eup %13782 }
 0xbe2   :  { %9075 = vmatmul.f32.vlgmr.msra.gmra.mxu2 %v8972_v39  ;;  %v9211_v39 = vand.u32 4294901760, %v9210_v15  ;;  %9307 = vmatpush.msra.mxu0 %v9193_v42  ;;  %v9367_v4 = vmul.f32 32.0, %v13783_v2  ;;  %vm9371_vm4 = vweird.f32 %v13783_v2 }
 0xbe3   :  { %9208 = vmatpush.msrb.mxu1 %v9207_v20 }
 0xbe4   :  { %v9212_v56 = vsub.f32 %v9210_v15, %v9211_v39  ;;  %9311 = vmatpush.msra.mxu0 %v9199_v60 }
 0xbe5   :  { %v9114_v42 = vpop.permute.xlu1 %9113 }
 0xbe6   :  { %v9213_v12 = vand.u32 4294901760, %v9212_v56  ;;  %9315 = vmatpush.msra.mxu0 %v9205_v9 }
 0xbe8   :  { %9214 = vmatpush.msrb.mxu1 %v9213_v12  ;;  %9319 = vmatpush.msra.mxu0 %v9211_v39 }
 0xbea   :  { %9342 = vmatpush.msra.mxu1 %v19751_v26 }
 0xbec   :  { %9344 = vmatpush.msra.mxu1 %v19753_v13 }
 0xbee   :  { %9346 = vmatpush.msra.mxu1 %v9158_v55 }
 0xbf0   :  { %9348 = vmatpush.msra.mxu1 %v9160_v62 }
 0xc43   :  { %v8852_v34 = vpop.f32.mrf.mxu1 }
 0xc4b   :  { %v8826_v1 = vpop.f32.mrf.mxu0  ;;  %v8876_v59 = vpop.f32.mrf.mxu2 }
 0xc4c   :  { %v8853_v48 = vadd.f32 %v8852_v34, %v8826_v1  ;;  %v8946_v63 = vpop.f32.mrf.mxu1  ;;  %v9125_v34 = vsel %vm6561_vm1, %v7039_v36, %v9104_v5  ;;  %v9112_v1 = vpop.permute.xlu0 %9111  ;;  %v9368_v5 = vsub.f32 1.0, %v9367_v4 }
 0xc4d   :  { %v8900_v10 = vpop.f32.mrf.mxu3  ;;  %v9128_v26 = vsel %vm9127_vm2, %v9125_v34, %v9112_v1 }
 0xc4e   :  { %v8877_v27 = vadd.f32 %v8876_v59, %v8853_v48  ;;  %v7145_v59 = vadd.f32 %v19618_v14, %v7121_v50 }
 0xc50   :  { %v8901_v31 = vadd.f32 %v8900_v10, %v8877_v27  ;;  %v7169_v29 = vadd.f32 %v19624_v38, %v7145_v59 }
 0xc52   :  { %v7191_v16 = vadd.f32 %v19622_v40, %v7169_v29 }
 0xc53   :  { %v8924_v30 = vpop.f32.mrf.mxu0 }
 0xc54   :  { %v8925_v37 = vadd.f32 %v8924_v30, %v8901_v31  ;;  %v9052_v54 = vpop.f32.mrf.mxu1  ;;  %v9106_v11 = vpop.permute.xlu0 %9105 }
 0xc55   :  { %v9126_v60 = vsel %vm6561_vm1, %v7191_v16, %v9106_v11  ;;  %v6315_v11 = vld [vmem:[%s20298_s10 + $0x8] sm:$0xff] }
 0xc56   :  { %v8947_v8 = vadd.f32 %v8946_v63, %v8925_v37  ;;  %v9129_v19 = vsel %vm9127_vm2, %v9126_v60, %v9114_v42  ;;  %v9446_v60 = vand.u32 4294901760, %v6315_v11 }
 0xc58   :  { %9119 = vrot.lane.b32.xlu2 %v8947_v8, %s20484_s26 }
 0xc5b   :  { %v9004_v45 = vpop.f32.mrf.mxu3  ;;  %v9028_v57 = vpop.f32.mrf.mxu0 }
 0xc5d   :  { %v8978_v6 = vpop.f32.mrf.mxu2 }
 0xc5e   :  { %v9005_v41 = vadd.f32 %v9004_v45, %v8978_v6 }
 0xc60   :  { %v9029_v44 = vadd.f32 %v9028_v57, %v9005_v41 }
 0xc62   :  { %v9053_v17 = vadd.f32 %v9052_v54, %v9029_v44 }
 0xc63   :  { %v9098_v52 = vpop.f32.mrf.mxu3 }
 0xc65   :  { %v9076_v23 = vpop.f32.mrf.mxu2 }
 0xc66   :  { %v9077_v28 = vadd.f32 %v9076_v23, %v9053_v17 }
 0xc68   :  { %v9099_v47 = vadd.f32 %v9098_v52, %v9077_v28 }
 0xc6a   :  { %9121 = vrot.lane.b32.xlu2 %v9099_v47, %s20484_s26 }
 0xcb2   :  { %v9120_v13 = vpop.permute.xlu2 %9119 }
 0xcb3   :  { %v9131_v53 = vsel %vm9130_vm3, %v9128_v26, %v9120_v13 }
 0xcb4   :  { %v9137_v51 = vsel %vm6335_vm0, %v9131_v53, 0 }
 0xcb5   :  { %v9162_v21 = vand.u32 4294901760, %v9137_v51 }
 0xcb7   :  { %v9163_v48 = vsub.f32 %v9137_v51, %v9162_v21  ;;  %9216 = vmatmul.f32.vlgmr.msrb.gmra.mxu1 %v9162_v21 }
 0xcb9   :  { %v9164_v32 = vand.u32 4294901760, %v9163_v48  ;;  %9250 = vmatmul.f32.vlgmr.msrb.gmra.mxu2 %v9163_v48 }
 0xcbb   :  { %v9165_v7 = vsub.f32 %v9163_v48, %v9164_v32  ;;  %9282 = vmatmul.f32.vlgmr.msrb.gmra.mxu3 %v9164_v32  ;;  %v6317_v32 = vld [vmem:[%s20298_s10 + $0x18] sm:$0xff] }
 0xcbc   :  { %v9442_v59 = vand.u32 4294901760, %v6317_v32 }
 0xcbd   :  { %v9166_v27 = vand.u32 4294901760, %v9165_v7  ;;  %v6316_v7 = vld [vmem:[%s20298_s10 + $0x10] sm:$0xff] }
 0xcbe   :  { %v9480_v29 = vsub.f32 %v6317_v32, %v9442_v59  ;;  %9560 = vmatpush.msrb.mxu1 %v9442_v59  ;;  %9443 = vmatpush.msra.mxu2 %v9442_v59 }
 0xcbf   :  { %9167 = vmatmul.f32.vlgmr.msrb.gmra.mxu0 %v9166_v27  ;;  %v9444_v27 = vand.u32 4294901760, %v6316_v7 }
 0xcc0   :  { %v9481_v16 = vand.u32 4294901760, %v9480_v29  ;;  %9526 = vmatpush.msrb.mxu0 %v9480_v29 }
 0xcc1   :  { %v9486_v42 = vsub.f32 %v6316_v7, %v9444_v27  ;;  %9562 = vmatpush.msrb.mxu1 %v9444_v27  ;;  %9445 = vmatpush.msra.mxu2 %v9444_v27 }
 0xcc3   :  { %9529 = vmatpush.msrb.mxu0 %v9486_v42  ;;  %9564 = vmatpush.msrb.mxu1 %v9446_v60 }
 0xcc4   :  { %v9122_v10 = vpop.permute.xlu2 %9121  ;;  %9447 = vmatpush.msra.mxu2 %v9446_v60 }
 0xcc5   :  { %v9132_v22 = vsel %vm9130_vm3, %v9129_v19, %v9122_v10  ;;  %v6314_v19 = vld [vmem:[%s20298_s10] sm:$0xff]  ;;  %v9482_v10 = vsub.f32 %v9480_v29, %v9481_v16  ;;  %v6325_v29 = vld [vmem:[%s20300_s12 + $0x30] sm:$0xff] }
 0xcc6   :  { %v9140_v24 = vsel %vm6335_vm0, %v9132_v22, 0  ;;  %v9487_v22 = vand.u32 4294901760, %v9486_v42 }
 0xcc7   :  { %v9170_v14 = vand.u32 4294901760, %v9140_v24 }
 0xcc9   :  { %v9171_v31 = vsub.f32 %v9140_v24, %v9170_v14  ;;  %9220 = vmatmul.f32.gmra.mxu1 %v9170_v14  ;;  %v9492_v24 = vsub.f32 %v6315_v11, %v9446_v60  ;;  %v19853_v11 = vand.u32 4294901760, %v6325_v29 }
 0xccb   :  { %9255 = vmatmul.f32.gmra.mxu2 %v9171_v31  ;;  %v9172_v38 = vand.u32 4294901760, %v9171_v31  ;;  %9532 = vmatpush.msrb.mxu0 %v9492_v24 }
 0xccd   :  { %9288 = vmatmul.f32.gmra.mxu3 %v9172_v38  ;;  %v9173_v30 = vsub.f32 %v9171_v31, %v9172_v38  ;;  %v9483_v31 = vand.u32 4294901760, %v9482_v10  ;;  %v9488_v38 = vsub.f32 %v9486_v42, %v9487_v22  ;;  %v6323_v10 = vld [vmem:[%s20300_s12 + $0x20] sm:$0xff] }
 0xccf   :  { %v9174_v46 = vand.u32 4294901760, %v9173_v30  ;;  %v9493_v30 = vand.u32 4294901760, %v9492_v24  ;;  %9484 = vmatpush.msra.mxu3 %v9483_v31  ;;  %v19880_v31 = vand.u32 4294901760, %v6323_v10 }
 0xcd1   :  { %9175 = vmatmul.f32.gmra.mxu0 %v9174_v46  ;;  %9350 = vmatmul.f32.vlgmr.msra.gmra.mxu1 %v9162_v21 }
 0xcd9   :  { %9321 = vmatmul.f32.vlgmr.msra.gmra.mxu0 %v9162_v21  ;;  %9354 = vmatmul.f32.gmra.mxu1 %v9170_v14 }
 0xce1   :  { %9325 = vmatmul.f32.gmra.mxu0 %v9170_v14  ;;  %v9448_v14 = vand.u32 4294901760, %v6314_v19 }
 0xce3   :  { %v9498_v46 = vsub.f32 %v6314_v19, %v9448_v14  ;;  %9566 = vmatpush.msrb.mxu1 %v9448_v14  ;;  %9449 = vmatpush.msra.mxu2 %v9448_v14 }
 0xce5   :  { %9535 = vmatpush.msrb.mxu0 %v9498_v46  ;;  %9595 = vmatpush.msrb.mxu2 %v9481_v16  ;;  %v6324_v16 = vld [vmem:[%s20300_s12 + $0x28] sm:$0xff] }
 0xce6   :  { %v19865_v19 = vand.u32 4294901760, %v6324_v16 }
 0xce7   :  { %9599 = vmatpush.msrb.mxu2 %v9487_v22 }
 0xce9   :  { %9603 = vmatpush.msrb.mxu2 %v9493_v30 }
 0xd34   :  { %v9217_v40 = vpop.f32.mrf.mxu1 }
 0xd3c   :  { %v9168_v37 = vpop.f32.mrf.mxu0  ;;  %v9251_v41 = vpop.f32.mrf.mxu2 }
 0xd3d   :  { %v9169_v63 = vadd.f32 %v13735_v25, %v9168_v37  ;;  %v9499_v37 = vand.u32 4294901760, %v9498_v46 }
 0xd3e   :  { %v9283_v54 = vpop.f32.mrf.mxu3 }
 0xd3f   :  { %v9218_v45 = vadd.f32 %v9217_v40, %v9169_v63  ;;  %v9489_v40 = vand.u32 4294901760, %v9488_v38  ;;  %9607 = vmatpush.msrb.mxu2 %v9499_v37  ;;  %v6322_v38 = vld [vmem:[%s20300_s12 + $0x18] sm:$0xff] }
 0xd41   :  { %v9252_v57 = vadd.f32 %v9251_v41, %v9218_v45  ;;  %9490 = vmatpush.msra.mxu3 %v9489_v40 }
 0xd43   :  { %v9284_v17 = vadd.f32 %v9283_v54, %v9252_v57 }
 0xd46   :  { %v9221_v8 = vpop.f32.mrf.mxu1 }
 0xd4e   :  { %v9176_v6 = vpop.f32.mrf.mxu0  ;;  %v9351_v28 = vpop.f32.mrf.mxu1 }
 0xd4f   :  { %v9177_v44 = vadd.f32 %v13735_v25, %v9176_v6  ;;  %v9256_v18 = vpop.f32.mrf.mxu2  ;;  %v9494_v25 = vsub.f32 %v9492_v24, %v9493_v30 }
 0xd50   :  { %v9289_v62 = vpop.f32.mrf.mxu3 }
 0xd51   :  { %v9222_v23 = vadd.f32 %v9221_v8, %v9177_v44  ;;  %v9495_v63 = vand.u32 4294901760, %v9494_v25  ;;  %v9500_v8 = vsub.f32 %v9498_v46, %v9499_v37  ;;  %v9726_v25 = vsub.f32 %v6323_v10, %v19880_v31 }
 0xd52   :  { %v19892_v37 = vand.u32 4294901760, %v6322_v38 }
 0xd53   :  { %v9257_v55 = vadd.f32 %v9256_v18, %v9222_v23  ;;  %9496 = vmatpush.msra.mxu3 %v9495_v63  ;;  %v9501_v45 = vand.u32 4294901760, %v9500_v8  ;;  %v6321_v63 = vld [vmem:[%s20300_s12 + $0x10] sm:$0xff] }
 0xd55   :  { %v9290_v9 = vadd.f32 %v9289_v62, %v9257_v55  ;;  %9502 = vmatpush.msra.mxu3 %v9501_v45  ;;  %v13736_v62 = vld [vmem:[%s20296_s8] ss:$0 sm:$0xff] }
 0xd56   :  { %v9322_v52 = vpop.f32.mrf.mxu0  ;;  %v9355_v20 = vpop.f32.mrf.mxu1 }
 0xd57   :  { %v9323_v47 = vadd.f32 %v9322_v52, %v9284_v17  ;;  %9630 = vmatpush.msrb.mxu3 %v9442_v59  ;;  %v6326_v59 = vld [vmem:[%s20300_s12 + $0x38] sm:$0xff] }
 0xd58   :  { %v19845_v7 = vand.u32 4294901760, %v6326_v59 }
 0xd59   :  { %v9352_v3 = vadd.f32 %v9351_v28, %v9323_v47  ;;  %9632 = vmatpush.msrb.mxu3 %v9444_v27 }
 0xd5a   :  { %v19851_v27 = vsub.f32 %v6326_v59, %v19845_v7  ;;  %9667 = vmatpush.msra.mxu0 %v19845_v7 }
 0xd5b   :  { %v9358_v0 = vadd.f32 %v9352_v3, %v19550_v58  ;;  %v9369_v58 = vmul.f32 %v13783_v2, %v9368_v5  ;;  %9634 = vmatpush.msrb.mxu3 %v9446_v60  ;;  %v19862_v60 = vsub.f32 %v6325_v29, %v19853_v11 }
 0xd5c   :  { %v9709_v42 = vand.u32 4294901760, %v19851_v27  ;;  %9669 = vmatpush.msra.mxu0 %v19853_v11 }
 0xd5d   :  { %v9360_v15 = vsel %vm6335_vm0, %v9358_v0, 0.0  ;;  %v9370_v36 = vadd.f32 %v13783_v2, %v9369_v58  ;;  %9636 = vmatpush.msrb.mxu3 %v9448_v14  ;;  %v9715_v24 = vand.u32 4294901760, %v19862_v60  ;;  %v19877_v14 = vsub.f32 %v6324_v16, %v19865_v19 }
 0xd5e   :  { %v9326_v61 = vpop.f32.mrf.mxu0  ;;  %9361 = vadd.xlane.f32.xlu0 %v9360_v15  ;;  %v9710_v22 = vsub.f32 %v19851_v27, %v9709_v42  ;;  %9671 = vmatpush.msra.mxu0 %v19865_v19 }
 0xd5f   :  { %v9327_v39 = vadd.f32 %v9326_v61, %v9290_v9  ;;  %v19798_v34 = vsel %vm9371_vm4, %v13783_v2, %v9370_v36  ;;  %v13737_v61 = vld [vmem:[%s20297_s9] ss:$0 sm:$0xff]  ;;  %v9716_v46 = vsub.f32 %v19862_v60, %v9715_v24  ;;  %v9721_v40 = vand.u32 4294901760, %v19877_v14 }
 0xd60   :  { %v9711_v30 = vand.u32 4294901760, %v9710_v22  ;;  %9673 = vmatpush.msra.mxu0 %v19880_v31 }
 0xd61   :  { %v9356_v56 = vadd.f32 %v9355_v20, %v9327_v39  ;;  %v9717_v8 = vand.u32 4294901760, %v9716_v46  ;;  %v9722_v45 = vsub.f32 %v19877_v14, %v9721_v40 }
 0xd62   :  { %9712 = vmatpush.msra.mxu1 %v9711_v30  ;;  %9675 = vmatpush.msra.mxu0 %v19892_v37 }
 0xd63   :  { %v9359_v12 = vadd.f32 %v9356_v56, %v19557_v35 }
 0xd64   :  { %9718 = vmatpush.msra.mxu1 %v9717_v8 }
 0xd65   :  { %v9363_v33 = vsel %vm6335_vm0, %v9359_v12, 0.0 }
 0xd66   :  { %9364 = vadd.xlane.f32.xlu1 %v9363_v33 }
 0xdd1   :  { %v9362_v1 = vpop.xlane.xlu0 %9361 }
 0xdd2   :  { %v9373_v26 = vmul.f32 %v19798_v34, %v9362_v1 }
 0xdd4   :  { %v19801_v13 = vsub.f32 %v9358_v0, %v9373_v26 }
 0xdd6   :  { %v9377_v35 = vmul.f32 %v19801_v13, %v19801_v13 }
 0xdd8   :  { %v9379_v43 = vsel %vm6335_vm0, %v9377_v35, 0.0 }
 0xdd9   :  { %9380 = vadd.xlane.f32.xlu2 %v9379_v43  ;;  %v9365_v53 = vpop.xlane.xlu1 %9364 }
 0xdda   :  { %v9374_v51 = vmul.f32 %v19798_v34, %v9365_v53 }
 0xddc   :  { %v19807_v21 = vsub.f32 %v9359_v12, %v9374_v51 }
 0xdde   :  { %v9378_v50 = vmul.f32 %v19807_v21, %v19807_v21 }
 0xde0   :  { %v9382_v48 = vsel %vm6335_vm0, %v9378_v50, 0.0 }
 0xde1   :  { %9383 = vadd.xlane.f32.xlu0 %v9382_v48 }
 0xe4c   :  { %v9381_v6 = vpop.xlane.xlu2 %9380 }
 0xe4d   :  { %v9385_v41 = vmul.f32 %v9381_v6, %v19798_v34  ;;  %v9727_v6 = vand.u32 4294901760, %v9726_v25 }
 0xe4f   :  { %v9387_v57 = vadd.f32 1e-05, %v9385_v41  ;;  %v9676_v41 = vand.u32 4294901760, %v6321_v63 }
 0xe51   :  { %13784 = vrsqrt.f32 %v9387_v57  ;;  %vm9395_vm6 = vweird.f32 %v9387_v57  ;;  %9677 = vmatpush.msra.mxu0 %v9676_v41 }
 0xe54   :  { %v9384_v44 = vpop.xlane.xlu0 %9383 }
 0xe55   :  { %v9386_v54 = vmul.f32 %v9384_v44, %v19798_v34  ;;  %v6320_v44 = vld [vmem:[%s20300_s12 + $0x8] sm:$0xff] }
 0xe57   :  { %v13785_v17 = vpop.eup %13784  ;;  %v9388_v23 = vadd.f32 1e-05, %v9386_v54  ;;  %v9723_v54 = vand.u32 4294901760, %v9722_v45 }
 0xe58   :  { %v9390_v28 = vmul.f32 %v13785_v17, %v9387_v57  ;;  %vm9396_vm5 = vweird.f32 %v13785_v17  ;;  %v9732_v57 = vsub.f32 %v6322_v38, %v19892_v37 }
 0xe59   :  { %13786 = vrsqrt.f32 %v9388_v23  ;;  %vm9397_vm7 = vmor %vm9395_vm6, %vm9396_vm5  ;;  %vm9405_vm9 = vweird.f32 %v9388_v23  ;;  %9724 = vmatpush.msra.mxu1 %v9723_v54  ;;  %v13739_v54 = vld [vmem:[%s20301_s13] ss:$0 sm:$0xff] }
 0xe5a   :  { %v9391_v52 = vmul.f32 %v13785_v17, %v9390_v28  ;;  %v9678_v28 = vand.u32 4294901760, %v6320_v44 }
 0xe5c   :  { %v9392_v47 = vmul.f32 0.5, %v9391_v52  ;;  %v9733_v52 = vand.u32 4294901760, %v9732_v57  ;;  %9679 = vmatpush.msra.mxu0 %v9678_v28 }
 0xe5e   :  { %v9393_v18 = vsub.f32 1.5, %v9392_v47  ;;  %v6319_v47 = vld [vmem:[%s20300_s12] sm:$0xff] }
 0xe5f   :  { %v13787_v55 = vpop.eup %13786 }
 0xe60   :  { %v9394_v3 = vmul.f32 %v13785_v17, %v9393_v18  ;;  %v9400_v0 = vmul.f32 %v13787_v55, %v9388_v23  ;;  %vm9406_vm8 = vweird.f32 %v13787_v55  ;;  %v9738_v23 = vsub.f32 %v6321_v63, %v9676_v41 }
 0xe61   :  { %vm9407_vm10 = vmor %vm9405_vm9, %vm9406_vm8 }
 0xe62   :  { %v9398_v9 = vsel %vm9397_vm7, %v13785_v17, %v9394_v3  ;;  %v9401_v15 = vmul.f32 %v13787_v55, %v9400_v0  ;;  %v9728_v17 = vsub.f32 %v9726_v25, %v9727_v6  ;;  %v9744_v3 = vsub.f32 %v6320_v44, %v9678_v28 }
 0xe63   :  { %v9409_v39 = vmul.f32 %v9398_v9, %v19801_v13  ;;  %v9680_v0 = vand.u32 4294901760, %v6319_v47 }
 0xe64   :  { %v9402_v20 = vmul.f32 0.5, %v9401_v15  ;;  %v9729_v18 = vand.u32 4294901760, %v9728_v17  ;;  %v9745_v15 = vand.u32 4294901760, %v9744_v3 }
 0xe65   :  { %v9414_v56 = vmul.f32 %v13736_v62, %v9409_v39  ;;  %9681 = vmatpush.msra.mxu0 %v9680_v0 }
 0xe66   :  { %v9403_v12 = vsub.f32 1.5, %v9402_v20  ;;  %9730 = vmatpush.msra.mxu1 %v9729_v18 }
 0xe67   :  { %v19833_v33 = vadd.f32 %v13737_v61, %v9414_v56  ;;  %v9746_v56 = vsub.f32 %v9744_v3, %v9745_v15 }
 0xe68   :  { %v9404_v49 = vmul.f32 %v13787_v55, %v9403_v12 }
 0xe69   :  { %v9425_v2 = vsel %vm6335_vm0, %v19833_v33, 0 }
 0xe6a   :  { %v9408_v4 = vsel %vm9407_vm10, %v13787_v55, %v9404_v49  ;;  %v9450_v5 = vand.u32 4294901760, %v9425_v2  ;;  %v9739_v55 = vand.u32 4294901760, %v9738_v23  ;;  %v9747_v49 = vand.u32 4294901760, %v9746_v56 }
 0xe6b   :  { %v9410_v58 = vmul.f32 %v9408_v4, %v19807_v21 }
 0xe6c   :  { %9504 = vmatmul.f32.vlgmr.msra.gmra.mxu3 %v9450_v5  ;;  %v9451_v36 = vsub.f32 %v9425_v2, %v9450_v5  ;;  %v9740_v9 = vsub.f32 %v9738_v23, %v9739_v55 }
 0xe6d   :  { %v9415_v1 = vmul.f32 %v13736_v62, %v9410_v58  ;;  %9816 = vmatpush.msra.mxu3 %v19845_v7  ;;  %v9734_v62 = vsub.f32 %v9732_v57, %v9733_v52  ;;  %v13738_v58 = vld [vmem:[%s20299_s11] ss:$0 sm:$0xff] }
 0xe6e   :  { %9538 = vmatmul.f32.vlgmr.msrb.gmra.mxu0 %v9451_v36  ;;  %v9452_v26 = vand.u32 4294901760, %v9451_v36  ;;  %v9741_v20 = vand.u32 4294901760, %v9740_v9 }
 0xe6f   :  { %v19838_v13 = vadd.f32 %v13737_v61, %v9415_v1  ;;  %9818 = vmatpush.msra.mxu3 %v19853_v11  ;;  %v9750_v61 = vsub.f32 %v6319_v47, %v9680_v0  ;;  %v9735_v39 = vand.u32 4294901760, %v9734_v62  ;;  %9855 = vmatpush.msrb.mxu0 %v9709_v42 }
 0xe70   :  { %9570 = vmatmul.f32.vlgmr.msrb.gmra.mxu1 %v9452_v26  ;;  %v9453_v35 = vsub.f32 %v9451_v36, %v9452_v26 }
 0xe71   :  { %v9428_v43 = vsel %vm6335_vm0, %v19838_v13, 0  ;;  %9820 = vmatpush.msra.mxu3 %v19865_v19  ;;  %v9751_v12 = vand.u32 4294901760, %v9750_v61  ;;  %9736 = vmatpush.msra.mxu1 %v9735_v39 }
 0xe72   :  { %v9454_v53 = vand.u32 4294901760, %v9453_v35  ;;  %v9458_v51 = vand.u32 4294901760, %v9428_v43  ;;  %9859 = vmatpush.msrb.mxu0 %v9715_v24 }
 0xe73   :  { %9822 = vmatpush.msra.mxu3 %v19880_v31  ;;  %v9752_v2 = vsub.f32 %v9750_v61, %v9751_v12  ;;  %9742 = vmatpush.msra.mxu1 %v9741_v20 }
 0xe74   :  { %9455 = vmatmul.f32.vlgmr.msra.gmra.mxu2 %v9454_v53  ;;  %9508 = vmatmul.f32.gmra.mxu3 %v9458_v51  ;;  %v9459_v50 = vsub.f32 %v9428_v43, %v9458_v51 }
 0xe75   :  { %9774 = vmatpush.msra.mxu2 %v19851_v27  ;;  %9824 = vmatpush.msra.mxu3 %v19892_v37  ;;  %v9753_v4 = vand.u32 4294901760, %v9752_v2 }
 0xe76   :  { %9543 = vmatmul.f32.gmra.mxu0 %v9459_v50  ;;  %v9460_v48 = vand.u32 4294901760, %v9459_v50  ;;  %9748 = vmatpush.msra.mxu1 %v9747_v49 }
 0xe77   :  { %9777 = vmatpush.msra.mxu2 %v19862_v60  ;;  %9826 = vmatpush.msra.mxu3 %v9676_v41 }
 0xe78   :  { %9576 = vmatmul.f32.gmra.mxu1 %v9460_v48  ;;  %v9461_v21 = vsub.f32 %v9459_v50, %v9460_v48  ;;  %9863 = vmatpush.msrb.mxu0 %v9721_v40 }
 0xe79   :  { %9780 = vmatpush.msra.mxu2 %v19877_v14  ;;  %9828 = vmatpush.msra.mxu3 %v9678_v28 }
 0xe7a   :  { %v9462_v32 = vand.u32 4294901760, %v9461_v21  ;;  %9754 = vmatpush.msra.mxu1 %v9753_v4  ;;  %9867 = vmatpush.msrb.mxu0 %v9727_v6 }
 0xe7b   :  { %9783 = vmatpush.msra.mxu2 %v9726_v25  ;;  %9830 = vmatpush.msra.mxu3 %v9680_v0 }
 0xe7c   :  { %9463 = vmatmul.f32.gmra.mxu2 %v9462_v32  ;;  %9638 = vmatmul.f32.vlgmr.msrb.gmra.mxu3 %v9450_v5 }
 0xe7d   :  { %9786 = vmatpush.msra.mxu2 %v9732_v57  ;;  %9902 = vmatpush.msrb.mxu1 %v19845_v7 }
 0xe7e   :  { %9871 = vmatpush.msrb.mxu0 %v9733_v52 }
 0xe7f   :  { %9789 = vmatpush.msra.mxu2 %v9738_v23  ;;  %9904 = vmatpush.msrb.mxu1 %v19853_v11 }
 0xe80   :  { %9875 = vmatpush.msrb.mxu0 %v9739_v55 }
 0xe81   :  { %9792 = vmatpush.msra.mxu2 %v9744_v3  ;;  %9906 = vmatpush.msrb.mxu1 %v19865_v19 }
 0xe82   :  { %9879 = vmatpush.msrb.mxu0 %v9745_v15 }
 0xe83   :  { %9795 = vmatpush.msra.mxu2 %v9750_v61  ;;  %9908 = vmatpush.msrb.mxu1 %v19880_v31 }
 0xe84   :  { %9609 = vmatmul.f32.vlgmr.msrb.gmra.mxu2 %v9450_v5  ;;  %9642 = vmatmul.f32.gmra.mxu3 %v9458_v51 }
 0xe85   :  { %9910 = vmatpush.msrb.mxu1 %v19892_v37  ;;  %9883 = vmatpush.msrb.mxu0 %v9751_v12 }
 0xe87   :  { %9912 = vmatpush.msrb.mxu1 %v9676_v41 }
 0xe89   :  { %9914 = vmatpush.msrb.mxu1 %v9678_v28 }
 0xe8b   :  { %9916 = vmatpush.msrb.mxu1 %v9680_v0 }
 0xe8c   :  { %9613 = vmatmul.f32.gmra.mxu2 %v9458_v51 }
 0xeeb   :  { %v9539_v43 = vpop.f32.mrf.mxu0 }
 0xeed   :  { %v9571_v48 = vpop.f32.mrf.mxu1 }
 0xeef   :  { %v9505_v5 = vpop.f32.mrf.mxu3 }
 0xef3   :  { %v9544_v27 = vpop.f32.mrf.mxu0 }
 0xef5   :  { %v9577_v60 = vpop.f32.mrf.mxu1 }
 0xef7   :  { %v9456_v36 = vpop.f32.mrf.mxu2  ;;  %v9509_v26 = vpop.f32.mrf.mxu3 }
 0xef8   :  { %v9457_v1 = vadd.f32 %v13738_v58, %v9456_v36 }
 0xefa   :  { %v9506_v35 = vadd.f32 %v9505_v5, %v9457_v1 }
 0xefc   :  { %v9540_v50 = vadd.f32 %v9539_v43, %v9506_v35 }
 0xefe   :  { %v9572_v32 = vadd.f32 %v9571_v48, %v9540_v50 }
 0xeff   :  { %v9464_v53 = vpop.f32.mrf.mxu2  ;;  %v9639_v59 = vpop.f32.mrf.mxu3 }
 0xf00   :  { %v9465_v51 = vadd.f32 %v13738_v58, %v9464_v53 }
 0xf02   :  { %v9510_v21 = vadd.f32 %v9509_v26, %v9465_v51 }
 0xf04   :  { %v9545_v16 = vadd.f32 %v9544_v27, %v9510_v21 }
 0xf06   :  { %v9578_v10 = vadd.f32 %v9577_v60, %v9545_v16  ;;  %v13681_v60 = vld [vmem:[%s20292_s4 + $0x28] sm:$0xff] }
 0xf07   :  { %v9610_v7 = vpop.f32.mrf.mxu2  ;;  %v9643_v38 = vpop.f32.mrf.mxu3 }
 0xf08   :  { %v9611_v29 = vadd.f32 %v9610_v7, %v9572_v32 }
 0xf0a   :  { %v9640_v11 = vadd.f32 %v9639_v59, %v9611_v29  ;;  %v13683_v29 = vld [vmem:[%s20292_s4 + $0x38] sm:$0xff] }
 0xf0b   :  { %v10043_v27 = vand.u32 4294901760, %v13683_v29 }
 0xf0c   :  { %v9646_v42 = vmax.f32 %v9640_v11, 0.0  ;;  %v13682_v11 = vld [vmem:[%s20292_s4 + $0x30] sm:$0xff] }
 0xf0d   :  { %v10081_v16 = vsub.f32 %v13683_v29, %v10043_v27  ;;  %10044 = vmatpush.msrb.mxu2 %v10043_v27 }
 0xf0e   :  { %v9653_v19 = vsel %vm9651_vm11, %v9646_v42, 0  ;;  %v10045_v42 = vand.u32 4294901760, %v13682_v11 }
 0xf0f   :  { %v9682_v22 = vand.u32 4294901760, %v9653_v19  ;;  %v9614_v24 = vpop.f32.mrf.mxu2 }
 0xf10   :  { %v9615_v14 = vadd.f32 %v9614_v24, %v9578_v10  ;;  %v10087_v10 = vsub.f32 %v13682_v11, %v10045_v42  ;;  %v13680_v24 = vld [vmem:[%s20292_s4 + $0x20] sm:$0xff]  ;;  %10046 = vmatpush.msrb.mxu2 %v10045_v42 }
 0xf11   :  { %v9683_v31 = vsub.f32 %v9653_v19, %v9682_v22  ;;  %9756 = vmatmul.f32.vlgmr.msra.gmra.mxu1 %v9682_v22  ;;  %v10082_v19 = vand.u32 4294901760, %v10081_v16  ;;  %v13742_v11 = vld [vmem:[%s20293_s5 + $0x1] ss:$0 sm:$0xff]  ;;  %s21014_s5 = smov 8  }
 0xf12   :  { %v9644_v30 = vadd.f32 %v9643_v38, %v9615_v14  ;;  %10161 = vmatpush.msra.mxu1 %v10043_v27 }
 0xf13   :  { %v9684_v46 = vand.u32 4294901760, %v9683_v31  ;;  %9798 = vmatmul.f32.vlgmr.msra.gmra.mxu2 %v9683_v31  ;;  %v10083_v14 = vsub.f32 %v10081_v16, %v10082_v19 }
 0xf14   :  { %v9647_v40 = vmax.f32 %v9644_v30, 0.0  ;;  %10163 = vmatpush.msra.mxu1 %v10045_v42  ;;  %v10049_v30 = vand.u32 4294901760, %v13680_v24 }
 0xf15   :  { %v9685_v25 = vsub.f32 %v9683_v31, %v9684_v46  ;;  %9834 = vmatmul.f32.vlgmr.msra.gmra.mxu3 %v9684_v46  ;;  %v10088_v31 = vand.u32 4294901760, %v10087_v10  ;;  %v10084_v46 = vand.u32 4294901760, %v10083_v14 }
 0xf16   :  { %v9656_v37 = vsel %vm9651_vm11, %v9647_v40, 0 }
 0xf17   :  { %v9690_v63 = vand.u32 4294901760, %v9656_v37  ;;  %v9686_v8 = vand.u32 4294901760, %v9685_v25  ;;  %v10089_v40 = vsub.f32 %v10087_v10, %v10088_v31  ;;  %10085 = vmatpush.msrb.mxu3 %v10084_v46 }
 0xf19   :  { %9687 = vmatmul.f32.vlgmr.msra.gmra.mxu0 %v9686_v8  ;;  %9760 = vmatmul.f32.gmra.mxu1 %v9690_v63  ;;  %v9691_v45 = vsub.f32 %v9656_v37, %v9690_v63  ;;  %v10099_v37 = vsub.f32 %v13680_v24, %v10049_v30 }
 0xf1a   :  { %10127 = vmatpush.msra.mxu0 %v10081_v16 }
 0xf1b   :  { %9803 = vmatmul.f32.gmra.mxu2 %v9691_v45  ;;  %v9692_v6 = vand.u32 4294901760, %v9691_v45 }
 0xf1c   :  { %10130 = vmatpush.msra.mxu0 %v10087_v10 }
 0xf1d   :  { %9840 = vmatmul.f32.gmra.mxu3 %v9692_v6  ;;  %v9693_v41 = vsub.f32 %v9691_v45, %v9692_v6  ;;  %v10100_v45 = vand.u32 4294901760, %v10099_v37 }
 0xf1f   :  { %v9694_v57 = vand.u32 4294901760, %v9693_v41  ;;  %v10101_v41 = vsub.f32 %v10099_v37, %v10100_v45 }
 0xf21   :  { %9695 = vmatmul.f32.gmra.mxu0 %v9694_v57  ;;  %9918 = vmatmul.f32.vlgmr.msrb.gmra.mxu1 %v9682_v22  ;;  %v10102_v57 = vand.u32 4294901760, %v10101_v41 }
 0xf29   :  { %9885 = vmatmul.f32.vlgmr.msrb.gmra.mxu0 %v9682_v22  ;;  %9922 = vmatmul.f32.gmra.mxu1 %v9690_v63  ;;  %v10047_v22 = vand.u32 4294901760, %v13681_v60 }
 0xf2b   :  { %v10093_v38 = vsub.f32 %v13681_v60, %v10047_v22  ;;  %10165 = vmatpush.msra.mxu1 %v10047_v22  ;;  %10048 = vmatpush.msrb.mxu2 %v10047_v22 }
 0xf2d   :  { %v10094_v25 = vand.u32 4294901760, %v10093_v38  ;;  %10133 = vmatpush.msra.mxu0 %v10093_v38  ;;  %10167 = vmatpush.msra.mxu1 %v10049_v30 }
 0xf2e   :  { %10050 = vmatpush.msrb.mxu2 %v10049_v30 }
 0xf2f   :  { %v10095_v8 = vsub.f32 %v10093_v38, %v10094_v25  ;;  %10136 = vmatpush.msra.mxu0 %v10099_v37 }
 0xf30   :  { %10196 = vmatpush.msra.mxu2 %v10082_v19 }
 0xf31   :  { %9889 = vmatmul.f32.gmra.mxu0 %v9690_v63  ;;  %v10090_v63 = vand.u32 4294901760, %v10089_v40  ;;  %v10096_v6 = vand.u32 4294901760, %v10095_v8 }
 0xf32   :  { %10200 = vmatpush.msra.mxu2 %v10088_v31 }
 0xf33   :  { %10091 = vmatpush.msrb.mxu3 %v10090_v63 }
 0xf34   :  { %10204 = vmatpush.msra.mxu2 %v10094_v25 }
 0xf35   :  { %10097 = vmatpush.msrb.mxu3 %v10096_v6 }
 0xf36   :  { %10208 = vmatpush.msra.mxu2 %v10100_v45 }
 0xf37   :  { %10103 = vmatpush.msrb.mxu3 %v10102_v57 }
 0xf39   :  { %10231 = vmatpush.msra.mxu3 %v10043_v27 }
 0xf3b   :  { %10233 = vmatpush.msra.mxu3 %v10045_v42 }
 0xf3d   :  { %10235 = vmatpush.msra.mxu3 %v10047_v22 }
 0xf3f   :  { %10237 = vmatpush.msra.mxu3 %v10049_v30 }
 0xf8e   :  { %v9757_v44 = vpop.f32.mrf.mxu1 }
 0xf96   :  { %v9688_v17 = vpop.f32.mrf.mxu0  ;;  %v9761_v28 = vpop.f32.mrf.mxu1 }
 0xf97   :  { %v9689_v23 = vadd.f32 %v13739_v54, %v9688_v17  ;;  %v9799_v47 = vpop.f32.mrf.mxu2 }
 0xf98   :  { %v9835_v0 = vpop.f32.mrf.mxu3 }
 0xf99   :  { %v9758_v52 = vadd.f32 %v9757_v44, %v9689_v23 }
 0xf9b   :  { %v9800_v55 = vadd.f32 %v9799_v47, %v9758_v52 }
 0xf9d   :  { %v9836_v62 = vadd.f32 %v9835_v0, %v9800_v55 }
 0xf9e   :  { %v9696_v18 = vpop.f32.mrf.mxu0  ;;  %v9919_v15 = vpop.f32.mrf.mxu1 }
 0xf9f   :  { %v9697_v3 = vadd.f32 %v13739_v54, %v9696_v18  ;;  %v9804_v20 = vpop.f32.mrf.mxu2 }
 0xfa0   :  { %v9841_v2 = vpop.f32.mrf.mxu3 }
 0xfa1   :  { %v9762_v9 = vadd.f32 %v9761_v28, %v9697_v3 }
 0xfa3   :  { %v9805_v56 = vadd.f32 %v9804_v20, %v9762_v9 }
 0xfa5   :  { %v9842_v4 = vadd.f32 %v9841_v2, %v9805_v56  ;;  %v13741_v56 = vld [vmem:[%s20303_s15] ss:$0 sm:$0xff] }
 0xfa6   :  { %v9886_v61 = vpop.f32.mrf.mxu0  ;;  %v9923_v1 = vpop.f32.mrf.mxu1 }
 0xfa7   :  { %v9887_v39 = vadd.f32 %v9886_v61, %v9836_v62  ;;  %v13740_v61 = vld [vmem:[%s20302_s14] ss:$0 sm:$0xff] }
 0xfa9   :  { %v9920_v12 = vadd.f32 %v9919_v15, %v9887_v39 }
 0xfab   :  { %v9926_v49 = vadd.f32 %v9920_v12, %v19833_v33 }
 0xfad   :  { %v9928_v5 = vsel %vm6335_vm0, %v9926_v49, 0.0 }
 0xfae   :  { %v9890_v58 = vpop.f32.mrf.mxu0  ;;  %9929 = vadd.xlane.f32.xlu1 %v9928_v5 }
 0xfaf   :  { %v9891_v36 = vadd.f32 %v9890_v58, %v9842_v4 }
 0xfb1   :  { %v9924_v26 = vadd.f32 %v9923_v1, %v9891_v36 }
 0xfb3   :  { %v9927_v35 = vadd.f32 %v9924_v26, %v19838_v13 }
 0xfb5   :  { %v9931_v43 = vsel %vm6335_vm0, %v9927_v35, 0.0 }
 0xfb6   :  { %9932 = vadd.xlane.f32.xlu2 %v9931_v43 }
0x1021   :  { %v9930_v53 = vpop.xlane.xlu1 %9929 }
0x1022   :  { %v9934_v51 = vmul.f32 %v9930_v53, %v19798_v34 }
0x1024   :  { %v19928_v50 = vsub.f32 %v9926_v49, %v9934_v51 }
0x1026   :  { %v9938_v33 = vmul.f32 %v19928_v50, %v19928_v50 }
0x1028   :  { %v9940_v48 = vsel %vm6335_vm0, %v9938_v33, 0.0 }
0x1029   :  { %9941 = vadd.xlane.f32.xlu0 %v9940_v48  ;;  %v9933_v21 = vpop.xlane.xlu2 %9932 }
0x102a   :  { %v9935_v32 = vmul.f32 %v9933_v21, %v19798_v34 }
0x102c   :  { %v19934_v59 = vsub.f32 %v9927_v35, %v9935_v32 }
0x102e   :  { %v9939_v13 = vmul.f32 %v19934_v59, %v19934_v59 }
0x1030   :  { %v9943_v7 = vsel %vm6335_vm0, %v9939_v13, 0.0 }
0x1031   :  { %9944 = vadd.xlane.f32.xlu1 %v9943_v7 }
0x109c   :  { %v9942_v44 = vpop.xlane.xlu0 %9941 }
0x109d   :  { %v9946_v54 = vmul.f32 %v9942_v44, %v19798_v34 }
0x109f   :  { %v9948_v17 = vadd.f32 1e-05, %v9946_v54 }
0x10a1   :  { %13788 = vrsqrt.f32 %v9948_v17  ;;  %vm9956_vm13 = vweird.f32 %v9948_v17 }
0x10a4   :  { %v9945_v23 = vpop.xlane.xlu1 %9944 }
0x10a5   :  { %v9947_v28 = vmul.f32 %v9945_v23, %v19798_v34 }
0x10a7   :  { %v13789_v52 = vpop.eup %13788  ;;  %v9949_v47 = vadd.f32 1e-05, %v9947_v28 }
0x10a8   :  { %v9951_v18 = vmul.f32 %v13789_v52, %v9948_v17  ;;  %vm9957_vm12 = vweird.f32 %v13789_v52 }
0x10a9   :  { %13790 = vrsqrt.f32 %v9949_v47  ;;  %vm9958_vm14 = vmor %vm9956_vm13, %vm9957_vm12  ;;  %vm9966_vm4 = vweird.f32 %v9949_v47 }
0x10aa   :  { %v9952_v55 = vmul.f32 %v13789_v52, %v9951_v18 }
0x10ac   :  { %v9953_v3 = vmul.f32 0.5, %v9952_v55 }
0x10ae   :  { %v9954_v0 = vsub.f32 1.5, %v9953_v3 }
0x10af   :  { %v13791_v62 = vpop.eup %13790 }
0x10b0   :  { %v9955_v9 = vmul.f32 %v13789_v52, %v9954_v0  ;;  %v9961_v15 = vmul.f32 %v13791_v62, %v9949_v47  ;;  %vm9967_vm15 = vweird.f32 %v13791_v62 }
0x10b1   :  { %vm9968_vm5 = vmor %vm9966_vm4, %vm9967_vm15 }
0x10b2   :  { %v9959_v39 = vsel %vm9958_vm14, %v13789_v52, %v9955_v9  ;;  %v9962_v20 = vmul.f32 %v13791_v62, %v9961_v15 }
0x10b3   :  { %v9970_v12 = vmul.f32 %v9959_v39, %v19928_v50 }
0x10b4   :  { %v9963_v49 = vmul.f32 0.5, %v9962_v20 }
0x10b5   :  { %v9975_v2 = vmul.f32 %v13740_v61, %v9970_v12 }
0x10b6   :  { %v9964_v4 = vsub.f32 1.5, %v9963_v49 }
0x10b7   :  { %v19960_v5 = vadd.f32 %v13741_v56, %v9975_v2 }
0x10b8   :  { %v9965_v58 = vmul.f32 %v13791_v62, %v9964_v4 }
0x10b9   :  { %v10026_v36 = vsel %vm6335_vm0, %v19960_v5, 0 }
0x10ba   :  { %v9969_v1 = vsel %vm9968_vm5, %v13791_v62, %v9965_v58  ;;  %v10051_v26 = vand.u32 4294901760, %v10026_v36 }
0x10bb   :  { %v9971_v35 = vmul.f32 %v9969_v1, %v19934_v59 }
0x10bc   :  { %10105 = vmatmul.f32.vlgmr.msrb.gmra.mxu3 %v10051_v26  ;;  %v10052_v43 = vsub.f32 %v10026_v36, %v10051_v26 }
0x10bd   :  { %v9976_v53 = vmul.f32 %v13740_v61, %v9971_v35 }
0x10be   :  { %10139 = vmatmul.f32.vlgmr.msra.gmra.mxu0 %v10052_v43  ;;  %v10053_v51 = vand.u32 4294901760, %v10052_v43 }
0x10bf   :  { %v19965_v50 = vadd.f32 %v13741_v56, %v9976_v53 }
0x10c0   :  { %10171 = vmatmul.f32.vlgmr.msra.gmra.mxu1 %v10053_v51  ;;  %v10054_v33 = vsub.f32 %v10052_v43, %v10053_v51 }
0x10c1   :  { %v10029_v48 = vsel %vm6335_vm0, %v19965_v50, 0 }
0x10c2   :  { %v10055_v21 = vand.u32 4294901760, %v10054_v33  ;;  %v10059_v32 = vand.u32 4294901760, %v10029_v48 }
0x10c4   :  { %10056 = vmatmul.f32.vlgmr.msrb.gmra.mxu2 %v10055_v21  ;;  %10109 = vmatmul.f32.gmra.mxu3 %v10059_v32  ;;  %v10060_v13 = vsub.f32 %v10029_v48, %v10059_v32 }
0x10c6   :  { %10144 = vmatmul.f32.gmra.mxu0 %v10060_v13  ;;  %v10061_v7 = vand.u32 4294901760, %v10060_v13 }
0x10c8   :  { %10177 = vmatmul.f32.gmra.mxu1 %v10061_v7  ;;  %v10062_v59 = vsub.f32 %v10060_v13, %v10061_v7 }
0x10ca   :  { %v10063_v29 = vand.u32 4294901760, %v10062_v59 }
0x10cc   :  { %10064 = vmatmul.f32.gmra.mxu2 %v10063_v29  ;;  %10239 = vmatmul.f32.vlgmr.msra.gmra.mxu3 %v10051_v26 }
0x10d4   :  { %10210 = vmatmul.f32.vlgmr.msra.gmra.mxu2 %v10051_v26  ;;  %10243 = vmatmul.f32.gmra.mxu3 %v10059_v32 }
0x10dc   :  { %10214 = vmatmul.f32.gmra.mxu2 %v10059_v32 }
0x113b   :  { %v10140_v10 = vpop.f32.mrf.mxu0 }
0x113d   :  { %v10172_v31 = vpop.f32.mrf.mxu1 }
0x113f   :  { %v10106_v27 = vpop.f32.mrf.mxu3 }
0x1143   :  { %v10145_v37 = vpop.f32.mrf.mxu0 }
0x1145   :  { %v10178_v45 = vpop.f32.mrf.mxu1 }
0x1147   :  { %v10057_v16 = vpop.f32.mrf.mxu2  ;;  %v10110_v60 = vpop.f32.mrf.mxu3 }
0x1148   :  { %v10058_v42 = vadd.f32 %v13742_v11, %v10057_v16 }
0x114a   :  { %v10107_v19 = vadd.f32 %v10106_v27, %v10058_v42 }
0x114c   :  { %v10141_v14 = vadd.f32 %v10140_v10, %v10107_v19 }
0x114e   :  { %v10173_v30 = vadd.f32 %v10172_v31, %v10141_v14 }
0x114f   :  { %v10065_v22 = vpop.f32.mrf.mxu2  ;;  %v10240_v46 = vpop.f32.mrf.mxu3 }
0x1150   :  { %v10066_v24 = vadd.f32 %v13742_v11, %v10065_v22 }
0x1152   :  { %v10111_v38 = vadd.f32 %v10110_v60, %v10066_v24 }
0x1154   :  { %v10146_v8 = vadd.f32 %v10145_v37, %v10111_v38 }
0x1156   :  { %v10179_v6 = vadd.f32 %v10178_v45, %v10146_v8 }
0x1157   :  { %v10211_v40 = vpop.f32.mrf.mxu2  ;;  %v10244_v44 = vpop.f32.mrf.mxu3 }
0x1158   :  { %v10212_v25 = vadd.f32 %v10211_v40, %v10173_v30 }
0x115a   :  { %v19972_v63 = vadd.f32 %v10240_v46, %v10212_v25 }
0x115c   :  { %10248 = vrot.lane.b32.xlu2 %v19972_v63, %s13858_s27  ;;  %v10250_v17 = vsel %vm6561_vm1, %v19972_v63, 0 }
0x115d   :  { %v10271_v23 = vand.u32 4294901760, %v10250_v17 }
0x115f   :  { %v10215_v41 = vpop.f32.mrf.mxu2  ;;  %v10272_v28 = vsub.f32 %v10250_v17, %v10271_v23 }
0x1160   :  { %v10216_v57 = vadd.f32 %v10215_v41, %v10179_v6 }
0x1161   :  { %v10273_v52 = vand.u32 4294901760, %v10272_v28 }
0x1162   :  { %v19976_v54 = vadd.f32 %v10244_v44, %v10216_v57 }
0x1163   :  { %v10274_v55 = vsub.f32 %v10272_v28, %v10273_v52 }
0x1164   :  { %10401 = vrot.lane.b32.xlu0 %v19976_v54, %s13858_s27  ;;  %v10403_v39 = vsel %vm6561_vm1, %v19976_v54, 0  ;;  %s13873_s27 = smov [#allocation2]  }
0x1165   :  { %v10275_v62 = vand.u32 4294901760, %v10274_v55  ;;  %v10424_v20 = vand.u32 4294901760, %v10403_v39 }
0x1167   :  { %v10425_v56 = vsub.f32 %v10403_v39, %v10424_v20 }
0x1169   :  { %v10426_v12 = vand.u32 4294901760, %v10425_v56 }
0x116b   :  { %v10427_v4 = vsub.f32 %v10425_v56, %v10426_v12 }
0x116c   :  { %10577 = vrot.lane.b32.xlu0 %v19972_v63, %s13859_s28 }
0x116d   :  { %v10428_v1 = vand.u32 4294901760, %v10427_v4 }
0x1174   :  { %10883 = vrot.lane.b32.xlu0 %v19972_v63, %s13861_s29 }
0x117c   :  { %10881 = vrot.lane.b32.xlu0 %v19972_v63, %s13860_s2 }
0x1184   :  { %11037 = vrot.lane.b32.xlu0 %v19976_v54, %s13861_s29 }
0x11b6   :  { %v10249_v47 = vpop.permute.xlu2 %10248 }
0x11b7   :  { %v10252_v18 = vsel %vm6561_vm1, %v10249_v47, 0 }
0x11b8   :  { %v10269_v3 = vand.u32 4294901760, %v10252_v18 }
0x11ba   :  { %v10296_v0 = vsub.f32 %v10252_v18, %v10269_v3  ;;  %10270 = vmatpush.xpose.msrb.mxu0 %v10269_v3  ;;  %10346 = vmatpush.xpose.msrb.mxu3 %v10269_v3 }
0x11bc   :  { %v10297_v9 = vand.u32 4294901760, %v10296_v0  ;;  %10323 = vmatpush.xpose.msrb.mxu2 %v10296_v0 }
0x11bd   :  { %10276 = vmatmul.f32.vlgmr.msrb.gmra.mxu0 %v10275_v62  ;;  %10350 = vmatmul.f32.vlgmr.msrb.gmra.mxu3 %v10273_v52 }
0x11be   :  { %v10298_v15 = vsub.f32 %v10296_v0, %v10297_v9  ;;  %10372 = vmatpush.xpose.msra.mxu0 %v10297_v9 }
0x11bf   :  { %10326 = vmatmul.f32.vlgmr.msrb.gmra.mxu2 %v10272_v28 }
0x11c0   :  { %v10299_v61 = vand.u32 4294901760, %v10298_v15 }
0x11c2   :  { %10300 = vmatpush.xpose.msrb.mxu1 %v10299_v61 }
0x11c5   :  { %10302 = vmatmul.f32.vlgmr.msrb.gmra.mxu1 %v10271_v23  ;;  %10374 = vmatmul.f32.vlgmr.msra.gmra.mxu0 %v10271_v23 }
0x11c6   :  { %10394 = vmatpush.xpose.msra.mxu1 %v10269_v3 }
0x11cd   :  { %10396 = vmatmul.f32.vlgmr.msra.gmra.mxu1 %v10271_v23 }
0x11d6   :  { %v10402_v49 = vpop.permute.xlu0 %10401 }
0x11d7   :  { %v10405_v2 = vsel %vm6561_vm1, %v10402_v49, 0 }
0x11d8   :  { %v10422_v58 = vand.u32 4294901760, %v10405_v2 }
0x11da   :  { %v10449_v36 = vsub.f32 %v10405_v2, %v10422_v58  ;;  %10423 = vmatpush.xpose.msra.mxu2 %v10422_v58  ;;  %10499 = vmatpush.xpose.msrb.mxu1 %v10422_v58 }
0x11dc   :  { %v10450_v26 = vand.u32 4294901760, %v10449_v36  ;;  %10476 = vmatpush.xpose.msrb.mxu0 %v10449_v36 }
0x11dd   :  { %10429 = vmatmul.f32.vlgmr.msra.gmra.mxu2 %v10428_v1  ;;  %10503 = vmatmul.f32.vlgmr.msrb.gmra.mxu1 %v10426_v12 }
0x11de   :  { %v10451_v35 = vsub.f32 %v10449_v36, %v10450_v26  ;;  %10525 = vmatpush.xpose.msrb.mxu2 %v10450_v26  ;;  %v10578_v43 = vpop.permute.xlu0 %10577 }
0x11df   :  { %v10598_v53 = vand.u32 4294901760, %v10578_v43  ;;  %10479 = vmatmul.f32.vlgmr.msrb.gmra.mxu0 %v10425_v56 }
0x11e0   :  { %v10452_v51 = vand.u32 4294901760, %v10451_v35 }
0x11e1   :  { %v10625_v33 = vsub.f32 %v10578_v43, %v10598_v53  ;;  %10599 = vmatpush.msra.mxu0 %v10598_v53 }
0x11e2   :  { %10453 = vmatpush.xpose.msra.mxu3 %v10452_v51 }
0x11e3   :  { %v10626_v48 = vand.u32 4294901760, %v10625_v33  ;;  %10652 = vmatpush.msra.mxu2 %v10625_v33 }
0x11e5   :  { %v10627_v21 = vsub.f32 %v10625_v33, %v10626_v48  ;;  %10455 = vmatmul.f32.vlgmr.msra.gmra.mxu3 %v10424_v20  ;;  %10527 = vmatmul.f32.vlgmr.msrb.gmra.mxu2 %v10424_v20 }
0x11e6   :  { %10547 = vmatpush.xpose.msrb.mxu3 %v10422_v58  ;;  %10701 = vmatpush.msrb.mxu0 %v10626_v48  ;;  %v10884_v9 = vpop.permute.xlu0 %10883 }
0x11e7   :  { %v10628_v32 = vand.u32 4294901760, %v10627_v21  ;;  %v10887_v61 = vsel %vm6561_vm1, %v10884_v9, 0 }
0x11e9   :  { %10629 = vmatpush.msra.mxu1 %v10628_v32 }
0x11ea   :  { %10675 = vmatpush.msra.mxu3 %v10598_v53 }
0x11eb   :  { %10723 = vmatpush.msrb.mxu1 %v10598_v53 }
0x11ed   :  { %10549 = vmatmul.f32.vlgmr.msrb.gmra.mxu3 %v10424_v20  ;;  %v10904_v20 = vand.u32 4294901760, %v10887_v61 }
0x11ee   :  { %v10882_v51 = vpop.permute.xlu0 %10881 }
0x11ef   :  { %v10931_v2 = vsub.f32 %v10887_v61, %v10904_v20 }
0x11f1   :  { %v10932_v36 = vand.u32 4294901760, %v10931_v2 }
0x11f3   :  { %v10933_v26 = vsub.f32 %v10931_v2, %v10932_v36 }
0x11f5   :  { %v10934_v53 = vand.u32 4294901760, %v10933_v26 }
0x123a   :  { %v10277_v13 = vpop.f32.mrf.mxu0 }
0x1240   :  { %v10351_v11 = vpop.f32.mrf.mxu3 }
0x1242   :  { %v10303_v7 = vpop.f32.mrf.mxu1  ;;  %v10327_v29 = vpop.f32.mrf.mxu2 }
0x1243   :  { %v10304_v59 = vadd.f32 %v10303_v7, %v10277_v13  ;;  %v10375_v42 = vpop.f32.mrf.mxu0  ;;  %v11038_v13 = vpop.permute.xlu0 %11037 }
0x1245   :  { %v10328_v27 = vadd.f32 %v10327_v29, %v10304_v59  ;;  %v11041_v59 = vsel %vm6561_vm1, %v11038_v13, 0  ;;  %v10885_v29 = vsel %vm6561_vm1, %v10882_v51, 0 }
0x1247   :  { %v10352_v16 = vadd.f32 %v10351_v11, %v10328_v27  ;;  %v11058_v27 = vand.u32 4294901760, %v11041_v59  ;;  %v10906_v11 = vand.u32 4294901760, %v10885_v29 }
0x1249   :  { %v10376_v60 = vadd.f32 %v10375_v42, %v10352_v16  ;;  %v11085_v42 = vsub.f32 %v11041_v59, %v11058_v27 }
0x124a   :  { %v10397_v19 = vpop.f32.mrf.mxu1 }
0x124b   :  { %v10398_v10 = vadd.f32 %v10397_v19, %v10376_v60  ;;  %v10907_v19 = vsub.f32 %v10885_v29, %v10906_v11 }
0x124d   :  { %v10553_v22 = vmul.f32 0.35355338, %v10398_v10 }
0x124f   :  { %v10555_v24 = vsel %vm6561_vm1, %v10553_v22, -inf }
0x1250   :  { %10556 = vmax.xlane.f32.xlu1 %v10555_v24  ;;  %v11086_v24 = vand.u32 4294901760, %v11085_v42 }
0x125a   :  { %v10504_v40 = vpop.f32.mrf.mxu1 }
0x125c   :  { %v10480_v30 = vpop.f32.mrf.mxu0 }
0x1260   :  { %v10430_v14 = vpop.f32.mrf.mxu2 }
0x1268   :  { %v10456_v31 = vpop.f32.mrf.mxu3  ;;  %v10528_v37 = vpop.f32.mrf.mxu2 }
0x1269   :  { %v10457_v38 = vadd.f32 %v10456_v31, %v10430_v14  ;;  %v10908_v14 = vand.u32 4294901760, %v10907_v19 }
0x126b   :  { %v10481_v46 = vadd.f32 %v10480_v30, %v10457_v38 }
0x126d   :  { %v10505_v25 = vadd.f32 %v10504_v40, %v10481_v46  ;;  %v11087_v46 = vsub.f32 %v11085_v42, %v11086_v24 }
0x126f   :  { %v10529_v8 = vadd.f32 %v10528_v37, %v10505_v25  ;;  %v10909_v25 = vsub.f32 %v10907_v19, %v10908_v14 }
0x1270   :  { %v10550_v45 = vpop.f32.mrf.mxu3 }
0x1271   :  { %v10551_v6 = vadd.f32 %v10550_v45, %v10529_v8  ;;  %v11088_v45 = vand.u32 4294901760, %v11087_v46 }
0x1273   :  { %v10554_v41 = vmul.f32 0.35355338, %v10551_v6 }
0x1275   :  { %v10558_v57 = vsel %vm6561_vm1, %v10554_v41, -inf }
0x1276   :  { %10559 = vmax.xlane.f32.xlu1 %v10558_v57 }
0x12c3   :  { %v10557_v44 = vpop.xlane.xlu1 %10556 }
0x12c4   :  { %v10561_v17 = vsub.f32 %v10553_v22, %v10557_v44 }
0x12c6   :  { %v10563_v23 = vmul.f32 1.442695, %v10561_v17 }
0x12c8   :  { %13792 = vpow2.f32 %v10563_v23 }
0x12ce   :  { %v13793_v28 = vpop.eup %13792 }
0x12cf   :  { %v10567_v52 = vsel %vm6561_vm1, %v13793_v28, 0.0 }
0x12d0   :  { %10568 = vadd.xlane.f32.xlu1 %v10567_v52 }
0x12e9   :  { %10729 = vrot.lane.b32.xlu1 %v19976_v54, %s13859_s28  ;;  %v10560_v47 = vpop.xlane.xlu1 %10559 }
0x12ea   :  { %v10562_v18 = vsub.f32 %v10554_v41, %v10560_v47  ;;  %v10910_v41 = vand.u32 4294901760, %v10909_v25 }
0x12ec   :  { %v10565_v55 = vmul.f32 1.442695, %v10562_v18 }
0x12ee   :  { %13794 = vpow2.f32 %v10565_v55 }
0x12f1   :  { %11035 = vrot.lane.b32.xlu1 %v19976_v54, %s13860_s2  ;;  %s21015_s2 = smov 24  }
0x12f4   :  { %v13795_v3 = vpop.eup %13794 }
0x12f5   :  { %v10570_v0 = vsel %vm6561_vm1, %v13795_v3, 0.0 }
0x12f6   :  { %10571 = vadd.xlane.f32.xlu2 %v10570_v0 }
0x130e   :  { %11213 = vrot.lane.b32.xlu2 %v19972_v63, %s13863_s30 }
0x1316   :  { %11519 = vrot.lane.b32.xlu2 %v19972_v63, %s13862_s19 }
0x131e   :  { %11673 = vrot.lane.b32.xlu2 %v19976_v54, %s13862_s19 }
0x1343   :  { %v10569_v62 = vpop.xlane.xlu1 %10568 }
0x1344   :  { %13796 = vrcp.f32 %v10569_v62 }
0x134a   :  { %v13797_v15 = vpop.eup %13796 }
0x134b   :  { %v10575_v39 = vmul.f32 %v13797_v15, %v13793_v28 }
0x134d   :  { %v10581_v56 = vsel %vm6561_vm1, %v10575_v39, 0 }
0x134e   :  { %v10600_v12 = vand.u32 4294901760, %v10581_v56 }
0x1350   :  { %v10601_v49 = vsub.f32 %v10581_v56, %v10600_v12  ;;  %10631 = vmatmul.f32.vlgmr.msra.gmra.mxu1 %v10600_v12 }
0x1352   :  { %10655 = vmatmul.f32.vlgmr.msra.gmra.mxu2 %v10601_v49  ;;  %v10602_v4 = vand.u32 4294901760, %v10601_v49 }
0x1354   :  { %10679 = vmatmul.f32.vlgmr.msra.gmra.mxu3 %v10602_v4  ;;  %v10603_v58 = vsub.f32 %v10601_v49, %v10602_v4 }
0x1356   :  { %v10604_v1 = vand.u32 4294901760, %v10603_v58 }
0x1358   :  { %10605 = vmatmul.f32.vlgmr.msra.gmra.mxu0 %v10604_v1  ;;  %10725 = vmatmul.f32.vlgmr.msrb.gmra.mxu1 %v10600_v12 }
0x135b   :  { %v10730_v35 = vpop.permute.xlu1 %10729 }
0x135c   :  { %v10750_v43 = vand.u32 4294901760, %v10730_v35 }
0x135e   :  { %v10777_v33 = vsub.f32 %v10730_v35, %v10750_v43  ;;  %10751 = vmatpush.msrb.mxu2 %v10750_v43  ;;  %10827 = vmatpush.msra.mxu1 %v10750_v43 }
0x1360   :  { %10935 = vmatpush.xpose.msrb.mxu1 %v10934_v53  ;;  %v10778_v48 = vand.u32 4294901760, %v10777_v33  ;;  %10703 = vmatmul.f32.vlgmr.msrb.gmra.mxu0 %v10600_v12 }
0x1361   :  { %10804 = vmatpush.msra.mxu0 %v10777_v33 }
0x1362   :  { %v10779_v21 = vsub.f32 %v10777_v33, %v10778_v48  ;;  %10853 = vmatpush.msra.mxu2 %v10778_v48 }
0x1363   :  { %10905 = vmatpush.xpose.msrb.mxu0 %v10904_v20  ;;  %v11036_v57 = vpop.permute.xlu1 %11035 }
0x1364   :  { %v10780_v32 = vand.u32 4294901760, %v10779_v21  ;;  %v11039_v44 = vsel %vm6561_vm1, %v11036_v57, 0 }
0x1365   :  { %v11060_v23 = vand.u32 4294901760, %v11039_v44 }
0x1366   :  { %10781 = vmatpush.msrb.mxu3 %v10780_v32 }
0x1367   :  { %v11061_v52 = vsub.f32 %v11039_v44, %v11060_v23 }
0x1368   :  { %10875 = vmatpush.msra.mxu3 %v10750_v43 }
0x1369   :  { %v10572_v7 = vpop.xlane.xlu2 %10571  ;;  %v11062_v18 = vand.u32 4294901760, %v11061_v52 }
0x136a   :  { %13798 = vrcp.f32 %v10572_v7 }
0x136b   :  { %v11063_v55 = vsub.f32 %v11061_v52, %v11062_v18 }
0x1370   :  { %v13799_v16 = vpop.eup %13798 }
0x1371   :  { %v10576_v60 = vmul.f32 %v13799_v16, %v13795_v3  ;;  %v11214_v38 = vpop.permute.xlu2 %11213  ;;  %v11064_v3 = vand.u32 4294901760, %v11063_v55 }
0x1372   :  { %v11234_v40 = vand.u32 4294901760, %v11214_v38 }
0x1373   :  { %v10733_v10 = vsel %vm6561_vm1, %v10576_v60, 0 }
0x1374   :  { %v10752_v22 = vand.u32 4294901760, %v10733_v10  ;;  %v11261_v6 = vsub.f32 %v11214_v38, %v11234_v40 }
0x1376   :  { %v10753_v31 = vsub.f32 %v10733_v10, %v10752_v22  ;;  %10783 = vmatmul.f32.vlgmr.msrb.gmra.mxu3 %v10752_v22  ;;  %v11262_v17 = vand.u32 4294901760, %v11261_v6 }
0x1377   :  { %10981 = vmatpush.xpose.msrb.mxu3 %v10904_v20 }
0x1378   :  { %10807 = vmatmul.f32.vlgmr.msra.gmra.mxu0 %v10753_v31  ;;  %v10754_v30 = vand.u32 4294901760, %v10753_v31  ;;  %v11263_v28 = vsub.f32 %v11261_v6, %v11262_v17 }
0x1379   :  { %11007 = vmatpush.xpose.msra.mxu0 %v10932_v36 }
0x137a   :  { %10831 = vmatmul.f32.vlgmr.msra.gmra.mxu1 %v10754_v30  ;;  %v10755_v37 = vsub.f32 %v10753_v31, %v10754_v30  ;;  %v11264_v47 = vand.u32 4294901760, %v11263_v28 }
0x137b   :  { %11029 = vmatpush.xpose.msra.mxu1 %v10904_v20 }
0x137c   :  { %v10756_v8 = vand.u32 4294901760, %v10755_v37 }
0x137e   :  { %10757 = vmatmul.f32.vlgmr.msrb.gmra.mxu2 %v10756_v8  ;;  %10877 = vmatmul.f32.vlgmr.msra.gmra.mxu3 %v10752_v22 }
0x137f   :  { %10958 = vmatpush.xpose.msrb.mxu2 %v10931_v2  ;;  %11089 = vmatpush.xpose.msra.mxu3 %v11088_v45 }
0x1380   :  { %10911 = vmatmul.f32.vlgmr.msrb.gmra.mxu0 %v10910_v41 }
0x1381   :  { %11112 = vmatpush.xpose.msrb.mxu0 %v11085_v42 }
0x1382   :  { %10937 = vmatmul.f32.vlgmr.msrb.gmra.mxu1 %v10906_v11 }
0x1383   :  { %11135 = vmatpush.xpose.msrb.mxu1 %v11058_v27 }
0x1386   :  { %10855 = vmatmul.f32.vlgmr.msra.gmra.mxu2 %v10752_v22  ;;  %10985 = vmatmul.f32.vlgmr.msrb.gmra.mxu3 %v10908_v14 }
0x1387   :  { %11059 = vmatpush.xpose.msra.mxu2 %v11058_v27  ;;  %11183 = vmatpush.xpose.msrb.mxu3 %v11058_v27 }
0x1388   :  { %11009 = vmatmul.f32.vlgmr.msra.gmra.mxu0 %v10906_v11 }
0x1389   :  { %11235 = vmatpush.msra.mxu0 %v11234_v40 }
0x138a   :  { %11031 = vmatmul.f32.vlgmr.msra.gmra.mxu1 %v10906_v11 }
0x138b   :  { %11265 = vmatpush.msra.mxu1 %v11264_v47 }
0x138e   :  { %10961 = vmatmul.f32.vlgmr.msrb.gmra.mxu2 %v10907_v19  ;;  %11091 = vmatmul.f32.vlgmr.msra.gmra.mxu3 %v11060_v23 }
0x138f   :  { %11161 = vmatpush.xpose.msrb.mxu2 %v11086_v24  ;;  %11311 = vmatpush.msra.mxu3 %v11234_v40 }
0x1390   :  { %11115 = vmatmul.f32.vlgmr.msrb.gmra.mxu0 %v11061_v52  ;;  %v11520_v52 = vpop.permute.xlu2 %11519 }
0x1391   :  { %11337 = vmatpush.msrb.mxu0 %v11262_v17  ;;  %v11523_v55 = vsel %vm6561_vm1, %v11520_v52, 0 }
0x1392   :  { %11139 = vmatmul.f32.vlgmr.msrb.gmra.mxu1 %v11062_v18 }
0x1393   :  { %11359 = vmatpush.msrb.mxu1 %v11234_v40 }
0x1396   :  { %11065 = vmatmul.f32.vlgmr.msra.gmra.mxu2 %v11064_v3  ;;  %11185 = vmatmul.f32.vlgmr.msrb.gmra.mxu3 %v11060_v23  ;;  %v11540_v3 = vand.u32 4294901760, %v11523_v55 }
0x1397   :  { %11288 = vmatpush.msra.mxu2 %v11261_v6 }
0x1398   :  { %v11674_v47 = vpop.permute.xlu2 %11673 }
0x139e   :  { %11163 = vmatmul.f32.vlgmr.msrb.gmra.mxu2 %v11060_v23 }
0x13cd   :  { %v20016_v62 = vpop.f32.mrf.mxu1 }
0x13d5   :  { %v20014_v0 = vpop.f32.mrf.mxu0  ;;  %v20022_v61 = vpop.f32.mrf.mxu2 }
0x13d6   :  { %v20024_v39 = vpop.f32.mrf.mxu1 }
0x13d7   :  { %v20018_v9 = vpop.f32.mrf.mxu3 }
0x13dd   :  { %v20020_v15 = vpop.f32.mrf.mxu0 }
0x13f5   :  { %v20028_v56 = vpop.f32.mrf.mxu0 }
0x13f7   :  { %v20030_v12 = vpop.f32.mrf.mxu1 }
0x13f9   :  { %v20026_v20 = vpop.f32.mrf.mxu3 }
0x13fd   :  { %v10912_v4 = vpop.f32.mrf.mxu0 }
0x13ff   :  { %v10938_v36 = vpop.f32.mrf.mxu1 }
0x1400   :  { %v10939_v26 = vadd.f32 %v10938_v36, %v10912_v4  ;;  %v11567_v36 = vsub.f32 %v11523_v55, %v11540_v3 }
0x1401   :  { %v20032_v49 = vpop.f32.mrf.mxu2  ;;  %v20034_v2 = vpop.f32.mrf.mxu3 }
0x1405   :  { %v11010_v35 = vpop.f32.mrf.mxu0 }
0x1407   :  { %v11032_v33 = vpop.f32.mrf.mxu1 }
0x1409   :  { %v20036_v58 = vpop.f32.mrf.mxu2  ;;  %v10986_v1 = vpop.f32.mrf.mxu3 }
0x140d   :  { %v11116_v29 = vpop.f32.mrf.mxu0 }
0x140f   :  { %v11140_v16 = vpop.f32.mrf.mxu1 }
0x1411   :  { %v10962_v43 = vpop.f32.mrf.mxu2  ;;  %v11092_v32 = vpop.f32.mrf.mxu3 }
0x1412   :  { %v10963_v53 = vadd.f32 %v10962_v43, %v10939_v26  ;;  %v11568_v43 = vand.u32 4294901760, %v11567_v36 }
0x1414   :  { %v10987_v51 = vadd.f32 %v10986_v1, %v10963_v53 }
0x1416   :  { %v11011_v48 = vadd.f32 %v11010_v35, %v10987_v51  ;;  %v11677_v51 = vsel %vm6561_vm1, %v11674_v47, 0 }
0x1418   :  { %v11033_v21 = vadd.f32 %v11032_v33, %v11011_v48 }
0x1419   :  { %v11066_v13 = vpop.f32.mrf.mxu2  ;;  %v11186_v10 = vpop.f32.mrf.mxu3 }
0x141a   :  { %v11093_v7 = vadd.f32 %v11092_v32, %v11066_v13  ;;  %v11189_v59 = vmul.f32 0.35355338, %v11033_v21  ;;  %v11569_v21 = vsub.f32 %v11567_v36, %v11568_v43  ;;  %v11694_v32 = vand.u32 4294901760, %v11677_v51 }
0x141c   :  { %v11117_v27 = vadd.f32 %v11116_v29, %v11093_v7  ;;  %v11191_v11 = vsel %vm6561_vm1, %v11189_v59, -inf  ;;  %v11570_v29 = vand.u32 4294901760, %v11569_v21 }
0x141d   :  { %11192 = vmax.xlane.f32.xlu0 %v11191_v11 }
0x141e   :  { %v11141_v42 = vadd.f32 %v11140_v16, %v11117_v27  ;;  %v11721_v27 = vsub.f32 %v11677_v51, %v11694_v32 }
0x1421   :  { %v11164_v60 = vpop.f32.mrf.mxu2 }
0x1422   :  { %v11165_v19 = vadd.f32 %v11164_v60, %v11141_v42 }
0x1424   :  { %v11187_v22 = vadd.f32 %v11186_v10, %v11165_v19  ;;  %v11722_v19 = vand.u32 4294901760, %v11721_v27 }
0x1426   :  { %v11190_v24 = vmul.f32 0.35355338, %v11187_v22 }
0x1428   :  { %v11194_v14 = vsel %vm6561_vm1, %v11190_v24, -inf }
0x1429   :  { %11195 = vmax.xlane.f32.xlu1 %v11194_v14 }
0x1431   :  { %11365 = vrot.lane.b32.xlu0 %v19976_v54, %s13863_s30 }
0x1442   :  { %11517 = vrot.lane.b32.xlu1 %v19972_v63, %s13864_s0 }
0x144a   :  { %12155 = vrot.lane.b32.xlu1 %v19972_v63, %s13867_s18 }
0x1490   :  { %v11193_v31 = vpop.xlane.xlu0 %11192 }
0x1491   :  { %v11197_v38 = vsub.f32 %v11189_v59, %v11193_v31  ;;  %v11723_v31 = vsub.f32 %v11721_v27, %v11722_v19 }
0x1493   :  { %v11199_v30 = vmul.f32 1.442695, %v11197_v38 }
0x1495   :  { %13800 = vpow2.f32 %v11199_v30 }
0x149b   :  { %v13801_v46 = vpop.eup %13800 }
0x149c   :  { %v11196_v40 = vpop.xlane.xlu1 %11195  ;;  %v11203_v25 = vsel %vm6561_vm1, %v13801_v46, 0.0 }
0x149d   :  { %v11198_v37 = vsub.f32 %v11190_v24, %v11196_v40  ;;  %11204 = vadd.xlane.f32.xlu2 %v11203_v25  ;;  %v11724_v40 = vand.u32 4294901760, %v11723_v31 }
0x149f   :  { %v11201_v8 = vmul.f32 1.442695, %v11198_v37 }
0x14a1   :  { %13802 = vpow2.f32 %v11201_v8 }
0x14a3   :  { %v11366_v45 = vpop.permute.xlu0 %11365 }
0x14a4   :  { %v11386_v6 = vand.u32 4294901760, %v11366_v45 }
0x14a6   :  { %v11413_v41 = vsub.f32 %v11366_v45, %v11386_v6  ;;  %11387 = vmatpush.msrb.mxu2 %v11386_v6 }
0x14a7   :  { %v13803_v57 = vpop.eup %13802 }
0x14a8   :  { %v11414_v44 = vand.u32 4294901760, %v11413_v41  ;;  %v11206_v17 = vsel %vm6561_vm1, %v13803_v57, 0.0 }
0x14a9   :  { %11207 = vadd.xlane.f32.xlu2 %v11206_v17 }
0x14aa   :  { %v11415_v23 = vsub.f32 %v11413_v41, %v11414_v44 }
0x14ac   :  { %v11416_v28 = vand.u32 4294901760, %v11415_v23 }
0x14ae   :  { %11417 = vmatpush.msrb.mxu3 %v11416_v28 }
0x14b4   :  { %v11518_v16 = vpop.permute.xlu1 %11517 }
0x14b5   :  { %v11521_v10 = vsel %vm6561_vm1, %v11518_v16, 0 }
0x14b6   :  { %v11542_v24 = vand.u32 4294901760, %v11521_v10 }
0x14b8   :  { %v11543_v30 = vsub.f32 %v11521_v10, %v11542_v24 }
0x14ba   :  { %v11544_v37 = vand.u32 4294901760, %v11543_v30 }
0x14bc   :  { %v11545_v45 = vsub.f32 %v11543_v30, %v11544_v37 }
0x14c1   :  { %11671 = vrot.lane.b32.xlu2 %v19976_v54, %s13864_s0 }
0x1510   :  { %v11205_v18 = vpop.xlane.xlu2 %11204 }
0x1511   :  { %13804 = vrcp.f32 %v11205_v18 }
0x1517   :  { %v13805_v4 = vpop.eup %13804 }
0x1518   :  { %v11211_v1 = vmul.f32 %v13805_v4, %v13801_v46 }
0x151a   :  { %v11217_v26 = vsel %vm6561_vm1, %v11211_v1, 0 }
0x151b   :  { %v11236_v35 = vand.u32 4294901760, %v11217_v26 }
0x151c   :  { %v11208_v53 = vpop.xlane.xlu2 %11207 }
0x151d   :  { %v11237_v33 = vsub.f32 %v11217_v26, %v11236_v35  ;;  %13806 = vrcp.f32 %v11208_v53  ;;  %11267 = vmatmul.f32.vlgmr.msra.gmra.mxu1 %v11236_v35 }
0x151e   :  { %11463 = vmatpush.msra.mxu1 %v11386_v6 }
0x151f   :  { %11291 = vmatmul.f32.vlgmr.msra.gmra.mxu2 %v11237_v33  ;;  %v11238_v48 = vand.u32 4294901760, %v11237_v33 }
0x1520   :  { %11489 = vmatpush.msra.mxu2 %v11414_v44 }
0x1521   :  { %11315 = vmatmul.f32.vlgmr.msra.gmra.mxu3 %v11238_v48  ;;  %v11239_v13 = vsub.f32 %v11237_v33, %v11238_v48 }
0x1522   :  { %11511 = vmatpush.msra.mxu3 %v11386_v6 }
0x1523   :  { %v13807_v7 = vpop.eup %13806  ;;  %v11240_v59 = vand.u32 4294901760, %v11239_v13 }
0x1524   :  { %v11212_v11 = vmul.f32 %v13807_v7, %v13803_v57  ;;  %v11672_v25 = vpop.permute.xlu2 %11671 }
0x1525   :  { %11241 = vmatmul.f32.vlgmr.msra.gmra.mxu0 %v11240_v59  ;;  %11361 = vmatmul.f32.vlgmr.msrb.gmra.mxu1 %v11236_v35  ;;  %v11675_v8 = vsel %vm6561_vm1, %v11672_v25, 0 }
0x1526   :  { %v11369_v42 = vsel %vm6561_vm1, %v11212_v11, 0  ;;  %11440 = vmatpush.msra.mxu0 %v11413_v41  ;;  %11571 = vmatpush.xpose.msrb.mxu1 %v11570_v29  ;;  %v11696_v6 = vand.u32 4294901760, %v11675_v8  ;;  %v11546_v41 = vand.u32 4294901760, %v11545_v45 }
0x1527   :  { %v11388_v60 = vand.u32 4294901760, %v11369_v42 }
0x1528   :  { %v11697_v57 = vsub.f32 %v11675_v8, %v11696_v6 }
0x1529   :  { %v11389_v22 = vsub.f32 %v11369_v42, %v11388_v60  ;;  %11419 = vmatmul.f32.vlgmr.msrb.gmra.mxu3 %v11388_v60 }
0x152a   :  { %11617 = vmatpush.xpose.msrb.mxu3 %v11540_v3  ;;  %v11698_v44 = vand.u32 4294901760, %v11697_v57 }
0x152b   :  { %v11390_v14 = vand.u32 4294901760, %v11389_v22 }
0x152c   :  { %v11699_v17 = vsub.f32 %v11697_v57, %v11698_v44 }
0x152d   :  { %11339 = vmatmul.f32.vlgmr.msrb.gmra.mxu0 %v11236_v35  ;;  %11467 = vmatmul.f32.vlgmr.msra.gmra.mxu1 %v11390_v14  ;;  %v11391_v38 = vsub.f32 %v11389_v22, %v11390_v14 }
0x152e   :  { %11541 = vmatpush.xpose.msrb.mxu0 %v11540_v3  ;;  %11665 = vmatpush.xpose.msra.mxu1 %v11540_v3  ;;  %v11700_v23 = vand.u32 4294901760, %v11699_v17 }
0x152f   :  { %v11392_v46 = vand.u32 4294901760, %v11391_v38 }
0x1531   :  { %11393 = vmatmul.f32.vlgmr.msrb.gmra.mxu2 %v11392_v46  ;;  %11513 = vmatmul.f32.vlgmr.msra.gmra.mxu3 %v11388_v60 }
0x1532   :  { %11594 = vmatpush.xpose.msrb.mxu2 %v11567_v36  ;;  %11725 = vmatpush.xpose.msra.mxu3 %v11724_v40 }
0x1535   :  { %11443 = vmatmul.f32.vlgmr.msra.gmra.mxu0 %v11389_v22  ;;  %11573 = vmatmul.f32.vlgmr.msrb.gmra.mxu1 %v11542_v24 }
0x1536   :  { %11643 = vmatpush.xpose.msra.mxu0 %v11568_v43  ;;  %11771 = vmatpush.xpose.msrb.mxu1 %v11694_v32 }
0x1539   :  { %11491 = vmatmul.f32.vlgmr.msra.gmra.mxu2 %v11388_v60  ;;  %11621 = vmatmul.f32.vlgmr.msrb.gmra.mxu3 %v11544_v37 }
0x153a   :  { %11695 = vmatpush.xpose.msra.mxu2 %v11694_v32  ;;  %11819 = vmatpush.xpose.msrb.mxu3 %v11694_v32 }
0x153d   :  { %11547 = vmatmul.f32.vlgmr.msrb.gmra.mxu0 %v11546_v41  ;;  %11667 = vmatmul.f32.vlgmr.msra.gmra.mxu1 %v11542_v24 }
0x153e   :  { %11748 = vmatpush.xpose.msrb.mxu0 %v11721_v27 }
0x1541   :  { %11597 = vmatmul.f32.vlgmr.msrb.gmra.mxu2 %v11543_v30  ;;  %11727 = vmatmul.f32.vlgmr.msra.gmra.mxu3 %v11696_v6 }
0x1542   :  { %11797 = vmatpush.xpose.msrb.mxu2 %v11722_v19 }
0x1545   :  { %11645 = vmatmul.f32.vlgmr.msra.gmra.mxu0 %v11542_v24  ;;  %11775 = vmatmul.f32.vlgmr.msrb.gmra.mxu1 %v11698_v44 }
0x1549   :  { %11701 = vmatmul.f32.vlgmr.msra.gmra.mxu2 %v11700_v23  ;;  %11821 = vmatmul.f32.vlgmr.msrb.gmra.mxu3 %v11696_v6 }
0x154d   :  { %11751 = vmatmul.f32.vlgmr.msrb.gmra.mxu0 %v11697_v57 }
0x1551   :  { %11799 = vmatmul.f32.vlgmr.msrb.gmra.mxu2 %v11696_v6 }
0x159a   :  { %v11268_v28 = vpop.f32.mrf.mxu1 }
0x15a2   :  { %v11242_v52 = vpop.f32.mrf.mxu0  ;;  %v11292_v18 = vpop.f32.mrf.mxu2 }
0x15a3   :  { %v11269_v47 = vadd.f32 %v11268_v28, %v11242_v52  ;;  %v11362_v36 = vpop.f32.mrf.mxu1 }
0x15a4   :  { %v11316_v55 = vpop.f32.mrf.mxu3 }
0x15a5   :  { %v11293_v3 = vadd.f32 %v11292_v18, %v11269_v47 }
0x15a7   :  { %v11317_v4 = vadd.f32 %v11316_v55, %v11293_v3 }
0x15aa   :  { %v11340_v1 = vpop.f32.mrf.mxu0 }
0x15ab   :  { %v11341_v26 = vadd.f32 %v11340_v1, %v11317_v4  ;;  %v11468_v51 = vpop.f32.mrf.mxu1 }
0x15ac   :  { %v11420_v43 = vpop.f32.mrf.mxu3 }
0x15ad   :  { %v20056_v35 = vadd.f32 %v11362_v36, %v11341_v26 }
0x15b2   :  { %v11444_v53 = vpop.f32.mrf.mxu0 }
0x15b3   :  { %v11574_v27 = vpop.f32.mrf.mxu1 }
0x15b4   :  { %v11394_v33 = vpop.f32.mrf.mxu2  ;;  %v11514_v32 = vpop.f32.mrf.mxu3 }
0x15b5   :  { %v11421_v48 = vadd.f32 %v11420_v43, %v11394_v33 }
0x15b7   :  { %v11445_v21 = vadd.f32 %v11444_v53, %v11421_v48 }
0x15b9   :  { %v11469_v13 = vadd.f32 %v11468_v51, %v11445_v21 }
0x15ba   :  { %v11548_v7 = vpop.f32.mrf.mxu0 }
0x15bb   :  { %v11575_v42 = vadd.f32 %v11574_v27, %v11548_v7  ;;  %v11668_v24 = vpop.f32.mrf.mxu1 }
0x15bc   :  { %v11492_v59 = vpop.f32.mrf.mxu2  ;;  %v11622_v16 = vpop.f32.mrf.mxu3 }
0x15bd   :  { %v11493_v29 = vadd.f32 %v11492_v59, %v11469_v13 }
0x15bf   :  { %v20058_v11 = vadd.f32 %v11514_v32, %v11493_v29 }
0x15c2   :  { %v11646_v60 = vpop.f32.mrf.mxu0 }
0x15c3   :  { %v11776_v45 = vpop.f32.mrf.mxu1 }
0x15c4   :  { %v11598_v19 = vpop.f32.mrf.mxu2  ;;  %v11728_v38 = vpop.f32.mrf.mxu3 }
0x15c5   :  { %v11599_v10 = vadd.f32 %v11598_v19, %v11575_v42  ;;  %v12156_v42 = vpop.permute.xlu1 %12155 }
0x15c6   :  { %v12159_v19 = vsel %vm6561_vm1, %v12156_v42, 0 }
0x15c7   :  { %v11623_v22 = vadd.f32 %v11622_v16, %v11599_v10  ;;  %v12176_v10 = vand.u32 4294901760, %v12159_v19 }
0x15c9   :  { %v11647_v14 = vadd.f32 %v11646_v60, %v11623_v22 }
0x15ca   :  { %v11752_v25 = vpop.f32.mrf.mxu0 }
0x15cb   :  { %v11669_v31 = vadd.f32 %v11668_v24, %v11647_v14  ;;  %v12203_v24 = vsub.f32 %v12159_v19, %v12176_v10 }
0x15cc   :  { %v11702_v30 = vpop.f32.mrf.mxu2  ;;  %v11822_v44 = vpop.f32.mrf.mxu3 }
0x15cd   :  { %v11729_v46 = vadd.f32 %v11728_v38, %v11702_v30  ;;  %v11825_v40 = vmul.f32 0.35355338, %v11669_v31 }
0x15cf   :  { %v11753_v37 = vadd.f32 %v11752_v25, %v11729_v46  ;;  %v11827_v8 = vsel %vm6561_vm1, %v11825_v40, -inf  ;;  %v12204_v46 = vand.u32 4294901760, %v12203_v24 }
0x15d0   :  { %11828 = vmax.xlane.f32.xlu0 %v11827_v8 }
0x15d1   :  { %v11777_v6 = vadd.f32 %v11776_v45, %v11753_v37  ;;  %v12205_v45 = vsub.f32 %v12203_v24, %v12204_v46 }
0x15d4   :  { %v11800_v41 = vpop.f32.mrf.mxu2 }
0x15d5   :  { %v11801_v57 = vadd.f32 %v11800_v41, %v11777_v6 }
0x15d7   :  { %v11823_v17 = vadd.f32 %v11822_v44, %v11801_v57 }
0x15d9   :  { %v11826_v23 = vmul.f32 0.35355338, %v11823_v17  ;;  %v12206_v17 = vand.u32 4294901760, %v12205_v45 }
0x15db   :  { %v11830_v28 = vsel %vm6561_vm1, %v11826_v23, -inf }
0x15dc   :  { %11831 = vmax.xlane.f32.xlu2 %v11830_v28 }
0x15e4   :  { %12001 = vrot.lane.b32.xlu0 %v19976_v54, %s13865_s3 }
0x15f4   :  { %11849 = vrot.lane.b32.xlu2 %v19972_v63, %s13865_s3 }
0x15fc   :  { %12309 = vrot.lane.b32.xlu2 %v19976_v54, %s13867_s18 }
0x1643   :  { %v11829_v52 = vpop.xlane.xlu0 %11828 }
0x1644   :  { %v11833_v47 = vsub.f32 %v11825_v40, %v11829_v52 }
0x1646   :  { %v11835_v18 = vmul.f32 1.442695, %v11833_v47 }
0x1648   :  { %13808 = vpow2.f32 %v11835_v18 }
0x164e   :  { %v13809_v55 = vpop.eup %13808 }
0x164f   :  { %v11832_v3 = vpop.xlane.xlu2 %11831  ;;  %v11839_v4 = vsel %vm6561_vm1, %v13809_v55, 0.0 }
0x1650   :  { %v11834_v36 = vsub.f32 %v11826_v23, %v11832_v3  ;;  %11840 = vadd.xlane.f32.xlu1 %v11839_v4 }
0x1652   :  { %v11837_v1 = vmul.f32 1.442695, %v11834_v36 }
0x1654   :  { %13810 = vpow2.f32 %v11837_v1 }
0x1656   :  { %v12002_v26 = vpop.permute.xlu0 %12001 }
0x1657   :  { %v12022_v43 = vand.u32 4294901760, %v12002_v26  ;;  %v11850_v53 = vpop.permute.xlu2 %11849 }
0x1658   :  { %v11870_v51 = vand.u32 4294901760, %v11850_v53 }
0x1659   :  { %v12049_v33 = vsub.f32 %v12002_v26, %v12022_v43 }
0x165a   :  { %v13811_v48 = vpop.eup %13810  ;;  %v11897_v21 = vsub.f32 %v11850_v53, %v11870_v51  ;;  %11871 = vmatpush.msra.mxu0 %v11870_v51  ;;  %11947 = vmatpush.msra.mxu3 %v11870_v51 }
0x165b   :  { %v12050_v32 = vand.u32 4294901760, %v12049_v33  ;;  %v11842_v13 = vsel %vm6561_vm1, %v13811_v48, 0.0 }
0x165c   :  { %v11898_v7 = vand.u32 4294901760, %v11897_v21  ;;  %11924 = vmatpush.msra.mxu2 %v11897_v21  ;;  %11843 = vadd.xlane.f32.xlu0 %v11842_v13 }
0x165d   :  { %v12051_v59 = vsub.f32 %v12049_v33, %v12050_v32 }
0x165e   :  { %12023 = vmatpush.msrb.mxu2 %v12022_v43  ;;  %v11899_v29 = vsub.f32 %v11897_v21, %v11898_v7  ;;  %11973 = vmatpush.msrb.mxu0 %v11898_v7 }
0x165f   :  { %v12052_v27 = vand.u32 4294901760, %v12051_v59  ;;  %v12310_v31 = vpop.permute.xlu2 %12309 }
0x1660   :  { %v11900_v16 = vand.u32 4294901760, %v11899_v29  ;;  %v12313_v25 = vsel %vm6561_vm1, %v12310_v31, 0 }
0x1661   :  { %12053 = vmatpush.msrb.mxu3 %v12052_v27  ;;  %v12330_v6 = vand.u32 4294901760, %v12313_v25 }
0x1662   :  { %11901 = vmatpush.msra.mxu1 %v11900_v16 }
0x1663   :  { %v12357_v23 = vsub.f32 %v12313_v25, %v12330_v6 }
0x1664   :  { %11995 = vmatpush.msrb.mxu1 %v11870_v51 }
0x1665   :  { %v12358_v18 = vand.u32 4294901760, %v12357_v23 }
0x1667   :  { %v12359_v4 = vsub.f32 %v12357_v23, %v12358_v18 }
0x1669   :  { %12307 = vrot.lane.b32.xlu1 %v19976_v54, %s13866_s17 }
0x1670   :  { %12153 = vrot.lane.b32.xlu0 %v19972_v63, %s13866_s17 }
0x16c3   :  { %v11841_v60 = vpop.xlane.xlu1 %11840 }
0x16c4   :  { %13812 = vrcp.f32 %v11841_v60 }
0x16ca   :  { %v13813_v22 = vpop.eup %13812 }
0x16cb   :  { %v11847_v14 = vmul.f32 %v13813_v22, %v13809_v55 }
0x16cd   :  { %v11853_v38 = vsel %vm6561_vm1, %v11847_v14, 0 }
0x16ce   :  { %v11872_v30 = vand.u32 4294901760, %v11853_v38 }
0x16cf   :  { %v11844_v40 = vpop.xlane.xlu0 %11843 }
0x16d0   :  { %v11873_v37 = vsub.f32 %v11853_v38, %v11872_v30  ;;  %13814 = vrcp.f32 %v11844_v40  ;;  %11903 = vmatmul.f32.vlgmr.msra.gmra.mxu1 %v11872_v30 }
0x16d1   :  { %12099 = vmatpush.msra.mxu1 %v12022_v43 }
0x16d2   :  { %11927 = vmatmul.f32.vlgmr.msra.gmra.mxu2 %v11873_v37  ;;  %v11874_v8 = vand.u32 4294901760, %v11873_v37 }
0x16d3   :  { %12125 = vmatpush.msra.mxu2 %v12050_v32 }
0x16d4   :  { %11951 = vmatmul.f32.vlgmr.msra.gmra.mxu3 %v11874_v8  ;;  %v11875_v41 = vsub.f32 %v11873_v37, %v11874_v8 }
0x16d5   :  { %12147 = vmatpush.msra.mxu3 %v12022_v43  ;;  %v12360_v43 = vand.u32 4294901760, %v12359_v4 }
0x16d6   :  { %v13815_v57 = vpop.eup %13814  ;;  %v11876_v44 = vand.u32 4294901760, %v11875_v41 }
0x16d7   :  { %v11848_v28 = vmul.f32 %v13815_v57, %v13811_v48 }
0x16d8   :  { %11877 = vmatmul.f32.vlgmr.msra.gmra.mxu0 %v11876_v44  ;;  %11997 = vmatmul.f32.vlgmr.msrb.gmra.mxu1 %v11872_v30 }
0x16d9   :  { %v12005_v52 = vsel %vm6561_vm1, %v11848_v28, 0  ;;  %12076 = vmatpush.msra.mxu0 %v12049_v33  ;;  %12207 = vmatpush.xpose.msrb.mxu1 %v12206_v17 }
0x16da   :  { %v12024_v47 = vand.u32 4294901760, %v12005_v52 }
0x16db   :  { %v12308_v51 = vpop.permute.xlu1 %12307 }
0x16dc   :  { %v12025_v55 = vsub.f32 %v12005_v52, %v12024_v47  ;;  %12055 = vmatmul.f32.vlgmr.msrb.gmra.mxu3 %v12024_v47  ;;  %v12311_v21 = vsel %vm6561_vm1, %v12308_v51, 0 }
0x16dd   :  { %12253 = vmatpush.xpose.msrb.mxu3 %v12176_v10  ;;  %v12332_v13 = vand.u32 4294901760, %v12311_v21 }
0x16de   :  { %v12026_v3 = vand.u32 4294901760, %v12025_v55 }
0x16df   :  { %v12333_v59 = vsub.f32 %v12311_v21, %v12332_v13 }
0x16e0   :  { %11975 = vmatmul.f32.vlgmr.msrb.gmra.mxu0 %v11872_v30  ;;  %12103 = vmatmul.f32.vlgmr.msra.gmra.mxu1 %v12026_v3  ;;  %v12027_v36 = vsub.f32 %v12025_v55, %v12026_v3 }
0x16e1   :  { %12177 = vmatpush.xpose.msrb.mxu0 %v12176_v10  ;;  %12301 = vmatpush.xpose.msra.mxu1 %v12176_v10  ;;  %v12334_v27 = vand.u32 4294901760, %v12333_v59 }
0x16e2   :  { %v12154_v1 = vpop.permute.xlu0 %12153  ;;  %v12028_v26 = vand.u32 4294901760, %v12027_v36 }
0x16e3   :  { %v12157_v53 = vsel %vm6561_vm1, %v12154_v1, 0  ;;  %v12335_v16 = vsub.f32 %v12333_v59, %v12334_v27 }
0x16e4   :  { %v12178_v33 = vand.u32 4294901760, %v12157_v53  ;;  %12029 = vmatmul.f32.vlgmr.msrb.gmra.mxu2 %v12028_v26  ;;  %12149 = vmatmul.f32.vlgmr.msra.gmra.mxu3 %v12024_v47 }
0x16e5   :  { %12230 = vmatpush.xpose.msrb.mxu2 %v12203_v24  ;;  %12361 = vmatpush.xpose.msra.mxu3 %v12360_v43  ;;  %v12336_v42 = vand.u32 4294901760, %v12335_v16 }
0x16e6   :  { %v12179_v48 = vsub.f32 %v12157_v53, %v12178_v33 }
0x16e8   :  { %v12180_v32 = vand.u32 4294901760, %v12179_v48  ;;  %12079 = vmatmul.f32.vlgmr.msra.gmra.mxu0 %v12025_v55  ;;  %12209 = vmatmul.f32.vlgmr.msrb.gmra.mxu1 %v12178_v33 }
0x16e9   :  { %12279 = vmatpush.xpose.msra.mxu0 %v12204_v46  ;;  %12407 = vmatpush.xpose.msrb.mxu1 %v12330_v6 }
0x16ea   :  { %v12181_v7 = vsub.f32 %v12179_v48, %v12180_v32 }
0x16ec   :  { %12127 = vmatmul.f32.vlgmr.msra.gmra.mxu2 %v12024_v47  ;;  %12257 = vmatmul.f32.vlgmr.msrb.gmra.mxu3 %v12180_v32  ;;  %v12182_v29 = vand.u32 4294901760, %v12181_v7 }
0x16ed   :  { %12331 = vmatpush.xpose.msra.mxu2 %v12330_v6  ;;  %12455 = vmatpush.xpose.msrb.mxu3 %v12330_v6 }
0x16f0   :  { %12183 = vmatmul.f32.vlgmr.msrb.gmra.mxu0 %v12182_v29  ;;  %12303 = vmatmul.f32.vlgmr.msra.gmra.mxu1 %v12178_v33 }
0x16f1   :  { %12384 = vmatpush.xpose.msrb.mxu0 %v12357_v23 }
0x16f4   :  { %12233 = vmatmul.f32.vlgmr.msrb.gmra.mxu2 %v12179_v48  ;;  %12363 = vmatmul.f32.vlgmr.msra.gmra.mxu3 %v12332_v13 }
0x16f5   :  { %12433 = vmatpush.xpose.msrb.mxu2 %v12358_v18 }
0x16f8   :  { %12281 = vmatmul.f32.vlgmr.msra.gmra.mxu0 %v12178_v33  ;;  %12411 = vmatmul.f32.vlgmr.msrb.gmra.mxu1 %v12334_v27 }
0x16fc   :  { %12337 = vmatmul.f32.vlgmr.msra.gmra.mxu2 %v12336_v42  ;;  %12457 = vmatmul.f32.vlgmr.msrb.gmra.mxu3 %v12332_v13 }
0x1700   :  { %12387 = vmatmul.f32.vlgmr.msrb.gmra.mxu0 %v12333_v59 }
0x1704   :  { %12435 = vmatmul.f32.vlgmr.msrb.gmra.mxu2 %v12332_v13 }
0x174d   :  { %v11904_v60 = vpop.f32.mrf.mxu1 }
0x1755   :  { %v11878_v19 = vpop.f32.mrf.mxu0  ;;  %v11928_v22 = vpop.f32.mrf.mxu2 }
0x1756   :  { %v11905_v10 = vadd.f32 %v11904_v60, %v11878_v19  ;;  %v11998_v38 = vpop.f32.mrf.mxu1 }
0x1757   :  { %v11952_v24 = vpop.f32.mrf.mxu3 }
0x1758   :  { %v11929_v14 = vadd.f32 %v11928_v22, %v11905_v10 }
0x175a   :  { %v11953_v31 = vadd.f32 %v11952_v24, %v11929_v14 }
0x175d   :  { %v11976_v30 = vpop.f32.mrf.mxu0 }
0x175e   :  { %v11977_v46 = vadd.f32 %v11976_v30, %v11953_v31  ;;  %v12104_v8 = vpop.f32.mrf.mxu1 }
0x175f   :  { %v12056_v25 = vpop.f32.mrf.mxu3 }
0x1760   :  { %v11999_v40 = vadd.f32 %v11998_v38, %v11977_v46 }
0x1765   :  { %v12080_v37 = vpop.f32.mrf.mxu0 }
0x1766   :  { %v12210_v52 = vpop.f32.mrf.mxu1 }
0x1767   :  { %v12030_v45 = vpop.f32.mrf.mxu2  ;;  %v12150_v57 = vpop.f32.mrf.mxu3 }
0x1768   :  { %v12057_v6 = vadd.f32 %v12056_v25, %v12030_v45 }
0x176a   :  { %v12081_v41 = vadd.f32 %v12080_v37, %v12057_v6 }
0x176c   :  { %v12105_v44 = vadd.f32 %v12104_v8, %v12081_v41 }
0x176d   :  { %v12184_v17 = vpop.f32.mrf.mxu0 }
0x176e   :  { %v12211_v55 = vadd.f32 %v12210_v52, %v12184_v17  ;;  %v12304_v26 = vpop.f32.mrf.mxu1 }
0x176f   :  { %v12128_v23 = vpop.f32.mrf.mxu2  ;;  %v12258_v18 = vpop.f32.mrf.mxu3 }
0x1770   :  { %v12129_v28 = vadd.f32 %v12128_v23, %v12105_v44 }
0x1772   :  { %v12151_v47 = vadd.f32 %v12150_v57, %v12129_v28 }
0x1775   :  { %v12282_v3 = vpop.f32.mrf.mxu0 }
0x1776   :  { %v12412_v59 = vpop.f32.mrf.mxu1 }
0x1777   :  { %v12234_v4 = vpop.f32.mrf.mxu2  ;;  %v12364_v51 = vpop.f32.mrf.mxu3 }
0x1778   :  { %v12235_v36 = vadd.f32 %v12234_v4, %v12211_v55 }
0x177a   :  { %v12259_v1 = vadd.f32 %v12258_v18, %v12235_v36 }
0x177c   :  { %v12283_v43 = vadd.f32 %v12282_v3, %v12259_v1 }
0x177d   :  { %v12388_v32 = vpop.f32.mrf.mxu0 }
0x177e   :  { %v12305_v53 = vadd.f32 %v12304_v26, %v12283_v43 }
0x177f   :  { %v12338_v33 = vpop.f32.mrf.mxu2  ;;  %v12458_v42 = vpop.f32.mrf.mxu3 }
0x1780   :  { %v12365_v48 = vadd.f32 %v12364_v51, %v12338_v33  ;;  %v12461_v21 = vmul.f32 0.35355338, %v12305_v53 }
0x1782   :  { %v12389_v13 = vadd.f32 %v12388_v32, %v12365_v48  ;;  %v12463_v7 = vsel %vm6561_vm1, %v12461_v21, -inf }
0x1783   :  { %12464 = vmax.xlane.f32.xlu0 %v12463_v7 }
0x1784   :  { %v12413_v29 = vadd.f32 %v12412_v59, %v12389_v13 }
0x1787   :  { %v12436_v27 = vpop.f32.mrf.mxu2 }
0x1788   :  { %v12437_v16 = vadd.f32 %v12436_v27, %v12413_v29  ;;  %v13688_v29 = vld [vmem:[%s20294_s6 + $0x38] sm:$0xff] }
0x178a   :  { %v12459_v60 = vadd.f32 %v12458_v42, %v12437_v16  ;;  %v20099_v16 = vand.u32 4294901760, %v13688_v29 }
0x178c   :  { %v12462_v19 = vmul.f32 0.35355338, %v12459_v60 }
0x178e   :  { %v12466_v10 = vsel %vm6561_vm1, %v12462_v19, -inf }
0x178f   :  { %12467 = vmax.xlane.f32.xlu2 %v12466_v10 }
0x17a7   :  { %12485 = vrot.lane.b32.xlu2 %v19972_v63, %s13868_s20 }
0x17af   :  { %12799 = vrot.lane.b32.xlu2 %v11999_v40, %s13869_s21 }
0x17b7   :  { %12801 = vrot.lane.b32.xlu2 %v12151_v47, %s13869_s21 }
0x17f6   :  { %v12465_v22 = vpop.xlane.xlu0 %12464 }
0x17f7   :  { %v12469_v24 = vsub.f32 %v12461_v21, %v12465_v22 }
0x17f9   :  { %v12471_v14 = vmul.f32 1.442695, %v12469_v24 }
0x17fb   :  { %13816 = vpow2.f32 %v12471_v14 }
0x1801   :  { %v13817_v31 = vpop.eup %13816 }
0x1802   :  { %v12468_v38 = vpop.xlane.xlu2 %12467  ;;  %v12475_v30 = vsel %vm6561_vm1, %v13817_v31, 0.0 }
0x1803   :  { %v12470_v46 = vsub.f32 %v12462_v19, %v12468_v38  ;;  %12476 = vadd.xlane.f32.xlu1 %v12475_v30  ;;  %v12878_v19 = vsub.f32 %v13688_v29, %v20099_v16 }
0x1805   :  { %v12473_v25 = vmul.f32 1.442695, %v12470_v46  ;;  %v12879_v10 = vand.u32 4294901760, %v12878_v19 }
0x1807   :  { %13818 = vpow2.f32 %v12473_v25  ;;  %v12880_v14 = vsub.f32 %v12878_v19, %v12879_v10 }
0x1809   :  { %v12881_v30 = vand.u32 4294901760, %v12880_v14 }
0x180a   :  { %v12486_v37 = vpop.permute.xlu2 %12485 }
0x180b   :  { %v12506_v8 = vand.u32 4294901760, %v12486_v37 }
0x180d   :  { %v13819_v45 = vpop.eup %13818  ;;  %v12533_v63 = vsub.f32 %v12486_v37, %v12506_v8  ;;  %12507 = vmatpush.msra.mxu0 %v12506_v8  ;;  %12583 = vmatpush.msra.mxu3 %v12506_v8 }
0x180e   :  { %v12478_v40 = vsel %vm6561_vm1, %v13819_v45, 0.0 }
0x180f   :  { %v12534_v6 = vand.u32 4294901760, %v12533_v63  ;;  %12479 = vadd.xlane.f32.xlu0 %v12478_v40  ;;  %12560 = vmatpush.msra.mxu2 %v12533_v63 }
0x1811   :  { %v12535_v41 = vsub.f32 %v12533_v63, %v12534_v6  ;;  %12609 = vmatpush.msrb.mxu0 %v12534_v6 }
0x1813   :  { %v12536_v57 = vand.u32 4294901760, %v12535_v41 }
0x1815   :  { %12537 = vmatpush.msra.mxu1 %v12536_v57 }
0x1817   :  { %12631 = vmatpush.msrb.mxu1 %v12506_v8 }
0x181c   :  { %12637 = vrot.lane.b32.xlu1 %v19976_v54, %s13868_s20 }
0x1823   :  { %12791 = vrot.lane.b32.xlu0 %v20056_v35, %s21014_s5 }
0x1824   :  { %12793 = vrot.lane.b32.xlu1 %v20058_v11, %s21014_s5 }
0x1876   :  { %v12477_v44 = vpop.xlane.xlu1 %12476 }
0x1877   :  { %13820 = vrcp.f32 %v12477_v44 }
0x187d   :  { %v13821_v17 = vpop.eup %13820 }
0x187e   :  { %v12483_v23 = vmul.f32 %v13821_v17, %v13817_v31 }
0x1880   :  { %v12489_v28 = vsel %vm6561_vm1, %v12483_v23, 0 }
0x1881   :  { %v12508_v52 = vand.u32 4294901760, %v12489_v28 }
0x1882   :  { %v12480_v47 = vpop.xlane.xlu0 %12479 }
0x1883   :  { %v12509_v18 = vsub.f32 %v12489_v28, %v12508_v52  ;;  %13822 = vrcp.f32 %v12480_v47  ;;  %12539 = vmatmul.f32.vlgmr.msra.gmra.mxu1 %v12508_v52  ;;  %v13687_v28 = vld [vmem:[%s20294_s6 + $0x30] sm:$0xff]  ;;  %v13686_v47 = vld [vmem:[%s20294_s6 + $0x28] sm:$0xff] }
0x1885   :  { %12563 = vmatmul.f32.vlgmr.msra.gmra.mxu2 %v12509_v18  ;;  %v12510_v55 = vand.u32 4294901760, %v12509_v18 }
0x1887   :  { %12587 = vmatmul.f32.vlgmr.msra.gmra.mxu3 %v12510_v55  ;;  %v12511_v54 = vsub.f32 %v12509_v18, %v12510_v55  ;;  %v12844_v55 = vand.u32 4294901760, %v13686_v47 }
0x1889   :  { %v13823_v3 = vpop.eup %13822  ;;  %v12512_v35 = vand.u32 4294901760, %v12511_v54  ;;  %v13685_v54 = vld [vmem:[%s20294_s6 + $0x20] sm:$0xff] }
0x188a   :  { %v12484_v4 = vmul.f32 %v13823_v3, %v13819_v45 }
0x188b   :  { %12513 = vmatmul.f32.vlgmr.msra.gmra.mxu0 %v12512_v35  ;;  %12633 = vmatmul.f32.vlgmr.msrb.gmra.mxu1 %v12508_v52  ;;  %v12890_v35 = vsub.f32 %v13686_v47, %v12844_v55 }
0x188c   :  { %v12641_v11 = vsel %vm6561_vm1, %v12484_v4, 0  ;;  %v12846_v4 = vand.u32 4294901760, %v13685_v54 }
0x188d   :  { %v12660_v36 = vand.u32 4294901760, %v12641_v11 }
0x188e   :  { %v12638_v1 = vpop.permute.xlu1 %12637 }
0x188f   :  { %v12661_v26 = vsub.f32 %v12641_v11, %v12660_v36  ;;  %v12658_v43 = vand.u32 4294901760, %v12638_v1 }
0x1891   :  { %v12685_v53 = vsub.f32 %v12638_v1, %v12658_v43  ;;  %12659 = vmatpush.msrb.mxu2 %v12658_v43  ;;  %12735 = vmatpush.msra.mxu1 %v12658_v43  ;;  %v12662_v51 = vand.u32 4294901760, %v12661_v26  ;;  %v12896_v1 = vsub.f32 %v13685_v54, %v12846_v4 }
0x1893   :  { %v12686_v33 = vand.u32 4294901760, %v12685_v53  ;;  %12611 = vmatmul.f32.vlgmr.msrb.gmra.mxu0 %v12508_v52  ;;  %12739 = vmatmul.f32.vlgmr.msra.gmra.mxu1 %v12662_v51  ;;  %v12663_v48 = vsub.f32 %v12661_v26, %v12662_v51  ;;  %v12842_v52 = vand.u32 4294901760, %v13687_v28 }
0x1894   :  { %12712 = vmatpush.msra.mxu0 %v12685_v53  ;;  %12882 = vmatpush.msrb.mxu1 %v12881_v30 }
0x1895   :  { %v12687_v21 = vsub.f32 %v12685_v53, %v12686_v33  ;;  %12761 = vmatpush.msra.mxu2 %v12686_v33  ;;  %v12664_v32 = vand.u32 4294901760, %v12663_v48  ;;  %v12884_v18 = vsub.f32 %v13687_v28, %v12842_v52  ;;  %v12897_v53 = vand.u32 4294901760, %v12896_v1 }
0x1896   :  { %12841 = vmatpush.msrb.mxu0 %v20099_v16 }
0x1897   :  { %v12688_v13 = vand.u32 4294901760, %v12687_v21  ;;  %12665 = vmatmul.f32.vlgmr.msrb.gmra.mxu2 %v12664_v32  ;;  %v12885_v3 = vand.u32 4294901760, %v12884_v18  ;;  %v12898_v33 = vsub.f32 %v12896_v1, %v12897_v53  ;;  %v10633_v21 = vadd.f32 %v20016_v62, %v20014_v0 }
0x1898   :  { %12924 = vmatpush.msrb.mxu2 %v12878_v19  ;;  %12843 = vmatpush.msrb.mxu0 %v12842_v52 }
0x1899   :  { %12689 = vmatpush.msrb.mxu3 %v12688_v13  ;;  %v12886_v11 = vsub.f32 %v12884_v18, %v12885_v3  ;;  %v12899_v48 = vand.u32 4294901760, %v12898_v33  ;;  %v10657_v32 = vadd.f32 %v20022_v61, %v10633_v21 }
0x189a   :  { %12691 = vmatmul.f32.vlgmr.msrb.gmra.mxu3 %v12660_v36  ;;  %12927 = vmatpush.msrb.mxu2 %v12884_v18 }
0x189b   :  { %12783 = vmatpush.msra.mxu3 %v12658_v43  ;;  %12715 = vmatmul.f32.vlgmr.msra.gmra.mxu0 %v12661_v26  ;;  %v12887_v26 = vand.u32 4294901760, %v12886_v11  ;;  %v10681_v13 = vadd.f32 %v20018_v9, %v10657_v32 }
0x189c   :  { %12845 = vmatpush.msrb.mxu0 %v12844_v55  ;;  %12930 = vmatpush.msrb.mxu2 %v12890_v35 }
0x189d   :  { %12958 = vmatpush.msrb.mxu3 %v20099_v16  ;;  %12888 = vmatpush.msrb.mxu1 %v12887_v26 }
0x189e   :  { %12847 = vmatpush.msrb.mxu0 %v12846_v4  ;;  %12933 = vmatpush.msrb.mxu2 %v12896_v1 }
0x189f   :  { %12763 = vmatmul.f32.vlgmr.msra.gmra.mxu2 %v12660_v36  ;;  %12960 = vmatpush.msrb.mxu3 %v12842_v52 }
0x18a0   :  { %12993 = vmatpush.msra.mxu0 %v12879_v10 }
0x18a1   :  { %12962 = vmatpush.msrb.mxu3 %v12844_v55 }
0x18a2   :  { %12785 = vmatmul.f32.vlgmr.msra.gmra.mxu3 %v12660_v36  ;;  %v12891_v36 = vand.u32 4294901760, %v12890_v35  ;;  %12997 = vmatpush.msra.mxu0 %v12885_v3 }
0x18a3   :  { %12964 = vmatpush.msrb.mxu3 %v12846_v4 }
0x18a4   :  { %v12892_v43 = vsub.f32 %v12890_v35, %v12891_v36  ;;  %13001 = vmatpush.msra.mxu0 %v12891_v36 }
0x18a6   :  { %v12893_v51 = vand.u32 4294901760, %v12892_v43  ;;  %13005 = vmatpush.msra.mxu0 %v12897_v53 }
0x18a8   :  { %12894 = vmatpush.msrb.mxu1 %v12893_v51 }
0x18aa   :  { %12900 = vmatpush.msrb.mxu1 %v12899_v48 }
0x18ac   :  { %13028 = vmatpush.msra.mxu1 %v20099_v16  ;;  %v10785_v16 = vadd.f32 %v20026_v20, %v20032_v49 }
0x18ae   :  { %13030 = vmatpush.msra.mxu1 %v12842_v52  ;;  %v10809_v9 = vadd.f32 %v20028_v56, %v10785_v16 }
0x18b0   :  { %13032 = vmatpush.msra.mxu1 %v12844_v55 }
0x18b2   :  { %13034 = vmatpush.msra.mxu1 %v12846_v4 }
0x1900   :  { %v12540_v7 = vpop.f32.mrf.mxu1 }
0x1908   :  { %v12514_v59 = vpop.f32.mrf.mxu0  ;;  %v12564_v42 = vpop.f32.mrf.mxu2 }
0x1909   :  { %v12541_v27 = vadd.f32 %v12540_v7, %v12514_v59  ;;  %v12634_v46 = vpop.f32.mrf.mxu1  ;;  %v10705_v7 = vadd.f32 %v20020_v15, %v10681_v13  ;;  %v12792_v59 = vpop.permute.xlu0 %12791 }
0x190a   :  { %v12588_v22 = vpop.f32.mrf.mxu3 }
0x190b   :  { %v12565_v60 = vadd.f32 %v12564_v42, %v12541_v27  ;;  %v10727_v29 = vadd.f32 %v20024_v39, %v10705_v7  ;;  %v12800_v42 = vpop.permute.xlu2 %12799  ;;  %v10833_v39 = vadd.f32 %v20030_v12, %v10809_v9 }
0x190d   :  { %v12589_v24 = vadd.f32 %v12588_v22, %v12565_v60  ;;  %v12813_v27 = vsel %vm6561_vm1, %v10727_v29, %v12792_v59  ;;  %v10857_v20 = vadd.f32 %v20036_v58, %v10833_v39 }
0x190e   :  { %v12815_v60 = vsel %vm9127_vm2, %v12813_v27, %v12800_v42 }
0x190f   :  { %v10879_v14 = vadd.f32 %v20034_v2, %v10857_v20  ;;  %v13690_v20 = vld [vmem:[%s20298_s10 + $0x20] sm:$0xff] }
0x1910   :  { %v12612_v31 = vpop.f32.mrf.mxu0 }
0x1911   :  { %v12613_v38 = vadd.f32 %v12612_v31, %v12589_v24  ;;  %v12740_v6 = vpop.f32.mrf.mxu1  ;;  %v12794_v24 = vpop.permute.xlu1 %12793 }
0x1912   :  { %v12814_v31 = vsel %vm6561_vm1, %v10879_v14, %v12794_v24 }
0x1913   :  { %v12635_v25 = vadd.f32 %v12634_v46, %v12613_v38  ;;  %v12802_v38 = vpop.permute.xlu2 %12801 }
0x1914   :  { %v12816_v56 = vsel %vm9127_vm2, %v12814_v31, %v12802_v38  ;;  %v13127_v31 = vand.u32 4294901760, %v13690_v20 }
0x1915   :  { %12807 = vrot.lane.b32.xlu0 %v12635_v25, %s21015_s2 }
0x1918   :  { %v12716_v63 = vpop.f32.mrf.mxu0 }
0x191a   :  { %v12666_v37 = vpop.f32.mrf.mxu2 }
0x191d   :  { %v12692_v8 = vpop.f32.mrf.mxu3 }
0x191e   :  { %v12693_v45 = vadd.f32 %v12692_v8, %v12666_v37 }
0x1920   :  { %v12717_v40 = vadd.f32 %v12716_v63, %v12693_v45  ;;  %v13743_v63 = vld [vmem:[%s20295_s7 + $0x1] ss:$0 sm:$0xff] }
0x1922   :  { %v12741_v41 = vadd.f32 %v12740_v6, %v12717_v40  ;;  %v12764_v57 = vpop.f32.mrf.mxu2 }
0x1924   :  { %v12765_v44 = vadd.f32 %v12764_v57, %v12741_v41 }
0x1925   :  { %v12786_v17 = vpop.f32.mrf.mxu3 }
0x1926   :  { %v12787_v23 = vadd.f32 %v12786_v17, %v12765_v44 }
0x1928   :  { %12809 = vrot.lane.b32.xlu0 %v12787_v23, %s21015_s2 }
0x1987   :  { %v12808_v19 = vpop.permute.xlu0 %12807 }
0x1988   :  { %v12817_v0 = vsel %vm9130_vm3, %v12815_v60, %v12808_v19  ;;  %v13693_v19 = vld [vmem:[%s20298_s10 + $0x38] sm:$0xff] }
0x1989   :  { %v12823_v62 = vsel %vm6335_vm0, %v12817_v0, 0  ;;  %v13121_v0 = vand.u32 4294901760, %v13693_v19 }
0x198a   :  { %v12848_v61 = vand.u32 4294901760, %v12823_v62 }
0x198b   :  { %13122 = vmatpush.msra.mxu2 %v13121_v0 }
0x198c   :  { %v12849_v15 = vsub.f32 %v12823_v62, %v12848_v61  ;;  %12902 = vmatmul.f32.vlgmr.msrb.gmra.mxu1 %v12848_v61  ;;  %v13692_v62 = vld [vmem:[%s20298_s10 + $0x30] sm:$0xff] }
0x198d   :  { %v13123_v9 = vand.u32 4294901760, %v13692_v62  ;;  %13239 = vmatpush.msrb.mxu1 %v13121_v0 }
0x198e   :  { %v12850_v10 = vand.u32 4294901760, %v12849_v15  ;;  %12936 = vmatmul.f32.vlgmr.msrb.gmra.mxu2 %v12849_v15 }
0x198f   :  { %v13165_v39 = vsub.f32 %v13692_v62, %v13123_v9  ;;  %13241 = vmatpush.msrb.mxu1 %v13123_v9  ;;  %13124 = vmatpush.msra.mxu2 %v13123_v9 }
0x1990   :  { %v12851_v22 = vsub.f32 %v12849_v15, %v12850_v10  ;;  %12968 = vmatmul.f32.vlgmr.msrb.gmra.mxu3 %v12850_v10  ;;  %v13691_v15 = vld [vmem:[%s20298_s10 + $0x28] sm:$0xff] }
0x1991   :  { %v13166_v24 = vand.u32 4294901760, %v13165_v39 }
0x1992   :  { %v12852_v49 = vand.u32 4294901760, %v12851_v22  ;;  %v13125_v22 = vand.u32 4294901760, %v13691_v15 }
0x1994   :  { %12853 = vmatmul.f32.vlgmr.msrb.gmra.mxu0 %v12852_v49  ;;  %v13171_v14 = vsub.f32 %v13691_v15, %v13125_v22  ;;  %13243 = vmatpush.msrb.mxu1 %v13125_v22 }
0x1995   :  { %13126 = vmatpush.msra.mxu2 %v13125_v22 }
0x1996   :  { %13245 = vmatpush.msrb.mxu1 %v13127_v31 }
0x1997   :  { %13128 = vmatpush.msra.mxu2 %v13127_v31 }
0x199a   :  { %v12810_v30 = vpop.permute.xlu0 %12809 }
0x199b   :  { %v12818_v46 = vsel %vm9130_vm3, %v12816_v56, %v12810_v30  ;;  %v13167_v30 = vsub.f32 %v13165_v39, %v13166_v24  ;;  %v13172_v56 = vand.u32 4294901760, %v13171_v14 }
0x199c   :  { %v12826_v25 = vsel %vm6335_vm0, %v12818_v46, 0  ;;  %v13177_v46 = vsub.f32 %v13690_v20, %v13127_v31 }
0x199d   :  { %v12856_v12 = vand.u32 4294901760, %v12826_v25 }
0x199f   :  { %v12857_v37 = vsub.f32 %v12826_v25, %v12856_v12  ;;  %12906 = vmatmul.f32.gmra.mxu1 %v12856_v12  ;;  %v13168_v25 = vand.u32 4294901760, %v13167_v30  ;;  %v13698_v30 = vld [vmem:[%s20300_s12 + $0x58] sm:$0xff] }
0x19a1   :  { %12941 = vmatmul.f32.gmra.mxu2 %v12857_v37  ;;  %v12858_v58 = vand.u32 4294901760, %v12857_v37 }
0x19a3   :  { %12974 = vmatmul.f32.gmra.mxu3 %v12858_v58  ;;  %v12859_v8 = vsub.f32 %v12857_v37, %v12858_v58  ;;  %v13178_v37 = vand.u32 4294901760, %v13177_v46 }
0x19a5   :  { %v12860_v45 = vand.u32 4294901760, %v12859_v8  ;;  %v13179_v8 = vsub.f32 %v13177_v46, %v13178_v37 }
0x19a7   :  { %12861 = vmatmul.f32.gmra.mxu0 %v12860_v45  ;;  %13036 = vmatmul.f32.vlgmr.msra.gmra.mxu1 %v12848_v61  ;;  %v13180_v45 = vand.u32 4294901760, %v13179_v8 }
0x19af   :  { %13007 = vmatmul.f32.vlgmr.msra.gmra.mxu0 %v12848_v61  ;;  %13040 = vmatmul.f32.gmra.mxu1 %v12856_v12  ;;  %v13159_v61 = vsub.f32 %v13693_v19, %v13121_v0 }
0x19b1   :  { %v13160_v10 = vand.u32 4294901760, %v13159_v61  ;;  %13205 = vmatpush.msrb.mxu0 %v13159_v61 }
0x19b3   :  { %v13161_v49 = vsub.f32 %v13159_v61, %v13160_v10  ;;  %13208 = vmatpush.msrb.mxu0 %v13165_v39  ;;  %13274 = vmatpush.msrb.mxu2 %v13160_v10  ;;  %v13701_v61 = vld [vmem:[%s20300_s12 + $0x70] sm:$0xff]  ;;  %v13700_v10 = vld [vmem:[%s20300_s12 + $0x68] sm:$0xff] }
0x19b4   :  { %v20196_v15 = vand.u32 4294901760, %v13701_v61  ;;  %v20208_v20 = vand.u32 4294901760, %v13700_v10 }
0x19b5   :  { %v13162_v38 = vand.u32 4294901760, %v13161_v49  ;;  %13211 = vmatpush.msrb.mxu0 %v13171_v14  ;;  %13278 = vmatpush.msrb.mxu2 %v13166_v24  ;;  %v13699_v49 = vld [vmem:[%s20300_s12 + $0x60] sm:$0xff] }
0x19b7   :  { %13011 = vmatmul.f32.gmra.mxu0 %v12856_v12  ;;  %13163 = vmatpush.msra.mxu3 %v13162_v38  ;;  %v13173_v12 = vsub.f32 %v13171_v14, %v13172_v56  ;;  %v20223_v38 = vand.u32 4294901760, %v13699_v49 }
0x19b8   :  { %13214 = vmatpush.msrb.mxu0 %v13177_v46  ;;  %13282 = vmatpush.msrb.mxu2 %v13172_v56 }
0x19b9   :  { %13169 = vmatpush.msra.mxu3 %v13168_v25  ;;  %v13174_v58 = vand.u32 4294901760, %v13173_v12  ;;  %v13404_v12 = vsub.f32 %v13699_v49, %v20223_v38 }
0x19ba   :  { %13286 = vmatpush.msrb.mxu2 %v13178_v37  ;;  %v20235_v37 = vand.u32 4294901760, %v13698_v30 }
0x19bb   :  { %13175 = vmatpush.msra.mxu3 %v13174_v58  ;;  %v13697_v58 = vld [vmem:[%s20300_s12 + $0x50] sm:$0xff] }
0x19bd   :  { %13181 = vmatpush.msra.mxu3 %v13180_v45 }
0x19bf   :  { %13309 = vmatpush.msrb.mxu3 %v13121_v0  ;;  %v13702_v0 = vld [vmem:[%s20300_s12 + $0x78] sm:$0xff] }
0x19c0   :  { %v20188_v62 = vand.u32 4294901760, %v13702_v0 }
0x19c1   :  { %13311 = vmatpush.msrb.mxu3 %v13123_v9 }
0x19c2   :  { %v20194_v9 = vsub.f32 %v13702_v0, %v20188_v62  ;;  %13345 = vmatpush.msra.mxu0 %v20188_v62 }
0x19c3   :  { %13313 = vmatpush.msrb.mxu3 %v13125_v22  ;;  %v20205_v22 = vsub.f32 %v13701_v61, %v20196_v15 }
0x19c4   :  { %v13387_v39 = vand.u32 4294901760, %v20194_v9  ;;  %13347 = vmatpush.msra.mxu0 %v20196_v15 }
0x19c5   :  { %13315 = vmatpush.msrb.mxu3 %v13127_v31  ;;  %v13393_v14 = vand.u32 4294901760, %v20205_v22  ;;  %v20220_v31 = vsub.f32 %v13700_v10, %v20208_v20 }
0x19c6   :  { %v13388_v24 = vsub.f32 %v20194_v9, %v13387_v39  ;;  %13349 = vmatpush.msra.mxu0 %v20208_v20 }
0x19c7   :  { %v13394_v46 = vsub.f32 %v20205_v22, %v13393_v14  ;;  %v13399_v25 = vand.u32 4294901760, %v20220_v31 }
0x19c8   :  { %v13389_v56 = vand.u32 4294901760, %v13388_v24  ;;  %13351 = vmatpush.msra.mxu0 %v20223_v38 }
0x19c9   :  { %v13395_v8 = vand.u32 4294901760, %v13394_v46  ;;  %v13400_v45 = vsub.f32 %v20220_v31, %v13399_v25 }
0x19ca   :  { %13390 = vmatpush.msra.mxu1 %v13389_v56  ;;  %13353 = vmatpush.msra.mxu0 %v20235_v37 }
0x19cc   :  { %13396 = vmatpush.msra.mxu1 %v13395_v8 }
0x1a09   :  { %v12903_v2 = vpop.f32.mrf.mxu1 }
0x1a11   :  { %v12854_v40 = vpop.f32.mrf.mxu0  ;;  %v12937_v17 = vpop.f32.mrf.mxu2 }
0x1a12   :  { %v12855_v6 = vadd.f32 %v13743_v63, %v12854_v40 }
0x1a13   :  { %v12969_v52 = vpop.f32.mrf.mxu3 }
0x1a14   :  { %v12904_v57 = vadd.f32 %v12903_v2, %v12855_v6 }
0x1a16   :  { %v12938_v23 = vadd.f32 %v12937_v17, %v12904_v57 }
0x1a18   :  { %v12970_v47 = vadd.f32 %v12969_v52, %v12938_v23 }
0x1a1c   :  { %v12907_v41 = vpop.f32.mrf.mxu1 }
0x1a24   :  { %v12862_v44 = vpop.f32.mrf.mxu0  ;;  %v13037_v55 = vpop.f32.mrf.mxu1 }
0x1a25   :  { %v12863_v28 = vadd.f32 %v13743_v63, %v12862_v44  ;;  %v12942_v35 = vpop.f32.mrf.mxu2 }
0x1a26   :  { %v12975_v1 = vpop.f32.mrf.mxu3 }
0x1a27   :  { %v12908_v18 = vadd.f32 %v12907_v41, %v12863_v28 }
0x1a29   :  { %v12943_v4 = vadd.f32 %v12942_v35, %v12908_v18 }
0x1a2b   :  { %v12976_v26 = vadd.f32 %v12975_v1, %v12943_v4  ;;  %v13745_v4 = vld [vmem:[%s20297_s9 + $0x1] ss:$0 sm:$0xff] }
0x1a2c   :  { %v13008_v54 = vpop.f32.mrf.mxu0  ;;  %v13041_v33 = vpop.f32.mrf.mxu1 }
0x1a2d   :  { %v13009_v3 = vadd.f32 %v13008_v54, %v12970_v47  ;;  %v13744_v54 = vld [vmem:[%s20296_s8 + $0x1] ss:$0 sm:$0xff]  ;;  %s13666_s8 = sshll.u32 %s13873_s27, 4  ;;  %s13667_s8 = int_to_ptr.vmem [resolvable:$true] %s13666_s8 }
0x1a2f   :  { %v13038_v11 = vadd.f32 %v13037_v55, %v13009_v3 }
0x1a31   :  { %v13044_v36 = vadd.f32 %v13038_v11, %v19960_v5 }
0x1a33   :  { %v13046_v43 = vsel %vm6335_vm0, %v13044_v36, 0.0 }
0x1a34   :  { %v13012_v53 = vpop.f32.mrf.mxu0  ;;  %13047 = vadd.xlane.f32.xlu1 %v13046_v43 }
0x1a35   :  { %v13013_v51 = vadd.f32 %v13012_v53, %v12976_v26 }
0x1a37   :  { %v13042_v48 = vadd.f32 %v13041_v33, %v13013_v51 }
0x1a39   :  { %v13045_v21 = vadd.f32 %v13042_v48, %v19965_v50 }
0x1a3b   :  { %v13049_v32 = vsel %vm6335_vm0, %v13045_v21, 0.0 }
0x1a3c   :  { %13050 = vadd.xlane.f32.xlu2 %v13049_v32 }
0x1aa7   :  { %v13048_v13 = vpop.xlane.xlu1 %13047 }
0x1aa8   :  { %v13052_v7 = vmul.f32 %v13048_v13, %v19798_v34 }
0x1aaa   :  { %v20144_v59 = vsub.f32 %v13044_v36, %v13052_v7 }
0x1aac   :  { %v13056_v5 = vmul.f32 %v20144_v59, %v20144_v59 }
0x1aae   :  { %v13058_v29 = vsel %vm6335_vm0, %v13056_v5, 0.0 }
0x1aaf   :  { %13059 = vadd.xlane.f32.xlu0 %v13058_v29  ;;  %v13051_v27 = vpop.xlane.xlu2 %13050 }
0x1ab0   :  { %v13053_v42 = vmul.f32 %v13051_v27, %v19798_v34 }
0x1ab2   :  { %v20150_v16 = vsub.f32 %v13045_v21, %v13053_v42 }
0x1ab4   :  { %v13057_v50 = vmul.f32 %v20150_v16, %v20150_v16 }
0x1ab6   :  { %v13061_v60 = vsel %vm6335_vm0, %v13057_v50, 0.0 }
0x1ab7   :  { %13062 = vadd.xlane.f32.xlu1 %v13061_v60 }
0x1b22   :  { %v13060_v2 = vpop.xlane.xlu0 %13059 }
0x1b23   :  { %v13064_v63 = vmul.f32 %v13060_v2, %v19798_v34  ;;  %v13405_v2 = vand.u32 4294901760, %v13404_v12 }
0x1b25   :  { %v13066_v40 = vadd.f32 1e-05, %v13064_v63  ;;  %v13354_v63 = vand.u32 4294901760, %v13697_v58 }
0x1b27   :  { %13824 = vrsqrt.f32 %v13066_v40  ;;  %vm13074_vm2 = vweird.f32 %v13066_v40  ;;  %13355 = vmatpush.msra.mxu0 %v13354_v63 }
0x1b2a   :  { %v13063_v6 = vpop.xlane.xlu1 %13062 }
0x1b2b   :  { %v13065_v41 = vmul.f32 %v13063_v6, %v19798_v34  ;;  %v13696_v6 = vld [vmem:[%s20300_s12 + $0x48] sm:$0xff] }
0x1b2d   :  { %v13825_v57 = vpop.eup %13824  ;;  %v13067_v44 = vadd.f32 1e-05, %v13065_v41  ;;  %v13401_v41 = vand.u32 4294901760, %v13400_v45 }
0x1b2e   :  { %v13069_v17 = vmul.f32 %v13825_v57, %v13066_v40  ;;  %vm13075_vm1 = vweird.f32 %v13825_v57  ;;  %v13410_v40 = vsub.f32 %v13698_v30, %v20235_v37 }
0x1b2f   :  { %13826 = vrsqrt.f32 %v13067_v44  ;;  %vm13076_vm3 = vmor %vm13074_vm2, %vm13075_vm1  ;;  %vm13084_vm7 = vweird.f32 %v13067_v44  ;;  %13402 = vmatpush.msra.mxu1 %v13401_v41  ;;  %v13747_v41 = vld [vmem:[%s20301_s13 + $0x1] ss:$0 sm:$0xff] }
0x1b30   :  { %v13070_v23 = vmul.f32 %v13825_v57, %v13069_v17  ;;  %v13356_v17 = vand.u32 4294901760, %v13696_v6 }
0x1b32   :  { %v13071_v28 = vmul.f32 0.5, %v13070_v23  ;;  %v13411_v23 = vand.u32 4294901760, %v13410_v40  ;;  %13357 = vmatpush.msra.mxu0 %v13356_v17 }
0x1b34   :  { %v13072_v52 = vsub.f32 1.5, %v13071_v28  ;;  %v13695_v28 = vld [vmem:[%s20300_s12 + $0x40] sm:$0xff] }
0x1b35   :  { %v13827_v47 = vpop.eup %13826 }
0x1b36   :  { %v13073_v18 = vmul.f32 %v13825_v57, %v13072_v52  ;;  %v13079_v55 = vmul.f32 %v13827_v47, %v13067_v44  ;;  %vm13085_vm6 = vweird.f32 %v13827_v47  ;;  %v13416_v44 = vsub.f32 %v13697_v58, %v13354_v63 }
0x1b37   :  { %vm13086_vm8 = vmor %vm13084_vm7, %vm13085_vm6 }
0x1b38   :  { %v13077_v3 = vsel %vm13076_vm3, %v13825_v57, %v13073_v18  ;;  %v13080_v35 = vmul.f32 %v13827_v47, %v13079_v55  ;;  %v13406_v57 = vsub.f32 %v13404_v12, %v13405_v2  ;;  %v13422_v18 = vsub.f32 %v13696_v6, %v13356_v17 }
0x1b39   :  { %v13088_v11 = vmul.f32 %v13077_v3, %v20144_v59  ;;  %v13358_v55 = vand.u32 4294901760, %v13695_v28 }
0x1b3a   :  { %v13081_v36 = vmul.f32 0.5, %v13080_v35  ;;  %v13407_v52 = vand.u32 4294901760, %v13406_v57  ;;  %v13423_v35 = vand.u32 4294901760, %v13422_v18 }
0x1b3b   :  { %v13093_v1 = vmul.f32 %v13744_v54, %v13088_v11  ;;  %13359 = vmatpush.msra.mxu0 %v13358_v55 }
0x1b3c   :  { %v13082_v26 = vsub.f32 1.5, %v13081_v36  ;;  %13408 = vmatpush.msra.mxu1 %v13407_v52 }
0x1b3d   :  { %v20176_v43 = vadd.f32 %v13745_v4, %v13093_v1  ;;  %v13424_v1 = vsub.f32 %v13422_v18, %v13423_v35 }
0x1b3e   :  { %v13083_v53 = vmul.f32 %v13827_v47, %v13082_v26 }
0x1b3f   :  { %v13104_v51 = vsel %vm6335_vm0, %v20176_v43, 0 }
0x1b40   :  { %v13087_v33 = vsel %vm13086_vm8, %v13827_v47, %v13083_v53  ;;  %v13129_v48 = vand.u32 4294901760, %v13104_v51  ;;  %v13417_v47 = vand.u32 4294901760, %v13416_v44  ;;  %v13425_v53 = vand.u32 4294901760, %v13424_v1 }
0x1b41   :  { %v13089_v21 = vmul.f32 %v13087_v33, %v20150_v16 }
0x1b42   :  { %13183 = vmatmul.f32.vlgmr.msra.gmra.mxu3 %v13129_v48  ;;  %v13130_v32 = vsub.f32 %v13104_v51, %v13129_v48  ;;  %v13418_v3 = vsub.f32 %v13416_v44, %v13417_v47 }
0x1b43   :  { %v13094_v13 = vmul.f32 %v13744_v54, %v13089_v21  ;;  %13494 = vmatpush.msra.mxu3 %v20188_v62  ;;  %v13412_v54 = vsub.f32 %v13410_v40, %v13411_v23  ;;  %v13746_v21 = vld [vmem:[%s20299_s11 + $0x1] ss:$0 sm:$0xff] }
0x1b44   :  { %13217 = vmatmul.f32.vlgmr.msrb.gmra.mxu0 %v13130_v32  ;;  %v13131_v7 = vand.u32 4294901760, %v13130_v32  ;;  %v13419_v36 = vand.u32 4294901760, %v13418_v3 }
0x1b45   :  { %v20181_v59 = vadd.f32 %v13745_v4, %v13094_v13  ;;  %13496 = vmatpush.msra.mxu3 %v20196_v15  ;;  %v13428_v4 = vsub.f32 %v13695_v28, %v13358_v55  ;;  %v13413_v11 = vand.u32 4294901760, %v13412_v54  ;;  %13533 = vmatpush.msrb.mxu0 %v13387_v39 }
0x1b46   :  { %13249 = vmatmul.f32.vlgmr.msrb.gmra.mxu1 %v13131_v7  ;;  %v13132_v5 = vsub.f32 %v13130_v32, %v13131_v7 }
0x1b47   :  { %v13107_v29 = vsel %vm6335_vm0, %v20181_v59, 0  ;;  %13498 = vmatpush.msra.mxu3 %v20208_v20  ;;  %v13429_v26 = vand.u32 4294901760, %v13428_v4  ;;  %13414 = vmatpush.msra.mxu1 %v13413_v11 }
0x1b48   :  { %v13133_v27 = vand.u32 4294901760, %v13132_v5  ;;  %v13137_v42 = vand.u32 4294901760, %v13107_v29  ;;  %13537 = vmatpush.msrb.mxu0 %v13393_v14 }
0x1b49   :  { %13500 = vmatpush.msra.mxu3 %v20223_v38  ;;  %v13430_v51 = vsub.f32 %v13428_v4, %v13429_v26  ;;  %13420 = vmatpush.msra.mxu1 %v13419_v36 }
0x1b4a   :  { %13134 = vmatmul.f32.vlgmr.msra.gmra.mxu2 %v13133_v27  ;;  %13187 = vmatmul.f32.gmra.mxu3 %v13137_v42  ;;  %v13138_v50 = vsub.f32 %v13107_v29, %v13137_v42 }
0x1b4b   :  { %13452 = vmatpush.msra.mxu2 %v20194_v9  ;;  %13502 = vmatpush.msra.mxu3 %v20235_v37  ;;  %v13431_v33 = vand.u32 4294901760, %v13430_v51 }
0x1b4c   :  { %13222 = vmatmul.f32.gmra.mxu0 %v13138_v50  ;;  %v13139_v60 = vand.u32 4294901760, %v13138_v50  ;;  %13426 = vmatpush.msra.mxu1 %v13425_v53 }
0x1b4d   :  { %13455 = vmatpush.msra.mxu2 %v20205_v22  ;;  %13504 = vmatpush.msra.mxu3 %v13354_v63 }
0x1b4e   :  { %13255 = vmatmul.f32.gmra.mxu1 %v13139_v60  ;;  %v13140_v16 = vsub.f32 %v13138_v50, %v13139_v60  ;;  %13541 = vmatpush.msrb.mxu0 %v13399_v25 }
0x1b4f   :  { %13458 = vmatpush.msra.mxu2 %v20220_v31  ;;  %13506 = vmatpush.msra.mxu3 %v13356_v17 }
0x1b50   :  { %v13141_v19 = vand.u32 4294901760, %v13140_v16  ;;  %13432 = vmatpush.msra.mxu1 %v13431_v33  ;;  %13545 = vmatpush.msrb.mxu0 %v13405_v2 }
0x1b51   :  { %13461 = vmatpush.msra.mxu2 %v13404_v12  ;;  %13508 = vmatpush.msra.mxu3 %v13358_v55 }
0x1b52   :  { %13142 = vmatmul.f32.gmra.mxu2 %v13141_v19  ;;  %13317 = vmatmul.f32.vlgmr.msrb.gmra.mxu3 %v13129_v48 }
0x1b53   :  { %13464 = vmatpush.msra.mxu2 %v13410_v40  ;;  %13580 = vmatpush.msrb.mxu1 %v20188_v62 }
0x1b54   :  { %13549 = vmatpush.msrb.mxu0 %v13411_v23 }
0x1b55   :  { %13467 = vmatpush.msra.mxu2 %v13416_v44  ;;  %13582 = vmatpush.msrb.mxu1 %v20196_v15 }
0x1b56   :  { %13553 = vmatpush.msrb.mxu0 %v13417_v47 }
0x1b57   :  { %13470 = vmatpush.msra.mxu2 %v13422_v18  ;;  %13584 = vmatpush.msrb.mxu1 %v20208_v20 }
0x1b58   :  { %13557 = vmatpush.msrb.mxu0 %v13423_v35 }
0x1b59   :  { %13473 = vmatpush.msra.mxu2 %v13428_v4  ;;  %13586 = vmatpush.msrb.mxu1 %v20223_v38 }
0x1b5a   :  { %13288 = vmatmul.f32.vlgmr.msrb.gmra.mxu2 %v13129_v48  ;;  %13321 = vmatmul.f32.gmra.mxu3 %v13137_v42 }
0x1b5b   :  { %13588 = vmatpush.msrb.mxu1 %v20235_v37  ;;  %13561 = vmatpush.msrb.mxu0 %v13429_v26 }
0x1b5d   :  { %13590 = vmatpush.msrb.mxu1 %v13354_v63 }
0x1b5f   :  { %13592 = vmatpush.msrb.mxu1 %v13356_v17 }
0x1b61   :  { %13594 = vmatpush.msrb.mxu1 %v13358_v55 }
0x1b62   :  { %13292 = vmatmul.f32.gmra.mxu2 %v13137_v42 }
0x1bc1   :  { %v13218_v29 = vpop.f32.mrf.mxu0 }
0x1bc3   :  { %v13250_v60 = vpop.f32.mrf.mxu1 }
0x1bc5   :  { %v13184_v48 = vpop.f32.mrf.mxu3 }
0x1bc9   :  { %v13223_v9 = vpop.f32.mrf.mxu0 }
0x1bcb   :  { %v13256_v22 = vpop.f32.mrf.mxu1 }
0x1bcd   :  { %v13135_v32 = vpop.f32.mrf.mxu2  ;;  %v13188_v7 = vpop.f32.mrf.mxu3 }
0x1bce   :  { %v13136_v13 = vadd.f32 %v13746_v21, %v13135_v32 }
0x1bd0   :  { %v13185_v5 = vadd.f32 %v13184_v48, %v13136_v13 }
0x1bd2   :  { %v13219_v50 = vadd.f32 %v13218_v29, %v13185_v5 }
0x1bd4   :  { %v13251_v19 = vadd.f32 %v13250_v60, %v13219_v50 }
0x1bd5   :  { %v13143_v27 = vpop.f32.mrf.mxu2  ;;  %v13318_v0 = vpop.f32.mrf.mxu3 }
0x1bd6   :  { %v13144_v42 = vadd.f32 %v13746_v21, %v13143_v27 }
0x1bd8   :  { %v13189_v16 = vadd.f32 %v13188_v7, %v13144_v42 }
0x1bda   :  { %v13224_v10 = vadd.f32 %v13223_v9, %v13189_v16 }
0x1bdc   :  { %v13257_v49 = vadd.f32 %v13256_v22, %v13224_v10 }
0x1bdd   :  { %v13289_v62 = vpop.f32.mrf.mxu2  ;;  %v13322_v30 = vpop.f32.mrf.mxu3 }
0x1bde   :  { %v13290_v61 = vadd.f32 %v13289_v62, %v13251_v19 }
0x1be0   :  { %v13319_v15 = vadd.f32 %v13318_v0, %v13290_v61 }
0x1be2   :  { %v13325_v39 = vmax.f32 %v13319_v15, 0.0 }
0x1be4   :  { %v13331_v20 = vsel %vm9651_vm11, %v13325_v39, 0 }
0x1be5   :  { %v13360_v24 = vand.u32 4294901760, %v13331_v20  ;;  %v13293_v14 = vpop.f32.mrf.mxu2 }
0x1be6   :  { %v13294_v31 = vadd.f32 %v13293_v14, %v13257_v49 }
0x1be7   :  { %v13361_v38 = vsub.f32 %v13331_v20, %v13360_v24  ;;  %13434 = vmatmul.f32.vlgmr.msra.gmra.mxu1 %v13360_v24 }
0x1be8   :  { %v13323_v56 = vadd.f32 %v13322_v30, %v13294_v31 }
0x1be9   :  { %v13362_v46 = vand.u32 4294901760, %v13361_v38  ;;  %13476 = vmatmul.f32.vlgmr.msra.gmra.mxu2 %v13361_v38 }
0x1bea   :  { %v13326_v25 = vmax.f32 %v13323_v56, 0.0 }
0x1beb   :  { %v13363_v12 = vsub.f32 %v13361_v38, %v13362_v46  ;;  %13512 = vmatmul.f32.vlgmr.msra.gmra.mxu3 %v13362_v46  ;;  %v13748_v46 = vld [vmem:[%s20302_s14 + $0x1] ss:$0 sm:$0xff] }
0x1bec   :  { %v13334_v37 = vsel %vm9651_vm11, %v13326_v25, 0 }
0x1bed   :  { %v13364_v58 = vand.u32 4294901760, %v13363_v12  ;;  %v13368_v8 = vand.u32 4294901760, %v13334_v37 }
0x1bef   :  { %13365 = vmatmul.f32.vlgmr.msra.gmra.mxu0 %v13364_v58  ;;  %13438 = vmatmul.f32.gmra.mxu1 %v13368_v8  ;;  %v13369_v45 = vsub.f32 %v13334_v37, %v13368_v8  ;;  %v13749_v37 = vld [vmem:[%s20303_s15 + $0x1] ss:$0 sm:$0xff]  ;;  %s13874_s15 = smov 128  }
0x1bf1   :  { %13481 = vmatmul.f32.gmra.mxu2 %v13369_v45  ;;  %v13370_v2 = vand.u32 4294901760, %v13369_v45 }
0x1bf3   :  { %13518 = vmatmul.f32.gmra.mxu3 %v13370_v2  ;;  %v13371_v63 = vsub.f32 %v13369_v45, %v13370_v2 }
0x1bf5   :  { %v13372_v40 = vand.u32 4294901760, %v13371_v63 }
0x1bf7   :  { %13373 = vmatmul.f32.gmra.mxu0 %v13372_v40  ;;  %13596 = vmatmul.f32.vlgmr.msrb.gmra.mxu1 %v13360_v24 }
0x1bff   :  { %13563 = vmatmul.f32.vlgmr.msrb.gmra.mxu0 %v13360_v24  ;;  %13600 = vmatmul.f32.gmra.mxu1 %v13368_v8 }
0x1c07   :  { %13567 = vmatmul.f32.gmra.mxu0 %v13368_v8 }
0x1c64   :  { %v13435_v6 = vpop.f32.mrf.mxu1 }
0x1c6c   :  { %v13366_v57 = vpop.f32.mrf.mxu0  ;;  %v13439_v17 = vpop.f32.mrf.mxu1 }
0x1c6d   :  { %v13367_v44 = vadd.f32 %v13747_v41, %v13366_v57  ;;  %v13477_v28 = vpop.f32.mrf.mxu2 }
0x1c6e   :  { %v13513_v55 = vpop.f32.mrf.mxu3 }
0x1c6f   :  { %v13436_v23 = vadd.f32 %v13435_v6, %v13367_v44 }
0x1c71   :  { %v13478_v47 = vadd.f32 %v13477_v28, %v13436_v23 }
0x1c73   :  { %v13514_v54 = vadd.f32 %v13513_v55, %v13478_v47 }
0x1c74   :  { %v13374_v52 = vpop.f32.mrf.mxu0  ;;  %v13597_v35 = vpop.f32.mrf.mxu1 }
0x1c75   :  { %v13375_v18 = vadd.f32 %v13747_v41, %v13374_v52  ;;  %v13482_v36 = vpop.f32.mrf.mxu2 }
0x1c76   :  { %v13519_v51 = vpop.f32.mrf.mxu3 }
0x1c77   :  { %v13440_v3 = vadd.f32 %v13439_v17, %v13375_v18 }
0x1c79   :  { %v13483_v1 = vadd.f32 %v13482_v36, %v13440_v3 }
0x1c7b   :  { %v13520_v33 = vadd.f32 %v13519_v51, %v13483_v1 }
0x1c7c   :  { %v13564_v4 = vpop.f32.mrf.mxu0  ;;  %v13601_v13 = vpop.f32.mrf.mxu1 }
0x1c7d   :  { %v13565_v11 = vadd.f32 %v13564_v4, %v13514_v54 }
0x1c7f   :  { %v13598_v26 = vadd.f32 %v13597_v35, %v13565_v11 }
0x1c81   :  { %v13604_v53 = vadd.f32 %v13598_v26, %v20176_v43 }
0x1c83   :  { %v13606_v48 = vsel %vm6335_vm0, %v13604_v53, 0.0 }
0x1c84   :  { %v13568_v21 = vpop.f32.mrf.mxu0  ;;  %13607 = vadd.xlane.f32.xlu2 %v13606_v48 }
0x1c85   :  { %v13569_v32 = vadd.f32 %v13568_v21, %v13520_v33 }
0x1c87   :  { %v13602_v7 = vadd.f32 %v13601_v13, %v13569_v32 }
0x1c89   :  { %v13605_v5 = vadd.f32 %v13602_v7, %v20181_v59 }
0x1c8b   :  { %v13609_v29 = vsel %vm6335_vm0, %v13605_v5, 0.0 }
0x1c8c   :  { %13610 = vadd.xlane.f32.xlu0 %v13609_v29 }
0x1cf7   :  { %v13608_v27 = vpop.xlane.xlu2 %13607 }
0x1cf8   :  { %v13612_v42 = vmul.f32 %v13608_v27, %v19798_v34 }
0x1cfa   :  { %v13614_v50 = vsub.f32 %v13604_v53, %v13612_v42 }
0x1cfc   :  { %v13616_v60 = vmul.f32 %v13614_v50, %v13614_v50 }
0x1cfe   :  { %v13618_v43 = vsel %vm6335_vm0, %v13616_v60, 0.0 }
0x1cff   :  { %13619 = vadd.xlane.f32.xlu1 %v13618_v43  ;;  %v13611_v16 = vpop.xlane.xlu0 %13610 }
0x1d00   :  { %v13613_v19 = vmul.f32 %v13611_v16, %v19798_v34 }
0x1d02   :  { %v13615_v0 = vsub.f32 %v13605_v5, %v13613_v19 }
0x1d04   :  { %v13617_v62 = vmul.f32 %v13615_v0, %v13615_v0 }
0x1d06   :  { %v13621_v61 = vsel %vm6335_vm0, %v13617_v62, 0.0 }
0x1d07   :  { %13622 = vadd.xlane.f32.xlu2 %v13621_v61 }
0x1d72   :  { %v13620_v59 = vpop.xlane.xlu1 %13619 }
0x1d73   :  { %v13624_v9 = vmul.f32 %v13620_v59, %v19798_v34 }
0x1d75   :  { %v13626_v15 = vadd.f32 1e-05, %v13624_v9 }
0x1d77   :  { %13828 = vrsqrt.f32 %v13626_v15  ;;  %vm13634_vm10 = vweird.f32 %v13626_v15 }
0x1d7a   :  { %v13623_v10 = vpop.xlane.xlu2 %13622 }
0x1d7b   :  { %v13625_v39 = vmul.f32 %v13623_v10, %v19798_v34 }
0x1d7d   :  { %v13829_v22 = vpop.eup %13828  ;;  %v13627_v20 = vadd.f32 1e-05, %v13625_v39 }
0x1d7e   :  { %v13629_v49 = vmul.f32 %v13829_v22, %v13626_v15  ;;  %vm13635_vm9 = vweird.f32 %v13829_v22 }
0x1d7f   :  { %13830 = vrsqrt.f32 %v13627_v20  ;;  %vm13636_vm11 = vmor %vm13634_vm10, %vm13635_vm9  ;;  %vm13644_vm13 = vweird.f32 %v13627_v20 }
0x1d80   :  { %v13630_v24 = vmul.f32 %v13829_v22, %v13629_v49 }
0x1d82   :  { %v13631_v14 = vmul.f32 0.5, %v13630_v24 }
0x1d84   :  { %v13632_v31 = vsub.f32 1.5, %v13631_v14 }
0x1d85   :  { %v13831_v38 = vpop.eup %13830 }
0x1d86   :  { %v13633_v30 = vmul.f32 %v13829_v22, %v13632_v31  ;;  %v13639_v56 = vmul.f32 %v13831_v38, %v13627_v20  ;;  %vm13645_vm12 = vweird.f32 %v13831_v38 }
0x1d87   :  { %vm13646_vm14 = vmor %vm13644_vm13, %vm13645_vm12 }
0x1d88   :  { %v13637_v25 = vsel %vm13636_vm11, %v13829_v22, %v13633_v30  ;;  %v13640_v12 = vmul.f32 %v13831_v38, %v13639_v56 }
0x1d89   :  { %v13648_v34 = vmul.f32 %v13637_v25, %v13614_v50 }
0x1d8a   :  { %v13641_v58 = vmul.f32 0.5, %v13640_v12 }
0x1d8b   :  { %v13653_v8 = vmul.f32 %v13748_v46, %v13648_v34 }
0x1d8c   :  { %v13642_v45 = vsub.f32 1.5, %v13641_v58 }
0x1d8d   :  { %v13658_v2 = vadd.f32 %v13749_v37, %v13653_v8 }
0x1d8e   :  { %v13643_v63 = vmul.f32 %v13831_v38, %v13642_v45 }
0x1d8f   :  { %13660 = vst.msk [vmem:[#allocation2] sm:$0xff] %vm6335_vm0, %v13658_v2 }
0x1d90   :  { %v13647_v40 = vsel %vm13646_vm14, %v13831_v38, %v13643_v63 }
0x1d91   :  { %v13649_v6 = vmul.f32 %v13647_v40, %v13615_v0 }
0x1d93   :  { %v13654_v41 = vmul.f32 %v13748_v46, %v13649_v6 }
0x1d95   :  { %v13659_v57 = vadd.f32 %v13749_v37, %v13654_v41 }
0x1d97   :  { %13661 = vst.msk [vmem:[#allocation2 + $0x8] sm:$0xff] %vm6335_vm0, %v13659_v57 }
0x1d98   :  { %13674 = dma.vmem_to_hbm [thread:$0]  %s13667_s8, 256, %s13669_s22, [#allocation3], %s13874_s15, %s13874_s15, %s21014_s5  }
0x1d99   :  { %13856 = dma.done.wait [#allocation3], 256  }
0x1d9a   :  { %13857 = vsyncadd [#allocation3], 4294967040 }
0x1d9b   :  { %13679 = vsyncpa [#allocation3], 1 }

</bundles_post_ra>
